<compile_context>
chip_gen: v7x
topology: tpu7x:2x2x1
jax: 0.10.0
libtpu: 0.0.40
codegen_flags: <defaults>
</compile_context>

<pallas_src>
import jax
import jax.numpy as jnp
from jax import lax
from jax.experimental import pallas as pl
from jax.experimental.pallas import tpu as pltpu


# ---------------------------------------------------------------------------
# Fused kernel builder: one batch element per grid step, all in VMEM.
# ---------------------------------------------------------------------------
def _make_kernel(H, W, cin_list, cmid, oc):
    S = sum(cin_list)
    HW = H * W
    n_in = len(cin_list)

    def zero_border(buf_ref, halo):
        # Interiors are fully overwritten every grid step; only the halo
        # border strips need to be (re)zeroed.
        Hp, Wp, C = buf_ref.shape
        z_row = jnp.zeros((halo, Wp, C), buf_ref.dtype)
        z_col = jnp.zeros((Hp - 2 * halo, halo, C), buf_ref.dtype)
        buf_ref[0:halo, :, :] = z_row
        buf_ref[Hp - halo:Hp, :, :] = z_row
        buf_ref[halo:Hp - halo, 0:halo, :] = z_col
        buf_ref[halo:Hp - halo, Wp - halo:Wp, :] = z_col

    def im2col(pad_ref, ch0, cin, halo, dil, col_ref):
        # Stage the 9 shifted (H*W, cin) patches of a dilated 3x3 conv into
        # a dense (H*W, 9*cin) buffer (tap-major channel layout, matching the
        # (9*cin, cout) weight reshape done in the wrapper).
        base = halo - dil
        for ky in range(3):
            for kx in range(3):
                t = ky * 3 + kx
                patch = pad_ref[base + ky * dil: base + ky * dil + H,
                                base + kx * dil: base + kx * dil + W,
                                ch0:ch0 + cin]
                col_ref[:, t * cin:(t + 1) * cin] = patch.reshape(HW, cin)

    def conv(col_ref, cin, w_ref, b_ref):
        # One big MXU matmul: bf16 operands, f32 accumulation; bias+ReLU on VPU.
        lhs = col_ref[:, :9 * cin].astype(jnp.bfloat16)
        acc = jnp.dot(lhs, w_ref[...], preferred_element_type=jnp.float32)
        return jnp.maximum(acc + b_ref[...], 0.0)          # (HW, cout) f32

    def kernel(*refs):
        x_refs = refs[:n_in]
        (w1_ref, b1_ref, w2_ref, b2_ref, w4_ref, b4_ref, wm_ref, bm_ref,
         o_ref, xp_ref, catp_ref, col_ref) = refs[n_in:]

        # Re-zero only the halo borders (cheap, correct under megacore split).
        zero_border(xp_ref, 1)
        zero_border(catp_ref, 4)

        # Stage 0: fused channel-concat of the branch inputs into the halo-1
        # padded input buffer (no wrapper-side jnp.concatenate).
        off = 0
        for i in range(n_in):
            ci = cin_list[i]
            xp_ref[1:1 + H, 1:1 + W, off:off + ci] = x_refs[i][0]
            off += ci

        # conv1 (dilation 1) on the concatenated input.
        im2col(xp_ref, 0, S, 1, 1, col_ref)
        y1 = conv(col_ref, S, w1_ref, b1_ref)               # (HW, cmid)
        catp_ref[4:4 + H, 4:4 + W, 0:cmid] = y1.reshape(H, W, cmid)

        # conv2 (dilation 2) on x1 (read from the shared halo-4 buffer).
        im2col(catp_ref, 0, cmid, 4, 2, col_ref)
        y2 = conv(col_ref, cmid, w2_ref, b2_ref)
        catp_ref[4:4 + H, 4:4 + W, cmid:2 * cmid] = y2.reshape(H, W, cmid)

        # conv4 (dilation 4) on x2.
        im2col(catp_ref, cmid, cmid, 4, 4, col_ref)
        y4 = conv(col_ref, cmid, w4_ref, b4_ref)
        catp_ref[4:4 + H, 4:4 + W, 2 * cmid:3 * cmid] = y4.reshape(H, W, cmid)

        # Merge conv (dilation 1) on concat(x1, x2, x4) — the concat is free
        # because all three already live at channel offsets in catp_ref.
        im2col(catp_ref, 0, 3 * cmid, 4, 1, col_ref)
        ym = conv(col_ref, 3 * cmid, wm_ref, bm_ref)        # (HW, OC) f32

        # Channel-major, lane-dense output: (OC, H*W) -> NCHW reshape is free.
        o_ref[0] = jnp.transpose(ym, (1, 0)).astype(o_ref.dtype)

    return kernel


def catfusion_forward_pallas(x_list_nhwc, kparams, *, cmid, oc):
    """x_list_nhwc: list of (N, H, W, Ci) f32 branch inputs (pre-concat)."""
    w1, b1, w2, b2, w4, b4, wm, bm = kparams
    N, H, W, _ = x_list_nhwc[0].shape
    cin_list = tuple(int(x.shape[-1]) for x in x_list_nhwc)
    S = sum(cin_list)
    HW = H * W

    kernel = _make_kernel(H, W, cin_list, cmid, oc)

    in_specs = [pl.BlockSpec((1, H, W, c), lambda n: (n, 0, 0, 0))
                for c in cin_list]
    in_specs += [
        pl.BlockSpec((9 * S, cmid), lambda n: (0, 0)),          # w1 (bf16)
        pl.BlockSpec((1, cmid), lambda n: (0, 0)),              # b1 (f32)
        pl.BlockSpec((9 * cmid, cmid), lambda n: (0, 0)),       # w2
        pl.BlockSpec((1, cmid), lambda n: (0, 0)),              # b2
        pl.BlockSpec((9 * cmid, cmid), lambda n: (0, 0)),       # w4
        pl.BlockSpec((1, cmid), lambda n: (0, 0)),              # b4
        pl.BlockSpec((9 * 3 * cmid, oc), lambda n: (0, 0)),     # wm
        pl.BlockSpec((1, oc), lambda n: (0, 0)),                # bm
    ]
    out_spec = pl.BlockSpec((1, oc, HW), lambda n: (n, 0, 0))

    col_w = 9 * max(S, 3 * cmid)
    scratch = [
        pltpu.VMEM((H + 2, W + 2, S), jnp.float32),         # halo-1 input
        pltpu.VMEM((H + 8, W + 8, 3 * cmid), jnp.float32),  # halo-4 x1|x2|x4
        pltpu.VMEM((HW, col_w), jnp.float32),               # im2col staging
    ]

    # NOTE(perf): on single-core v5e/v6e the batch grid is a serial loop; it
    # could be folded (NB samples per step) to amortize per-step overhead.
    # On v7x "parallel" lets the two samples shard across both TensorCores.
    return pl.pallas_call(
        kernel,
        out_shape=jax.ShapeDtypeStruct((N, oc, HW), jnp.float32),
        grid=(N,),
        in_specs=in_specs,
        out_specs=out_spec,
        scratch_shapes=scratch,
        compiler_params=pltpu.CompilerParams(
            dimension_semantics=("parallel",)),
    )(*x_list_nhwc, w1, b1, w2, b2, w4, b4, wm, bm)


# ---------------------------------------------------------------------------
# Parameter construction: deterministic conv weights + BN params, BN folded.
# ---------------------------------------------------------------------------
def make_conv_bn_params(key, cin, cout, eps=1e-5):
    k1, k2, k3, k4, k5 = jax.random.split(key, 5)
    w = jax.random.normal(k1, (cout, cin, 3, 3), jnp.float32)
    w = w * (1.0 / (3.0 * 3.0 * cin)) ** 0.5
    gamma = jax.random.uniform(k2, (cout,), jnp.float32, 0.5, 1.5)
    beta = jax.random.normal(k3, (cout,), jnp.float32) * 0.1
    mean = jax.random.normal(k4, (cout,), jnp.float32) * 0.1
    var = jax.random.uniform(k5, (cout,), jnp.float32, 0.5, 1.5)

    scale = gamma / jnp.sqrt(var + eps)
    w_folded = w * scale[:, None, None, None]          # (Cout, Cin, 3, 3)
    b_folded = beta - mean * scale                     # (Cout,)
    # (Cout, Cin, 3, 3) -> (3, 3, Cin, Cout) -> (9, Cin, Cout), tap = ky*3+kx
    w_taps = jnp.transpose(w_folded, (2, 3, 1, 0)).reshape(9, cin, cout)
    return w_taps, b_folded


class CatFusionCtxPallas:
    def __init__(self, in_channel_list, out_channel, double_branch=True, *,
                 key):
        self.double_branch = double_branch
        oc = 2 * out_channel if double_branch else out_channel
        assert len(in_channel_list) >= 2
        s = sum(in_channel_list)
        cmid = s // 3          # matches PyTorch's integer division
        self.cmid, self.oc = cmid, oc
        k1, k2, k3, k4 = jax.random.split(key, 4)
        # f32 "tap" parameters (also used by the pure-JAX reference).
        self.p1 = make_conv_bn_params(k1, s, cmid)
        self.p2 = make_conv_bn_params(k2, cmid, cmid)
        self.p4 = make_conv_bn_params(k3, cmid, cmid)
        self.pm = make_conv_bn_params(k4, 3 * cmid, oc)

        # Kernel-ready params: weights (9*Cin, Cout) bf16, biases (1, Cout) f32.
        def prep(p):
            w, b = p
            cin, cout = w.shape[1], w.shape[2]
            return (w.reshape(9 * cin, cout).astype(jnp.bfloat16),
                    b.reshape(1, cout).astype(jnp.float32))

        self.kparams = prep(self.p1) + prep(self.p2) + prep(self.p4) \
            + prep(self.pm)

    def __call__(self, *x_list):
        # PyTorch NCHW inputs -> NHWC per branch; the channel concat is fused
        # into the kernel (each branch passed as a separate ref).
        x_nhwc = [jnp.transpose(t, (0, 2, 3, 1)) for t in x_list]
        N, H, W = x_nhwc[0].shape[0], x_nhwc[0].shape[1], x_nhwc[0].shape[2]
        out = catfusion_forward_pallas(x_nhwc, self.kparams,
                                       cmid=self.cmid, oc=self.oc)
        xo = out.reshape(N, self.oc, H, W)        # already NCHW: free reshape
        if self.double_branch:
            c = self.oc // 2
            return xo[:, :c], xo[:, c:]
        return xo, xo


# ---------------------------------------------------------------------------
# Pure-JAX reference (lax.conv_general_dilated) for correctness checking.
# ---------------------------------------------------------------------------
def _conv_ref(x_nhwc, w_taps, bias, *, dilation):
    cin, cout = w_taps.shape[1], w_taps.shape[2]
    w_hwio = w_taps.reshape(3, 3, cin, cout)
    y = lax.conv_general_dilated(
        x_nhwc, w_hwio,
        window_strides=(1, 1),
        padding=((dilation, dilation), (dilation, dilation)),
        rhs_dilation=(dilation, dilation),
        dimension_numbers=("NHWC", "HWIO", "NHWC"))
    return jnp.maximum(y + bias, 0.0)


def _forward_ref(module, *x_list):
    x_cat = jnp.concatenate(x_list, axis=1)
    x = jnp.transpose(x_cat, (0, 2, 3, 1))
    x1 = _conv_ref(x, *module.p1, dilation=1)
    x2 = _conv_ref(x1, *module.p2, dilation=2)
    x4 = _conv_ref(x2, *module.p4, dilation=4)
    xm = jnp.concatenate([x1, x2, x4], axis=-1)
    xo = _conv_ref(xm, *module.pm, dilation=1)
    xo = jnp.transpose(xo, (0, 3, 1, 2))
    c = xo.shape[1] // 2
    return xo[:, :c], xo[:, c:]


if __name__ == "__main__":
    key = jax.random.PRNGKey(0)
    k_params, k_x0, k_x1 = jax.random.split(key, 3)

    # Small shapes: batch=2, spatial=16x16, in_channel_list=[8, 16], out=16.
    in_channel_list = [8, 16]
    out_channel = 16
    N, H, W = 2, 16, 16

    x0 = jax.random.normal(k_x0, (N, in_channel_list[0], H, W), jnp.float32)
    x1 = jax.random.normal(k_x1, (N, in_channel_list[1], H, W), jnp.float32)

    module = CatFusionCtxPallas(in_channel_list, out_channel,
                                double_branch=True, key=k_params)

    fwd = jax.jit(lambda a, b: module(a, b))
    y1, y2 = fwd(x0, x1)
    y1 = jax.block_until_ready(y1)
    y2 = jax.block_until_ready(y2)

    r1, r2 = _forward_ref(module, x0, x1)
    assert y1.shape == (N, out_channel, H, W)
    assert y2.shape == (N, out_channel, H, W)
    # bf16 MXU operands (f32 accumulation) -> slightly loosened tolerance.
    assert jnp.allclose(y1, r1, rtol=5e-2, atol=5e-2)
    assert jnp.allclose(y2, r2, rtol=5e-2, atol=5e-2)

    print("KERNEL_OK")
</pallas_src>

<mosaic_0001>
module attributes {stable_mosaic.version = 11 : i64} {
  func.func @kernel(%arg0: i32, %arg1: memref<1x16x16x8xf32, #tpu.memory_space<vmem>>, %arg2: memref<1x16x16x16xf32, #tpu.memory_space<vmem>>, %arg3: memref<216x8xbf16, #tpu.memory_space<vmem>>, %arg4: memref<1x8xf32, #tpu.memory_space<vmem>>, %arg5: memref<72x8xbf16, #tpu.memory_space<vmem>>, %arg6: memref<1x8xf32, #tpu.memory_space<vmem>>, %arg7: memref<72x8xbf16, #tpu.memory_space<vmem>>, %arg8: memref<1x8xf32, #tpu.memory_space<vmem>>, %arg9: memref<216x32xbf16, #tpu.memory_space<vmem>>, %arg10: memref<1x32xf32, #tpu.memory_space<vmem>>, %arg11: memref<1x32x256xf32, #tpu.memory_space<vmem>>, %arg12: memref<18x18x24xf32, #tpu.memory_space<vmem>>, %arg13: memref<24x24x24xf32, #tpu.memory_space<vmem>>, %arg14: memref<256x216xf32, #tpu.memory_space<vmem>>) attributes {dimension_semantics = [#tpu.dimension_semantics<parallel>], iteration_bounds = array<i64: 2>, scalar_prefetch = 0 : i64, scratch_operands = 3 : i64, tpu.core_type = #tpu.core_type<tc>, window_params = [{transform_indices = @transform_0, window_bounds = array<i64: 1, 16, 16, 8>}, {transform_indices = @transform_1, window_bounds = array<i64: 1, 16, 16, 16>}, {pipeline_mode = #tpu.pipeline_mode<synchronous>, transform_indices = @transform_2, window_bounds = array<i64: 216, 8>}, {pipeline_mode = #tpu.pipeline_mode<synchronous>, transform_indices = @transform_3, window_bounds = array<i64: 1, 8>}, {pipeline_mode = #tpu.pipeline_mode<synchronous>, transform_indices = @transform_4, window_bounds = array<i64: 72, 8>}, {pipeline_mode = #tpu.pipeline_mode<synchronous>, transform_indices = @transform_5, window_bounds = array<i64: 1, 8>}, {pipeline_mode = #tpu.pipeline_mode<synchronous>, transform_indices = @transform_6, window_bounds = array<i64: 72, 8>}, {pipeline_mode = #tpu.pipeline_mode<synchronous>, transform_indices = @transform_7, window_bounds = array<i64: 1, 8>}, {pipeline_mode = #tpu.pipeline_mode<synchronous>, transform_indices = @transform_8, window_bounds = array<i64: 216, 32>}, {pipeline_mode = #tpu.pipeline_mode<synchronous>, transform_indices = @transform_9, window_bounds = array<i64: 1, 32>}, {transform_indices = @transform_10, window_bounds = array<i64: 1, 32, 256>}]} {
    %cst = arith.constant 0.000000e+00 : f32
    %0 = vector.broadcast %cst : f32 to vector<1x18x24xf32>
    %cst_0 = arith.constant 0.000000e+00 : f32
    %1 = vector.broadcast %cst_0 : f32 to vector<16x1x24xf32>
    %c0 = arith.constant 0 : index
    %c0_1 = arith.constant 0 : index
    %c0_2 = arith.constant 0 : index
    %2 = vector.load %arg12[%c0, %c0_1, %c0_2] : memref<18x18x24xf32, #tpu.memory_space<vmem>>, vector<1x18x24xf32>
    tpu.vector_store %arg12[%c0, %c0_1, %c0_2], %0 {strides = array<i32>} : memref<18x18x24xf32, #tpu.memory_space<vmem>>, vector<1x18x24xf32>,
    %c17 = arith.constant 17 : index
    %c0_3 = arith.constant 0 : index
    %c0_4 = arith.constant 0 : index
    %3 = vector.load %arg12[%c17, %c0_3, %c0_4] : memref<18x18x24xf32, #tpu.memory_space<vmem>>, vector<1x18x24xf32>
    tpu.vector_store %arg12[%c17, %c0_3, %c0_4], %0 {strides = array<i32>} : memref<18x18x24xf32, #tpu.memory_space<vmem>>, vector<1x18x24xf32>,
    %c1 = arith.constant 1 : index
    %c0_5 = arith.constant 0 : index
    %c0_6 = arith.constant 0 : index
    %4 = vector.load %arg12[%c1, %c0_5, %c0_6] : memref<18x18x24xf32, #tpu.memory_space<vmem>>, vector<16x1x24xf32>
    tpu.vector_store %arg12[%c1, %c0_5, %c0_6], %1 {strides = array<i32>} : memref<18x18x24xf32, #tpu.memory_space<vmem>>, vector<16x1x24xf32>,
    %c1_7 = arith.constant 1 : index
    %c17_8 = arith.constant 17 : index
    %c0_9 = arith.constant 0 : index
    %5 = vector.load %arg12[%c1_7, %c17_8, %c0_9] : memref<18x18x24xf32, #tpu.memory_space<vmem>>, vector<16x1x24xf32>
    tpu.vector_store %arg12[%c1_7, %c17_8, %c0_9], %1 {strides = array<i32>} : memref<18x18x24xf32, #tpu.memory_space<vmem>>, vector<16x1x24xf32>,
    %cst_10 = arith.constant 0.000000e+00 : f32
    %6 = vector.broadcast %cst_10 : f32 to vector<4x24x24xf32>
    %cst_11 = arith.constant 0.000000e+00 : f32
    %7 = vector.broadcast %cst_11 : f32 to vector<16x4x24xf32>
    %c0_12 = arith.constant 0 : index
    %c0_13 = arith.constant 0 : index
    %c0_14 = arith.constant 0 : index
    %8 = vector.load %arg13[%c0_12, %c0_13, %c0_14] : memref<24x24x24xf32, #tpu.memory_space<vmem>>, vector<4x24x24xf32>
    tpu.vector_store %arg13[%c0_12, %c0_13, %c0_14], %6 {strides = array<i32>} : memref<24x24x24xf32, #tpu.memory_space<vmem>>, vector<4x24x24xf32>,
    %c20 = arith.constant 20 : index
    %c0_15 = arith.constant 0 : index
    %c0_16 = arith.constant 0 : index
    %9 = vector.load %arg13[%c20, %c0_15, %c0_16] : memref<24x24x24xf32, #tpu.memory_space<vmem>>, vector<4x24x24xf32>
    tpu.vector_store %arg13[%c20, %c0_15, %c0_16], %6 {strides = array<i32>} : memref<24x24x24xf32, #tpu.memory_space<vmem>>, vector<4x24x24xf32>,
    %c4 = arith.constant 4 : index
    %c0_17 = arith.constant 0 : index
    %c0_18 = arith.constant 0 : index
    %10 = vector.load %arg13[%c4, %c0_17, %c0_18] : memref<24x24x24xf32, #tpu.memory_space<vmem>>, vector<16x4x24xf32>
    tpu.vector_store %arg13[%c4, %c0_17, %c0_18], %7 {strides = array<i32>} : memref<24x24x24xf32, #tpu.memory_space<vmem>>, vector<16x4x24xf32>,
    %c4_19 = arith.constant 4 : index
    %c20_20 = arith.constant 20 : index
    %c0_21 = arith.constant 0 : index
    %11 = vector.load %arg13[%c4_19, %c20_20, %c0_21] : memref<24x24x24xf32, #tpu.memory_space<vmem>>, vector<16x4x24xf32>
    tpu.vector_store %arg13[%c4_19, %c20_20, %c0_21], %7 {strides = array<i32>} : memref<24x24x24xf32, #tpu.memory_space<vmem>>, vector<16x4x24xf32>,
    %c0_22 = arith.constant 0 : index
    %c0_23 = arith.constant 0 : index
    %c0_24 = arith.constant 0 : index
    %c0_25 = arith.constant 0 : index
    %12 = vector.load %arg1[%c0_22, %c0_23, %c0_24, %c0_25] : memref<1x16x16x8xf32, #tpu.memory_space<vmem>>, vector<1x16x16x8xf32>
    %13 = vector.shape_cast %12 : vector<1x16x16x8xf32> to vector<16x16x8xf32>
    %c1_26 = arith.constant 1 : index
    %c1_27 = arith.constant 1 : index
    %c0_28 = arith.constant 0 : index
    %14 = vector.load %arg12[%c1_26, %c1_27, %c0_28] : memref<18x18x24xf32, #tpu.memory_space<vmem>>, vector<16x16x8xf32>
    tpu.vector_store %arg12[%c1_26, %c1_27, %c0_28], %13 {strides = array<i32>} : memref<18x18x24xf32, #tpu.memory_space<vmem>>, vector<16x16x8xf32>,
    %c0_29 = arith.constant 0 : index
    %c0_30 = arith.constant 0 : index
    %c0_31 = arith.constant 0 : index
    %c0_32 = arith.constant 0 : index
    %15 = vector.load %arg2[%c0_29, %c0_30, %c0_31, %c0_32] : memref<1x16x16x16xf32, #tpu.memory_space<vmem>>, vector<1x16x16x16xf32>
    %16 = vector.shape_cast %15 : vector<1x16x16x16xf32> to vector<16x16x16xf32>
    %c1_33 = arith.constant 1 : index
    %c1_34 = arith.constant 1 : index
    %c8 = arith.constant 8 : index
    %17 = vector.load %arg12[%c1_33, %c1_34, %c8] : memref<18x18x24xf32, #tpu.memory_space<vmem>>, vector<16x16x16xf32>
    tpu.vector_store %arg12[%c1_33, %c1_34, %c8], %16 {strides = array<i32>} : memref<18x18x24xf32, #tpu.memory_space<vmem>>, vector<16x16x16xf32>,
    %c0_35 = arith.constant 0 : index
    %c0_36 = arith.constant 0 : index
    %c0_37 = arith.constant 0 : index
    %18 = vector.load %arg12[%c0_35, %c0_36, %c0_37] : memref<18x18x24xf32, #tpu.memory_space<vmem>>, vector<16x16x24xf32>
    %19 = vector.shape_cast %18 : vector<16x16x24xf32> to vector<256x24xf32>
    %c0_38 = arith.constant 0 : index
    %c0_39 = arith.constant 0 : index
    %20 = vector.load %arg14[%c0_38, %c0_39] : memref<256x216xf32, #tpu.memory_space<vmem>>, vector<256x24xf32>
    tpu.vector_store %arg14[%c0_38, %c0_39], %19 {strides = array<i32>} : memref<256x216xf32, #tpu.memory_space<vmem>>, vector<256x24xf32>,
    %c0_40 = arith.constant 0 : index
    %c1_41 = arith.constant 1 : index
    %c0_42 = arith.constant 0 : index
    %21 = vector.load %arg12[%c0_40, %c1_41, %c0_42] : memref<18x18x24xf32, #tpu.memory_space<vmem>>, vector<16x16x24xf32>
    %22 = vector.shape_cast %21 : vector<16x16x24xf32> to vector<256x24xf32>
    %c0_43 = arith.constant 0 : index
    %c24 = arith.constant 24 : index
    %23 = vector.load %arg14[%c0_43, %c24] : memref<256x216xf32, #tpu.memory_space<vmem>>, vector<256x24xf32>
    tpu.vector_store %arg14[%c0_43, %c24], %22 {strides = array<i32>} : memref<256x216xf32, #tpu.memory_space<vmem>>, vector<256x24xf32>,
    %c0_44 = arith.constant 0 : index
    %c2 = arith.constant 2 : index
    %c0_45 = arith.constant 0 : index
    %24 = vector.load %arg12[%c0_44, %c2, %c0_45] : memref<18x18x24xf32, #tpu.memory_space<vmem>>, vector<16x16x24xf32>
    %25 = vector.shape_cast %24 : vector<16x16x24xf32> to vector<256x24xf32>
    %c0_46 = arith.constant 0 : index
    %c48 = arith.constant 48 : index
    %26 = vector.load %arg14[%c0_46, %c48] : memref<256x216xf32, #tpu.memory_space<vmem>>, vector<256x24xf32>
    tpu.vector_store %arg14[%c0_46, %c48], %25 {strides = array<i32>} : memref<256x216xf32, #tpu.memory_space<vmem>>, vector<256x24xf32>,
    %c1_47 = arith.constant 1 : index
    %c0_48 = arith.constant 0 : index
    %c0_49 = arith.constant 0 : index
    %27 = vector.load %arg12[%c1_47, %c0_48, %c0_49] : memref<18x18x24xf32, #tpu.memory_space<vmem>>, vector<16x16x24xf32>
    %28 = vector.shape_cast %27 : vector<16x16x24xf32> to vector<256x24xf32>
    %c0_50 = arith.constant 0 : index
    %c72 = arith.constant 72 : index
    %29 = vector.load %arg14[%c0_50, %c72] : memref<256x216xf32, #tpu.memory_space<vmem>>, vector<256x24xf32>
    tpu.vector_store %arg14[%c0_50, %c72], %28 {strides = array<i32>} : memref<256x216xf32, #tpu.memory_space<vmem>>, vector<256x24xf32>,
    %c1_51 = arith.constant 1 : index
    %c1_52 = arith.constant 1 : index
    %c0_53 = arith.constant 0 : index
    %30 = vector.load %arg12[%c1_51, %c1_52, %c0_53] : memref<18x18x24xf32, #tpu.memory_space<vmem>>, vector<16x16x24xf32>
    %31 = vector.shape_cast %30 : vector<16x16x24xf32> to vector<256x24xf32>
    %c0_54 = arith.constant 0 : index
    %c96 = arith.constant 96 : index
    %32 = vector.load %arg14[%c0_54, %c96] : memref<256x216xf32, #tpu.memory_space<vmem>>, vector<256x24xf32>
    tpu.vector_store %arg14[%c0_54, %c96], %31 {strides = array<i32>} : memref<256x216xf32, #tpu.memory_space<vmem>>, vector<256x24xf32>,
    %c1_55 = arith.constant 1 : index
    %c2_56 = arith.constant 2 : index
    %c0_57 = arith.constant 0 : index
    %33 = vector.load %arg12[%c1_55, %c2_56, %c0_57] : memref<18x18x24xf32, #tpu.memory_space<vmem>>, vector<16x16x24xf32>
    %34 = vector.shape_cast %33 : vector<16x16x24xf32> to vector<256x24xf32>
    %c0_58 = arith.constant 0 : index
    %c120 = arith.constant 120 : index
    %35 = vector.load %arg14[%c0_58, %c120] : memref<256x216xf32, #tpu.memory_space<vmem>>, vector<256x24xf32>
    tpu.vector_store %arg14[%c0_58, %c120], %34 {strides = array<i32>} : memref<256x216xf32, #tpu.memory_space<vmem>>, vector<256x24xf32>,
    %c2_59 = arith.constant 2 : index
    %c0_60 = arith.constant 0 : index
    %c0_61 = arith.constant 0 : index
    %36 = vector.load %arg12[%c2_59, %c0_60, %c0_61] : memref<18x18x24xf32, #tpu.memory_space<vmem>>, vector<16x16x24xf32>
    %37 = vector.shape_cast %36 : vector<16x16x24xf32> to vector<256x24xf32>
    %c0_62 = arith.constant 0 : index
    %c144 = arith.constant 144 : index
    %38 = vector.load %arg14[%c0_62, %c144] : memref<256x216xf32, #tpu.memory_space<vmem>>, vector<256x24xf32>
    tpu.vector_store %arg14[%c0_62, %c144], %37 {strides = array<i32>} : memref<256x216xf32, #tpu.memory_space<vmem>>, vector<256x24xf32>,
    %c2_63 = arith.constant 2 : index
    %c1_64 = arith.constant 1 : index
    %c0_65 = arith.constant 0 : index
    %39 = vector.load %arg12[%c2_63, %c1_64, %c0_65] : memref<18x18x24xf32, #tpu.memory_space<vmem>>, vector<16x16x24xf32>
    %40 = vector.shape_cast %39 : vector<16x16x24xf32> to vector<256x24xf32>
    %c0_66 = arith.constant 0 : index
    %c168 = arith.constant 168 : index
    %41 = vector.load %arg14[%c0_66, %c168] : memref<256x216xf32, #tpu.memory_space<vmem>>, vector<256x24xf32>
    tpu.vector_store %arg14[%c0_66, %c168], %40 {strides = array<i32>} : memref<256x216xf32, #tpu.memory_space<vmem>>, vector<256x24xf32>,
    %c2_67 = arith.constant 2 : index
    %c2_68 = arith.constant 2 : index
    %c0_69 = arith.constant 0 : index
    %42 = vector.load %arg12[%c2_67, %c2_68, %c0_69] : memref<18x18x24xf32, #tpu.memory_space<vmem>>, vector<16x16x24xf32>
    %43 = vector.shape_cast %42 : vector<16x16x24xf32> to vector<256x24xf32>
    %c0_70 = arith.constant 0 : index
    %c192 = arith.constant 192 : index
    %44 = vector.load %arg14[%c0_70, %c192] : memref<256x216xf32, #tpu.memory_space<vmem>>, vector<256x24xf32>
    tpu.vector_store %arg14[%c0_70, %c192], %43 {strides = array<i32>} : memref<256x216xf32, #tpu.memory_space<vmem>>, vector<256x24xf32>,
    %c0_71 = arith.constant 0 : index
    %c0_72 = arith.constant 0 : index
    %45 = vector.load %arg14[%c0_71, %c0_72] : memref<256x216xf32, #tpu.memory_space<vmem>>, vector<256x216xf32>
    %46 = arith.truncf %45 : vector<256x216xf32> to vector<256x216xbf16>
    %c0_73 = arith.constant 0 : index
    %c0_74 = arith.constant 0 : index
    %47 = vector.load %arg3[%c0_73, %c0_74] : memref<216x8xbf16, #tpu.memory_space<vmem>>, vector<216x8xbf16>
    %cst_75 = arith.constant dense<0.000000e+00> : vector<256x8xf32>
    %48 = tpu.matmul %46, %47, %cst_75 {dimension_numbers = #tpu.dot_dimension_numbers<[1], [0], [0], [1], [0, 0, 1, 1], [], []>} : vector<256x216xbf16>, vector<216x8xbf16>, vector<256x8xf32> -> vector<256x8xf32>
    %c0_76 = arith.constant 0 : index
    %c0_77 = arith.constant 0 : index
    %49 = vector.load %arg4[%c0_76, %c0_77] : memref<1x8xf32, #tpu.memory_space<vmem>>, vector<1x8xf32>
    %50 = vector.broadcast %49 : vector<1x8xf32> to vector<256x8xf32>
    %51 = arith.addf %48, %50 : vector<256x8xf32>
    %cst_78 = arith.constant 0.000000e+00 : f32
    %52 = vector.broadcast %cst_78 : f32 to vector<256x8xf32>
    %53 = arith.maximumf %51, %52 : vector<256x8xf32>
    %54 = vector.shape_cast %53 : vector<256x8xf32> to vector<16x16x8xf32>
    %c4_79 = arith.constant 4 : index
    %c4_80 = arith.constant 4 : index
    %c0_81 = arith.constant 0 : index
    %55 = vector.load %arg13[%c4_79, %c4_80, %c0_81] : memref<24x24x24xf32, #tpu.memory_space<vmem>>, vector<16x16x8xf32>
    tpu.vector_store %arg13[%c4_79, %c4_80, %c0_81], %54 {strides = array<i32>} : memref<24x24x24xf32, #tpu.memory_space<vmem>>, vector<16x16x8xf32>,
    %c2_82 = arith.constant 2 : index
    %c2_83 = arith.constant 2 : index
    %c0_84 = arith.constant 0 : index
    %56 = vector.load %arg13[%c2_82, %c2_83, %c0_84] : memref<24x24x24xf32, #tpu.memory_space<vmem>>, vector<16x16x8xf32>
    %57 = vector.shape_cast %56 : vector<16x16x8xf32> to vector<256x8xf32>
    %c0_85 = arith.constant 0 : index
    %c0_86 = arith.constant 0 : index
    %58 = vector.load %arg14[%c0_85, %c0_86] : memref<256x216xf32, #tpu.memory_space<vmem>>, vector<256x8xf32>
    tpu.vector_store %arg14[%c0_85, %c0_86], %57 {strides = array<i32>} : memref<256x216xf32, #tpu.memory_space<vmem>>, vector<256x8xf32>,
    %c2_87 = arith.constant 2 : index
    %c4_88 = arith.constant 4 : index
    %c0_89 = arith.constant 0 : index
    %59 = vector.load %arg13[%c2_87, %c4_88, %c0_89] : memref<24x24x24xf32, #tpu.memory_space<vmem>>, vector<16x16x8xf32>
    %60 = vector.shape_cast %59 : vector<16x16x8xf32> to vector<256x8xf32>
    %c0_90 = arith.constant 0 : index
    %c8_91 = arith.constant 8 : index
    %61 = vector.load %arg14[%c0_90, %c8_91] : memref<256x216xf32, #tpu.memory_space<vmem>>, vector<256x8xf32>
    tpu.vector_store %arg14[%c0_90, %c8_91], %60 {strides = array<i32>} : memref<256x216xf32, #tpu.memory_space<vmem>>, vector<256x8xf32>,
    %c2_92 = arith.constant 2 : index
    %c6 = arith.constant 6 : index
    %c0_93 = arith.constant 0 : index
    %62 = vector.load %arg13[%c2_92, %c6, %c0_93] : memref<24x24x24xf32, #tpu.memory_space<vmem>>, vector<16x16x8xf32>
    %63 = vector.shape_cast %62 : vector<16x16x8xf32> to vector<256x8xf32>
    %c0_94 = arith.constant 0 : index
    %c16 = arith.constant 16 : index
    %64 = vector.load %arg14[%c0_94, %c16] : memref<256x216xf32, #tpu.memory_space<vmem>>, vector<256x8xf32>
    tpu.vector_store %arg14[%c0_94, %c16], %63 {strides = array<i32>} : memref<256x216xf32, #tpu.memory_space<vmem>>, vector<256x8xf32>,
    %c4_95 = arith.constant 4 : index
    %c2_96 = arith.constant 2 : index
    %c0_97 = arith.constant 0 : index
    %65 = vector.load %arg13[%c4_95, %c2_96, %c0_97] : memref<24x24x24xf32, #tpu.memory_space<vmem>>, vector<16x16x8xf32>
    %66 = vector.shape_cast %65 : vector<16x16x8xf32> to vector<256x8xf32>
    %c0_98 = arith.constant 0 : index
    %c24_99 = arith.constant 24 : index
    %67 = vector.load %arg14[%c0_98, %c24_99] : memref<256x216xf32, #tpu.memory_space<vmem>>, vector<256x8xf32>
    tpu.vector_store %arg14[%c0_98, %c24_99], %66 {strides = array<i32>} : memref<256x216xf32, #tpu.memory_space<vmem>>, vector<256x8xf32>,
    %c4_100 = arith.constant 4 : index
    %c4_101 = arith.constant 4 : index
    %c0_102 = arith.constant 0 : index
    %68 = vector.load %arg13[%c4_100, %c4_101, %c0_102] : memref<24x24x24xf32, #tpu.memory_space<vmem>>, vector<16x16x8xf32>
    %69 = vector.shape_cast %68 : vector<16x16x8xf32> to vector<256x8xf32>
    %c0_103 = arith.constant 0 : index
    %c32 = arith.constant 32 : index
    %70 = vector.load %arg14[%c0_103, %c32] : memref<256x216xf32, #tpu.memory_space<vmem>>, vector<256x8xf32>
    tpu.vector_store %arg14[%c0_103, %c32], %69 {strides = array<i32>} : memref<256x216xf32, #tpu.memory_space<vmem>>, vector<256x8xf32>,
    %c4_104 = arith.constant 4 : index
    %c6_105 = arith.constant 6 : index
    %c0_106 = arith.constant 0 : index
    %71 = vector.load %arg13[%c4_104, %c6_105, %c0_106] : memref<24x24x24xf32, #tpu.memory_space<vmem>>, vector<16x16x8xf32>
    %72 = vector.shape_cast %71 : vector<16x16x8xf32> to vector<256x8xf32>
    %c0_107 = arith.constant 0 : index
    %c40 = arith.constant 40 : index
    %73 = vector.load %arg14[%c0_107, %c40] : memref<256x216xf32, #tpu.memory_space<vmem>>, vector<256x8xf32>
    tpu.vector_store %arg14[%c0_107, %c40], %72 {strides = array<i32>} : memref<256x216xf32, #tpu.memory_space<vmem>>, vector<256x8xf32>,
    %c6_108 = arith.constant 6 : index
    %c2_109 = arith.constant 2 : index
    %c0_110 = arith.constant 0 : index
    %74 = vector.load %arg13[%c6_108, %c2_109, %c0_110] : memref<24x24x24xf32, #tpu.memory_space<vmem>>, vector<16x16x8xf32>
    %75 = vector.shape_cast %74 : vector<16x16x8xf32> to vector<256x8xf32>
    %c0_111 = arith.constant 0 : index
    %c48_112 = arith.constant 48 : index
    %76 = vector.load %arg14[%c0_111, %c48_112] : memref<256x216xf32, #tpu.memory_space<vmem>>, vector<256x8xf32>
    tpu.vector_store %arg14[%c0_111, %c48_112], %75 {strides = array<i32>} : memref<256x216xf32, #tpu.memory_space<vmem>>, vector<256x8xf32>,
    %c6_113 = arith.constant 6 : index
    %c4_114 = arith.constant 4 : index
    %c0_115 = arith.constant 0 : index
    %77 = vector.load %arg13[%c6_113, %c4_114, %c0_115] : memref<24x24x24xf32, #tpu.memory_space<vmem>>, vector<16x16x8xf32>
    %78 = vector.shape_cast %77 : vector<16x16x8xf32> to vector<256x8xf32>
    %c0_116 = arith.constant 0 : index
    %c56 = arith.constant 56 : index
    %79 = vector.load %arg14[%c0_116, %c56] : memref<256x216xf32, #tpu.memory_space<vmem>>, vector<256x8xf32>
    tpu.vector_store %arg14[%c0_116, %c56], %78 {strides = array<i32>} : memref<256x216xf32, #tpu.memory_space<vmem>>, vector<256x8xf32>,
    %c6_117 = arith.constant 6 : index
    %c6_118 = arith.constant 6 : index
    %c0_119 = arith.constant 0 : index
    %80 = vector.load %arg13[%c6_117, %c6_118, %c0_119] : memref<24x24x24xf32, #tpu.memory_space<vmem>>, vector<16x16x8xf32>
    %81 = vector.shape_cast %80 : vector<16x16x8xf32> to vector<256x8xf32>
    %c0_120 = arith.constant 0 : index
    %c64 = arith.constant 64 : index
    %82 = vector.load %arg14[%c0_120, %c64] : memref<256x216xf32, #tpu.memory_space<vmem>>, vector<256x8xf32>
    tpu.vector_store %arg14[%c0_120, %c64], %81 {strides = array<i32>} : memref<256x216xf32, #tpu.memory_space<vmem>>, vector<256x8xf32>,
    %c0_121 = arith.constant 0 : index
    %c0_122 = arith.constant 0 : index
    %83 = vector.load %arg14[%c0_121, %c0_122] : memref<256x216xf32, #tpu.memory_space<vmem>>, vector<256x72xf32>
    %84 = arith.truncf %83 : vector<256x72xf32> to vector<256x72xbf16>
    %c0_123 = arith.constant 0 : index
    %c0_124 = arith.constant 0 : index
    %85 = vector.load %arg5[%c0_123, %c0_124] : memref<72x8xbf16, #tpu.memory_space<vmem>>, vector<72x8xbf16>
    %cst_125 = arith.constant dense<0.000000e+00> : vector<256x8xf32>
    %86 = tpu.matmul %84, %85, %cst_125 {dimension_numbers = #tpu.dot_dimension_numbers<[1], [0], [0], [1], [0, 0, 1, 1], [], []>} : vector<256x72xbf16>, vector<72x8xbf16>, vector<256x8xf32> -> vector<256x8xf32>
    %c0_126 = arith.constant 0 : index
    %c0_127 = arith.constant 0 : index
    %87 = vector.load %arg6[%c0_126, %c0_127] : memref<1x8xf32, #tpu.memory_space<vmem>>, vector<1x8xf32>
    %88 = vector.broadcast %87 : vector<1x8xf32> to vector<256x8xf32>
    %89 = arith.addf %86, %88 : vector<256x8xf32>
    %cst_128 = arith.constant 0.000000e+00 : f32
    %90 = vector.broadcast %cst_128 : f32 to vector<256x8xf32>
    %91 = arith.maximumf %89, %90 : vector<256x8xf32>
    %92 = vector.shape_cast %91 : vector<256x8xf32> to vector<16x16x8xf32>
    %c4_129 = arith.constant 4 : index
    %c4_130 = arith.constant 4 : index
    %c8_131 = arith.constant 8 : index
    %93 = vector.load %arg13[%c4_129, %c4_130, %c8_131] : memref<24x24x24xf32, #tpu.memory_space<vmem>>, vector<16x16x8xf32>
    tpu.vector_store %arg13[%c4_129, %c4_130, %c8_131], %92 {strides = array<i32>} : memref<24x24x24xf32, #tpu.memory_space<vmem>>, vector<16x16x8xf32>,
    %c0_132 = arith.constant 0 : index
    %c0_133 = arith.constant 0 : index
    %c8_134 = arith.constant 8 : index
    %94 = vector.load %arg13[%c0_132, %c0_133, %c8_134] : memref<24x24x24xf32, #tpu.memory_space<vmem>>, vector<16x16x8xf32>
    %95 = vector.shape_cast %94 : vector<16x16x8xf32> to vector<256x8xf32>
    %c0_135 = arith.constant 0 : index
    %c0_136 = arith.constant 0 : index
    %96 = vector.load %arg14[%c0_135, %c0_136] : memref<256x216xf32, #tpu.memory_space<vmem>>, vector<256x8xf32>
    tpu.vector_store %arg14[%c0_135, %c0_136], %95 {strides = array<i32>} : memref<256x216xf32, #tpu.memory_space<vmem>>, vector<256x8xf32>,
    %c0_137 = arith.constant 0 : index
    %c4_138 = arith.constant 4 : index
    %c8_139 = arith.constant 8 : index
    %97 = vector.load %arg13[%c0_137, %c4_138, %c8_139] : memref<24x24x24xf32, #tpu.memory_space<vmem>>, vector<16x16x8xf32>
    %98 = vector.shape_cast %97 : vector<16x16x8xf32> to vector<256x8xf32>
    %c0_140 = arith.constant 0 : index
    %c8_141 = arith.constant 8 : index
    %99 = vector.load %arg14[%c0_140, %c8_141] : memref<256x216xf32, #tpu.memory_space<vmem>>, vector<256x8xf32>
    tpu.vector_store %arg14[%c0_140, %c8_141], %98 {strides = array<i32>} : memref<256x216xf32, #tpu.memory_space<vmem>>, vector<256x8xf32>,
    %c0_142 = arith.constant 0 : index
    %c8_143 = arith.constant 8 : index
    %c8_144 = arith.constant 8 : index
    %100 = vector.load %arg13[%c0_142, %c8_143, %c8_144] : memref<24x24x24xf32, #tpu.memory_space<vmem>>, vector<16x16x8xf32>
    %101 = vector.shape_cast %100 : vector<16x16x8xf32> to vector<256x8xf32>
    %c0_145 = arith.constant 0 : index
    %c16_146 = arith.constant 16 : index
    %102 = vector.load %arg14[%c0_145, %c16_146] : memref<256x216xf32, #tpu.memory_space<vmem>>, vector<256x8xf32>
    tpu.vector_store %arg14[%c0_145, %c16_146], %101 {strides = array<i32>} : memref<256x216xf32, #tpu.memory_space<vmem>>, vector<256x8xf32>,
    %c4_147 = arith.constant 4 : index
    %c0_148 = arith.constant 0 : index
    %c8_149 = arith.constant 8 : index
    %103 = vector.load %arg13[%c4_147, %c0_148, %c8_149] : memref<24x24x24xf32, #tpu.memory_space<vmem>>, vector<16x16x8xf32>
    %104 = vector.shape_cast %103 : vector<16x16x8xf32> to vector<256x8xf32>
    %c0_150 = arith.constant 0 : index
    %c24_151 = arith.constant 24 : index
    %105 = vector.load %arg14[%c0_150, %c24_151] : memref<256x216xf32, #tpu.memory_space<vmem>>, vector<256x8xf32>
    tpu.vector_store %arg14[%c0_150, %c24_151], %104 {strides = array<i32>} : memref<256x216xf32, #tpu.memory_space<vmem>>, vector<256x8xf32>,
    %c4_152 = arith.constant 4 : index
    %c4_153 = arith.constant 4 : index
    %c8_154 = arith.constant 8 : index
    %106 = vector.load %arg13[%c4_152, %c4_153, %c8_154] : memref<24x24x24xf32, #tpu.memory_space<vmem>>, vector<16x16x8xf32>
    %107 = vector.shape_cast %106 : vector<16x16x8xf32> to vector<256x8xf32>
    %c0_155 = arith.constant 0 : index
    %c32_156 = arith.constant 32 : index
    %108 = vector.load %arg14[%c0_155, %c32_156] : memref<256x216xf32, #tpu.memory_space<vmem>>, vector<256x8xf32>
    tpu.vector_store %arg14[%c0_155, %c32_156], %107 {strides = array<i32>} : memref<256x216xf32, #tpu.memory_space<vmem>>, vector<256x8xf32>,
    %c4_157 = arith.constant 4 : index
    %c8_158 = arith.constant 8 : index
    %c8_159 = arith.constant 8 : index
    %109 = vector.load %arg13[%c4_157, %c8_158, %c8_159] : memref<24x24x24xf32, #tpu.memory_space<vmem>>, vector<16x16x8xf32>
    %110 = vector.shape_cast %109 : vector<16x16x8xf32> to vector<256x8xf32>
    %c0_160 = arith.constant 0 : index
    %c40_161 = arith.constant 40 : index
    %111 = vector.load %arg14[%c0_160, %c40_161] : memref<256x216xf32, #tpu.memory_space<vmem>>, vector<256x8xf32>
    tpu.vector_store %arg14[%c0_160, %c40_161], %110 {strides = array<i32>} : memref<256x216xf32, #tpu.memory_space<vmem>>, vector<256x8xf32>,
    %c8_162 = arith.constant 8 : index
    %c0_163 = arith.constant 0 : index
    %c8_164 = arith.constant 8 : index
    %112 = vector.load %arg13[%c8_162, %c0_163, %c8_164] : memref<24x24x24xf32, #tpu.memory_space<vmem>>, vector<16x16x8xf32>
    %113 = vector.shape_cast %112 : vector<16x16x8xf32> to vector<256x8xf32>
    %c0_165 = arith.constant 0 : index
    %c48_166 = arith.constant 48 : index
    %114 = vector.load %arg14[%c0_165, %c48_166] : memref<256x216xf32, #tpu.memory_space<vmem>>, vector<256x8xf32>
    tpu.vector_store %arg14[%c0_165, %c48_166], %113 {strides = array<i32>} : memref<256x216xf32, #tpu.memory_space<vmem>>, vector<256x8xf32>,
    %c8_167 = arith.constant 8 : index
    %c4_168 = arith.constant 4 : index
    %c8_169 = arith.constant 8 : index
    %115 = vector.load %arg13[%c8_167, %c4_168, %c8_169] : memref<24x24x24xf32, #tpu.memory_space<vmem>>, vector<16x16x8xf32>
    %116 = vector.shape_cast %115 : vector<16x16x8xf32> to vector<256x8xf32>
    %c0_170 = arith.constant 0 : index
    %c56_171 = arith.constant 56 : index
    %117 = vector.load %arg14[%c0_170, %c56_171] : memref<256x216xf32, #tpu.memory_space<vmem>>, vector<256x8xf32>
    tpu.vector_store %arg14[%c0_170, %c56_171], %116 {strides = array<i32>} : memref<256x216xf32, #tpu.memory_space<vmem>>, vector<256x8xf32>,
    %c8_172 = arith.constant 8 : index
    %c8_173 = arith.constant 8 : index
    %c8_174 = arith.constant 8 : index
    %118 = vector.load %arg13[%c8_172, %c8_173, %c8_174] : memref<24x24x24xf32, #tpu.memory_space<vmem>>, vector<16x16x8xf32>
    %119 = vector.shape_cast %118 : vector<16x16x8xf32> to vector<256x8xf32>
    %c0_175 = arith.constant 0 : index
    %c64_176 = arith.constant 64 : index
    %120 = vector.load %arg14[%c0_175, %c64_176] : memref<256x216xf32, #tpu.memory_space<vmem>>, vector<256x8xf32>
    tpu.vector_store %arg14[%c0_175, %c64_176], %119 {strides = array<i32>} : memref<256x216xf32, #tpu.memory_space<vmem>>, vector<256x8xf32>,
    %c0_177 = arith.constant 0 : index
    %c0_178 = arith.constant 0 : index
    %121 = vector.load %arg14[%c0_177, %c0_178] : memref<256x216xf32, #tpu.memory_space<vmem>>, vector<256x72xf32>
    %122 = arith.truncf %121 : vector<256x72xf32> to vector<256x72xbf16>
    %c0_179 = arith.constant 0 : index
    %c0_180 = arith.constant 0 : index
    %123 = vector.load %arg7[%c0_179, %c0_180] : memref<72x8xbf16, #tpu.memory_space<vmem>>, vector<72x8xbf16>
    %cst_181 = arith.constant dense<0.000000e+00> : vector<256x8xf32>
    %124 = tpu.matmul %122, %123, %cst_181 {dimension_numbers = #tpu.dot_dimension_numbers<[1], [0], [0], [1], [0, 0, 1, 1], [], []>} : vector<256x72xbf16>, vector<72x8xbf16>, vector<256x8xf32> -> vector<256x8xf32>
    %c0_182 = arith.constant 0 : index
    %c0_183 = arith.constant 0 : index
    %125 = vector.load %arg8[%c0_182, %c0_183] : memref<1x8xf32, #tpu.memory_space<vmem>>, vector<1x8xf32>
    %126 = vector.broadcast %125 : vector<1x8xf32> to vector<256x8xf32>
    %127 = arith.addf %124, %126 : vector<256x8xf32>
    %cst_184 = arith.constant 0.000000e+00 : f32
    %128 = vector.broadcast %cst_184 : f32 to vector<256x8xf32>
    %129 = arith.maximumf %127, %128 : vector<256x8xf32>
    %130 = vector.shape_cast %129 : vector<256x8xf32> to vector<16x16x8xf32>
    %c4_185 = arith.constant 4 : index
    %c4_186 = arith.constant 4 : index
    %c16_187 = arith.constant 16 : index
    %131 = vector.load %arg13[%c4_185, %c4_186, %c16_187] : memref<24x24x24xf32, #tpu.memory_space<vmem>>, vector<16x16x8xf32>
    tpu.vector_store %arg13[%c4_185, %c4_186, %c16_187], %130 {strides = array<i32>} : memref<24x24x24xf32, #tpu.memory_space<vmem>>, vector<16x16x8xf32>,
    %c3 = arith.constant 3 : index
    %c3_188 = arith.constant 3 : index
    %c0_189 = arith.constant 0 : index
    %132 = vector.load %arg13[%c3, %c3_188, %c0_189] : memref<24x24x24xf32, #tpu.memory_space<vmem>>, vector<16x16x24xf32>
    %133 = vector.shape_cast %132 : vector<16x16x24xf32> to vector<256x24xf32>
    %c0_190 = arith.constant 0 : index
    %c0_191 = arith.constant 0 : index
    %134 = vector.load %arg14[%c0_190, %c0_191] : memref<256x216xf32, #tpu.memory_space<vmem>>, vector<256x24xf32>
    tpu.vector_store %arg14[%c0_190, %c0_191], %133 {strides = array<i32>} : memref<256x216xf32, #tpu.memory_space<vmem>>, vector<256x24xf32>,
    %c3_192 = arith.constant 3 : index
    %c4_193 = arith.constant 4 : index
    %c0_194 = arith.constant 0 : index
    %135 = vector.load %arg13[%c3_192, %c4_193, %c0_194] : memref<24x24x24xf32, #tpu.memory_space<vmem>>, vector<16x16x24xf32>
    %136 = vector.shape_cast %135 : vector<16x16x24xf32> to vector<256x24xf32>
    %c0_195 = arith.constant 0 : index
    %c24_196 = arith.constant 24 : index
    %137 = vector.load %arg14[%c0_195, %c24_196] : memref<256x216xf32, #tpu.memory_space<vmem>>, vector<256x24xf32>
    tpu.vector_store %arg14[%c0_195, %c24_196], %136 {strides = array<i32>} : memref<256x216xf32, #tpu.memory_space<vmem>>, vector<256x24xf32>,
    %c3_197 = arith.constant 3 : index
    %c5 = arith.constant 5 : index
    %c0_198 = arith.constant 0 : index
    %138 = vector.load %arg13[%c3_197, %c5, %c0_198] : memref<24x24x24xf32, #tpu.memory_space<vmem>>, vector<16x16x24xf32>
    %139 = vector.shape_cast %138 : vector<16x16x24xf32> to vector<256x24xf32>
    %c0_199 = arith.constant 0 : index
    %c48_200 = arith.constant 48 : index
    %140 = vector.load %arg14[%c0_199, %c48_200] : memref<256x216xf32, #tpu.memory_space<vmem>>, vector<256x24xf32>
    tpu.vector_store %arg14[%c0_199, %c48_200], %139 {strides = array<i32>} : memref<256x216xf32, #tpu.memory_space<vmem>>, vector<256x24xf32>,
    %c4_201 = arith.constant 4 : index
    %c3_202 = arith.constant 3 : index
    %c0_203 = arith.constant 0 : index
    %141 = vector.load %arg13[%c4_201, %c3_202, %c0_203] : memref<24x24x24xf32, #tpu.memory_space<vmem>>, vector<16x16x24xf32>
    %142 = vector.shape_cast %141 : vector<16x16x24xf32> to vector<256x24xf32>
    %c0_204 = arith.constant 0 : index
    %c72_205 = arith.constant 72 : index
    %143 = vector.load %arg14[%c0_204, %c72_205] : memref<256x216xf32, #tpu.memory_space<vmem>>, vector<256x24xf32>
    tpu.vector_store %arg14[%c0_204, %c72_205], %142 {strides = array<i32>} : memref<256x216xf32, #tpu.memory_space<vmem>>, vector<256x24xf32>,
    %c4_206 = arith.constant 4 : index
    %c4_207 = arith.constant 4 : index
    %c0_208 = arith.constant 0 : index
    %144 = vector.load %arg13[%c4_206, %c4_207, %c0_208] : memref<24x24x24xf32, #tpu.memory_space<vmem>>, vector<16x16x24xf32>
    %145 = vector.shape_cast %144 : vector<16x16x24xf32> to vector<256x24xf32>
    %c0_209 = arith.constant 0 : index
    %c96_210 = arith.constant 96 : index
    %146 = vector.load %arg14[%c0_209, %c96_210] : memref<256x216xf32, #tpu.memory_space<vmem>>, vector<256x24xf32>
    tpu.vector_store %arg14[%c0_209, %c96_210], %145 {strides = array<i32>} : memref<256x216xf32, #tpu.memory_space<vmem>>, vector<256x24xf32>,
    %c4_211 = arith.constant 4 : index
    %c5_212 = arith.constant 5 : index
    %c0_213 = arith.constant 0 : index
    %147 = vector.load %arg13[%c4_211, %c5_212, %c0_213] : memref<24x24x24xf32, #tpu.memory_space<vmem>>, vector<16x16x24xf32>
    %148 = vector.shape_cast %147 : vector<16x16x24xf32> to vector<256x24xf32>
    %c0_214 = arith.constant 0 : index
    %c120_215 = arith.constant 120 : index
    %149 = vector.load %arg14[%c0_214, %c120_215] : memref<256x216xf32, #tpu.memory_space<vmem>>, vector<256x24xf32>
    tpu.vector_store %arg14[%c0_214, %c120_215], %148 {strides = array<i32>} : memref<256x216xf32, #tpu.memory_space<vmem>>, vector<256x24xf32>,
    %c5_216 = arith.constant 5 : index
    %c3_217 = arith.constant 3 : index
    %c0_218 = arith.constant 0 : index
    %150 = vector.load %arg13[%c5_216, %c3_217, %c0_218] : memref<24x24x24xf32, #tpu.memory_space<vmem>>, vector<16x16x24xf32>
    %151 = vector.shape_cast %150 : vector<16x16x24xf32> to vector<256x24xf32>
    %c0_219 = arith.constant 0 : index
    %c144_220 = arith.constant 144 : index
    %152 = vector.load %arg14[%c0_219, %c144_220] : memref<256x216xf32, #tpu.memory_space<vmem>>, vector<256x24xf32>
    tpu.vector_store %arg14[%c0_219, %c144_220], %151 {strides = array<i32>} : memref<256x216xf32, #tpu.memory_space<vmem>>, vector<256x24xf32>,
    %c5_221 = arith.constant 5 : index
    %c4_222 = arith.constant 4 : index
    %c0_223 = arith.constant 0 : index
    %153 = vector.load %arg13[%c5_221, %c4_222, %c0_223] : memref<24x24x24xf32, #tpu.memory_space<vmem>>, vector<16x16x24xf32>
    %154 = vector.shape_cast %153 : vector<16x16x24xf32> to vector<256x24xf32>
    %c0_224 = arith.constant 0 : index
    %c168_225 = arith.constant 168 : index
    %155 = vector.load %arg14[%c0_224, %c168_225] : memref<256x216xf32, #tpu.memory_space<vmem>>, vector<256x24xf32>
    tpu.vector_store %arg14[%c0_224, %c168_225], %154 {strides = array<i32>} : memref<256x216xf32, #tpu.memory_space<vmem>>, vector<256x24xf32>,
    %c5_226 = arith.constant 5 : index
    %c5_227 = arith.constant 5 : index
    %c0_228 = arith.constant 0 : index
    %156 = vector.load %arg13[%c5_226, %c5_227, %c0_228] : memref<24x24x24xf32, #tpu.memory_space<vmem>>, vector<16x16x24xf32>
    %157 = vector.shape_cast %156 : vector<16x16x24xf32> to vector<256x24xf32>
    %c0_229 = arith.constant 0 : index
    %c192_230 = arith.constant 192 : index
    %158 = vector.load %arg14[%c0_229, %c192_230] : memref<256x216xf32, #tpu.memory_space<vmem>>, vector<256x24xf32>
    tpu.vector_store %arg14[%c0_229, %c192_230], %157 {strides = array<i32>} : memref<256x216xf32, #tpu.memory_space<vmem>>, vector<256x24xf32>,
    %c0_231 = arith.constant 0 : index
    %c0_232 = arith.constant 0 : index
    %159 = vector.load %arg14[%c0_231, %c0_232] : memref<256x216xf32, #tpu.memory_space<vmem>>, vector<256x216xf32>
    %160 = arith.truncf %159 : vector<256x216xf32> to vector<256x216xbf16>
    %c0_233 = arith.constant 0 : index
    %c0_234 = arith.constant 0 : index
    %161 = vector.load %arg9[%c0_233, %c0_234] : memref<216x32xbf16, #tpu.memory_space<vmem>>, vector<216x32xbf16>
    %cst_235 = arith.constant dense<0.000000e+00> : vector<256x32xf32>
    %162 = tpu.matmul %160, %161, %cst_235 {dimension_numbers = #tpu.dot_dimension_numbers<[1], [0], [0], [1], [0, 0, 1, 1], [], []>} : vector<256x216xbf16>, vector<216x32xbf16>, vector<256x32xf32> -> vector<256x32xf32>
    %c0_236 = arith.constant 0 : index
    %c0_237 = arith.constant 0 : index
    %163 = vector.load %arg10[%c0_236, %c0_237] : memref<1x32xf32, #tpu.memory_space<vmem>>, vector<1x32xf32>
    %164 = vector.broadcast %163 : vector<1x32xf32> to vector<256x32xf32>
    %165 = arith.addf %162, %164 : vector<256x32xf32>
    %cst_238 = arith.constant 0.000000e+00 : f32
    %166 = vector.broadcast %cst_238 : f32 to vector<256x32xf32>
    %167 = arith.maximumf %165, %166 : vector<256x32xf32>
    %168 = tpu.transpose %167, [1, 0] : vector<256x32xf32> -> vector<32x256xf32>
    %c0_239 = arith.constant 0 : index
    %c0_240 = arith.constant 0 : index
    %c0_241 = arith.constant 0 : index
    %169 = vector.load %arg11[%c0_239, %c0_240, %c0_241] : memref<1x32x256xf32, #tpu.memory_space<vmem>>, vector<1x32x256xf32>
    %170 = vector.shape_cast %169 : vector<1x32x256xf32> to vector<32x256xf32>
    %171 = vector.shape_cast %168 : vector<32x256xf32> to vector<1x32x256xf32>
    tpu.vector_store %arg11[%c0_239, %c0_240, %c0_241], %171 {strides = array<i32>} : memref<1x32x256xf32, #tpu.memory_space<vmem>>, vector<1x32x256xf32>,
    return
  }
  func.func @transform_0(%arg0: i32) -> (i32, i32, i32, i32) {
    %c0_i32 = arith.constant 0 : i32
    %c0_i32_0 = arith.constant 0 : i32
    %c0_i32_1 = arith.constant 0 : i32
    %c0_i32_2 = arith.constant 0 : i32
    return %arg0, %c0_i32, %c0_i32_0, %c0_i32_1 : i32, i32, i32, i32
  }
  func.func @transform_1(%arg0: i32) -> (i32, i32, i32, i32) {
    %c0_i32 = arith.constant 0 : i32
    %c0_i32_0 = arith.constant 0 : i32
    %c0_i32_1 = arith.constant 0 : i32
    %c0_i32_2 = arith.constant 0 : i32
    return %arg0, %c0_i32, %c0_i32_0, %c0_i32_1 : i32, i32, i32, i32
  }
  func.func @transform_2(%arg0: i32) -> (i32, i32) {
    %c0_i32 = arith.constant 0 : i32
    %c0_i32_0 = arith.constant 0 : i32
    %c0_i32_1 = arith.constant 0 : i32
    return %c0_i32, %c0_i32_0 : i32, i32
  }
  func.func @transform_3(%arg0: i32) -> (i32, i32) {
    %c0_i32 = arith.constant 0 : i32
    %c0_i32_0 = arith.constant 0 : i32
    %c0_i32_1 = arith.constant 0 : i32
    return %c0_i32, %c0_i32_0 : i32, i32
  }
  func.func @transform_4(%arg0: i32) -> (i32, i32) {
    %c0_i32 = arith.constant 0 : i32
    %c0_i32_0 = arith.constant 0 : i32
    %c0_i32_1 = arith.constant 0 : i32
    return %c0_i32, %c0_i32_0 : i32, i32
  }
  func.func @transform_5(%arg0: i32) -> (i32, i32) {
    %c0_i32 = arith.constant 0 : i32
    %c0_i32_0 = arith.constant 0 : i32
    %c0_i32_1 = arith.constant 0 : i32
    return %c0_i32, %c0_i32_0 : i32, i32
  }
  func.func @transform_6(%arg0: i32) -> (i32, i32) {
    %c0_i32 = arith.constant 0 : i32
    %c0_i32_0 = arith.constant 0 : i32
    %c0_i32_1 = arith.constant 0 : i32
    return %c0_i32, %c0_i32_0 : i32, i32
  }
  func.func @transform_7(%arg0: i32) -> (i32, i32) {
    %c0_i32 = arith.constant 0 : i32
    %c0_i32_0 = arith.constant 0 : i32
    %c0_i32_1 = arith.constant 0 : i32
    return %c0_i32, %c0_i32_0 : i32, i32
  }
  func.func @transform_8(%arg0: i32) -> (i32, i32) {
    %c0_i32 = arith.constant 0 : i32
    %c0_i32_0 = arith.constant 0 : i32
    %c0_i32_1 = arith.constant 0 : i32
    return %c0_i32, %c0_i32_0 : i32, i32
  }
  func.func @transform_9(%arg0: i32) -> (i32, i32) {
    %c0_i32 = arith.constant 0 : i32
    %c0_i32_0 = arith.constant 0 : i32
    %c0_i32_1 = arith.constant 0 : i32
    return %c0_i32, %c0_i32_0 : i32, i32
  }
  func.func @transform_10(%arg0: i32) -> (i32, i32, i32) {
    %c0_i32 = arith.constant 0 : i32
    %c0_i32_0 = arith.constant 0 : i32
    %c0_i32_1 = arith.constant 0 : i32
    return %arg0, %c0_i32, %c0_i32_0 : i32, i32, i32
  }
}

</mosaic_0001>

<bundles_post_ra>
// kernel: _lambda_.1
= control target key start
LH: loop header
LB: loop body
LE: loop exit
PB: predicated region body
PF: predicated region fallthrough
CT: control target
= control target key end

     0   :  { %s9709_s13 = smov 0   ;;  %s14355_s0 = inlined_call_operand.vmem [shape: f32[2,16,16,8], index: 0, kind: input, shape index: {}]   ;;  %s14356_s1 = inlined_call_operand.vmem [shape: f32[2,16,16,16], index: 1, kind: input, shape index: {}]   ;;  %s14357_s2 = inlined_call_operand.vmem [shape: bf16[216,8], index: 2, kind: input, shape index: {}]   ;;  %s14358_s3 = inlined_call_operand.vmem [shape: f32[1,8], index: 3, kind: input, shape index: {}]   ;;  %s14359_s4 = inlined_call_operand.vmem [shape: bf16[72,8], index: 4, kind: input, shape index: {}]   ;;  %s14360_s5 = inlined_call_operand.vmem [shape: f32[1,8], index: 5, kind: input, shape index: {}]   ;;  %s14361_s6 = inlined_call_operand.vmem [shape: bf16[72,8], index: 6, kind: input, shape index: {}]   ;;  %s14362_s7 = inlined_call_operand.vmem [shape: f32[1,8], index: 7, kind: input, shape index: {}]   ;;  %s14363_s8 = inlined_call_operand.vmem [shape: bf16[216,32], index: 8, kind: input, shape index: {}]   ;;  %s14364_s9 = inlined_call_operand.vmem [shape: f32[1,32], index: 9, kind: input, shape index: {}]   ;;  %s14365_s10 = inlined_call_operand.vmem [shape: f32[2,32,256], index: 10, kind: output, shape index: {}]  }
   0x1 LB: > { %s9302_s14 = sadd.s32 4294967295, %s9639_s13   ;;  %p9306_p0 = scmp.ge.s32.totalorder %s9639_s13, 1  ;;  %s9639_s13 = sphi %s9709_s13, %s20_s13  }
   0x2   : > { %p322_p1 = scmp.lt.s32.totalorder %s9639_s13, 3 }
   0x4   : > { %p323_p2 = pnand %p9306_p0, %p322_p1 }
   0x6   : > { %326 = sbr.rel (%p323_p2) target bundleno = 3736 (0xe98), region = 60 }
   0xd   : > { %p9719_p3 = scmp.lt.s32.totalorder %s9302_s14, 1  ;;  %vm381_vm0 = vcmask 195584   ;;  %v14366_v0 = vmov 0.0   ;;  %vm384_vm1 = vcmask 189440   ;;  %vm391_vm2 = vcmask 188416   ;;  %s9642_s20 = smov 8  }
   0xe   : > { %382 = vst.msk [vmem:[#allocation2] sm:$0xff] %vm381_vm0, %v14366_v0  ;;  %383 = vst.msk [vmem:[#allocation2 + $0x8] sm:$0xff] %vm381_vm0, %v14366_v0  ;;  %vm515_vm3 = vcmask 64512   ;;  %s9643_s24 = smov 24   ;;  %s9644_s25 = smov 48   ;;  %vm708_vm4 = vcmask 195648  }
   0xf   : > { %387 = vst.msk [vmem:[#allocation2 + $0x198] sm:$0xff] %vm381_vm0, %v14366_v0  ;;  %388 = vst.msk [vmem:[#allocation2 + $0x1a0] sm:$0xff] %vm381_vm0, %v14366_v0  ;;  %s14718_s14 = smov (!%p9719_p3, %s9302_s14), 1  ;;  %vm965_vm5 = vcmask 392384   ;;  %vm1158_vm6 = vcmask 589184   ;;  %s9645_s26 = smov 72  }
  0x10   : > { %424 = vst.msk [vmem:[#allocation3] sm:$0xff] %vm381_vm0, %v14366_v0  ;;  %425 = vst.msk [vmem:[#allocation3 + $0x8] sm:$0xff] %vm381_vm0, %v14366_v0  ;;  %s9421_s16 = sshll.u32 %s14718_s14, 8  ;;  %s9646_s27 = smov 96   ;;  %vm1351_vm7 = vcmask 785984   ;;  %vm14427_vm8 = vcmask 982784  }
  0x11   : > { %426 = vst.msk [vmem:[#allocation3 + $0x10] sm:$0xff] %vm381_vm0, %v14366_v0  ;;  %427 = vst.msk [vmem:[#allocation3 + $0x18] sm:$0xff] %vm381_vm0, %v14366_v0  ;;  %s9855_s19 = scalar_lea.vmem %s14356_s1, %s9421_s16  ;;  %s9870_s23 = scalar_lea.vmem %s14355_s0, %s9421_s16  ;;  %vm14426_vm9 = vcmask 1048512   ;;  %vm1739_vm10 = vcmask 130048   ;;  %vm14429_vm11 = vcmask 326784   ;;  %vm2643_vm12 = vcmask 1043456  }
  0x12   : > { %428 = vst.msk [vmem:[#allocation3 + $0x20] sm:$0xff] %vm381_vm0, %v14366_v0  ;;  %429 = vst.msk [vmem:[#allocation3 + $0x28] sm:$0xff] %vm381_vm0, %v14366_v0  ;;  %v550_v1 = vld [vmem:[%s9855_s19 + $0x10] sm:$0xff]  ;;  %v548_v2 = vld [vmem:[%s9855_s19] sm:$0xff]  ;;  %s9647_s28 = smov 120   ;;  %s9648_s29 = smov 16  }
  0x13   : > { %430 = vst.msk [vmem:[#allocation3 + $0x30] sm:$0xff] %vm381_vm0, %v14366_v0  ;;  %431 = vst.msk [vmem:[#allocation3 + $0x38] sm:$0xff] %vm381_vm0, %v14366_v0  ;;  %616 = vrot.lane.b32.xlu1 %v550_v1, %s9642_s20  ;;  %612 = vrot.lane.b32.xlu0 %v548_v2, %s9642_s20  ;;  %v551_v3 = vld [vmem:[%s9855_s19 + $0x18] sm:$0xff]  ;;  %v549_v4 = vld [vmem:[%s9855_s19 + $0x8] sm:$0xff]  ;;  %s9649_s30 = smov 40   ;;  %s9651_s22 = smov 64  }
  0x14   : > { %432 = vst.msk [vmem:[#allocation3 + $0x40] sm:$0xff] %vm381_vm0, %v14366_v0  ;;  %433 = vst.msk [vmem:[#allocation3 + $0x48] sm:$0xff] %vm381_vm0, %v14366_v0  ;;  %v552_v5 = vld [vmem:[%s9855_s19 + $0x20] sm:$0xff]  ;;  %v553_v6 = vld [vmem:[%s9855_s19 + $0x28] sm:$0xff]  ;;  %vm14428_vm13 = vcmask 523584   ;;  %vm14425_vm14 = vcmask 720384  }
  0x15   : > { %434 = vst.msk [vmem:[#allocation3 + $0x50] sm:$0xff] %vm381_vm0, %v14366_v0  ;;  %435 = vst.msk [vmem:[#allocation3 + $0x58] sm:$0xff] %vm381_vm0, %v14366_v0  ;;  %v554_v7 = vld [vmem:[%s9855_s19 + $0x30] sm:$0xff]  ;;  %v555_v8 = vld [vmem:[%s9855_s19 + $0x38] sm:$0xff]  ;;  %vm14424_vm15 = vcmask 719872   ;;  %s9652_s12 = smov 32  }
  0x16   : > { %437 = vst.msk [vmem:[#allocation3 + $0x1e0] sm:$0xff] %vm381_vm0, %v14366_v0  ;;  %438 = vst.msk [vmem:[#allocation3 + $0x1e8] sm:$0xff] %vm381_vm0, %v14366_v0  ;;  %v485_v9 = vld [vmem:[%s9870_s23 + $0x10] sm:$0xff]  ;;  %v483_v10 = vld [vmem:[%s9870_s23] sm:$0xff] }
  0x17   : > { %439 = vst.msk [vmem:[#allocation3 + $0x1f0] sm:$0xff] %vm381_vm0, %v14366_v0  ;;  %440 = vst.msk [vmem:[#allocation3 + $0x1f8] sm:$0xff] %vm381_vm0, %v14366_v0  ;;  %618 = vrot.lane.b32.xlu1 %v551_v3, %s9642_s20  ;;  %614 = vrot.lane.b32.xlu0 %v549_v4, %s9642_s20  ;;  %v556_v11 = vld [vmem:[%s9855_s19 + $0x40] sm:$0xff]  ;;  %v486_v12 = vld [vmem:[%s9870_s23 + $0x18] sm:$0xff] }
  0x18   : > { %441 = vst.msk [vmem:[#allocation3 + $0x200] sm:$0xff] %vm381_vm0, %v14366_v0  ;;  %442 = vst.msk [vmem:[#allocation3 + $0x208] sm:$0xff] %vm381_vm0, %v14366_v0  ;;  %v484_v13 = vld [vmem:[%s9870_s23 + $0x8] sm:$0xff]  ;;  %v487_v15 = vld [vmem:[%s9870_s23 + $0x20] sm:$0xff] }
  0x19   : > { %443 = vst.msk [vmem:[#allocation3 + $0x210] sm:$0xff] %vm381_vm0, %v14366_v0  ;;  %444 = vst.msk [vmem:[#allocation3 + $0x218] sm:$0xff] %vm381_vm0, %v14366_v0  ;;  %v557_v14 = vld [vmem:[%s9855_s19 + $0x48] sm:$0xff]  ;;  %v489_v17 = vld [vmem:[%s9870_s23 + $0x30] sm:$0xff] }
  0x1a   : > { %445 = vst.msk [vmem:[#allocation3 + $0x220] sm:$0xff] %vm381_vm0, %v14366_v0  ;;  %446 = vst.msk [vmem:[#allocation3 + $0x228] sm:$0xff] %vm381_vm0, %v14366_v0  ;;  %v488_v16 = vld [vmem:[%s9870_s23 + $0x28] sm:$0xff]  ;;  %v490_v18 = vld [vmem:[%s9870_s23 + $0x38] sm:$0xff] }
  0x1b   : > { %447 = vst.msk [vmem:[#allocation3 + $0x230] sm:$0xff] %vm381_vm0, %v14366_v0  ;;  %448 = vst.msk [vmem:[#allocation3 + $0x238] sm:$0xff] %vm381_vm0, %v14366_v0  ;;  %620 = vrot.lane.b32.xlu0 %v552_v5, %s9642_s20  ;;  %622 = vrot.lane.b32.xlu1 %v553_v6, %s9642_s20  ;;  %v491_v19 = vld [vmem:[%s9870_s23 + $0x40] sm:$0xff]  ;;  %v492_v20 = vld [vmem:[%s9870_s23 + $0x48] sm:$0xff] }
  0x1c   : > { %385 = vst.msk [vmem:[#allocation2 + $0x10] sm:$0x3] %vm384_vm1, %v14366_v0  ;;  %389 = vst.msk [vmem:[#allocation2 + $0x1a8] sm:$0x3] %vm384_vm1, %v14366_v0  ;;  %v493_v21 = vld [vmem:[%s9870_s23 + $0x50] sm:$0xff]  ;;  %v559_v23 = vld [vmem:[%s9855_s19 + $0x58] sm:$0xff] }
  0x1d   : > { %408 = vst.msk [vmem:[#allocation2 + $0x29] sm:$0x1] %vm391_vm2, %v14366_v0  ;;  %392 = vst.msk [vmem:[#allocation2 + $0x18] sm:$0x1] %vm391_vm2, %v14366_v0  ;;  %v558_v22 = vld [vmem:[%s9855_s19 + $0x50] sm:$0xff]  ;;  %v494_v24 = vld [vmem:[%s9870_s23 + $0x58] sm:$0xff] }
  0x1e   : > { %393 = vst.msk [vmem:[#allocation2 + $0x30] sm:$0x1] %vm391_vm2, %v14366_v0  ;;  %394 = vst.msk [vmem:[#allocation2 + $0x48] sm:$0x1] %vm391_vm2, %v14366_v0  ;;  %v495_v25 = vld [vmem:[%s9870_s23 + $0x60] sm:$0xff]  ;;  %v496_v26 = vld [vmem:[%s9870_s23 + $0x68] sm:$0xff] }
  0x1f   : > { %395 = vst.msk [vmem:[#allocation2 + $0x60] sm:$0x1] %vm391_vm2, %v14366_v0  ;;  %396 = vst.msk [vmem:[#allocation2 + $0x78] sm:$0x1] %vm391_vm2, %v14366_v0  ;;  %624 = vrot.lane.b32.xlu0 %v554_v7, %s9642_s20  ;;  %626 = vrot.lane.b32.xlu1 %v555_v8, %s9642_s20  ;;  %v497_v27 = vld [vmem:[%s9870_s23 + $0x70] sm:$0xff]  ;;  %v498_v28 = vld [vmem:[%s9870_s23 + $0x78] sm:$0xff] }
  0x20   : > { %397 = vst.msk [vmem:[#allocation2 + $0x90] sm:$0x1] %vm391_vm2, %v14366_v0  ;;  %398 = vst.msk [vmem:[#allocation2 + $0xa8] sm:$0x1] %vm391_vm2, %v14366_v0  ;;  %v499_v29 = vld [vmem:[%s9870_s23 + $0x80] sm:$0xff]  ;;  %v561_v31 = vld [vmem:[%s9855_s19 + $0x68] sm:$0xff] }
  0x21   : > { %399 = vst.msk [vmem:[#allocation2 + $0xc0] sm:$0x1] %vm391_vm2, %v14366_v0  ;;  %400 = vst.msk [vmem:[#allocation2 + $0xd8] sm:$0x1] %vm391_vm2, %v14366_v0  ;;  %v560_v30 = vld [vmem:[%s9855_s19 + $0x60] sm:$0xff]  ;;  %v500_v32 = vld [vmem:[%s9870_s23 + $0x88] sm:$0xff] }
  0x22   : > { %401 = vst.msk [vmem:[#allocation2 + $0xf0] sm:$0x1] %vm391_vm2, %v14366_v0  ;;  %402 = vst.msk [vmem:[#allocation2 + $0x108] sm:$0x1] %vm391_vm2, %v14366_v0  ;;  %v501_v33 = vld [vmem:[%s9870_s23 + $0x90] sm:$0xff]  ;;  %v563_v35 = vld [vmem:[%s9855_s19 + $0x78] sm:$0xff] }
  0x23   : > { %403 = vst.msk [vmem:[#allocation2 + $0x120] sm:$0x1] %vm391_vm2, %v14366_v0  ;;  %404 = vst.msk [vmem:[#allocation2 + $0x138] sm:$0x1] %vm391_vm2, %v14366_v0  ;;  %628 = vrot.lane.b32.xlu0 %v556_v11, %s9642_s20  ;;  %630 = vrot.lane.b32.xlu1 %v557_v14, %s9642_s20  ;;  %v562_v34 = vld [vmem:[%s9855_s19 + $0x70] sm:$0xff]  ;;  %v502_v36 = vld [vmem:[%s9870_s23 + $0x98] sm:$0xff] }
  0x24   : > { %405 = vst.msk [vmem:[#allocation2 + $0x150] sm:$0x1] %vm391_vm2, %v14366_v0  ;;  %406 = vst.msk [vmem:[#allocation2 + $0x168] sm:$0x1] %vm391_vm2, %v14366_v0  ;;  %v503_v37 = vld [vmem:[%s9870_s23 + $0xa0] sm:$0xff]  ;;  %v565_v39 = vld [vmem:[%s9855_s19 + $0x88] sm:$0xff] }
  0x25   : > { %407 = vst.msk [vmem:[#allocation2 + $0x180] sm:$0x1] %vm391_vm2, %v14366_v0  ;;  %409 = vst.msk [vmem:[#allocation2 + $0x41] sm:$0x1] %vm391_vm2, %v14366_v0  ;;  %v564_v38 = vld [vmem:[%s9855_s19 + $0x80] sm:$0xff]  ;;  %v504_v40 = vld [vmem:[%s9870_s23 + $0xa8] sm:$0xff] }
  0x26   : > { %410 = vst.msk [vmem:[#allocation2 + $0x59] sm:$0x1] %vm391_vm2, %v14366_v0  ;;  %411 = vst.msk [vmem:[#allocation2 + $0x71] sm:$0x1] %vm391_vm2, %v14366_v0  ;;  %v505_v41 = vld [vmem:[%s9870_s23 + $0xb0] sm:$0xff]  ;;  %v567_v43 = vld [vmem:[%s9855_s19 + $0x98] sm:$0xff] }
  0x27   : > { %412 = vst.msk [vmem:[#allocation2 + $0x89] sm:$0x1] %vm391_vm2, %v14366_v0  ;;  %413 = vst.msk [vmem:[#allocation2 + $0xa1] sm:$0x1] %vm391_vm2, %v14366_v0  ;;  %632 = vrot.lane.b32.xlu0 %v558_v22, %s9642_s20  ;;  %634 = vrot.lane.b32.xlu1 %v559_v23, %s9642_s20  ;;  %v566_v42 = vld [vmem:[%s9855_s19 + $0x90] sm:$0xff]  ;;  %v506_v44 = vld [vmem:[%s9870_s23 + $0xb8] sm:$0xff] }
  0x28   : > { %414 = vst.msk [vmem:[#allocation2 + $0xb9] sm:$0x1] %vm391_vm2, %v14366_v0  ;;  %415 = vst.msk [vmem:[#allocation2 + $0xd1] sm:$0x1] %vm391_vm2, %v14366_v0  ;;  %v507_v45 = vld [vmem:[%s9870_s23 + $0xc0] sm:$0xff]  ;;  %v569_v47 = vld [vmem:[%s9855_s19 + $0xa8] sm:$0xff] }
  0x29   : > { %416 = vst.msk [vmem:[#allocation2 + $0xe9] sm:$0x1] %vm391_vm2, %v14366_v0  ;;  %417 = vst.msk [vmem:[#allocation2 + $0x101] sm:$0x1] %vm391_vm2, %v14366_v0  ;;  %v568_v46 = vld [vmem:[%s9855_s19 + $0xa0] sm:$0xff]  ;;  %v508_v48 = vld [vmem:[%s9870_s23 + $0xc8] sm:$0xff] }
  0x2a   : > { %418 = vst.msk [vmem:[#allocation2 + $0x119] sm:$0x1] %vm391_vm2, %v14366_v0  ;;  %419 = vst.msk [vmem:[#allocation2 + $0x131] sm:$0x1] %vm391_vm2, %v14366_v0  ;;  %v509_v49 = vld [vmem:[%s9870_s23 + $0xd0] sm:$0xff]  ;;  %v571_v51 = vld [vmem:[%s9855_s19 + $0xb8] sm:$0xff] }
  0x2b   : > { %420 = vst.msk [vmem:[#allocation2 + $0x149] sm:$0x1] %vm391_vm2, %v14366_v0  ;;  %421 = vst.msk [vmem:[#allocation2 + $0x161] sm:$0x1] %vm391_vm2, %v14366_v0  ;;  %636 = vrot.lane.b32.xlu0 %v560_v30, %s9642_s20  ;;  %638 = vrot.lane.b32.xlu1 %v561_v31, %s9642_s20  ;;  %v570_v50 = vld [vmem:[%s9855_s19 + $0xb0] sm:$0xff]  ;;  %v510_v52 = vld [vmem:[%s9870_s23 + $0xd8] sm:$0xff] }
  0x2c   : > { %422 = vst.msk [vmem:[#allocation2 + $0x179] sm:$0x1] %vm391_vm2, %v14366_v0  ;;  %423 = vst.msk [vmem:[#allocation2 + $0x191] sm:$0x1] %vm391_vm2, %v14366_v0  ;;  %v511_v53 = vld [vmem:[%s9870_s23 + $0xe0] sm:$0xff]  ;;  %v512_v54 = vld [vmem:[%s9870_s23 + $0xe8] sm:$0xff] }
  0x2d   : > { %518 = vst.msk [vmem:[#allocation2 + $0x31] sm:$0xff] %vm515_vm3, %v485_v9  ;;  %516 = vst.msk [vmem:[#allocation2 + $0x19] sm:$0xff] %vm515_vm3, %v483_v10  ;;  %v572_v55 = vld [vmem:[%s9855_s19 + $0xc0] sm:$0xff]  ;;  %v573_v56 = vld [vmem:[%s9855_s19 + $0xc8] sm:$0xff]  ;;  %vm450_vm1 = vcmask 191488   ;;  %vm3097_vm2 = vcmask 130112  }
  0x2e   : > { %519 = vst.msk [vmem:[#allocation2 + $0x39] sm:$0xff] %vm515_vm3, %v486_v12  ;;  %517 = vst.msk [vmem:[#allocation2 + $0x21] sm:$0xff] %vm515_vm3, %v484_v13  ;;  %v574_v57 = vld [vmem:[%s9855_s19 + $0xd0] sm:$0xff]  ;;  %v575_v58 = vld [vmem:[%s9855_s19 + $0xd8] sm:$0xff] }
  0x2f   : > { %520 = vst.msk [vmem:[#allocation2 + $0x49] sm:$0xff] %vm515_vm3, %v487_v15  ;;  %521 = vst.msk [vmem:[#allocation2 + $0x51] sm:$0xff] %vm515_vm3, %v488_v16  ;;  %640 = vrot.lane.b32.xlu0 %v562_v34, %s9642_s20  ;;  %642 = vrot.lane.b32.xlu1 %v563_v35, %s9642_s20  ;;  %v576_v59 = vld [vmem:[%s9855_s19 + $0xe0] sm:$0xff]  ;;  %v577_v60 = vld [vmem:[%s9855_s19 + $0xe8] sm:$0xff] }
  0x30   : > { %522 = vst.msk [vmem:[#allocation2 + $0x61] sm:$0xff] %vm515_vm3, %v489_v17  ;;  %523 = vst.msk [vmem:[#allocation2 + $0x69] sm:$0xff] %vm515_vm3, %v490_v18  ;;  %v578_v61 = vld [vmem:[%s9855_s19 + $0xf0] sm:$0xff]  ;;  %v579_v62 = vld [vmem:[%s9855_s19 + $0xf8] sm:$0xff] }
  0x31   : > { %524 = vst.msk [vmem:[#allocation2 + $0x79] sm:$0xff] %vm515_vm3, %v491_v19  ;;  %525 = vst.msk [vmem:[#allocation2 + $0x81] sm:$0xff] %vm515_vm3, %v492_v20  ;;  %v805_v63 = vld [vmem:[#allocation2 + $0x1] sm:$0xff]  ;;  %v806_v1 = vld [vmem:[#allocation2 + $0x9] sm:$0xff] }
  0x32   : > { %526 = vst.msk [vmem:[#allocation2 + $0x91] sm:$0xff] %vm515_vm3, %v493_v21  ;;  %527 = vst.msk [vmem:[#allocation2 + $0x99] sm:$0xff] %vm515_vm3, %v494_v24  ;;  %v998_v2 = vld [vmem:[#allocation2 + $0x2] sm:$0xff]  ;;  %v999_v3 = vld [vmem:[#allocation2 + $0xa] sm:$0xff] }
  0x33   : > { %528 = vst.msk [vmem:[#allocation2 + $0xa9] sm:$0xff] %vm515_vm3, %v495_v25  ;;  %529 = vst.msk [vmem:[#allocation2 + $0xb1] sm:$0xff] %vm515_vm3, %v496_v26  ;;  %644 = vrot.lane.b32.xlu0 %v564_v38, %s9642_s20  ;;  %646 = vrot.lane.b32.xlu1 %v565_v39, %s9642_s20  ;;  %v513_v4 = vld [vmem:[%s9870_s23 + $0xf0] sm:$0xff]  ;;  %v514_v5 = vld [vmem:[%s9870_s23 + $0xf8] sm:$0xff]  ;;  %s9653_s23 = smov 56  }
  0x34   : > { %530 = vst.msk [vmem:[#allocation2 + $0xc1] sm:$0xff] %vm515_vm3, %v497_v27  ;;  %531 = vst.msk [vmem:[#allocation2 + $0xc9] sm:$0xff] %vm515_vm3, %v498_v28  ;;  %v741_v6 = vld [vmem:[#allocation2] sm:$0xff]  ;;  %v742_v7 = vld [vmem:[#allocation2 + $0x8] sm:$0xff] }
  0x35   : > { %532 = vst.msk [vmem:[#allocation2 + $0xd9] sm:$0xff] %vm515_vm3, %v499_v29  ;;  %533 = vst.msk [vmem:[#allocation2 + $0xe1] sm:$0xff] %vm515_vm3, %v500_v32 }
  0x36   : > { %534 = vst.msk [vmem:[#allocation2 + $0xf1] sm:$0xff] %vm515_vm3, %v501_v33  ;;  %535 = vst.msk [vmem:[#allocation2 + $0xf9] sm:$0xff] %vm515_vm3, %v502_v36 }
  0x37   : > { %536 = vst.msk [vmem:[#allocation2 + $0x109] sm:$0xff] %vm515_vm3, %v503_v37  ;;  %537 = vst.msk [vmem:[#allocation2 + $0x111] sm:$0xff] %vm515_vm3, %v504_v40  ;;  %648 = vrot.lane.b32.xlu0 %v566_v42, %s9642_s20  ;;  %650 = vrot.lane.b32.xlu1 %v567_v43, %s9642_s20 }
  0x38   : > { %538 = vst.msk [vmem:[#allocation2 + $0x121] sm:$0xff] %vm515_vm3, %v505_v41  ;;  %539 = vst.msk [vmem:[#allocation2 + $0x129] sm:$0xff] %vm515_vm3, %v506_v44 }
  0x39   : > { %540 = vst.msk [vmem:[#allocation2 + $0x139] sm:$0xff] %vm515_vm3, %v507_v45  ;;  %541 = vst.msk [vmem:[#allocation2 + $0x141] sm:$0xff] %vm515_vm3, %v508_v48 }
  0x3a   : > { %542 = vst.msk [vmem:[#allocation2 + $0x151] sm:$0xff] %vm515_vm3, %v509_v49  ;;  %543 = vst.msk [vmem:[#allocation2 + $0x159] sm:$0xff] %vm515_vm3, %v510_v52 }
  0x3b   : > { %652 = vrot.lane.b32.xlu0 %v568_v46, %s9642_s20  ;;  %654 = vrot.lane.b32.xlu1 %v569_v47, %s9642_s20  ;;  %544 = vst.msk [vmem:[#allocation2 + $0x169] sm:$0xff] %vm515_vm3, %v511_v53  ;;  %545 = vst.msk [vmem:[#allocation2 + $0x171] sm:$0xff] %vm515_vm3, %v512_v54 }
  0x3c   : > { %546 = vst.msk [vmem:[#allocation2 + $0x181] sm:$0xff] %vm515_vm3, %v513_v4  ;;  %547 = vst.msk [vmem:[#allocation2 + $0x189] sm:$0xff] %vm515_vm3, %v514_v5 }
  0x3d   : > { %773 = vst.msk [vmem:[#allocation4] sm:$0xff] %vm381_vm0, %v741_v6  ;;  %774 = vst.msk [vmem:[#allocation4 + $0x10] sm:$0xff] %vm381_vm0, %v742_v7 }
  0x3f   : > { %656 = vrot.lane.b32.xlu0 %v570_v50, %s9642_s20  ;;  %658 = vrot.lane.b32.xlu1 %v571_v51, %s9642_s20 }
  0x43   : > { %660 = vrot.lane.b32.xlu0 %v572_v55, %s9642_s20  ;;  %662 = vrot.lane.b32.xlu1 %v573_v56, %s9642_s20 }
  0x47   : > { %664 = vrot.lane.b32.xlu0 %v574_v57, %s9642_s20  ;;  %666 = vrot.lane.b32.xlu1 %v575_v58, %s9642_s20 }
  0x4b   : > { %668 = vrot.lane.b32.xlu0 %v576_v59, %s9642_s20  ;;  %670 = vrot.lane.b32.xlu1 %v577_v60, %s9642_s20 }
  0x4f   : > { %672 = vrot.lane.b32.xlu0 %v578_v61, %s9642_s20  ;;  %674 = vrot.lane.b32.xlu1 %v579_v62, %s9642_s20 }
  0x53   : > { %869 = vrot.lane.b32.xlu0 %v805_v63, %s9643_s24  ;;  %871 = vrot.lane.b32.xlu1 %v806_v1, %s9643_s24 }
  0x57   : > { %1062 = vrot.lane.b32.xlu0 %v998_v2, %s9644_s25  ;;  %1064 = vrot.lane.b32.xlu1 %v999_v3, %s9644_s25 }
  0x85   : > { %v617_v8 = vpop.permute.xlu1 %616  ;;  %v613_v9 = vpop.permute.xlu0 %612 }
  0x86   : > { %711 = vst.msk [vmem:[#allocation2 + $0x31] sm:$0xff] %vm708_vm4, %v617_v8  ;;  %709 = vst.msk [vmem:[#allocation2 + $0x19] sm:$0xff] %vm708_vm4, %v613_v9 }
  0x89   : > { %v619_v10 = vpop.permute.xlu1 %618  ;;  %v615_v11 = vpop.permute.xlu0 %614 }
  0x8a   : > { %712 = vst.msk [vmem:[#allocation2 + $0x39] sm:$0xff] %vm708_vm4, %v619_v10  ;;  %710 = vst.msk [vmem:[#allocation2 + $0x21] sm:$0xff] %vm708_vm4, %v615_v11 }
  0x8d   : > { %v621_v12 = vpop.permute.xlu0 %620  ;;  %v10000_v13 = vld [vmem:[#allocation2 + $0x19] sm:$0xff]  ;;  %v623_v14 = vpop.permute.xlu1 %622  ;;  %v10010_v16 = vld [vmem:[#allocation2 + $0x30] sm:$0xff] }
  0x8e   : > { %v10002_v15 = vld [vmem:[#allocation2 + $0x18] sm:$0xff]  ;;  %713 = vst.msk [vmem:[#allocation2 + $0x49] sm:$0xff] %vm708_vm4, %v621_v12  ;;  %873 = vrot.lane.b32.xlu0 %v10000_v13, %s9643_s24  ;;  %714 = vst.msk [vmem:[#allocation2 + $0x51] sm:$0xff] %vm708_vm4, %v623_v14 }
  0x8f   : > { %775 = vst.msk [vmem:[#allocation4 + $0x20] sm:$0xff] %vm381_vm0, %v10002_v15  ;;  %v10012_v17 = vld [vmem:[#allocation2 + $0x31] sm:$0xff]  ;;  %777 = vst.msk [vmem:[#allocation4 + $0x40] sm:$0xff] %vm381_vm0, %v10010_v16 }
  0x91   : > { %v625_v18 = vpop.permute.xlu0 %624  ;;  %v10016_v19 = vld [vmem:[#allocation2 + $0x21] sm:$0xff]  ;;  %v627_v20 = vpop.permute.xlu1 %626  ;;  %v10024_v21 = vld [vmem:[#allocation2 + $0x39] sm:$0xff] }
  0x92   : > { %715 = vst.msk [vmem:[#allocation2 + $0x61] sm:$0xff] %vm708_vm4, %v625_v18  ;;  %875 = vrot.lane.b32.xlu1 %v10016_v19, %s9643_s24  ;;  %877 = vrot.lane.b32.xlu0 %v10012_v17, %s9643_s24  ;;  %716 = vst.msk [vmem:[#allocation2 + $0x69] sm:$0xff] %vm708_vm4, %v627_v20  ;;  %v10026_v22 = vld [vmem:[#allocation2 + $0x20] sm:$0xff]  ;;  %v10028_v23 = vld [vmem:[#allocation2 + $0x38] sm:$0xff] }
  0x93   : > { %776 = vst.msk [vmem:[#allocation4 + $0x30] sm:$0xff] %vm381_vm0, %v10026_v22  ;;  %778 = vst.msk [vmem:[#allocation4 + $0x50] sm:$0xff] %vm381_vm0, %v10028_v23 }
  0x95   : > { %v629_v24 = vpop.permute.xlu0 %628  ;;  %v10034_v25 = vld [vmem:[#allocation2 + $0x49] sm:$0xff]  ;;  %v631_v26 = vpop.permute.xlu1 %630  ;;  %v10046_v29 = vld [vmem:[#allocation2 + $0x51] sm:$0xff] }
  0x96   : > { %717 = vst.msk [vmem:[#allocation2 + $0x79] sm:$0xff] %vm708_vm4, %v629_v24  ;;  %879 = vrot.lane.b32.xlu1 %v10024_v21, %s9643_s24  ;;  %881 = vrot.lane.b32.xlu0 %v10034_v25, %s9643_s24  ;;  %718 = vst.msk [vmem:[#allocation2 + $0x81] sm:$0xff] %vm708_vm4, %v631_v26  ;;  %v10042_v27 = vld [vmem:[#allocation2 + $0x48] sm:$0xff]  ;;  %v10044_v28 = vld [vmem:[#allocation2 + $0x50] sm:$0xff] }
  0x97   : > { %779 = vst.msk [vmem:[#allocation4 + $0x60] sm:$0xff] %vm381_vm0, %v10042_v27  ;;  %780 = vst.msk [vmem:[#allocation4 + $0x70] sm:$0xff] %vm381_vm0, %v10044_v28 }
  0x99   : > { %v633_v30 = vpop.permute.xlu0 %632  ;;  %v10052_v31 = vld [vmem:[#allocation2 + $0x61] sm:$0xff]  ;;  %v635_v32 = vpop.permute.xlu1 %634  ;;  %v10064_v35 = vld [vmem:[#allocation2 + $0x69] sm:$0xff] }
  0x9a   : > { %719 = vst.msk [vmem:[#allocation2 + $0x91] sm:$0xff] %vm708_vm4, %v633_v30  ;;  %883 = vrot.lane.b32.xlu1 %v10046_v29, %s9643_s24  ;;  %885 = vrot.lane.b32.xlu0 %v10052_v31, %s9643_s24  ;;  %720 = vst.msk [vmem:[#allocation2 + $0x99] sm:$0xff] %vm708_vm4, %v635_v32  ;;  %v10060_v33 = vld [vmem:[#allocation2 + $0x60] sm:$0xff]  ;;  %v10062_v34 = vld [vmem:[#allocation2 + $0x68] sm:$0xff] }
  0x9b   : > { %781 = vst.msk [vmem:[#allocation4 + $0x80] sm:$0xff] %vm381_vm0, %v10060_v33  ;;  %782 = vst.msk [vmem:[#allocation4 + $0x90] sm:$0xff] %vm381_vm0, %v10062_v34 }
  0x9d   : > { %v637_v36 = vpop.permute.xlu0 %636  ;;  %v10070_v37 = vld [vmem:[#allocation2 + $0x79] sm:$0xff]  ;;  %v639_v38 = vpop.permute.xlu1 %638  ;;  %v10082_v41 = vld [vmem:[#allocation2 + $0x81] sm:$0xff] }
  0x9e   : > { %721 = vst.msk [vmem:[#allocation2 + $0xa9] sm:$0xff] %vm708_vm4, %v637_v36  ;;  %887 = vrot.lane.b32.xlu1 %v10064_v35, %s9643_s24  ;;  %889 = vrot.lane.b32.xlu0 %v10070_v37, %s9643_s24  ;;  %722 = vst.msk [vmem:[#allocation2 + $0xb1] sm:$0xff] %vm708_vm4, %v639_v38  ;;  %v10078_v39 = vld [vmem:[#allocation2 + $0x78] sm:$0xff]  ;;  %v10080_v40 = vld [vmem:[#allocation2 + $0x80] sm:$0xff] }
  0x9f   : > { %783 = vst.msk [vmem:[#allocation4 + $0xa0] sm:$0xff] %vm381_vm0, %v10078_v39  ;;  %784 = vst.msk [vmem:[#allocation4 + $0xb0] sm:$0xff] %vm381_vm0, %v10080_v40 }
  0xa1   : > { %v641_v42 = vpop.permute.xlu0 %640  ;;  %v10088_v43 = vld [vmem:[#allocation2 + $0x91] sm:$0xff]  ;;  %v643_v44 = vpop.permute.xlu1 %642  ;;  %v10100_v47 = vld [vmem:[#allocation2 + $0x99] sm:$0xff] }
  0xa2   : > { %723 = vst.msk [vmem:[#allocation2 + $0xc1] sm:$0xff] %vm708_vm4, %v641_v42  ;;  %891 = vrot.lane.b32.xlu1 %v10082_v41, %s9643_s24  ;;  %893 = vrot.lane.b32.xlu0 %v10088_v43, %s9643_s24  ;;  %724 = vst.msk [vmem:[#allocation2 + $0xc9] sm:$0xff] %vm708_vm4, %v643_v44  ;;  %v10096_v45 = vld [vmem:[#allocation2 + $0x90] sm:$0xff]  ;;  %v10098_v46 = vld [vmem:[#allocation2 + $0x98] sm:$0xff] }
  0xa3   : > { %785 = vst.msk [vmem:[#allocation4 + $0xc0] sm:$0xff] %vm381_vm0, %v10096_v45  ;;  %786 = vst.msk [vmem:[#allocation4 + $0xd0] sm:$0xff] %vm381_vm0, %v10098_v46 }
  0xa5   : > { %v645_v48 = vpop.permute.xlu0 %644  ;;  %v10106_v49 = vld [vmem:[#allocation2 + $0xa9] sm:$0xff]  ;;  %v647_v50 = vpop.permute.xlu1 %646  ;;  %v10118_v53 = vld [vmem:[#allocation2 + $0xb1] sm:$0xff] }
  0xa6   : > { %725 = vst.msk [vmem:[#allocation2 + $0xd9] sm:$0xff] %vm708_vm4, %v645_v48  ;;  %895 = vrot.lane.b32.xlu1 %v10100_v47, %s9643_s24  ;;  %897 = vrot.lane.b32.xlu0 %v10106_v49, %s9643_s24  ;;  %726 = vst.msk [vmem:[#allocation2 + $0xe1] sm:$0xff] %vm708_vm4, %v647_v50  ;;  %v10114_v51 = vld [vmem:[#allocation2 + $0xa8] sm:$0xff]  ;;  %v10116_v52 = vld [vmem:[#allocation2 + $0xb0] sm:$0xff] }
  0xa7   : > { %787 = vst.msk [vmem:[#allocation4 + $0xe0] sm:$0xff] %vm381_vm0, %v10114_v51  ;;  %788 = vst.msk [vmem:[#allocation4 + $0xf0] sm:$0xff] %vm381_vm0, %v10116_v52 }
  0xa9   : > { %v649_v54 = vpop.permute.xlu0 %648  ;;  %v10124_v55 = vld [vmem:[#allocation2 + $0xc1] sm:$0xff]  ;;  %v651_v56 = vpop.permute.xlu1 %650  ;;  %v10136_v59 = vld [vmem:[#allocation2 + $0xc9] sm:$0xff] }
  0xaa   : > { %727 = vst.msk [vmem:[#allocation2 + $0xf1] sm:$0xff] %vm708_vm4, %v649_v54  ;;  %899 = vrot.lane.b32.xlu1 %v10118_v53, %s9643_s24  ;;  %901 = vrot.lane.b32.xlu0 %v10124_v55, %s9643_s24  ;;  %728 = vst.msk [vmem:[#allocation2 + $0xf9] sm:$0xff] %vm708_vm4, %v651_v56  ;;  %v10132_v57 = vld [vmem:[#allocation2 + $0xc0] sm:$0xff]  ;;  %v10134_v58 = vld [vmem:[#allocation2 + $0xc8] sm:$0xff] }
  0xab   : > { %789 = vst.msk [vmem:[#allocation4 + $0x100] sm:$0xff] %vm381_vm0, %v10132_v57  ;;  %790 = vst.msk [vmem:[#allocation4 + $0x110] sm:$0xff] %vm381_vm0, %v10134_v58 }
  0xad   : > { %v653_v60 = vpop.permute.xlu0 %652  ;;  %v10142_v61 = vld [vmem:[#allocation2 + $0xd9] sm:$0xff]  ;;  %v655_v62 = vpop.permute.xlu1 %654  ;;  %v10154_v2 = vld [vmem:[#allocation2 + $0xe1] sm:$0xff] }
  0xae   : > { %729 = vst.msk [vmem:[#allocation2 + $0x109] sm:$0xff] %vm708_vm4, %v653_v60  ;;  %903 = vrot.lane.b32.xlu1 %v10136_v59, %s9643_s24  ;;  %905 = vrot.lane.b32.xlu0 %v10142_v61, %s9643_s24  ;;  %730 = vst.msk [vmem:[#allocation2 + $0x111] sm:$0xff] %vm708_vm4, %v655_v62  ;;  %v10150_v63 = vld [vmem:[#allocation2 + $0xd8] sm:$0xff]  ;;  %v10152_v1 = vld [vmem:[#allocation2 + $0xe0] sm:$0xff] }
  0xaf   : > { %791 = vst.msk [vmem:[#allocation4 + $0x120] sm:$0xff] %vm381_vm0, %v10150_v63  ;;  %792 = vst.msk [vmem:[#allocation4 + $0x130] sm:$0xff] %vm381_vm0, %v10152_v1 }
  0xb1   : > { %v657_v3 = vpop.permute.xlu0 %656  ;;  %v10160_v4 = vld [vmem:[#allocation2 + $0xf1] sm:$0xff]  ;;  %v659_v5 = vpop.permute.xlu1 %658  ;;  %v10172_v8 = vld [vmem:[#allocation2 + $0xf9] sm:$0xff] }
  0xb2   : > { %731 = vst.msk [vmem:[#allocation2 + $0x121] sm:$0xff] %vm708_vm4, %v657_v3  ;;  %907 = vrot.lane.b32.xlu1 %v10154_v2, %s9643_s24  ;;  %909 = vrot.lane.b32.xlu0 %v10160_v4, %s9643_s24  ;;  %732 = vst.msk [vmem:[#allocation2 + $0x129] sm:$0xff] %vm708_vm4, %v659_v5  ;;  %v10168_v6 = vld [vmem:[#allocation2 + $0xf0] sm:$0xff]  ;;  %v10170_v7 = vld [vmem:[#allocation2 + $0xf8] sm:$0xff] }
  0xb3   : > { %793 = vst.msk [vmem:[#allocation4 + $0x140] sm:$0xff] %vm381_vm0, %v10168_v6  ;;  %794 = vst.msk [vmem:[#allocation4 + $0x150] sm:$0xff] %vm381_vm0, %v10170_v7 }
  0xb5   : > { %v661_v9 = vpop.permute.xlu0 %660  ;;  %v10178_v10 = vld [vmem:[#allocation2 + $0x109] sm:$0xff]  ;;  %v663_v11 = vpop.permute.xlu1 %662  ;;  %v10190_v18 = vld [vmem:[#allocation2 + $0x111] sm:$0xff] }
  0xb6   : > { %733 = vst.msk [vmem:[#allocation2 + $0x139] sm:$0xff] %vm708_vm4, %v661_v9  ;;  %911 = vrot.lane.b32.xlu1 %v10172_v8, %s9643_s24  ;;  %913 = vrot.lane.b32.xlu0 %v10178_v10, %s9643_s24  ;;  %734 = vst.msk [vmem:[#allocation2 + $0x141] sm:$0xff] %vm708_vm4, %v663_v11  ;;  %v10186_v12 = vld [vmem:[#allocation2 + $0x108] sm:$0xff]  ;;  %v10188_v14 = vld [vmem:[#allocation2 + $0x110] sm:$0xff] }
  0xb7   : > { %795 = vst.msk [vmem:[#allocation4 + $0x160] sm:$0xff] %vm381_vm0, %v10186_v12  ;;  %796 = vst.msk [vmem:[#allocation4 + $0x170] sm:$0xff] %vm381_vm0, %v10188_v14 }
  0xb9   : > { %v665_v20 = vpop.permute.xlu0 %664  ;;  %v10196_v24 = vld [vmem:[#allocation2 + $0x121] sm:$0xff]  ;;  %v667_v26 = vpop.permute.xlu1 %666  ;;  %v10208_v36 = vld [vmem:[#allocation2 + $0x129] sm:$0xff] }
  0xba   : > { %735 = vst.msk [vmem:[#allocation2 + $0x151] sm:$0xff] %vm708_vm4, %v665_v20  ;;  %915 = vrot.lane.b32.xlu1 %v10190_v18, %s9643_s24  ;;  %917 = vrot.lane.b32.xlu0 %v10196_v24, %s9643_s24  ;;  %736 = vst.msk [vmem:[#allocation2 + $0x159] sm:$0xff] %vm708_vm4, %v667_v26  ;;  %v10204_v30 = vld [vmem:[#allocation2 + $0x120] sm:$0xff]  ;;  %v10206_v32 = vld [vmem:[#allocation2 + $0x128] sm:$0xff] }
  0xbb   : > { %797 = vst.msk [vmem:[#allocation4 + $0x180] sm:$0xff] %vm381_vm0, %v10204_v30  ;;  %798 = vst.msk [vmem:[#allocation4 + $0x190] sm:$0xff] %vm381_vm0, %v10206_v32 }
  0xbd   : > { %v669_v38 = vpop.permute.xlu0 %668  ;;  %v10214_v42 = vld [vmem:[#allocation2 + $0x139] sm:$0xff]  ;;  %v671_v44 = vpop.permute.xlu1 %670  ;;  %v10226_v54 = vld [vmem:[#allocation2 + $0x141] sm:$0xff] }
  0xbe   : > { %737 = vst.msk [vmem:[#allocation2 + $0x169] sm:$0xff] %vm708_vm4, %v669_v38  ;;  %919 = vrot.lane.b32.xlu1 %v10208_v36, %s9643_s24  ;;  %921 = vrot.lane.b32.xlu0 %v10214_v42, %s9643_s24  ;;  %738 = vst.msk [vmem:[#allocation2 + $0x171] sm:$0xff] %vm708_vm4, %v671_v44  ;;  %v10222_v48 = vld [vmem:[#allocation2 + $0x138] sm:$0xff]  ;;  %v10224_v50 = vld [vmem:[#allocation2 + $0x140] sm:$0xff] }
  0xbf   : > { %799 = vst.msk [vmem:[#allocation4 + $0x1a0] sm:$0xff] %vm381_vm0, %v10222_v48  ;;  %800 = vst.msk [vmem:[#allocation4 + $0x1b0] sm:$0xff] %vm381_vm0, %v10224_v50 }
  0xc1   : > { %v10232_v56 = vld [vmem:[#allocation2 + $0x151] sm:$0xff]  ;;  %v673_v60 = vpop.permute.xlu0 %672  ;;  %v675_v62 = vpop.permute.xlu1 %674  ;;  %v10244_v9 = vld [vmem:[#allocation2 + $0x159] sm:$0xff] }
  0xc2   : > { %923 = vrot.lane.b32.xlu1 %v10226_v54, %s9643_s24  ;;  %925 = vrot.lane.b32.xlu0 %v10232_v56, %s9643_s24  ;;  %739 = vst.msk [vmem:[#allocation2 + $0x181] sm:$0xff] %vm708_vm4, %v673_v60  ;;  %740 = vst.msk [vmem:[#allocation2 + $0x189] sm:$0xff] %vm708_vm4, %v675_v62  ;;  %v10240_v3 = vld [vmem:[#allocation2 + $0x150] sm:$0xff]  ;;  %v10242_v5 = vld [vmem:[#allocation2 + $0x158] sm:$0xff]  ;;  %vm3290_vm4 = vcmask 195712  }
  0xc3   : > { %14431 = vst [vmem:[#allocation5_spill] sm:$0xff] %v10244_v9  ;;  %801 = vst.msk [vmem:[#allocation4 + $0x1c0] sm:$0xff] %vm381_vm0, %v10240_v3  ;;  %v10268_v62 = vld [vmem:[#allocation2 + $0x1a] sm:$0xff] }
  0xc4   : > { %802 = vst.msk [vmem:[#allocation4 + $0x1d0] sm:$0xff] %vm381_vm0, %v10242_v5  ;;  %14434 = vst [vmem:[#allocation8_spill] sm:$0xff] %v10268_v62 }
  0xc5   : > { %v10250_v11 = vld [vmem:[#allocation2 + $0x169] sm:$0xff]  ;;  %v870_v20 = vpop.permute.xlu0 %869  ;;  %v872_v26 = vpop.permute.xlu1 %871  ;;  %v10262_v60 = vld [vmem:[#allocation2 + $0x171] sm:$0xff] }
  0xc6   : > { %14432 = vst [vmem:[#allocation6_spill] sm:$0xff] %v10250_v11  ;;  %927 = vrot.lane.b32.xlu1 %v10244_v9, %s9643_s24  ;;  %929 = vrot.lane.b32.xlu0 %v10250_v11, %s9643_s24  ;;  %966 = vst.msk [vmem:[#allocation4] sm:$0xff] %vm965_vm5, %v870_v20  ;;  %v10258_v38 = vld [vmem:[#allocation2 + $0x168] sm:$0xff]  ;;  %v10260_v44 = vld [vmem:[#allocation2 + $0x170] sm:$0xff] }
  0xc7   : > { %967 = vst.msk [vmem:[#allocation4 + $0x10] sm:$0xff] %vm965_vm5, %v872_v26  ;;  %14433 = vst [vmem:[#allocation7_spill] sm:$0xff] %v10262_v60  ;;  %v10276_v20 = vld [vmem:[#allocation2 + $0x22] sm:$0xff]  ;;  %v10278_v26 = vld [vmem:[#allocation2 + $0x32] sm:$0xff] }
  0xc8   : > { %803 = vst.msk [vmem:[#allocation4 + $0x1e0] sm:$0xff] %vm381_vm0, %v10258_v38  ;;  %804 = vst.msk [vmem:[#allocation4 + $0x1f0] sm:$0xff] %vm381_vm0, %v10260_v44  ;;  %v10284_v9 = vld [vmem:[#allocation2 + $0x3a] sm:$0xff] }
  0xc9   : > { %v1063_v0 = vpop.permute.xlu0 %1062  ;;  %v1065_v11 = vpop.permute.xlu1 %1064  ;;  %14435 = vst [vmem:[#allocation9_spill] sm:$0xff] %v10276_v20  ;;  %14436 = vst [vmem:[#allocation10_spill] sm:$0xff] %v10278_v26 }
  0xca   : > { %931 = vrot.lane.b32.xlu1 %v10262_v60, %s9643_s24  ;;  %1066 = vrot.lane.b32.xlu0 %v10268_v62, %s9644_s25  ;;  %1159 = vst.msk [vmem:[#allocation4] sm:$0xff] %vm1158_vm6, %v1063_v0  ;;  %1160 = vst.msk [vmem:[#allocation4 + $0x10] sm:$0xff] %vm1158_vm6, %v1065_v11  ;;  %v10286_v60 = vld [vmem:[#allocation2 + $0x4a] sm:$0xff]  ;;  %v10292_v0 = vld [vmem:[#allocation2 + $0x52] sm:$0xff] }
  0xcb   : > { %14437 = vst [vmem:[#allocation11_spill] sm:$0xff] %v10284_v9  ;;  %14438 = vst [vmem:[#allocation12_spill] sm:$0xff] %v10286_v60  ;;  %v10294_v11 = vld [vmem:[#allocation2 + $0x62] sm:$0xff]  ;;  %v10383_v62 = vld [vmem:[#allocation2 + $0x16a] sm:$0xff] }
  0xcc   : > { %14439 = vst [vmem:[#allocation13_spill] sm:$0xff] %v10292_v0  ;;  %14440 = vst [vmem:[#allocation14_spill] sm:$0xff] %v10294_v11 }
  0xce   : > { %1068 = vrot.lane.b32.xlu1 %v10276_v20, %s9644_s25  ;;  %1070 = vrot.lane.b32.xlu0 %v10278_v26, %s9644_s25  ;;  %v10300_v26 = vld [vmem:[#allocation2 + $0x6a] sm:$0xff]  ;;  %v10302_v20 = vld [vmem:[#allocation2 + $0x7a] sm:$0xff] }
  0xcf   : > { %14441 = vst [vmem:[#allocation15_spill] sm:$0xff] %v10300_v26  ;;  %14442 = vst [vmem:[#allocation16_spill] sm:$0xff] %v10302_v20 }
  0xd2   : > { %1072 = vrot.lane.b32.xlu1 %v10284_v9, %s9644_s25  ;;  %1074 = vrot.lane.b32.xlu0 %v10286_v60, %s9644_s25  ;;  %v10308_v60 = vld [vmem:[#allocation2 + $0x82] sm:$0xff]  ;;  %v10310_v9 = vld [vmem:[#allocation2 + $0x92] sm:$0xff] }
  0xd3   : > { %14443 = vst [vmem:[#allocation17_spill] sm:$0xff] %v10308_v60  ;;  %14444 = vst [vmem:[#allocation18_spill] sm:$0xff] %v10310_v9 }
  0xd6   : > { %1076 = vrot.lane.b32.xlu1 %v10292_v0, %s9644_s25  ;;  %1078 = vrot.lane.b32.xlu0 %v10294_v11, %s9644_s25  ;;  %v10316_v11 = vld [vmem:[#allocation2 + $0x9a] sm:$0xff]  ;;  %v10318_v0 = vld [vmem:[#allocation2 + $0xaa] sm:$0xff] }
  0xd7   : > { %14445 = vst [vmem:[#allocation19_spill] sm:$0xff] %v10316_v11  ;;  %14446 = vst [vmem:[#allocation20_spill] sm:$0xff] %v10318_v0 }
  0xda   : > { %1080 = vrot.lane.b32.xlu1 %v10300_v26, %s9644_s25  ;;  %1082 = vrot.lane.b32.xlu0 %v10302_v20, %s9644_s25  ;;  %v10324_v20 = vld [vmem:[#allocation2 + $0xb2] sm:$0xff]  ;;  %v10326_v26 = vld [vmem:[#allocation2 + $0xc2] sm:$0xff] }
  0xdb   : > { %14447 = vst [vmem:[#allocation21_spill] sm:$0xff] %v10324_v20  ;;  %14448 = vst [vmem:[#allocation22_spill] sm:$0xff] %v10326_v26 }
  0xde   : > { %1084 = vrot.lane.b32.xlu1 %v10308_v60, %s9644_s25  ;;  %1086 = vrot.lane.b32.xlu0 %v10310_v9, %s9644_s25  ;;  %v10332_v9 = vld [vmem:[#allocation2 + $0xca] sm:$0xff]  ;;  %v10334_v60 = vld [vmem:[#allocation2 + $0xda] sm:$0xff] }
  0xdf   : > { %14449 = vst [vmem:[#allocation23_spill] sm:$0xff] %v10332_v9  ;;  %14450 = vst [vmem:[#allocation24_spill] sm:$0xff] %v10334_v60 }
  0xe2   : > { %1088 = vrot.lane.b32.xlu1 %v10316_v11, %s9644_s25  ;;  %1090 = vrot.lane.b32.xlu0 %v10318_v0, %s9644_s25  ;;  %v10340_v0 = vld [vmem:[#allocation2 + $0xe2] sm:$0xff]  ;;  %v10342_v11 = vld [vmem:[#allocation2 + $0xf2] sm:$0xff] }
  0xe3   : > { %14451 = vst [vmem:[#allocation25_spill] sm:$0xff] %v10340_v0  ;;  %14452 = vst [vmem:[#allocation26_spill] sm:$0xff] %v10342_v11 }
  0xe6   : > { %1092 = vrot.lane.b32.xlu1 %v10324_v20, %s9644_s25  ;;  %1094 = vrot.lane.b32.xlu0 %v10326_v26, %s9644_s25  ;;  %v10348_v26 = vld [vmem:[#allocation2 + $0xfa] sm:$0xff]  ;;  %v10350_v20 = vld [vmem:[#allocation2 + $0x10a] sm:$0xff] }
  0xe7   : > { %14453 = vst [vmem:[#allocation27_spill] sm:$0xff] %v10348_v26  ;;  %14454 = vst [vmem:[#allocation28_spill] sm:$0xff] %v10350_v20 }
  0xea   : > { %1096 = vrot.lane.b32.xlu1 %v10332_v9, %s9644_s25  ;;  %1098 = vrot.lane.b32.xlu0 %v10334_v60, %s9644_s25  ;;  %v10356_v60 = vld [vmem:[#allocation2 + $0x112] sm:$0xff]  ;;  %v10358_v9 = vld [vmem:[#allocation2 + $0x122] sm:$0xff] }
  0xeb   : > { %14455 = vst [vmem:[#allocation29_spill] sm:$0xff] %v10356_v60  ;;  %14456 = vst [vmem:[#allocation30_spill] sm:$0xff] %v10358_v9 }
  0xee   : > { %1100 = vrot.lane.b32.xlu1 %v10340_v0, %s9644_s25  ;;  %1102 = vrot.lane.b32.xlu0 %v10342_v11, %s9644_s25  ;;  %v10364_v11 = vld [vmem:[#allocation2 + $0x12a] sm:$0xff]  ;;  %v10366_v0 = vld [vmem:[#allocation2 + $0x13a] sm:$0xff] }
  0xef   : > { %14457 = vst [vmem:[#allocation31_spill] sm:$0xff] %v10364_v11  ;;  %14458 = vst [vmem:[#allocation32_spill] sm:$0xff] %v10366_v0 }
  0xf2   : > { %1104 = vrot.lane.b32.xlu1 %v10348_v26, %s9644_s25  ;;  %1106 = vrot.lane.b32.xlu0 %v10350_v20, %s9644_s25  ;;  %v10372_v20 = vld [vmem:[#allocation2 + $0x142] sm:$0xff]  ;;  %v10374_v26 = vld [vmem:[#allocation2 + $0x152] sm:$0xff] }
  0xf3   : > { %14459 = vst [vmem:[#allocation33_spill] sm:$0xff] %v10374_v26 }
  0xf6   : > { %1108 = vrot.lane.b32.xlu1 %v10356_v60, %s9644_s25  ;;  %1110 = vrot.lane.b32.xlu0 %v10358_v9, %s9644_s25  ;;  %v10381_v60 = vld [vmem:[#allocation2 + $0x15a] sm:$0xff] }
  0xf7   : > { %14460 = vst [vmem:[#allocation34_spill] sm:$0xff] %v10381_v60 }
  0xfa   : > { %1112 = vrot.lane.b32.xlu1 %v10364_v11, %s9644_s25  ;;  %1114 = vrot.lane.b32.xlu0 %v10366_v0, %s9644_s25 }
  0xfe   : > { %1116 = vrot.lane.b32.xlu1 %v10372_v20, %s9644_s25  ;;  %1118 = vrot.lane.b32.xlu0 %v10374_v26, %s9644_s25  ;;  %v10391_v26 = vld [vmem:[#allocation2 + $0x172] sm:$0xff] }
 0x100   : > { %v874_v9 = vpop.permute.xlu0 %873 }
 0x101   : > { %968 = vst.msk [vmem:[#allocation4 + $0x20] sm:$0xff] %vm965_vm5, %v874_v9 }
 0x102   : > { %1120 = vrot.lane.b32.xlu1 %v10381_v60, %s9644_s25  ;;  %1122 = vrot.lane.b32.xlu0 %v10383_v62, %s9644_s25 }
 0x104   : > { %v876_v0 = vpop.permute.xlu1 %875  ;;  %v878_v11 = vpop.permute.xlu0 %877 }
 0x105   : > { %969 = vst.msk [vmem:[#allocation4 + $0x30] sm:$0xff] %vm965_vm5, %v876_v0  ;;  %970 = vst.msk [vmem:[#allocation4 + $0x40] sm:$0xff] %vm965_vm5, %v878_v11 }
 0x106   : > { %1124 = vrot.lane.b32.xlu1 %v10391_v26, %s9644_s25  ;;  %1255 = vrot.lane.b32.xlu0 %v10002_v15, %s9645_s26 }
 0x108   : > { %v880_v9 = vpop.permute.xlu1 %879  ;;  %v882_v60 = vpop.permute.xlu0 %881 }
 0x109   : > { %971 = vst.msk [vmem:[#allocation4 + $0x50] sm:$0xff] %vm965_vm5, %v880_v9  ;;  %972 = vst.msk [vmem:[#allocation4 + $0x60] sm:$0xff] %vm965_vm5, %v882_v60 }
 0x10a   : > { %1257 = vrot.lane.b32.xlu1 %v10026_v22, %s9645_s26  ;;  %1259 = vrot.lane.b32.xlu0 %v10010_v16, %s9645_s26 }
 0x10c   : > { %v884_v0 = vpop.permute.xlu1 %883  ;;  %v886_v11 = vpop.permute.xlu0 %885 }
 0x10d   : > { %973 = vst.msk [vmem:[#allocation4 + $0x70] sm:$0xff] %vm965_vm5, %v884_v0  ;;  %974 = vst.msk [vmem:[#allocation4 + $0x80] sm:$0xff] %vm965_vm5, %v886_v11 }
 0x10e   : > { %1261 = vrot.lane.b32.xlu1 %v10028_v23, %s9645_s26  ;;  %1263 = vrot.lane.b32.xlu0 %v10042_v27, %s9645_s26 }
 0x110   : > { %v888_v15 = vpop.permute.xlu1 %887  ;;  %v890_v60 = vpop.permute.xlu0 %889 }
 0x111   : > { %975 = vst.msk [vmem:[#allocation4 + $0x90] sm:$0xff] %vm965_vm5, %v888_v15  ;;  %976 = vst.msk [vmem:[#allocation4 + $0xa0] sm:$0xff] %vm965_vm5, %v890_v60 }
 0x112   : > { %1265 = vrot.lane.b32.xlu1 %v10044_v28, %s9645_s26  ;;  %1267 = vrot.lane.b32.xlu0 %v10060_v33, %s9645_s26 }
 0x114   : > { %v892_v22 = vpop.permute.xlu1 %891  ;;  %v894_v9 = vpop.permute.xlu0 %893 }
 0x115   : > { %977 = vst.msk [vmem:[#allocation4 + $0xb0] sm:$0xff] %vm965_vm5, %v892_v22  ;;  %978 = vst.msk [vmem:[#allocation4 + $0xc0] sm:$0xff] %vm965_vm5, %v894_v9 }
 0x116   : > { %1269 = vrot.lane.b32.xlu1 %v10062_v34, %s9645_s26  ;;  %1271 = vrot.lane.b32.xlu0 %v10078_v39, %s9645_s26 }
 0x118   : > { %v896_v0 = vpop.permute.xlu1 %895  ;;  %v898_v11 = vpop.permute.xlu0 %897 }
 0x119   : > { %979 = vst.msk [vmem:[#allocation4 + $0xd0] sm:$0xff] %vm965_vm5, %v896_v0  ;;  %980 = vst.msk [vmem:[#allocation4 + $0xe0] sm:$0xff] %vm965_vm5, %v898_v11 }
 0x11a   : > { %1273 = vrot.lane.b32.xlu1 %v10080_v40, %s9645_s26  ;;  %1275 = vrot.lane.b32.xlu0 %v10096_v45, %s9645_s26 }
 0x11c   : > { %v900_v15 = vpop.permute.xlu1 %899  ;;  %v902_v60 = vpop.permute.xlu0 %901 }
 0x11d   : > { %981 = vst.msk [vmem:[#allocation4 + $0xf0] sm:$0xff] %vm965_vm5, %v900_v15  ;;  %982 = vst.msk [vmem:[#allocation4 + $0x100] sm:$0xff] %vm965_vm5, %v902_v60 }
 0x11e   : > { %1277 = vrot.lane.b32.xlu1 %v10098_v46, %s9645_s26  ;;  %1279 = vrot.lane.b32.xlu0 %v10114_v51, %s9645_s26 }
 0x120   : > { %v904_v22 = vpop.permute.xlu1 %903  ;;  %v906_v9 = vpop.permute.xlu0 %905 }
 0x121   : > { %983 = vst.msk [vmem:[#allocation4 + $0x110] sm:$0xff] %vm965_vm5, %v904_v22  ;;  %984 = vst.msk [vmem:[#allocation4 + $0x120] sm:$0xff] %vm965_vm5, %v906_v9 }
 0x122   : > { %1281 = vrot.lane.b32.xlu1 %v10116_v52, %s9645_s26  ;;  %1283 = vrot.lane.b32.xlu0 %v10132_v57, %s9645_s26 }
 0x124   : > { %v908_v0 = vpop.permute.xlu1 %907  ;;  %v910_v11 = vpop.permute.xlu0 %909 }
 0x125   : > { %985 = vst.msk [vmem:[#allocation4 + $0x130] sm:$0xff] %vm965_vm5, %v908_v0  ;;  %986 = vst.msk [vmem:[#allocation4 + $0x140] sm:$0xff] %vm965_vm5, %v910_v11 }
 0x126   : > { %1285 = vrot.lane.b32.xlu1 %v10134_v58, %s9645_s26  ;;  %1287 = vrot.lane.b32.xlu0 %v10150_v63, %s9645_s26 }
 0x128   : > { %v912_v15 = vpop.permute.xlu1 %911  ;;  %v914_v60 = vpop.permute.xlu0 %913 }
 0x129   : > { %987 = vst.msk [vmem:[#allocation4 + $0x150] sm:$0xff] %vm965_vm5, %v912_v15  ;;  %988 = vst.msk [vmem:[#allocation4 + $0x160] sm:$0xff] %vm965_vm5, %v914_v60 }
 0x12a   : > { %1289 = vrot.lane.b32.xlu1 %v10152_v1, %s9645_s26  ;;  %1291 = vrot.lane.b32.xlu0 %v10168_v6, %s9645_s26 }
 0x12c   : > { %v916_v22 = vpop.permute.xlu1 %915  ;;  %v918_v9 = vpop.permute.xlu0 %917 }
 0x12d   : > { %989 = vst.msk [vmem:[#allocation4 + $0x170] sm:$0xff] %vm965_vm5, %v916_v22  ;;  %990 = vst.msk [vmem:[#allocation4 + $0x180] sm:$0xff] %vm965_vm5, %v918_v9 }
 0x12e   : > { %1293 = vrot.lane.b32.xlu1 %v10170_v7, %s9645_s26  ;;  %1295 = vrot.lane.b32.xlu0 %v10186_v12, %s9645_s26 }
 0x130   : > { %v920_v0 = vpop.permute.xlu1 %919  ;;  %v922_v11 = vpop.permute.xlu0 %921 }
 0x131   : > { %991 = vst.msk [vmem:[#allocation4 + $0x190] sm:$0xff] %vm965_vm5, %v920_v0  ;;  %992 = vst.msk [vmem:[#allocation4 + $0x1a0] sm:$0xff] %vm965_vm5, %v922_v11 }
 0x132   : > { %1297 = vrot.lane.b32.xlu1 %v10188_v14, %s9645_s26  ;;  %1299 = vrot.lane.b32.xlu0 %v10204_v30, %s9645_s26 }
 0x134   : > { %v924_v15 = vpop.permute.xlu1 %923  ;;  %v926_v60 = vpop.permute.xlu0 %925 }
 0x135   : > { %993 = vst.msk [vmem:[#allocation4 + $0x1b0] sm:$0xff] %vm965_vm5, %v924_v15  ;;  %994 = vst.msk [vmem:[#allocation4 + $0x1c0] sm:$0xff] %vm965_vm5, %v926_v60 }
 0x136   : > { %1301 = vrot.lane.b32.xlu1 %v10206_v32, %s9645_s26  ;;  %1303 = vrot.lane.b32.xlu0 %v10222_v48, %s9645_s26 }
 0x138   : > { %v928_v22 = vpop.permute.xlu1 %927  ;;  %v930_v9 = vpop.permute.xlu0 %929 }
 0x139   : > { %995 = vst.msk [vmem:[#allocation4 + $0x1d0] sm:$0xff] %vm965_vm5, %v928_v22  ;;  %996 = vst.msk [vmem:[#allocation4 + $0x1e0] sm:$0xff] %vm965_vm5, %v930_v9  ;;  %v10483_v22 = vld [vmem:[#allocation2 + $0x180] sm:$0xff] }
 0x13a   : > { %1305 = vrot.lane.b32.xlu1 %v10224_v50, %s9645_s26  ;;  %1307 = vrot.lane.b32.xlu0 %v10240_v3, %s9645_s26 }
 0x13c   : > { %v932_v0 = vpop.permute.xlu1 %931  ;;  %v1067_v11 = vpop.permute.xlu0 %1066 }
 0x13d   : > { %997 = vst.msk [vmem:[#allocation4 + $0x1f0] sm:$0xff] %vm965_vm5, %v932_v0 }
 0x13e   : > { %1161 = vst.msk [vmem:[#allocation4 + $0x20] sm:$0xff] %vm1158_vm6, %v1067_v11  ;;  %1309 = vrot.lane.b32.xlu1 %v10242_v5, %s9645_s26  ;;  %1311 = vrot.lane.b32.xlu0 %v10258_v38, %s9645_s26  ;;  %v10491_v11 = vld [vmem:[#allocation2 + $0x188] sm:$0xff] }
 0x140   : > { %v1069_v15 = vpop.permute.xlu1 %1068  ;;  %v1071_v60 = vpop.permute.xlu0 %1070 }
 0x141   : > { %1162 = vst.msk [vmem:[#allocation4 + $0x30] sm:$0xff] %vm1158_vm6, %v1069_v15  ;;  %1163 = vst.msk [vmem:[#allocation4 + $0x40] sm:$0xff] %vm1158_vm6, %v1071_v60 }
 0x142   : > { %1313 = vrot.lane.b32.xlu1 %v10260_v44, %s9645_s26  ;;  %1315 = vrot.lane.b32.xlu0 %v10483_v22, %s9645_s26 }
 0x144   : > { %v1073_v9 = vpop.permute.xlu1 %1072  ;;  %v1075_v0 = vpop.permute.xlu0 %1074 }
 0x145   : > { %1164 = vst.msk [vmem:[#allocation4 + $0x50] sm:$0xff] %vm1158_vm6, %v1073_v9  ;;  %1165 = vst.msk [vmem:[#allocation4 + $0x60] sm:$0xff] %vm1158_vm6, %v1075_v0 }
 0x146   : > { %1317 = vrot.lane.b32.xlu1 %v10491_v11, %s9645_s26  ;;  %1448 = vrot.lane.b32.xlu0 %v10000_v13, %s9646_s27 }
 0x148   : > { %v1077_v15 = vpop.permute.xlu1 %1076  ;;  %v1079_v60 = vpop.permute.xlu0 %1078 }
 0x149   : > { %1166 = vst.msk [vmem:[#allocation4 + $0x70] sm:$0xff] %vm1158_vm6, %v1077_v15  ;;  %1167 = vst.msk [vmem:[#allocation4 + $0x80] sm:$0xff] %vm1158_vm6, %v1079_v60 }
 0x14a   : > { %1450 = vrot.lane.b32.xlu1 %v10016_v19, %s9646_s27  ;;  %1452 = vrot.lane.b32.xlu0 %v10012_v17, %s9646_s27 }
 0x14c   : > { %v1081_v9 = vpop.permute.xlu1 %1080  ;;  %v1083_v0 = vpop.permute.xlu0 %1082 }
 0x14d   : > { %1168 = vst.msk [vmem:[#allocation4 + $0x90] sm:$0xff] %vm1158_vm6, %v1081_v9  ;;  %1169 = vst.msk [vmem:[#allocation4 + $0xa0] sm:$0xff] %vm1158_vm6, %v1083_v0 }
 0x14e   : > { %1454 = vrot.lane.b32.xlu1 %v10024_v21, %s9646_s27  ;;  %1456 = vrot.lane.b32.xlu0 %v10034_v25, %s9646_s27 }
 0x150   : > { %v1085_v13 = vpop.permute.xlu1 %1084  ;;  %v1087_v15 = vpop.permute.xlu0 %1086 }
 0x151   : > { %1170 = vst.msk [vmem:[#allocation4 + $0xb0] sm:$0xff] %vm1158_vm6, %v1085_v13  ;;  %1171 = vst.msk [vmem:[#allocation4 + $0xc0] sm:$0xff] %vm1158_vm6, %v1087_v15  ;;  %v10591_v15 = vld [vmem:[#allocation2 + $0x189] sm:$0xff] }
 0x152   : > { %1458 = vrot.lane.b32.xlu1 %v10046_v29, %s9646_s27  ;;  %1460 = vrot.lane.b32.xlu0 %v10052_v31, %s9646_s27 }
 0x154   : > { %v1089_v17 = vpop.permute.xlu1 %1088  ;;  %v1091_v19 = vpop.permute.xlu0 %1090 }
 0x155   : > { %1172 = vst.msk [vmem:[#allocation4 + $0xd0] sm:$0xff] %vm1158_vm6, %v1089_v17  ;;  %1173 = vst.msk [vmem:[#allocation4 + $0xe0] sm:$0xff] %vm1158_vm6, %v1091_v19  ;;  %v14464_v17 = vld [vmem:[#allocation8_spill] sm:$0xff] }
 0x156   : > { %1462 = vrot.lane.b32.xlu1 %v10064_v35, %s9646_s27  ;;  %1464 = vrot.lane.b32.xlu0 %v10070_v37, %s9646_s27 }
 0x158   : > { %v1093_v21 = vpop.permute.xlu1 %1092  ;;  %v1095_v25 = vpop.permute.xlu0 %1094 }
 0x159   : > { %1174 = vst.msk [vmem:[#allocation4 + $0xf0] sm:$0xff] %vm1158_vm6, %v1093_v21  ;;  %1175 = vst.msk [vmem:[#allocation4 + $0x100] sm:$0xff] %vm1158_vm6, %v1095_v25  ;;  %v14465_v25 = vld [vmem:[#allocation9_spill] sm:$0xff] }
 0x15a   : > { %1466 = vrot.lane.b32.xlu1 %v10082_v41, %s9646_s27  ;;  %1468 = vrot.lane.b32.xlu0 %v10088_v43, %s9646_s27 }
 0x15c   : > { %v1097_v29 = vpop.permute.xlu1 %1096  ;;  %v1099_v31 = vpop.permute.xlu0 %1098 }
 0x15d   : > { %1176 = vst.msk [vmem:[#allocation4 + $0x110] sm:$0xff] %vm1158_vm6, %v1097_v29  ;;  %1177 = vst.msk [vmem:[#allocation4 + $0x120] sm:$0xff] %vm1158_vm6, %v1099_v31  ;;  %v14466_v29 = vld [vmem:[#allocation10_spill] sm:$0xff] }
 0x15e   : > { %1470 = vrot.lane.b32.xlu1 %v10100_v47, %s9646_s27  ;;  %1472 = vrot.lane.b32.xlu0 %v10106_v49, %s9646_s27 }
 0x160   : > { %v1101_v35 = vpop.permute.xlu1 %1100  ;;  %v1103_v37 = vpop.permute.xlu0 %1102 }
 0x161   : > { %1178 = vst.msk [vmem:[#allocation4 + $0x130] sm:$0xff] %vm1158_vm6, %v1101_v35  ;;  %1179 = vst.msk [vmem:[#allocation4 + $0x140] sm:$0xff] %vm1158_vm6, %v1103_v37  ;;  %v14467_v37 = vld [vmem:[#allocation11_spill] sm:$0xff] }
 0x162   : > { %1474 = vrot.lane.b32.xlu1 %v10118_v53, %s9646_s27  ;;  %1476 = vrot.lane.b32.xlu0 %v10124_v55, %s9646_s27 }
 0x164   : > { %v1105_v41 = vpop.permute.xlu1 %1104  ;;  %v1107_v43 = vpop.permute.xlu0 %1106 }
 0x165   : > { %1180 = vst.msk [vmem:[#allocation4 + $0x150] sm:$0xff] %vm1158_vm6, %v1105_v41  ;;  %1181 = vst.msk [vmem:[#allocation4 + $0x160] sm:$0xff] %vm1158_vm6, %v1107_v43  ;;  %v14468_v41 = vld [vmem:[#allocation12_spill] sm:$0xff] }
 0x166   : > { %1478 = vrot.lane.b32.xlu1 %v10136_v59, %s9646_s27  ;;  %1480 = vrot.lane.b32.xlu0 %v10142_v61, %s9646_s27 }
 0x168   : > { %v1109_v47 = vpop.permute.xlu1 %1108  ;;  %v1111_v49 = vpop.permute.xlu0 %1110 }
 0x169   : > { %1182 = vst.msk [vmem:[#allocation4 + $0x170] sm:$0xff] %vm1158_vm6, %v1109_v47  ;;  %1183 = vst.msk [vmem:[#allocation4 + $0x180] sm:$0xff] %vm1158_vm6, %v1111_v49  ;;  %v14469_v49 = vld [vmem:[#allocation13_spill] sm:$0xff] }
 0x16a   : > { %1482 = vrot.lane.b32.xlu1 %v10154_v2, %s9646_s27  ;;  %1484 = vrot.lane.b32.xlu0 %v10160_v4, %s9646_s27 }
 0x16c   : > { %v1113_v53 = vpop.permute.xlu1 %1112  ;;  %v1115_v55 = vpop.permute.xlu0 %1114 }
 0x16d   : > { %1184 = vst.msk [vmem:[#allocation4 + $0x190] sm:$0xff] %vm1158_vm6, %v1113_v53  ;;  %1185 = vst.msk [vmem:[#allocation4 + $0x1a0] sm:$0xff] %vm1158_vm6, %v1115_v55  ;;  %v14470_v53 = vld [vmem:[#allocation14_spill] sm:$0xff] }
 0x16e   : > { %1486 = vrot.lane.b32.xlu1 %v10172_v8, %s9646_s27  ;;  %1488 = vrot.lane.b32.xlu0 %v10178_v10, %s9646_s27 }
 0x170   : > { %v1117_v59 = vpop.permute.xlu1 %1116  ;;  %v1119_v61 = vpop.permute.xlu0 %1118 }
 0x171   : > { %1186 = vst.msk [vmem:[#allocation4 + $0x1b0] sm:$0xff] %vm1158_vm6, %v1117_v59  ;;  %1187 = vst.msk [vmem:[#allocation4 + $0x1c0] sm:$0xff] %vm1158_vm6, %v1119_v61  ;;  %v14471_v61 = vld [vmem:[#allocation15_spill] sm:$0xff] }
 0x172   : > { %1490 = vrot.lane.b32.xlu1 %v10190_v18, %s9646_s27  ;;  %1492 = vrot.lane.b32.xlu0 %v10196_v24, %s9646_s27 }
 0x174   : > { %v1121_v2 = vpop.permute.xlu1 %1120  ;;  %v1123_v4 = vpop.permute.xlu0 %1122 }
 0x175   : > { %1188 = vst.msk [vmem:[#allocation4 + $0x1d0] sm:$0xff] %vm1158_vm6, %v1121_v2  ;;  %1189 = vst.msk [vmem:[#allocation4 + $0x1e0] sm:$0xff] %vm1158_vm6, %v1123_v4  ;;  %v14472_v2 = vld [vmem:[#allocation16_spill] sm:$0xff] }
 0x176   : > { %1494 = vrot.lane.b32.xlu1 %v10208_v36, %s9646_s27  ;;  %1496 = vrot.lane.b32.xlu0 %v10214_v42, %s9646_s27  ;;  %v14461_v36 = vld [vmem:[#allocation5_spill] sm:$0xff]  ;;  %v14462_v42 = vld [vmem:[#allocation6_spill] sm:$0xff] }
 0x178   : > { %v1125_v8 = vpop.permute.xlu1 %1124  ;;  %v1256_v10 = vpop.permute.xlu0 %1255 }
 0x179   : > { %1190 = vst.msk [vmem:[#allocation4 + $0x1f0] sm:$0xff] %vm1158_vm6, %v1125_v8 }
 0x17a   : > { %1352 = vst.msk [vmem:[#allocation4] sm:$0xff] %vm1351_vm7, %v1256_v10  ;;  %1498 = vrot.lane.b32.xlu1 %v10226_v54, %s9646_s27  ;;  %1500 = vrot.lane.b32.xlu0 %v10232_v56, %s9646_s27  ;;  %v10583_v54 = vld [vmem:[#allocation2 + $0x181] sm:$0xff]  ;;  %v14473_v10 = vld [vmem:[#allocation17_spill] sm:$0xff] }
 0x17b   : > { %v14463_v56 = vld [vmem:[#allocation7_spill] sm:$0xff] }
 0x17c   : > { %v1258_v18 = vpop.permute.xlu1 %1257  ;;  %v1260_v24 = vpop.permute.xlu0 %1259 }
 0x17d   : > { %1353 = vst.msk [vmem:[#allocation4 + $0x10] sm:$0xff] %vm1351_vm7, %v1258_v18  ;;  %1354 = vst.msk [vmem:[#allocation4 + $0x20] sm:$0xff] %vm1351_vm7, %v1260_v24  ;;  %v14474_v18 = vld [vmem:[#allocation18_spill] sm:$0xff] }
 0x17e   : > { %1502 = vrot.lane.b32.xlu1 %v14461_v36, %s9646_s27  ;;  %1504 = vrot.lane.b32.xlu0 %v14462_v42, %s9646_s27  ;;  %v14475_v42 = vld [vmem:[#allocation19_spill] sm:$0xff] }
 0x180   : > { %v1262_v60 = vpop.permute.xlu1 %1261  ;;  %v1264_v9 = vpop.permute.xlu0 %1263 }
 0x181   : > { %1355 = vst.msk [vmem:[#allocation4 + $0x30] sm:$0xff] %vm1351_vm7, %v1262_v60  ;;  %1356 = vst.msk [vmem:[#allocation4 + $0x40] sm:$0xff] %vm1351_vm7, %v1264_v9  ;;  %v14476_v60 = vld [vmem:[#allocation20_spill] sm:$0xff] }
 0x182   : > { %1506 = vrot.lane.b32.xlu1 %v14463_v56, %s9646_s27  ;;  %1508 = vrot.lane.b32.xlu0 %v10583_v54, %s9646_s27 }
 0x184   : > { %v1266_v0 = vpop.permute.xlu1 %1265  ;;  %v1268_v13 = vpop.permute.xlu0 %1267 }
 0x185   : > { %1357 = vst.msk [vmem:[#allocation4 + $0x50] sm:$0xff] %vm1351_vm7, %v1266_v0  ;;  %1358 = vst.msk [vmem:[#allocation4 + $0x60] sm:$0xff] %vm1351_vm7, %v1268_v13  ;;  %v14477_v0 = vld [vmem:[#allocation21_spill] sm:$0xff]  ;;  %v14478_v13 = vld [vmem:[#allocation22_spill] sm:$0xff] }
 0x186   : > { %1510 = vrot.lane.b32.xlu1 %v10591_v15, %s9646_s27  ;;  %1641 = vrot.lane.b32.xlu0 %v14464_v17, %s9647_s28 }
 0x188   : > { %v1270_v19 = vpop.permute.xlu1 %1269  ;;  %v1272_v21 = vpop.permute.xlu0 %1271 }
 0x189   : > { %1359 = vst.msk [vmem:[#allocation4 + $0x70] sm:$0xff] %vm1351_vm7, %v1270_v19  ;;  %1360 = vst.msk [vmem:[#allocation4 + $0x80] sm:$0xff] %vm1351_vm7, %v1272_v21  ;;  %v14479_v21 = vld [vmem:[#allocation23_spill] sm:$0xff] }
 0x18a   : > { %1643 = vrot.lane.b32.xlu1 %v14465_v25, %s9647_s28  ;;  %1645 = vrot.lane.b32.xlu0 %v14466_v29, %s9647_s28  ;;  %v14480_v25 = vld [vmem:[#allocation24_spill] sm:$0xff] }
 0x18c   : > { %v1274_v31 = vpop.permute.xlu1 %1273  ;;  %v1276_v35 = vpop.permute.xlu0 %1275 }
 0x18d   : > { %1361 = vst.msk [vmem:[#allocation4 + $0x90] sm:$0xff] %vm1351_vm7, %v1274_v31  ;;  %1362 = vst.msk [vmem:[#allocation4 + $0xa0] sm:$0xff] %vm1351_vm7, %v1276_v35  ;;  %v14481_v35 = vld [vmem:[#allocation25_spill] sm:$0xff] }
 0x18e   : > { %1647 = vrot.lane.b32.xlu1 %v14467_v37, %s9647_s28  ;;  %1649 = vrot.lane.b32.xlu0 %v14468_v41, %s9647_s28  ;;  %v14482_v37 = vld [vmem:[#allocation26_spill] sm:$0xff] }
 0x190   : > { %v1278_v43 = vpop.permute.xlu1 %1277  ;;  %v1280_v47 = vpop.permute.xlu0 %1279 }
 0x191   : > { %1363 = vst.msk [vmem:[#allocation4 + $0xb0] sm:$0xff] %vm1351_vm7, %v1278_v43  ;;  %1364 = vst.msk [vmem:[#allocation4 + $0xc0] sm:$0xff] %vm1351_vm7, %v1280_v47  ;;  %v14483_v47 = vld [vmem:[#allocation27_spill] sm:$0xff] }
 0x192   : > { %1651 = vrot.lane.b32.xlu1 %v14469_v49, %s9647_s28  ;;  %1653 = vrot.lane.b32.xlu0 %v14470_v53, %s9647_s28  ;;  %v14484_v49 = vld [vmem:[#allocation28_spill] sm:$0xff] }
 0x194   : > { %v1282_v55 = vpop.permute.xlu1 %1281  ;;  %v1284_v59 = vpop.permute.xlu0 %1283 }
 0x195   : > { %1365 = vst.msk [vmem:[#allocation4 + $0xd0] sm:$0xff] %vm1351_vm7, %v1282_v55  ;;  %1366 = vst.msk [vmem:[#allocation4 + $0xe0] sm:$0xff] %vm1351_vm7, %v1284_v59  ;;  %v14485_v59 = vld [vmem:[#allocation29_spill] sm:$0xff] }
 0x196   : > { %1655 = vrot.lane.b32.xlu1 %v14471_v61, %s9647_s28  ;;  %1657 = vrot.lane.b32.xlu0 %v14472_v2, %s9647_s28  ;;  %v14486_v61 = vld [vmem:[#allocation30_spill] sm:$0xff] }
 0x198   : > { %v1286_v4 = vpop.permute.xlu1 %1285  ;;  %v1288_v8 = vpop.permute.xlu0 %1287 }
 0x199   : > { %1367 = vst.msk [vmem:[#allocation4 + $0xf0] sm:$0xff] %vm1351_vm7, %v1286_v4  ;;  %1368 = vst.msk [vmem:[#allocation4 + $0x100] sm:$0xff] %vm1351_vm7, %v1288_v8  ;;  %v14487_v8 = vld [vmem:[#allocation31_spill] sm:$0xff] }
 0x19a   : > { %1659 = vrot.lane.b32.xlu1 %v14473_v10, %s9647_s28  ;;  %1661 = vrot.lane.b32.xlu0 %v14474_v18, %s9647_s28  ;;  %v14488_v10 = vld [vmem:[#allocation32_spill] sm:$0xff] }
 0x19c   : > { %v1290_v24 = vpop.permute.xlu1 %1289  ;;  %v1292_v36 = vpop.permute.xlu0 %1291 }
 0x19d   : > { %1369 = vst.msk [vmem:[#allocation4 + $0x110] sm:$0xff] %vm1351_vm7, %v1290_v24  ;;  %1370 = vst.msk [vmem:[#allocation4 + $0x120] sm:$0xff] %vm1351_vm7, %v1292_v36  ;;  %v14489_v36 = vld [vmem:[#allocation33_spill] sm:$0xff] }
 0x19e   : > { %1663 = vrot.lane.b32.xlu1 %v14475_v42, %s9647_s28  ;;  %1665 = vrot.lane.b32.xlu0 %v14476_v60, %s9647_s28 }
 0x1a0   : > { %v1294_v9 = vpop.permute.xlu1 %1293  ;;  %v1296_v56 = vpop.permute.xlu0 %1295 }
 0x1a1   : > { %1371 = vst.msk [vmem:[#allocation4 + $0x130] sm:$0xff] %vm1351_vm7, %v1294_v9  ;;  %1372 = vst.msk [vmem:[#allocation4 + $0x140] sm:$0xff] %vm1351_vm7, %v1296_v56  ;;  %v14490_v9 = vld [vmem:[#allocation34_spill] sm:$0xff] }
 0x1a2   : > { %1667 = vrot.lane.b32.xlu1 %v14477_v0, %s9647_s28  ;;  %1669 = vrot.lane.b32.xlu0 %v14478_v13, %s9647_s28 }
 0x1a4   : > { %v1298_v17 = vpop.permute.xlu1 %1297  ;;  %v1300_v19 = vpop.permute.xlu0 %1299 }
 0x1a5   : > { %1373 = vst.msk [vmem:[#allocation4 + $0x150] sm:$0xff] %vm1351_vm7, %v1298_v17  ;;  %1374 = vst.msk [vmem:[#allocation4 + $0x160] sm:$0xff] %vm1351_vm7, %v1300_v19 }
 0x1a6   : > { %1671 = vrot.lane.b32.xlu1 %v14479_v21, %s9647_s28  ;;  %1673 = vrot.lane.b32.xlu0 %v14480_v25, %s9647_s28 }
 0x1a8   : > { %v1302_v29 = vpop.permute.xlu1 %1301  ;;  %v1304_v31 = vpop.permute.xlu0 %1303 }
 0x1a9   : > { %1375 = vst.msk [vmem:[#allocation4 + $0x170] sm:$0xff] %vm1351_vm7, %v1302_v29  ;;  %1376 = vst.msk [vmem:[#allocation4 + $0x180] sm:$0xff] %vm1351_vm7, %v1304_v31 }
 0x1aa   : > { %1675 = vrot.lane.b32.xlu1 %v14481_v35, %s9647_s28  ;;  %1677 = vrot.lane.b32.xlu0 %v14482_v37, %s9647_s28  ;;  %v1998_v37 = vld [vmem:[#allocation2 + $0x39] sm:$0xff] }
 0x1ac   : > { %v1306_v41 = vpop.permute.xlu1 %1305  ;;  %v1308_v43 = vpop.permute.xlu0 %1307 }
 0x1ad   : > { %1377 = vst.msk [vmem:[#allocation4 + $0x190] sm:$0xff] %vm1351_vm7, %v1306_v41  ;;  %1378 = vst.msk [vmem:[#allocation4 + $0x1a0] sm:$0xff] %vm1351_vm7, %v1308_v43  ;;  %v1999_v41 = vld [vmem:[#allocation2 + $0x49] sm:$0xff] }
 0x1ae   : > { %1679 = vrot.lane.b32.xlu1 %v14483_v47, %s9647_s28  ;;  %1681 = vrot.lane.b32.xlu0 %v14484_v49, %s9647_s28  ;;  %v2000_v49 = vld [vmem:[#allocation2 + $0x51] sm:$0xff] }
 0x1b0   : > { %v1310_v53 = vpop.permute.xlu1 %1309  ;;  %v1312_v55 = vpop.permute.xlu0 %1311 }
 0x1b1   : > { %1379 = vst.msk [vmem:[#allocation4 + $0x1b0] sm:$0xff] %vm1351_vm7, %v1310_v53  ;;  %1380 = vst.msk [vmem:[#allocation4 + $0x1c0] sm:$0xff] %vm1351_vm7, %v1312_v55  ;;  %v2001_v53 = vld [vmem:[#allocation2 + $0x61] sm:$0xff]  ;;  %v14398_v55 = vmov 0  }
 0x1b2   : > { %1683 = vrot.lane.b32.xlu1 %v14485_v59, %s9647_s28  ;;  %1685 = vrot.lane.b32.xlu0 %v14486_v61, %s9647_s28 }
 0x1b3   : > { %2647 = vmatprep.subr.bf16.mxu0 %v14398_v55 }
 0x1b4   : > { %v1314_v2 = vpop.permute.xlu1 %1313  ;;  %v1316_v4 = vpop.permute.xlu0 %1315 }
 0x1b5   : > { %1381 = vst.msk [vmem:[#allocation4 + $0x1d0] sm:$0xff] %vm1351_vm7, %v1314_v2  ;;  %1382 = vst.msk [vmem:[#allocation4 + $0x1e0] sm:$0xff] %vm1351_vm7, %v1316_v4  ;;  %v2002_v2 = vld [vmem:[#allocation2 + $0x69] sm:$0xff]  ;;  %v2003_v4 = vld [vmem:[#allocation2 + $0x79] sm:$0xff] }
 0x1b6   : > { %1687 = vrot.lane.b32.xlu1 %v14487_v8, %s9647_s28  ;;  %1689 = vrot.lane.b32.xlu0 %v14488_v10, %s9647_s28  ;;  %v9595_v8 = vld [vmem:[%s14357_s2] sm:$0xff]  }
 0x1b7   : > { %2648 = vmatpush1.bf16.msra.mxu0 %v9595_v8 }
 0x1b8   : > { %v1318_v18 = vpop.permute.xlu1 %1317  ;;  %v1449_v24 = vpop.permute.xlu0 %1448  ;;  %2649 = vmatprep.subr.bf16.mxu0 %v14398_v55 }
 0x1b9   : > { %1383 = vst.msk [vmem:[#allocation4 + $0x1f0] sm:$0xff] %vm1351_vm7, %v1318_v18 }
 0x1ba   : > { %1545 = vst.msk [vmem:[#allocation4] sm:$0xff] %vm14427_vm8, %v1449_v24  ;;  %1691 = vrot.lane.b32.xlu1 %v10372_v20, %s9647_s28  ;;  %1693 = vrot.lane.b32.xlu0 %v14489_v36, %s9647_s28  ;;  %v10683_v20 = vld [vmem:[#allocation2 + $0x182] sm:$0xff]  ;;  %v2005_v36 = vld [vmem:[#allocation2 + $0x91] sm:$0xff] }
 0x1bb   : > { %v2004_v24 = vld [vmem:[#allocation2 + $0x81] sm:$0xff] }
 0x1bc   : > { %v1451_v42 = vpop.permute.xlu1 %1450  ;;  %v1453_v60 = vpop.permute.xlu0 %1452 }
 0x1bd   : > { %1546 = vst.msk [vmem:[#allocation4 + $0x10] sm:$0xff] %vm14427_vm8, %v1451_v42  ;;  %1547 = vst.msk [vmem:[#allocation4 + $0x20] sm:$0xff] %vm14427_vm8, %v1453_v60  ;;  %v9596_v42 = vld [vmem:[%s14357_s2 + $0x8] sm:$0xff]  }
 0x1be   : > { %1695 = vrot.lane.b32.xlu1 %v14490_v9, %s9647_s28  ;;  %1697 = vrot.lane.b32.xlu0 %v10383_v62, %s9647_s28  ;;  %v10691_v62 = vld [vmem:[#allocation2 + $0x18a] sm:$0xff] }
 0x1bf   : > { %2650 = vmatpush1.bf16.msra.mxu0 %v9596_v42 }
 0x1c0   : > { %v1455_v56 = vpop.permute.xlu1 %1454  ;;  %v1457_v0 = vpop.permute.xlu0 %1456  ;;  %2651 = vmatprep.subr.bf16.mxu0 %v14398_v55 }
 0x1c1   : > { %1548 = vst.msk [vmem:[#allocation4 + $0x30] sm:$0xff] %vm14427_vm8, %v1455_v56  ;;  %1549 = vst.msk [vmem:[#allocation4 + $0x40] sm:$0xff] %vm14427_vm8, %v1457_v0  ;;  %v2006_v56 = vld [vmem:[#allocation2 + $0x99] sm:$0xff]  ;;  %v2007_v0 = vld [vmem:[#allocation2 + $0xa9] sm:$0xff] }
 0x1c2   : > { %1699 = vrot.lane.b32.xlu1 %v10391_v26, %s9647_s28  ;;  %1701 = vrot.lane.b32.xlu0 %v10683_v20, %s9647_s28 }
 0x1c4   : > { %v1459_v13 = vpop.permute.xlu1 %1458  ;;  %v1461_v17 = vpop.permute.xlu0 %1460 }
 0x1c5   : > { %1550 = vst.msk [vmem:[#allocation4 + $0x50] sm:$0xff] %vm14427_vm8, %v1459_v13  ;;  %1551 = vst.msk [vmem:[#allocation4 + $0x60] sm:$0xff] %vm14427_vm8, %v1461_v17  ;;  %v9597_v13 = vld [vmem:[%s14357_s2 + $0x10] sm:$0xff]  }
 0x1c6   : > { %1703 = vrot.lane.b32.xlu1 %v10691_v62, %s9647_s28  ;;  %1868 = vrot.lane.b32.xlu0 %v10010_v16, %s9648_s29 }
 0x1c7   : > { %2652 = vmatpush1.bf16.msra.mxu0 %v9597_v13  ;;  %v2193_v13 = vld [vmem:[#allocation2 + $0x52] sm:$0xff] }
 0x1c8   : > { %v1463_v19 = vpop.permute.xlu1 %1462  ;;  %v1465_v26 = vpop.permute.xlu0 %1464  ;;  %2653 = vmatprep.subr.bf16.mxu0 %v14398_v55 }
 0x1c9   : > { %1552 = vst.msk [vmem:[#allocation4 + $0x70] sm:$0xff] %vm14427_vm8, %v1463_v19  ;;  %1553 = vst.msk [vmem:[#allocation4 + $0x80] sm:$0xff] %vm14427_vm8, %v1465_v26  ;;  %v2008_v26 = vld [vmem:[#allocation2 + $0xb1] sm:$0xff] }
 0x1ca   : > { %1870 = vrot.lane.b32.xlu1 %v10028_v23, %s9648_s29  ;;  %1872 = vrot.lane.b32.xlu0 %v10042_v27, %s9648_s29 }
 0x1cc   : > { %v1467_v21 = vpop.permute.xlu1 %1466  ;;  %v1469_v25 = vpop.permute.xlu0 %1468 }
 0x1cd   : > { %1554 = vst.msk [vmem:[#allocation4 + $0x90] sm:$0xff] %vm14427_vm8, %v1467_v21  ;;  %1555 = vst.msk [vmem:[#allocation4 + $0xa0] sm:$0xff] %vm14427_vm8, %v1469_v25  ;;  %v2009_v21 = vld [vmem:[#allocation2 + $0xc1] sm:$0xff]  ;;  %v9598_v25 = vld [vmem:[%s14357_s2 + $0x18] sm:$0xff]  }
 0x1ce   : > { %1874 = vrot.lane.b32.xlu1 %v10044_v28, %s9648_s29  ;;  %1876 = vrot.lane.b32.xlu0 %v10060_v33, %s9648_s29 }
 0x1cf   : > { %2654 = vmatpush1.bf16.msra.mxu0 %v9598_v25  ;;  %v2196_v25 = vld [vmem:[#allocation2 + $0x7a] sm:$0xff] }
 0x1d0   : > { %v1471_v16 = vpop.permute.xlu1 %1470  ;;  %v1473_v29 = vpop.permute.xlu0 %1472  ;;  %2655 = vmatprep.subr.bf16.mxu0 %v14398_v55 }
 0x1d1   : > { %1556 = vst.msk [vmem:[#allocation4 + $0xb0] sm:$0xff] %vm14427_vm8, %v1471_v16  ;;  %1557 = vst.msk [vmem:[#allocation4 + $0xc0] sm:$0xff] %vm14427_vm8, %v1473_v29 }
 0x1d2   : > { %1878 = vrot.lane.b32.xlu1 %v10062_v34, %s9648_s29  ;;  %1880 = vrot.lane.b32.xlu0 %v10078_v39, %s9648_s29 }
 0x1d4   : > { %v1475_v23 = vpop.permute.xlu1 %1474  ;;  %v1477_v27 = vpop.permute.xlu0 %1476 }
 0x1d5   : > { %1558 = vst.msk [vmem:[#allocation4 + $0xd0] sm:$0xff] %vm14427_vm8, %v1475_v23  ;;  %1559 = vst.msk [vmem:[#allocation4 + $0xe0] sm:$0xff] %vm14427_vm8, %v1477_v27  ;;  %v2010_v23 = vld [vmem:[#allocation2 + $0xc9] sm:$0xff]  ;;  %v2011_v27 = vld [vmem:[#allocation2 + $0xd9] sm:$0xff] }
 0x1d6   : > { %1882 = vrot.lane.b32.xlu1 %v10080_v40, %s9648_s29  ;;  %1884 = vrot.lane.b32.xlu0 %v10096_v45, %s9648_s29 }
 0x1d8   : > { %v1479_v28 = vpop.permute.xlu1 %1478  ;;  %v1481_v33 = vpop.permute.xlu0 %1480 }
 0x1d9   : > { %1560 = vst.msk [vmem:[#allocation4 + $0xf0] sm:$0xff] %vm14427_vm8, %v1479_v28  ;;  %1561 = vst.msk [vmem:[#allocation4 + $0x100] sm:$0xff] %vm14427_vm8, %v1481_v33  ;;  %v9599_v28 = vld [vmem:[%s14357_s2 + $0x20] sm:$0xff]  }
 0x1da   : > { %1886 = vrot.lane.b32.xlu1 %v10098_v46, %s9648_s29  ;;  %1888 = vrot.lane.b32.xlu0 %v10114_v51, %s9648_s29 }
 0x1db   : > { %2656 = vmatpush1.bf16.msra.mxu0 %v9599_v28 }
 0x1dc   : > { %v1483_v34 = vpop.permute.xlu1 %1482  ;;  %v1485_v39 = vpop.permute.xlu0 %1484  ;;  %2657 = vmatprep.subr.bf16.mxu0 %v14398_v55 }
 0x1dd   : > { %1562 = vst.msk [vmem:[#allocation4 + $0x110] sm:$0xff] %vm14427_vm8, %v1483_v34  ;;  %1563 = vst.msk [vmem:[#allocation4 + $0x120] sm:$0xff] %vm14427_vm8, %v1485_v39  ;;  %v2012_v39 = vld [vmem:[#allocation2 + $0xe1] sm:$0xff] }
 0x1de   : > { %1890 = vrot.lane.b32.xlu1 %v10116_v52, %s9648_s29  ;;  %1892 = vrot.lane.b32.xlu0 %v10132_v57, %s9648_s29 }
 0x1e0   : > { %v1487_v40 = vpop.permute.xlu1 %1486  ;;  %v1489_v45 = vpop.permute.xlu0 %1488 }
 0x1e1   : > { %1564 = vst.msk [vmem:[#allocation4 + $0x130] sm:$0xff] %vm14427_vm8, %v1487_v40  ;;  %1565 = vst.msk [vmem:[#allocation4 + $0x140] sm:$0xff] %vm14427_vm8, %v1489_v45  ;;  %v2013_v40 = vld [vmem:[#allocation2 + $0xf1] sm:$0xff]  ;;  %v9600_v45 = vld [vmem:[%s14357_s2 + $0x28] sm:$0xff]  }
 0x1e2   : > { %1894 = vrot.lane.b32.xlu1 %v10134_v58, %s9648_s29  ;;  %1896 = vrot.lane.b32.xlu0 %v10150_v63, %s9648_s29 }
 0x1e3   : > { %2658 = vmatpush1.bf16.msra.mxu0 %v9600_v45 }
 0x1e4   : > { %v1491_v46 = vpop.permute.xlu1 %1490  ;;  %v1493_v51 = vpop.permute.xlu0 %1492  ;;  %2659 = vmatprep.subr.bf16.mxu0 %v14398_v55 }
 0x1e5   : > { %1566 = vst.msk [vmem:[#allocation4 + $0x150] sm:$0xff] %vm14427_vm8, %v1491_v46  ;;  %1567 = vst.msk [vmem:[#allocation4 + $0x160] sm:$0xff] %vm14427_vm8, %v1493_v51 }
 0x1e6   : > { %1898 = vrot.lane.b32.xlu1 %v10152_v1, %s9648_s29  ;;  %1900 = vrot.lane.b32.xlu0 %v10168_v6, %s9648_s29 }
 0x1e8   : > { %v1495_v52 = vpop.permute.xlu1 %1494  ;;  %v1497_v57 = vpop.permute.xlu0 %1496 }
 0x1e9   : > { %1568 = vst.msk [vmem:[#allocation4 + $0x170] sm:$0xff] %vm14427_vm8, %v1495_v52  ;;  %1569 = vst.msk [vmem:[#allocation4 + $0x180] sm:$0xff] %vm14427_vm8, %v1497_v57  ;;  %v2014_v52 = vld [vmem:[#allocation2 + $0xf9] sm:$0xff]  ;;  %v2015_v57 = vld [vmem:[#allocation2 + $0x109] sm:$0xff] }
 0x1ea   : > { %1902 = vrot.lane.b32.xlu1 %v10170_v7, %s9648_s29  ;;  %1904 = vrot.lane.b32.xlu0 %v10186_v12, %s9648_s29 }
 0x1ec   : > { %v1499_v58 = vpop.permute.xlu1 %1498  ;;  %v1501_v63 = vpop.permute.xlu0 %1500 }
 0x1ed   : > { %1570 = vst.msk [vmem:[#allocation4 + $0x190] sm:$0xff] %vm14427_vm8, %v1499_v58  ;;  %1571 = vst.msk [vmem:[#allocation4 + $0x1a0] sm:$0xff] %vm14427_vm8, %v1501_v63  ;;  %v9601_v58 = vld [vmem:[%s14357_s2 + $0x30] sm:$0xff]  }
 0x1ee   : > { %1906 = vrot.lane.b32.xlu1 %v10188_v14, %s9648_s29  ;;  %1908 = vrot.lane.b32.xlu0 %v10204_v30, %s9648_s29 }
 0x1ef   : > { %2660 = vmatpush1.bf16.msra.mxu0 %v9601_v58  ;;  %v2203_v58 = vld [vmem:[#allocation2 + $0xca] sm:$0xff] }
 0x1f0   : > { %v1503_v1 = vpop.permute.xlu1 %1502  ;;  %v1505_v6 = vpop.permute.xlu0 %1504  ;;  %2661 = vmatprep.subr.bf16.mxu0 %v14398_v55 }
 0x1f1   : > { %1572 = vst.msk [vmem:[#allocation4 + $0x1b0] sm:$0xff] %vm14427_vm8, %v1503_v1  ;;  %1573 = vst.msk [vmem:[#allocation4 + $0x1c0] sm:$0xff] %vm14427_vm8, %v1505_v6  ;;  %v2016_v6 = vld [vmem:[#allocation2 + $0x111] sm:$0xff] }
 0x1f2   : > { %1910 = vrot.lane.b32.xlu1 %v10206_v32, %s9648_s29  ;;  %1912 = vrot.lane.b32.xlu0 %v10222_v48, %s9648_s29 }
 0x1f4   : > { %v1507_v7 = vpop.permute.xlu1 %1506  ;;  %v1509_v12 = vpop.permute.xlu0 %1508 }
 0x1f5   : > { %1574 = vst.msk [vmem:[#allocation4 + $0x1d0] sm:$0xff] %vm14427_vm8, %v1507_v7  ;;  %1575 = vst.msk [vmem:[#allocation4 + $0x1e0] sm:$0xff] %vm14427_vm8, %v1509_v12  ;;  %v2017_v7 = vld [vmem:[#allocation2 + $0x121] sm:$0xff]  ;;  %v9602_v12 = vld [vmem:[%s14357_s2 + $0x38] sm:$0xff]  }
 0x1f6   : > { %1914 = vrot.lane.b32.xlu1 %v10224_v50, %s9648_s29  ;;  %1916 = vrot.lane.b32.xlu0 %v10240_v3, %s9648_s29  ;;  %v1834_v50 = vld [vmem:[#allocation2 + $0x198] sm:$0xff] }
 0x1f7   : > { %2662 = vmatpush1.bf16.msra.mxu0 %v9602_v12  ;;  %v2206_v12 = vld [vmem:[#allocation2 + $0xf2] sm:$0xff] }
 0x1f8   : > { %v1511_v14 = vpop.permute.xlu1 %1510  ;;  %v1642_v30 = vpop.permute.xlu0 %1641  ;;  %2663 = vmatprep.subr.bf16.mxu0 %v14398_v55 }
 0x1f9   : > { %1576 = vst.msk [vmem:[#allocation4 + $0x1f0] sm:$0xff] %vm14427_vm8, %v1511_v14  ;;  %vm4256_vm8 = vcmask 523712  }
 0x1fa   : > { %1738 = vst.msk [vmem:[#allocation4] sm:$0xff] %vm14426_vm9, %v1642_v30  ;;  %1918 = vrot.lane.b32.xlu1 %v10242_v5, %s9648_s29  ;;  %1920 = vrot.lane.b32.xlu0 %v10258_v38, %s9648_s29  ;;  %v1835_v38 = vld [vmem:[#allocation2 + $0x1a0] sm:$0xff] }
 0x1fb   : > { %1740 = vst.msk [vmem:[#allocation4 + $0x8] sm:$0xff] %vm1739_vm10, %v1642_v30 }
 0x1fc   : > { %v1644_v32 = vpop.permute.xlu1 %1643  ;;  %v1646_v48 = vpop.permute.xlu0 %1645 }
 0x1fd   : > { %1741 = vst.msk [vmem:[#allocation4 + $0x10] sm:$0xff] %vm14426_vm9, %v1644_v32  ;;  %1743 = vst.msk [vmem:[#allocation4 + $0x20] sm:$0xff] %vm14426_vm9, %v1646_v48 }
 0x1fe   : > { %1742 = vst.msk [vmem:[#allocation4 + $0x18] sm:$0xff] %vm1739_vm10, %v1644_v32  ;;  %1744 = vst.msk [vmem:[#allocation4 + $0x28] sm:$0xff] %vm1739_vm10, %v1646_v48  ;;  %1922 = vrot.lane.b32.xlu1 %v10260_v44, %s9648_s29  ;;  %1924 = vrot.lane.b32.xlu0 %v10483_v22, %s9648_s29  ;;  %v1997_v22 = vld [vmem:[#allocation2 + $0x31] sm:$0xff]  ;;  %v2018_v32 = vld [vmem:[#allocation2 + $0x129] sm:$0xff] }
 0x1ff   : > { %v2019_v48 = vld [vmem:[#allocation2 + $0x139] sm:$0xff] }
 0x200   : > { %v1648_v3 = vpop.permute.xlu1 %1647  ;;  %v1650_v5 = vpop.permute.xlu0 %1649 }
 0x201   : > { %1745 = vst.msk [vmem:[#allocation4 + $0x30] sm:$0xff] %vm14426_vm9, %v1648_v3  ;;  %1747 = vst.msk [vmem:[#allocation4 + $0x40] sm:$0xff] %vm14426_vm9, %v1650_v5 }
 0x202   : > { %1746 = vst.msk [vmem:[#allocation4 + $0x38] sm:$0xff] %vm1739_vm10, %v1648_v3  ;;  %1748 = vst.msk [vmem:[#allocation4 + $0x48] sm:$0xff] %vm1739_vm10, %v1650_v5  ;;  %1926 = vrot.lane.b32.xlu1 %v10491_v11, %s9648_s29  ;;  %1928 = vrot.lane.b32.xlu0 %v1834_v50, %s9648_s29  ;;  %v9603_v50 = vld [vmem:[%s14357_s2 + $0x40] sm:$0xff]  }
 0x203   : > { %2664 = vmatpush1.bf16.msra.mxu0 %v9603_v50 }
 0x204   : > { %v1652_v44 = vpop.permute.xlu1 %1651  ;;  %v1654_v31 = vpop.permute.xlu0 %1653  ;;  %2665 = vmatprep.subr.bf16.mxu0 %v14398_v55 }
 0x205   : > { %1749 = vst.msk [vmem:[#allocation4 + $0x50] sm:$0xff] %vm14426_vm9, %v1652_v44  ;;  %1751 = vst.msk [vmem:[#allocation4 + $0x60] sm:$0xff] %vm14426_vm9, %v1654_v31 }
 0x206   : > { %1750 = vst.msk [vmem:[#allocation4 + $0x58] sm:$0xff] %vm1739_vm10, %v1652_v44  ;;  %1752 = vst.msk [vmem:[#allocation4 + $0x68] sm:$0xff] %vm1739_vm10, %v1654_v31  ;;  %1930 = vrot.lane.b32.xlu1 %v1835_v38, %s9648_s29  ;;  %2061 = vrot.lane.b32.xlu0 %v1997_v22, %s9649_s30  ;;  %v2020_v38 = vld [vmem:[#allocation2 + $0x141] sm:$0xff]  ;;  %v2021_v44 = vld [vmem:[#allocation2 + $0x151] sm:$0xff] }
 0x207   : > { %v9604_v31 = vld [vmem:[%s14357_s2 + $0x48] sm:$0xff]  }
 0x208   : > { %v1656_v11 = vpop.permute.xlu1 %1655  ;;  %v1658_v35 = vpop.permute.xlu0 %1657  ;;  %2666 = vmatpush1.bf16.msra.mxu0 %v9604_v31 }
 0x209   : > { %1753 = vst.msk [vmem:[#allocation4 + $0x70] sm:$0xff] %vm14426_vm9, %v1656_v11  ;;  %1755 = vst.msk [vmem:[#allocation4 + $0x80] sm:$0xff] %vm14426_vm9, %v1658_v35  ;;  %2667 = vmatprep.subr.bf16.mxu0 %v14398_v55 }
 0x20a   : > { %1754 = vst.msk [vmem:[#allocation4 + $0x78] sm:$0xff] %vm1739_vm10, %v1656_v11  ;;  %1756 = vst.msk [vmem:[#allocation4 + $0x88] sm:$0xff] %vm1739_vm10, %v1658_v35  ;;  %2063 = vrot.lane.b32.xlu1 %v1998_v37, %s9649_s30  ;;  %2065 = vrot.lane.b32.xlu0 %v1999_v41, %s9649_s30  ;;  %v2022_v35 = vld [vmem:[#allocation2 + $0x159] sm:$0xff]  ;;  %v2023_v37 = vld [vmem:[#allocation2 + $0x169] sm:$0xff] }
 0x20b   : > { %v9605_v41 = vld [vmem:[%s14357_s2 + $0x50] sm:$0xff]  }
 0x20c   : > { %v1660_v43 = vpop.permute.xlu1 %1659  ;;  %v1662_v47 = vpop.permute.xlu0 %1661  ;;  %2668 = vmatpush1.bf16.msra.mxu0 %v9605_v41  ;;  %v2213_v41 = vld [vmem:[#allocation2 + $0x142] sm:$0xff] }
 0x20d   : > { %1757 = vst.msk [vmem:[#allocation4 + $0x90] sm:$0xff] %vm14426_vm9, %v1660_v43  ;;  %1759 = vst.msk [vmem:[#allocation4 + $0xa0] sm:$0xff] %vm14426_vm9, %v1662_v47  ;;  %2669 = vmatprep.subr.bf16.mxu0 %v14398_v55 }
 0x20e   : > { %1758 = vst.msk [vmem:[#allocation4 + $0x98] sm:$0xff] %vm1739_vm10, %v1660_v43  ;;  %1760 = vst.msk [vmem:[#allocation4 + $0xa8] sm:$0xff] %vm1739_vm10, %v1662_v47  ;;  %2067 = vrot.lane.b32.xlu1 %v2000_v49, %s9649_s30  ;;  %2069 = vrot.lane.b32.xlu0 %v2001_v53, %s9649_s30  ;;  %v2024_v49 = vld [vmem:[#allocation2 + $0x171] sm:$0xff] }
 0x20f   : > { %v9606_v53 = vld [vmem:[%s14357_s2 + $0x58] sm:$0xff]  }
 0x210   : > { %v1664_v59 = vpop.permute.xlu1 %1663  ;;  %v1666_v61 = vpop.permute.xlu0 %1665  ;;  %2670 = vmatpush1.bf16.msra.mxu0 %v9606_v53  ;;  %v2215_v53 = vld [vmem:[#allocation2 + $0x15a] sm:$0xff] }
 0x211   : > { %1761 = vst.msk [vmem:[#allocation4 + $0xb0] sm:$0xff] %vm14426_vm9, %v1664_v59  ;;  %1763 = vst.msk [vmem:[#allocation4 + $0xc0] sm:$0xff] %vm14426_vm9, %v1666_v61  ;;  %2671 = vmatprep.subr.bf16.mxu0 %v14398_v55 }
 0x212   : > { %1762 = vst.msk [vmem:[#allocation4 + $0xb8] sm:$0xff] %vm1739_vm10, %v1664_v59  ;;  %1764 = vst.msk [vmem:[#allocation4 + $0xc8] sm:$0xff] %vm1739_vm10, %v1666_v61  ;;  %2071 = vrot.lane.b32.xlu1 %v2002_v2, %s9649_s30  ;;  %2073 = vrot.lane.b32.xlu0 %v2003_v4, %s9649_s30  ;;  %v2027_v59 = vld [vmem:[#allocation2 + $0x199] sm:$0xff] }
 0x213   : > { %v9607_v4 = vld [vmem:[%s14357_s2 + $0x60] sm:$0xff]  }
 0x214   : > { %v1668_v10 = vpop.permute.xlu1 %1667  ;;  %v1670_v18 = vpop.permute.xlu0 %1669  ;;  %2672 = vmatpush1.bf16.msra.mxu0 %v9607_v4  ;;  %v2217_v4 = vld [vmem:[#allocation2 + $0x172] sm:$0xff] }
 0x215   : > { %1765 = vst.msk [vmem:[#allocation4 + $0xd0] sm:$0xff] %vm14426_vm9, %v1668_v10  ;;  %1767 = vst.msk [vmem:[#allocation4 + $0xe0] sm:$0xff] %vm14426_vm9, %v1670_v18  ;;  %2673 = vmatprep.subr.bf16.mxu0 %v14398_v55 }
 0x216   : > { %1766 = vst.msk [vmem:[#allocation4 + $0xd8] sm:$0xff] %vm1739_vm10, %v1668_v10  ;;  %1768 = vst.msk [vmem:[#allocation4 + $0xe8] sm:$0xff] %vm1739_vm10, %v1670_v18  ;;  %2075 = vrot.lane.b32.xlu1 %v2004_v24, %s9649_s30  ;;  %2077 = vrot.lane.b32.xlu0 %v2005_v36, %s9649_s30  ;;  %v2190_v18 = vld [vmem:[#allocation2 + $0x32] sm:$0xff]  ;;  %v9608_v24 = vld [vmem:[%s14357_s2 + $0x68] ss:$0 sps:$4 sm:$0xff]  }
 0x218   : > { %v1672_v60 = vpop.permute.xlu1 %1671  ;;  %v1674_v9 = vpop.permute.xlu0 %1673 }
 0x219   : > { %1769 = vst.msk [vmem:[#allocation4 + $0xf0] sm:$0xff] %vm14426_vm9, %v1672_v60  ;;  %1771 = vst.msk [vmem:[#allocation4 + $0x100] sm:$0xff] %vm14426_vm9, %v1674_v9 }
 0x21a   : > { %1770 = vst.msk [vmem:[#allocation4 + $0xf8] sm:$0xff] %vm1739_vm10, %v1672_v60  ;;  %1772 = vst.msk [vmem:[#allocation4 + $0x108] sm:$0xff] %vm1739_vm10, %v1674_v9  ;;  %2079 = vrot.lane.b32.xlu1 %v2006_v56, %s9649_s30  ;;  %2081 = vrot.lane.b32.xlu0 %v2007_v0, %s9649_s30  ;;  %v2191_v60 = vld [vmem:[#allocation2 + $0x3a] sm:$0xff]  ;;  %v2192_v9 = vld [vmem:[#allocation2 + $0x4a] sm:$0xff] }
 0x21c   : > { %v1676_v17 = vpop.permute.xlu1 %1675  ;;  %v1678_v19 = vpop.permute.xlu0 %1677 }
 0x21d   : > { %1773 = vst.msk [vmem:[#allocation4 + $0x110] sm:$0xff] %vm14426_vm9, %v1676_v17  ;;  %1775 = vst.msk [vmem:[#allocation4 + $0x120] sm:$0xff] %vm14426_vm9, %v1678_v19 }
 0x21e   : > { %1774 = vst.msk [vmem:[#allocation4 + $0x118] sm:$0xff] %vm1739_vm10, %v1676_v17  ;;  %1776 = vst.msk [vmem:[#allocation4 + $0x128] sm:$0xff] %vm1739_vm10, %v1678_v19  ;;  %2083 = vrot.lane.b32.xlu1 %v2008_v26, %s9649_s30  ;;  %2085 = vrot.lane.b32.xlu0 %v2009_v21, %s9649_s30  ;;  %v2194_v17 = vld [vmem:[#allocation2 + $0x62] sm:$0xff]  ;;  %v2195_v21 = vld [vmem:[#allocation2 + $0x6a] sm:$0xff] }
 0x220   : > { %v1680_v16 = vpop.permute.xlu1 %1679  ;;  %v1682_v29 = vpop.permute.xlu0 %1681 }
 0x221   : > { %1777 = vst.msk [vmem:[#allocation4 + $0x130] sm:$0xff] %vm14426_vm9, %v1680_v16  ;;  %1779 = vst.msk [vmem:[#allocation4 + $0x140] sm:$0xff] %vm14426_vm9, %v1682_v29 }
 0x222   : > { %1778 = vst.msk [vmem:[#allocation4 + $0x138] sm:$0xff] %vm1739_vm10, %v1680_v16  ;;  %1780 = vst.msk [vmem:[#allocation4 + $0x148] sm:$0xff] %vm1739_vm10, %v1682_v29  ;;  %2087 = vrot.lane.b32.xlu1 %v2010_v23, %s9649_s30  ;;  %2089 = vrot.lane.b32.xlu0 %v2011_v27, %s9649_s30  ;;  %v2197_v23 = vld [vmem:[#allocation2 + $0x82] sm:$0xff]  ;;  %v2198_v27 = vld [vmem:[#allocation2 + $0x92] sm:$0xff] }
 0x224   : > { %v1684_v33 = vpop.permute.xlu1 %1683  ;;  %v1686_v34 = vpop.permute.xlu0 %1685 }
 0x225   : > { %1781 = vst.msk [vmem:[#allocation4 + $0x150] sm:$0xff] %vm14426_vm9, %v1684_v33  ;;  %1783 = vst.msk [vmem:[#allocation4 + $0x160] sm:$0xff] %vm14426_vm9, %v1686_v34 }
 0x226   : > { %1782 = vst.msk [vmem:[#allocation4 + $0x158] sm:$0xff] %vm1739_vm10, %v1684_v33  ;;  %1784 = vst.msk [vmem:[#allocation4 + $0x168] sm:$0xff] %vm1739_vm10, %v1686_v34  ;;  %2091 = vrot.lane.b32.xlu1 %v2012_v39, %s9649_s30  ;;  %2093 = vrot.lane.b32.xlu0 %v2013_v40, %s9649_s30  ;;  %v2199_v34 = vld [vmem:[#allocation2 + $0x9a] sm:$0xff]  ;;  %v2200_v39 = vld [vmem:[#allocation2 + $0xaa] sm:$0xff] }
 0x228   : > { %v1688_v46 = vpop.permute.xlu1 %1687  ;;  %v1690_v51 = vpop.permute.xlu0 %1689 }
 0x229   : > { %1785 = vst.msk [vmem:[#allocation4 + $0x170] sm:$0xff] %vm14426_vm9, %v1688_v46  ;;  %1787 = vst.msk [vmem:[#allocation4 + $0x180] sm:$0xff] %vm14426_vm9, %v1690_v51 }
 0x22a   : > { %1786 = vst.msk [vmem:[#allocation4 + $0x178] sm:$0xff] %vm1739_vm10, %v1688_v46  ;;  %1788 = vst.msk [vmem:[#allocation4 + $0x188] sm:$0xff] %vm1739_vm10, %v1690_v51  ;;  %2095 = vrot.lane.b32.xlu1 %v2014_v52, %s9649_s30  ;;  %2097 = vrot.lane.b32.xlu0 %v2015_v57, %s9649_s30  ;;  %v2201_v46 = vld [vmem:[#allocation2 + $0xb2] sm:$0xff]  ;;  %v2202_v51 = vld [vmem:[#allocation2 + $0xc2] sm:$0xff] }
 0x22c   : > { %v1692_v63 = vpop.permute.xlu1 %1691  ;;  %v1694_v1 = vpop.permute.xlu0 %1693 }
 0x22d   : > { %1789 = vst.msk [vmem:[#allocation4 + $0x190] sm:$0xff] %vm14426_vm9, %v1692_v63  ;;  %1791 = vst.msk [vmem:[#allocation4 + $0x1a0] sm:$0xff] %vm14426_vm9, %v1694_v1 }
 0x22e   : > { %1790 = vst.msk [vmem:[#allocation4 + $0x198] sm:$0xff] %vm1739_vm10, %v1692_v63  ;;  %1792 = vst.msk [vmem:[#allocation4 + $0x1a8] sm:$0xff] %vm1739_vm10, %v1694_v1  ;;  %2099 = vrot.lane.b32.xlu1 %v2016_v6, %s9649_s30  ;;  %2101 = vrot.lane.b32.xlu0 %v2017_v7, %s9649_s30  ;;  %v2204_v63 = vld [vmem:[#allocation2 + $0xda] sm:$0xff]  ;;  %v2205_v7 = vld [vmem:[#allocation2 + $0xe2] sm:$0xff] }
 0x230   : > { %v1696_v14 = vpop.permute.xlu1 %1695  ;;  %v1698_v30 = vpop.permute.xlu0 %1697 }
 0x231   : > { %1793 = vst.msk [vmem:[#allocation4 + $0x1b0] sm:$0xff] %vm14426_vm9, %v1696_v14  ;;  %1795 = vst.msk [vmem:[#allocation4 + $0x1c0] sm:$0xff] %vm14426_vm9, %v1698_v30 }
 0x232   : > { %1794 = vst.msk [vmem:[#allocation4 + $0x1b8] sm:$0xff] %vm1739_vm10, %v1696_v14  ;;  %1796 = vst.msk [vmem:[#allocation4 + $0x1c8] sm:$0xff] %vm1739_vm10, %v1698_v30  ;;  %2103 = vrot.lane.b32.xlu1 %v2018_v32, %s9649_s30  ;;  %2105 = vrot.lane.b32.xlu0 %v2019_v48, %s9649_s30  ;;  %v2207_v32 = vld [vmem:[#allocation2 + $0xfa] sm:$0xff]  ;;  %v2208_v48 = vld [vmem:[#allocation2 + $0x10a] sm:$0xff] }
 0x234   : > { %v1700_v3 = vpop.permute.xlu1 %1699  ;;  %v1702_v5 = vpop.permute.xlu0 %1701 }
 0x235   : > { %1797 = vst.msk [vmem:[#allocation4 + $0x1d0] sm:$0xff] %vm14426_vm9, %v1700_v3  ;;  %1799 = vst.msk [vmem:[#allocation4 + $0x1e0] sm:$0xff] %vm14426_vm9, %v1702_v5 }
 0x236   : > { %1798 = vst.msk [vmem:[#allocation4 + $0x1d8] sm:$0xff] %vm1739_vm10, %v1700_v3  ;;  %1800 = vst.msk [vmem:[#allocation4 + $0x1e8] sm:$0xff] %vm1739_vm10, %v1702_v5  ;;  %2107 = vrot.lane.b32.xlu1 %v2020_v38, %s9649_s30  ;;  %2109 = vrot.lane.b32.xlu0 %v2021_v44, %s9649_s30  ;;  %v2209_v5 = vld [vmem:[#allocation2 + $0x112] sm:$0xff]  ;;  %v2210_v38 = vld [vmem:[#allocation2 + $0x122] sm:$0xff] }
 0x238   : > { %v1704_v22 = vpop.permute.xlu1 %1703  ;;  %v1869_v11 = vpop.permute.xlu0 %1868 }
 0x239   : > { %1801 = vst.msk [vmem:[#allocation4 + $0x1f0] sm:$0xff] %vm14426_vm9, %v1704_v22  ;;  %vm4063_vm9 = vcmask 458112  }
 0x23a   : > { %1802 = vst.msk [vmem:[#allocation4 + $0x1f8] sm:$0xff] %vm1739_vm10, %v1704_v22  ;;  %2111 = vrot.lane.b32.xlu1 %v2022_v35, %s9649_s30  ;;  %2113 = vrot.lane.b32.xlu0 %v2023_v37, %s9649_s30  ;;  %v2211_v22 = vld [vmem:[#allocation2 + $0x12a] sm:$0xff] }
 0x23b   : > { %1965 = vst.msk [vmem:[#allocation4 + $0x8] sm:$0xff] %vm14429_vm11, %v1869_v11  ;;  %v2212_v11 = vld [vmem:[#allocation2 + $0x13a] sm:$0xff] }
 0x23c   : > { %v1871_v43 = vpop.permute.xlu1 %1870  ;;  %v1873_v47 = vpop.permute.xlu0 %1872 }
 0x23d   : > { %1966 = vst.msk [vmem:[#allocation4 + $0x18] sm:$0xff] %vm14429_vm11, %v1871_v43  ;;  %1967 = vst.msk [vmem:[#allocation4 + $0x28] sm:$0xff] %vm14429_vm11, %v1873_v47  ;;  %v2214_v43 = vld [vmem:[#allocation2 + $0x152] sm:$0xff] }
 0x23e   : > { %2115 = vrot.lane.b32.xlu1 %v2024_v49, %s9649_s30  ;;  %2117 = vrot.lane.b32.xlu0 %v10583_v54, %s9649_s30  ;;  %v2028_v54 = vld [vmem:[#allocation2 + $0x1a1] sm:$0xff] }
 0x240   : > { %v1875_v61 = vpop.permute.xlu1 %1874  ;;  %v1877_v2 = vpop.permute.xlu0 %1876 }
 0x241   : > { %1968 = vst.msk [vmem:[#allocation4 + $0x38] sm:$0xff] %vm14429_vm11, %v1875_v61  ;;  %1969 = vst.msk [vmem:[#allocation4 + $0x48] sm:$0xff] %vm14429_vm11, %v1877_v2 }
 0x242   : > { %2119 = vrot.lane.b32.xlu1 %v10591_v15, %s9649_s30  ;;  %2121 = vrot.lane.b32.xlu0 %v2027_v59, %s9649_s30  ;;  %v2645_v15 = vsel %vm2643_vm12, %v9608_v24, 0  ;;  %v2216_v59 = vld [vmem:[#allocation2 + $0x16a] sm:$0xff] }
 0x243   : > { %2674 = vmatpush1.bf16.msra.mxu0 %v2645_v15 }
 0x244   : > { %v1879_v8 = vpop.permute.xlu1 %1878  ;;  %v1881_v10 = vpop.permute.xlu0 %1880 }
 0x245   : > { %1970 = vst.msk [vmem:[#allocation4 + $0x58] sm:$0xff] %vm14429_vm11, %v1879_v8  ;;  %1971 = vst.msk [vmem:[#allocation4 + $0x68] sm:$0xff] %vm14429_vm11, %v1881_v10 }
 0x246   : > { %2123 = vrot.lane.b32.xlu1 %v2028_v54, %s9649_s30  ;;  %2254 = vrot.lane.b32.xlu0 %v2190_v18, %s9651_s22  ;;  %v2220_v54 = vld [vmem:[#allocation2 + $0x19a] sm:$0xff]  ;;  %v2221_v18 = vld [vmem:[#allocation2 + $0x1a2] sm:$0xff] }
 0x248   : > { %v1883_v36 = vpop.permute.xlu1 %1882  ;;  %v1885_v42 = vpop.permute.xlu0 %1884 }
 0x249   : > { %1972 = vst.msk [vmem:[#allocation4 + $0x78] sm:$0xff] %vm14429_vm11, %v1883_v36  ;;  %1973 = vst.msk [vmem:[#allocation4 + $0x88] sm:$0xff] %vm14429_vm11, %v1885_v42 }
 0x24a   : > { %2256 = vrot.lane.b32.xlu1 %v2191_v60, %s9651_s22  ;;  %2258 = vrot.lane.b32.xlu0 %v2192_v9, %s9651_s22 }
 0x24c   : > { %v1887_v56 = vpop.permute.xlu1 %1886  ;;  %v1889_v0 = vpop.permute.xlu0 %1888 }
 0x24d   : > { %1974 = vst.msk [vmem:[#allocation4 + $0x98] sm:$0xff] %vm14429_vm11, %v1887_v56  ;;  %1975 = vst.msk [vmem:[#allocation4 + $0xa8] sm:$0xff] %vm14429_vm11, %v1889_v0 }
 0x24e   : > { %2260 = vrot.lane.b32.xlu1 %v2193_v13, %s9651_s22  ;;  %2262 = vrot.lane.b32.xlu0 %v2194_v17, %s9651_s22 }
 0x250   : > { %v1891_v19 = vpop.permute.xlu1 %1890  ;;  %v1893_v26 = vpop.permute.xlu0 %1892 }
 0x251   : > { %1976 = vst.msk [vmem:[#allocation4 + $0xb8] sm:$0xff] %vm14429_vm11, %v1891_v19  ;;  %1977 = vst.msk [vmem:[#allocation4 + $0xc8] sm:$0xff] %vm14429_vm11, %v1893_v26 }
 0x252   : > { %2264 = vrot.lane.b32.xlu1 %v2195_v21, %s9651_s22  ;;  %2266 = vrot.lane.b32.xlu0 %v2196_v25, %s9651_s22 }
 0x254   : > { %v1895_v16 = vpop.permute.xlu1 %1894  ;;  %v1897_v29 = vpop.permute.xlu0 %1896 }
 0x255   : > { %1978 = vst.msk [vmem:[#allocation4 + $0xd8] sm:$0xff] %vm14429_vm11, %v1895_v16  ;;  %1979 = vst.msk [vmem:[#allocation4 + $0xe8] sm:$0xff] %vm14429_vm11, %v1897_v29 }
 0x256   : > { %2268 = vrot.lane.b32.xlu1 %v2197_v23, %s9651_s22  ;;  %2270 = vrot.lane.b32.xlu0 %v2198_v27, %s9651_s22 }
 0x258   : > { %v1899_v28 = vpop.permute.xlu1 %1898  ;;  %v1901_v33 = vpop.permute.xlu0 %1900 }
 0x259   : > { %1980 = vst.msk [vmem:[#allocation4 + $0xf8] sm:$0xff] %vm14429_vm11, %v1899_v28  ;;  %1981 = vst.msk [vmem:[#allocation4 + $0x108] sm:$0xff] %vm14429_vm11, %v1901_v33 }
 0x25a   : > { %2272 = vrot.lane.b32.xlu1 %v2199_v34, %s9651_s22  ;;  %2274 = vrot.lane.b32.xlu0 %v2200_v39, %s9651_s22 }
 0x25c   : > { %v1903_v40 = vpop.permute.xlu1 %1902  ;;  %v1905_v45 = vpop.permute.xlu0 %1904 }
 0x25d   : > { %1982 = vst.msk [vmem:[#allocation4 + $0x118] sm:$0xff] %vm14429_vm11, %v1903_v40  ;;  %1983 = vst.msk [vmem:[#allocation4 + $0x128] sm:$0xff] %vm14429_vm11, %v1905_v45 }
 0x25e   : > { %2276 = vrot.lane.b32.xlu1 %v2201_v46, %s9651_s22  ;;  %2278 = vrot.lane.b32.xlu0 %v2202_v51, %s9651_s22 }
 0x260   : > { %v1907_v52 = vpop.permute.xlu1 %1906  ;;  %v1909_v57 = vpop.permute.xlu0 %1908 }
 0x261   : > { %1984 = vst.msk [vmem:[#allocation4 + $0x138] sm:$0xff] %vm14429_vm11, %v1907_v52  ;;  %1985 = vst.msk [vmem:[#allocation4 + $0x148] sm:$0xff] %vm14429_vm11, %v1909_v57 }
 0x262   : > { %2280 = vrot.lane.b32.xlu1 %v2203_v58, %s9651_s22  ;;  %2282 = vrot.lane.b32.xlu0 %v2204_v63, %s9651_s22 }
 0x264   : > { %v1911_v1 = vpop.permute.xlu1 %1910  ;;  %v1913_v6 = vpop.permute.xlu0 %1912 }
 0x265   : > { %1986 = vst.msk [vmem:[#allocation4 + $0x158] sm:$0xff] %vm14429_vm11, %v1911_v1  ;;  %1987 = vst.msk [vmem:[#allocation4 + $0x168] sm:$0xff] %vm14429_vm11, %v1913_v6  ;;  %v2385_v1 = vld [vmem:[#allocation4 + $0x10] sm:$0xff] }
 0x266   : > { %2284 = vrot.lane.b32.xlu1 %v2205_v7, %s9651_s22  ;;  %2286 = vrot.lane.b32.xlu0 %v2206_v12, %s9651_s22 }
 0x268   : > { %v1915_v14 = vpop.permute.xlu1 %1914  ;;  %v1917_v30 = vpop.permute.xlu0 %1916 }
 0x269   : > { %1988 = vst.msk [vmem:[#allocation4 + $0x178] sm:$0xff] %vm14429_vm11, %v1915_v14  ;;  %1989 = vst.msk [vmem:[#allocation4 + $0x188] sm:$0xff] %vm14429_vm11, %v1917_v30 }
 0x26a   : > { %2288 = vrot.lane.b32.xlu1 %v2207_v32, %s9651_s22  ;;  %2290 = vrot.lane.b32.xlu0 %v2208_v48, %s9651_s22  ;;  %v2383_v32 = vld [vmem:[#allocation4] sm:$0xff] }
 0x26b   : > { %v2447_v48 = vpack.c.bf16 %v2385_v1, %v2383_v32  ;;  %v2409_v1 = vld [vmem:[#allocation4 + $0xd0] sm:$0xff] }
 0x26c   : > { %v1919_v50 = vpop.permute.xlu1 %1918  ;;  %v1921_v3 = vpop.permute.xlu0 %1920 }
 0x26d   : > { %1990 = vst.msk [vmem:[#allocation4 + $0x198] sm:$0xff] %vm14429_vm11, %v1919_v50  ;;  %1991 = vst.msk [vmem:[#allocation4 + $0x1a8] sm:$0xff] %vm14429_vm11, %v1921_v3 }
 0x26e   : > { %2292 = vrot.lane.b32.xlu1 %v2209_v5, %s9651_s22  ;;  %2294 = vrot.lane.b32.xlu0 %v2210_v38, %s9651_s22 }
 0x270   : > { %v1923_v44 = vpop.permute.xlu1 %1922  ;;  %v1925_v31 = vpop.permute.xlu0 %1924 }
 0x271   : > { %1992 = vst.msk [vmem:[#allocation4 + $0x1b8] sm:$0xff] %vm14429_vm11, %v1923_v44  ;;  %1993 = vst.msk [vmem:[#allocation4 + $0x1c8] sm:$0xff] %vm14429_vm11, %v1925_v31  ;;  %v2389_v31 = vld [vmem:[#allocation4 + $0x30] sm:$0xff] }
 0x272   : > { %2296 = vrot.lane.b32.xlu1 %v2211_v22, %s9651_s22  ;;  %2298 = vrot.lane.b32.xlu0 %v2212_v11, %s9651_s22 }
 0x274   : > { %v1927_v35 = vpop.permute.xlu1 %1926  ;;  %v1929_v37 = vpop.permute.xlu0 %1928 }
 0x275   : > { %1994 = vst.msk [vmem:[#allocation4 + $0x1d8] sm:$0xff] %vm14429_vm11, %v1927_v35  ;;  %1995 = vst.msk [vmem:[#allocation4 + $0x1e8] sm:$0xff] %vm14429_vm11, %v1929_v37  ;;  %v2387_v37 = vld [vmem:[#allocation4 + $0x20] sm:$0xff] }
 0x276   : > { %2300 = vrot.lane.b32.xlu1 %v2213_v41, %s9651_s22  ;;  %2302 = vrot.lane.b32.xlu0 %v2214_v43, %s9651_s22  ;;  %v2449_v41 = vpack.c.bf16 %v2389_v31, %v2387_v37  ;;  %v2415_v37 = vld [vmem:[#allocation4 + $0x100] sm:$0xff] }
 0x278   : > { %v1931_v47 = vpop.permute.xlu1 %1930  ;;  %v2062_v49 = vpop.permute.xlu0 %2061 }
 0x279   : > { %1996 = vst.msk [vmem:[#allocation4 + $0x1f8] sm:$0xff] %vm14429_vm11, %v1931_v47  ;;  %vm4573_vm11 = vcmask 588800  }
 0x27a   : > { %2158 = vst.msk [vmem:[#allocation4 + $0x8] sm:$0xff] %vm14428_vm13, %v2062_v49  ;;  %2304 = vrot.lane.b32.xlu1 %v2215_v53, %s9651_s22  ;;  %2306 = vrot.lane.b32.xlu0 %v2216_v59, %s9651_s22  ;;  %v2393_v59 = vld [vmem:[#allocation4 + $0x50] sm:$0xff] }
 0x27c   : > { %v2064_v61 = vpop.permute.xlu1 %2063  ;;  %v2066_v2 = vpop.permute.xlu0 %2065 }
 0x27d   : > { %2159 = vst.msk [vmem:[#allocation4 + $0x18] sm:$0xff] %vm14428_vm13, %v2064_v61  ;;  %2160 = vst.msk [vmem:[#allocation4 + $0x28] sm:$0xff] %vm14428_vm13, %v2066_v2 }
 0x27e   : > { %2308 = vrot.lane.b32.xlu1 %v2217_v4, %s9651_s22  ;;  %2310 = vrot.lane.b32.xlu0 %v10683_v20, %s9651_s22 }
 0x280   : > { %v2068_v8 = vpop.permute.xlu1 %2067  ;;  %v2070_v10 = vpop.permute.xlu0 %2069 }
 0x281   : > { %2161 = vst.msk [vmem:[#allocation4 + $0x38] sm:$0xff] %vm14428_vm13, %v2068_v8  ;;  %2162 = vst.msk [vmem:[#allocation4 + $0x48] sm:$0xff] %vm14428_vm13, %v2070_v10 }
 0x282   : > { %2312 = vrot.lane.b32.xlu1 %v10691_v62, %s9651_s22  ;;  %2314 = vrot.lane.b32.xlu0 %v2220_v54, %s9651_s22  ;;  %v2391_v54 = vld [vmem:[#allocation4 + $0x40] sm:$0xff] }
 0x283   : > { %v2451_v8 = vpack.c.bf16 %v2393_v59, %v2391_v54  ;;  %v2419_v59 = vld [vmem:[#allocation4 + $0x120] sm:$0xff]  ;;  %v2425_v54 = vld [vmem:[#allocation4 + $0x150] sm:$0xff] }
 0x284   : > { %v2072_v24 = vpop.permute.xlu1 %2071  ;;  %v2074_v15 = vpop.permute.xlu0 %2073 }
 0x285   : > { %2163 = vst.msk [vmem:[#allocation4 + $0x58] sm:$0xff] %vm14428_vm13, %v2072_v24  ;;  %2164 = vst.msk [vmem:[#allocation4 + $0x68] sm:$0xff] %vm14428_vm13, %v2074_v15 }
 0x286   : > { %2316 = vrot.lane.b32.xlu1 %v2221_v18, %s9651_s22 }
 0x288   : > { %v2076_v20 = vpop.permute.xlu1 %2075  ;;  %v2078_v36 = vpop.permute.xlu0 %2077 }
 0x289   : > { %2165 = vst.msk [vmem:[#allocation4 + $0x78] sm:$0xff] %vm14428_vm13, %v2076_v20  ;;  %2166 = vst.msk [vmem:[#allocation4 + $0x88] sm:$0xff] %vm14428_vm13, %v2078_v36  ;;  %v2397_v20 = vld [vmem:[#allocation4 + $0x70] sm:$0xff] }
 0x28c   : > { %v2080_v42 = vpop.permute.xlu1 %2079  ;;  %v2082_v60 = vpop.permute.xlu0 %2081 }
 0x28d   : > { %2167 = vst.msk [vmem:[#allocation4 + $0x98] sm:$0xff] %vm14428_vm13, %v2080_v42  ;;  %2168 = vst.msk [vmem:[#allocation4 + $0xa8] sm:$0xff] %vm14428_vm13, %v2082_v60 }
 0x290   : > { %v2084_v62 = vpop.permute.xlu1 %2083  ;;  %v2086_v9 = vpop.permute.xlu0 %2085 }
 0x291   : > { %2169 = vst.msk [vmem:[#allocation4 + $0xb8] sm:$0xff] %vm14428_vm13, %v2084_v62  ;;  %2170 = vst.msk [vmem:[#allocation4 + $0xc8] sm:$0xff] %vm14428_vm13, %v2086_v9  ;;  %v2395_v62 = vld [vmem:[#allocation4 + $0x60] sm:$0xff] }
 0x292   : > { %v2453_v9 = vpack.c.bf16 %v2397_v20, %v2395_v62  ;;  %v2429_v20 = vld [vmem:[#allocation4 + $0x170] sm:$0xff] }
 0x294   : > { %v2088_v56 = vpop.permute.xlu1 %2087  ;;  %v2090_v0 = vpop.permute.xlu0 %2089 }
 0x295   : > { %2171 = vst.msk [vmem:[#allocation4 + $0xd8] sm:$0xff] %vm14428_vm13, %v2088_v56  ;;  %2172 = vst.msk [vmem:[#allocation4 + $0xe8] sm:$0xff] %vm14428_vm13, %v2090_v0 }
 0x298   : > { %v2092_v13 = vpop.permute.xlu1 %2091  ;;  %v2094_v17 = vpop.permute.xlu0 %2093 }
 0x299   : > { %2173 = vst.msk [vmem:[#allocation4 + $0xf8] sm:$0xff] %vm14428_vm13, %v2092_v13  ;;  %2174 = vst.msk [vmem:[#allocation4 + $0x108] sm:$0xff] %vm14428_vm13, %v2094_v17 }
 0x29c   : > { %v2096_v19 = vpop.permute.xlu1 %2095  ;;  %v2098_v26 = vpop.permute.xlu0 %2097 }
 0x29d   : > { %2175 = vst.msk [vmem:[#allocation4 + $0x118] sm:$0xff] %vm14428_vm13, %v2096_v19  ;;  %2176 = vst.msk [vmem:[#allocation4 + $0x128] sm:$0xff] %vm14428_vm13, %v2098_v26  ;;  %v2401_v19 = vld [vmem:[#allocation4 + $0x90] sm:$0xff] }
 0x2a0   : > { %v2100_v21 = vpop.permute.xlu1 %2099  ;;  %v2102_v25 = vpop.permute.xlu0 %2101 }
 0x2a1   : > { %2177 = vst.msk [vmem:[#allocation4 + $0x138] sm:$0xff] %vm14428_vm13, %v2100_v21  ;;  %2178 = vst.msk [vmem:[#allocation4 + $0x148] sm:$0xff] %vm14428_vm13, %v2102_v25 }
 0x2a4   : > { %v2104_v16 = vpop.permute.xlu1 %2103  ;;  %v2106_v29 = vpop.permute.xlu0 %2105 }
 0x2a5   : > { %2179 = vst.msk [vmem:[#allocation4 + $0x158] sm:$0xff] %vm14428_vm13, %v2104_v16  ;;  %2180 = vst.msk [vmem:[#allocation4 + $0x168] sm:$0xff] %vm14428_vm13, %v2106_v29  ;;  %v2399_v16 = vld [vmem:[#allocation4 + $0x80] sm:$0xff] }
 0x2a6   : > { %v2455_v29 = vpack.c.bf16 %v2401_v19, %v2399_v16  ;;  %v2939_v16 = vld [vmem:[#allocation3 + $0x4c] sm:$0xff] }
 0x2a8   : > { %v2108_v23 = vpop.permute.xlu1 %2107  ;;  %v2110_v27 = vpop.permute.xlu0 %2109 }
 0x2a9   : > { %2181 = vst.msk [vmem:[#allocation4 + $0x178] sm:$0xff] %vm14428_vm13, %v2108_v23  ;;  %2182 = vst.msk [vmem:[#allocation4 + $0x188] sm:$0xff] %vm14428_vm13, %v2110_v27 }
 0x2ac   : > { %v2112_v28 = vpop.permute.xlu1 %2111  ;;  %v2114_v33 = vpop.permute.xlu0 %2113 }
 0x2ad   : > { %2183 = vst.msk [vmem:[#allocation4 + $0x198] sm:$0xff] %vm14428_vm13, %v2112_v28  ;;  %2184 = vst.msk [vmem:[#allocation4 + $0x1a8] sm:$0xff] %vm14428_vm13, %v2114_v33 }
 0x2b0   : > { %v2116_v34 = vpop.permute.xlu1 %2115  ;;  %v2118_v39 = vpop.permute.xlu0 %2117 }
 0x2b1   : > { %2185 = vst.msk [vmem:[#allocation4 + $0x1b8] sm:$0xff] %vm14428_vm13, %v2116_v34  ;;  %2186 = vst.msk [vmem:[#allocation4 + $0x1c8] sm:$0xff] %vm14428_vm13, %v2118_v39  ;;  %v2405_v34 = vld [vmem:[#allocation4 + $0xb0] sm:$0xff] }
 0x2b4   : > { %v2120_v40 = vpop.permute.xlu1 %2119  ;;  %v2122_v45 = vpop.permute.xlu0 %2121 }
 0x2b5   : > { %2187 = vst.msk [vmem:[#allocation4 + $0x1d8] sm:$0xff] %vm14428_vm13, %v2120_v40  ;;  %2188 = vst.msk [vmem:[#allocation4 + $0x1e8] sm:$0xff] %vm14428_vm13, %v2122_v45 }
 0x2b8   : > { %v2124_v46 = vpop.permute.xlu1 %2123  ;;  %v2255_v51 = vpop.permute.xlu0 %2254 }
 0x2b9   : > { %2189 = vst.msk [vmem:[#allocation4 + $0x1f8] sm:$0xff] %vm14428_vm13, %v2124_v46  ;;  %v2403_v46 = vld [vmem:[#allocation4 + $0xa0] sm:$0xff]  ;;  %vm4449_vm13 = vcmask 589312  }
 0x2ba   : > { %2351 = vst.msk [vmem:[#allocation4 + $0x8] sm:$0xff] %vm14425_vm14, %v2255_v51  ;;  %v2457_v51 = vpack.c.bf16 %v2405_v34, %v2403_v46 }
 0x2bc   : > { %v2257_v52 = vpop.permute.xlu1 %2256  ;;  %v2259_v57 = vpop.permute.xlu0 %2258 }
 0x2bd   : > { %2352 = vst.msk [vmem:[#allocation4 + $0x18] sm:$0xff] %vm14425_vm14, %v2257_v52  ;;  %2353 = vst.msk [vmem:[#allocation4 + $0x28] sm:$0xff] %vm14425_vm14, %v2259_v57 }
 0x2c0   : > { %v2261_v58 = vpop.permute.xlu1 %2260  ;;  %v2263_v63 = vpop.permute.xlu0 %2262 }
 0x2c1   : > { %2354 = vst.msk [vmem:[#allocation4 + $0x38] sm:$0xff] %vm14425_vm14, %v2261_v58  ;;  %2355 = vst.msk [vmem:[#allocation4 + $0x48] sm:$0xff] %vm14425_vm14, %v2263_v63  ;;  %v2384_v12 = vld [vmem:[#allocation4 + $0x8] sm:$0xff] }
 0x2c4   : > { %v2265_v6 = vpop.permute.xlu1 %2264  ;;  %v2267_v7 = vpop.permute.xlu0 %2266  ;;  %v2386_v14 = vld [vmem:[#allocation4 + $0x18] sm:$0xff]  ;;  %v2388_v5 = vld [vmem:[#allocation4 + $0x28] sm:$0xff] }
 0x2c5   : > { %2356 = vst.msk [vmem:[#allocation4 + $0x58] sm:$0xff] %vm14425_vm14, %v2265_v6  ;;  %2357 = vst.msk [vmem:[#allocation4 + $0x68] sm:$0xff] %vm14425_vm14, %v2267_v7  ;;  %v2448_v30 = vpack.c.bf16 %v2386_v14, %v2384_v12  ;;  %v2407_v14 = vld [vmem:[#allocation4 + $0xc0] sm:$0xff] }
 0x2c7   : > { %9328 = vmatprep.mubr.msk.bf16.mxu0 %vm14424_vm15, %v2448_v30  ;;  %v2459_v30 = vpack.c.bf16 %v2409_v1, %v2407_v14  ;;  %v2443_v1 = vld [vmem:[#allocation4 + $0x1e0] sm:$0xff] }
 0x2c8   : > { %v2269_v50 = vpop.permute.xlu1 %2268  ;;  %2680 = vmatmul.mubr.bf16.vlgmr.msra.gmra.mrb[0].mxu0 %v2447_v48  ;;  %v2271_v3 = vpop.permute.xlu0 %2270  ;;  %v2390_v38 = vld [vmem:[#allocation4 + $0x38] sm:$0xff]  ;;  %v2392_v43 = vld [vmem:[#allocation4 + $0x48] sm:$0xff] }
 0x2c9   : > { %2358 = vst.msk [vmem:[#allocation4 + $0x78] sm:$0xff] %vm14425_vm14, %v2269_v50  ;;  %2359 = vst.msk [vmem:[#allocation4 + $0x88] sm:$0xff] %vm14425_vm14, %v2271_v3  ;;  %v2450_v44 = vpack.c.bf16 %v2390_v38, %v2388_v5  ;;  %v2413_v3 = vld [vmem:[#allocation4 + $0xf0] sm:$0xff]  ;;  %v2411_v38 = vld [vmem:[#allocation4 + $0xe0] sm:$0xff] }
 0x2cb   : > { %9329 = vmatprep.mubr.msk.bf16.mxu0 %vm14424_vm15, %v2450_v44  ;;  %v2461_v44 = vpack.c.bf16 %v2413_v3, %v2411_v38  ;;  %v2876_v3 = vld [vmem:[#allocation3 + $0x52] sm:$0xff] }
 0x2cc   : > { %v2273_v22 = vpop.permute.xlu1 %2272  ;;  %v2275_v11 = vpop.permute.xlu0 %2274  ;;  %v2394_v35 = vld [vmem:[#allocation4 + $0x58] sm:$0xff]  ;;  %v2396_v10 = vld [vmem:[#allocation4 + $0x68] sm:$0xff]  ;;  %2908 = vst.msk [vmem:[#allocation4 + $0x30] sm:$0xff] %vm515_vm3, %v2876_v3 }
 0x2cd   : > { %2360 = vst.msk [vmem:[#allocation4 + $0x98] sm:$0xff] %vm14425_vm14, %v2273_v22  ;;  %2361 = vst.msk [vmem:[#allocation4 + $0xa8] sm:$0xff] %vm14425_vm14, %v2275_v11  ;;  %v2452_v47 = vpack.c.bf16 %v2394_v35, %v2392_v43  ;;  %v2417_v11 = vld [vmem:[#allocation4 + $0x110] sm:$0xff] }
 0x2d0   : > { %v2277_v49 = vpop.permute.xlu1 %2276  ;;  %v2279_v53 = vpop.permute.xlu0 %2278  ;;  %2688 = vmatmul.mubr.bf16.gmra.mrb[4].mxu0 %v2449_v41  ;;  %v2398_v4 = vld [vmem:[#allocation4 + $0x78] sm:$0xff]  ;;  %v2400_v56 = vld [vmem:[#allocation4 + $0x88] sm:$0xff]  ;;  %v2463_v41 = vpack.c.bf16 %v2417_v11, %v2415_v37 }
 0x2d1   : > { %2362 = vst.msk [vmem:[#allocation4 + $0xb8] sm:$0xff] %vm14425_vm14, %v2277_v49  ;;  %2363 = vst.msk [vmem:[#allocation4 + $0xc8] sm:$0xff] %vm14425_vm14, %v2279_v53  ;;  %9330 = vmatprep.mubr.msk.bf16.mxu0 %vm14424_vm15, %v2452_v47  ;;  %v2454_v18 = vpack.c.bf16 %v2398_v4, %v2396_v10  ;;  %v2421_v49 = vld [vmem:[#allocation4 + $0x130] sm:$0xff]  ;;  %v2423_v10 = vld [vmem:[#allocation4 + $0x140] sm:$0xff] }
 0x2d4   : > { %v2281_v61 = vpop.permute.xlu1 %2280  ;;  %v2283_v2 = vpop.permute.xlu0 %2282  ;;  %v2402_v60 = vld [vmem:[#allocation4 + $0x98] sm:$0xff]  ;;  %v2404_v23 = vld [vmem:[#allocation4 + $0xa8] sm:$0xff] }
 0x2d5   : > { %2364 = vst.msk [vmem:[#allocation4 + $0xd8] sm:$0xff] %vm14425_vm14, %v2281_v61  ;;  %2365 = vst.msk [vmem:[#allocation4 + $0xe8] sm:$0xff] %vm14425_vm14, %v2283_v2  ;;  %v2456_v0 = vpack.c.bf16 %v2402_v60, %v2400_v56  ;;  %v2465_v61 = vpack.c.bf16 %v2421_v49, %v2419_v59  ;;  %v2937_v56 = vld [vmem:[#allocation3 + $0x34] sm:$0xff] }
 0x2d6   : > { %3001 = vrot.lane.b32.xlu0 %v2937_v56, %s9642_s20 }
 0x2d8   : > { %v2285_v24 = vpop.permute.xlu1 %2284  ;;  %v2287_v15 = vpop.permute.xlu0 %2286  ;;  %2696 = vmatmul.mubr.bf16.gmra.mrb[8].mxu0 %v2451_v8  ;;  %v2406_v25 = vld [vmem:[#allocation4 + $0xb8] sm:$0xff]  ;;  %v2408_v52 = vld [vmem:[#allocation4 + $0xc8] sm:$0xff] }
 0x2d9   : > { %2366 = vst.msk [vmem:[#allocation4 + $0xf8] sm:$0xff] %vm14425_vm14, %v2285_v24  ;;  %2367 = vst.msk [vmem:[#allocation4 + $0x108] sm:$0xff] %vm14425_vm14, %v2287_v15  ;;  %9331 = vmatprep.mubr.msk.bf16.mxu0 %vm14424_vm15, %v2454_v18  ;;  %v2458_v27 = vpack.c.bf16 %v2406_v25, %v2404_v23  ;;  %v2467_v18 = vpack.c.bf16 %v2425_v54, %v2423_v10  ;;  %v2940_v23 = vld [vmem:[#allocation3 + $0x54] sm:$0xff] }
 0x2da   : > { %3005 = vrot.lane.b32.xlu0 %v2939_v16, %s9642_s20 }
 0x2dc   : > { %v2289_v36 = vpop.permute.xlu1 %2288  ;;  %v2291_v42 = vpop.permute.xlu0 %2290  ;;  %v2410_v45 = vld [vmem:[#allocation4 + $0xd8] sm:$0xff]  ;;  %v2412_v32 = vld [vmem:[#allocation4 + $0xe8] sm:$0xff] }
 0x2dd   : > { %2368 = vst.msk [vmem:[#allocation4 + $0x118] sm:$0xff] %vm14425_vm14, %v2289_v36  ;;  %2369 = vst.msk [vmem:[#allocation4 + $0x128] sm:$0xff] %vm14425_vm14, %v2291_v42  ;;  %v2460_v57 = vpack.c.bf16 %v2410_v45, %v2408_v52  ;;  %v2427_v42 = vld [vmem:[#allocation4 + $0x160] sm:$0xff] }
 0x2de   : > { %v2469_v60 = vpack.c.bf16 %v2429_v20, %v2427_v42  ;;  %v2439_v52 = vld [vmem:[#allocation4 + $0x1c0] sm:$0xff] }
 0x2e0   : > { %v2293_v13 = vpop.permute.xlu1 %2292  ;;  %v2295_v17 = vpop.permute.xlu0 %2294  ;;  %2704 = vmatmul.mubr.bf16.gmra.mrb[12].mxu0 %v2453_v9  ;;  %v2414_v7 = vld [vmem:[#allocation4 + $0xf8] sm:$0xff]  ;;  %v2416_v31 = vld [vmem:[#allocation4 + $0x108] sm:$0xff] }
 0x2e1   : > { %2370 = vst.msk [vmem:[#allocation4 + $0x138] sm:$0xff] %vm14425_vm14, %v2293_v13  ;;  %2371 = vst.msk [vmem:[#allocation4 + $0x148] sm:$0xff] %vm14425_vm14, %v2295_v17  ;;  %9332 = vmatprep.mubr.msk.bf16.mxu0 %vm14424_vm15, %v2456_v0  ;;  %v2462_v48 = vpack.c.bf16 %v2414_v7, %v2412_v32  ;;  %v2938_v0 = vld [vmem:[#allocation3 + $0x3c] sm:$0xff]  ;;  %v2433_v13 = vld [vmem:[#allocation4 + $0x190] sm:$0xff]  ;;  %v14491_v17 = vmov 0.0  }
 0x2e2   : > { %3003 = vrot.lane.b32.xlu1 %v2938_v0, %s9642_s20  ;;  %451 = vst.msk [vmem:[#allocation3 + $0x60] sm:$0xf] %vm450_vm1, %v14491_v17  ;;  %452 = vst.msk [vmem:[#allocation3 + $0x78] sm:$0xf] %vm450_vm1, %v14491_v17  ;;  %v2873_v7 = vld [vmem:[#allocation3 + $0x32] sm:$0xff] }
 0x2e3   : > { %453 = vst.msk [vmem:[#allocation3 + $0x90] sm:$0xf] %vm450_vm1, %v14491_v17  ;;  %454 = vst.msk [vmem:[#allocation3 + $0xa8] sm:$0xf] %vm450_vm1, %v14491_v17  ;;  %v11156_v32 = vld [vmem:[%s14358_s3] ss:$0 sm:$0xff] }
 0x2e4   : > { %v2297_v26 = vpop.permute.xlu1 %2296  ;;  %v2299_v21 = vpop.permute.xlu0 %2298  ;;  %v2418_v5 = vld [vmem:[#allocation4 + $0x118] sm:$0xff]  ;;  %v2420_v43 = vld [vmem:[#allocation4 + $0x128] sm:$0xff]  ;;  %455 = vst.msk [vmem:[#allocation3 + $0xc0] sm:$0xf] %vm450_vm1, %v14491_v17  ;;  %456 = vst.msk [vmem:[#allocation3 + $0xd8] sm:$0xf] %vm450_vm1, %v14491_v17 }
 0x2e5   : > { %2372 = vst.msk [vmem:[#allocation4 + $0x158] sm:$0xff] %vm14425_vm14, %v2297_v26  ;;  %2373 = vst.msk [vmem:[#allocation4 + $0x168] sm:$0xff] %vm14425_vm14, %v2299_v21  ;;  %v2464_v22 = vpack.c.bf16 %v2418_v5, %v2416_v31  ;;  %v2431_v26 = vld [vmem:[#allocation4 + $0x180] sm:$0xff] }
 0x2e6   : > { %457 = vst.msk [vmem:[#allocation3 + $0xf0] sm:$0xf] %vm450_vm1, %v14491_v17  ;;  %458 = vst.msk [vmem:[#allocation3 + $0x108] sm:$0xf] %vm450_vm1, %v14491_v17  ;;  %v2471_v21 = vpack.c.bf16 %v2433_v13, %v2431_v26  ;;  %3007 = vrot.lane.b32.xlu1 %v2940_v23, %s9642_s20 }
 0x2e7   : > { %459 = vst.msk [vmem:[#allocation3 + $0x120] sm:$0xf] %vm450_vm1, %v14491_v17  ;;  %460 = vst.msk [vmem:[#allocation3 + $0x138] sm:$0xf] %vm450_vm1, %v14491_v17 }
 0x2e8   : > { %v2301_v28 = vpop.permute.xlu1 %2300  ;;  %v2303_v33 = vpop.permute.xlu0 %2302  ;;  %2712 = vmatmul.mubr.bf16.gmra.mrb[16].mxu0 %v2455_v29  ;;  %v2422_v35 = vld [vmem:[#allocation4 + $0x138] sm:$0xff]  ;;  %v2424_v2 = vld [vmem:[#allocation4 + $0x148] sm:$0xff]  ;;  %461 = vst.msk [vmem:[#allocation3 + $0x150] sm:$0xf] %vm450_vm1, %v14491_v17  ;;  %462 = vst.msk [vmem:[#allocation3 + $0x168] sm:$0xf] %vm450_vm1, %v14491_v17 }
 0x2e9   : > { %2374 = vst.msk [vmem:[#allocation4 + $0x178] sm:$0xff] %vm14425_vm14, %v2301_v28  ;;  %2375 = vst.msk [vmem:[#allocation4 + $0x188] sm:$0xff] %vm14425_vm14, %v2303_v33  ;;  %9333 = vmatprep.mubr.msk.bf16.mxu0 %vm14424_vm15, %v2458_v27  ;;  %v2466_v47 = vpack.c.bf16 %v2422_v35, %v2420_v43  ;;  %v2437_v27 = vld [vmem:[#allocation4 + $0x1b0] sm:$0xff]  ;;  %v2435_v33 = vld [vmem:[#allocation4 + $0x1a0] sm:$0xff] }
 0x2ea   : > { %463 = vst.msk [vmem:[#allocation3 + $0x180] sm:$0xf] %vm450_vm1, %v14491_v17  ;;  %464 = vst.msk [vmem:[#allocation3 + $0x198] sm:$0xf] %vm450_vm1, %v14491_v17  ;;  %v2473_v34 = vpack.c.bf16 %v2437_v27, %v2435_v33 }
 0x2eb   : > { %465 = vst.msk [vmem:[#allocation3 + $0x1b0] sm:$0xf] %vm450_vm1, %v14491_v17  ;;  %466 = vst.msk [vmem:[#allocation3 + $0x1c8] sm:$0xf] %vm450_vm1, %v14491_v17 }
 0x2ec   : > { %v2305_v39 = vpop.permute.xlu1 %2304  ;;  %v2307_v40 = vpop.permute.xlu0 %2306  ;;  %v2426_v53 = vld [vmem:[#allocation4 + $0x158] sm:$0xff]  ;;  %v2428_v24 = vld [vmem:[#allocation4 + $0x168] sm:$0xff]  ;;  %467 = vst.msk [vmem:[#allocation3 + $0x74] sm:$0xf] %vm450_vm1, %v14491_v17  ;;  %468 = vst.msk [vmem:[#allocation3 + $0x8c] sm:$0xf] %vm450_vm1, %v14491_v17 }
 0x2ed   : > { %2376 = vst.msk [vmem:[#allocation4 + $0x198] sm:$0xff] %vm14425_vm14, %v2305_v39  ;;  %2377 = vst.msk [vmem:[#allocation4 + $0x1a8] sm:$0xff] %vm14425_vm14, %v2307_v40  ;;  %v2468_v4 = vpack.c.bf16 %v2426_v53, %v2424_v2 }
 0x2ee   : > { %469 = vst.msk [vmem:[#allocation3 + $0xa4] sm:$0xf] %vm450_vm1, %v14491_v17  ;;  %470 = vst.msk [vmem:[#allocation3 + $0xbc] sm:$0xf] %vm450_vm1, %v14491_v17 }
 0x2ef   : > { %471 = vst.msk [vmem:[#allocation3 + $0xd4] sm:$0xf] %vm450_vm1, %v14491_v17  ;;  %472 = vst.msk [vmem:[#allocation3 + $0xec] sm:$0xf] %vm450_vm1, %v14491_v17 }
 0x2f0   : > { %v2309_v58 = vpop.permute.xlu1 %2308  ;;  %v2311_v63 = vpop.permute.xlu0 %2310  ;;  %2720 = vmatmul.mubr.bf16.gmra.mrb[20].mxu0 %v2457_v51  ;;  %v2430_v8 = vld [vmem:[#allocation4 + $0x178] sm:$0xff]  ;;  %v2432_v62 = vld [vmem:[#allocation4 + $0x188] sm:$0xff]  ;;  %473 = vst.msk [vmem:[#allocation3 + $0x104] sm:$0xf] %vm450_vm1, %v14491_v17  ;;  %474 = vst.msk [vmem:[#allocation3 + $0x11c] sm:$0xf] %vm450_vm1, %v14491_v17 }
 0x2f1   : > { %2378 = vst.msk [vmem:[#allocation4 + $0x1b8] sm:$0xff] %vm14425_vm14, %v2309_v58  ;;  %2379 = vst.msk [vmem:[#allocation4 + $0x1c8] sm:$0xff] %vm14425_vm14, %v2311_v63  ;;  %9334 = vmatprep.mubr.msk.bf16.mxu0 %vm14424_vm15, %v2460_v57  ;;  %v2470_v15 = vpack.c.bf16 %v2430_v8, %v2428_v24  ;;  %v2441_v51 = vld [vmem:[#allocation4 + $0x1d0] sm:$0xff] }
 0x2f2   : > { %475 = vst.msk [vmem:[#allocation3 + $0x134] sm:$0xf] %vm450_vm1, %v14491_v17  ;;  %476 = vst.msk [vmem:[#allocation3 + $0x14c] sm:$0xf] %vm450_vm1, %v14491_v17  ;;  %v2475_v58 = vpack.c.bf16 %v2441_v51, %v2439_v52  ;;  %v2445_v63 = vld [vmem:[#allocation4 + $0x1f0] sm:$0xff] }
 0x2f3   : > { %477 = vst.msk [vmem:[#allocation3 + $0x164] sm:$0xf] %vm450_vm1, %v14491_v17  ;;  %478 = vst.msk [vmem:[#allocation3 + $0x17c] sm:$0xf] %vm450_vm1, %v14491_v17 }
 0x2f4   : > { %v2313_v6 = vpop.permute.xlu1 %2312  ;;  %v2315_v12 = vpop.permute.xlu0 %2314  ;;  %v2434_v36 = vld [vmem:[#allocation4 + $0x198] sm:$0xff]  ;;  %479 = vst.msk [vmem:[#allocation3 + $0x194] sm:$0xf] %vm450_vm1, %v14491_v17  ;;  %480 = vst.msk [vmem:[#allocation3 + $0x1ac] sm:$0xf] %vm450_vm1, %v14491_v17  ;;  %v2436_v25 = vld [vmem:[#allocation4 + $0x1a8] sm:$0xff] }
 0x2f5   : > { %2380 = vst.msk [vmem:[#allocation4 + $0x1d8] sm:$0xff] %vm14425_vm14, %v2313_v6  ;;  %2381 = vst.msk [vmem:[#allocation4 + $0x1e8] sm:$0xff] %vm14425_vm14, %v2315_v12  ;;  %v2472_v9 = vpack.c.bf16 %v2434_v36, %v2432_v62  ;;  %v2477_v6 = vpack.c.bf16 %v2445_v63, %v2443_v1 }
 0x2f6   : > { %481 = vst.msk [vmem:[#allocation3 + $0x1c4] sm:$0xf] %vm450_vm1, %v14491_v17  ;;  %482 = vst.msk [vmem:[#allocation3 + $0x1dc] sm:$0xf] %vm450_vm1, %v14491_v17  ;;  %vm3483_vm1 = vcmask 261312  }
 0x2f7   : > { %2905 = vst.msk [vmem:[#allocation4] sm:$0xff] %vm515_vm3, %v2873_v7 }
 0x2f8   : > { %2728 = vmatmul.mubr.bf16.gmra.mrb[24].mxu0 %v2459_v30  ;;  %v2317_v50 = vpop.permute.xlu1 %2316  ;;  %v2438_v19 = vld [vmem:[#allocation4 + $0x1b8] sm:$0xff]  ;;  %v2440_v39 = vld [vmem:[#allocation4 + $0x1c8] sm:$0xff] }
 0x2f9   : > { %9335 = vmatprep.mubr.msk.bf16.mxu0 %vm14424_vm15, %v2462_v48  ;;  %2382 = vst.msk [vmem:[#allocation4 + $0x1f8] sm:$0xff] %vm14425_vm14, %v2317_v50  ;;  %v2474_v29 = vpack.c.bf16 %v2438_v19, %v2436_v25  ;;  %v2874_v30 = vld [vmem:[#allocation3 + $0x3a] sm:$0xff]  ;;  %v2875_v48 = vld [vmem:[#allocation3 + $0x4a] sm:$0xff]  ;;  %vm3869_vm14 = vcmask 392512  }
 0x2fa   : > { %2906 = vst.msk [vmem:[#allocation4 + $0x10] sm:$0xff] %vm515_vm3, %v2874_v30  ;;  %2907 = vst.msk [vmem:[#allocation4 + $0x20] sm:$0xff] %vm515_vm3, %v2875_v48 }
 0x2fc   : > { %v2442_v28 = vld [vmem:[#allocation4 + $0x1d8] sm:$0xff]  ;;  %v2444_v45 = vld [vmem:[#allocation4 + $0x1e8] sm:$0xff] }
 0x2fd   : > { %v2476_v40 = vpack.c.bf16 %v2442_v28, %v2440_v39 }
 0x300   : > { %2736 = vmatmul.mubr.bf16.gmra.mrb[28].mxu0 %v2461_v44  ;;  %v2446_v46 = vld [vmem:[#allocation4 + $0x1f8] sm:$0xff] }
 0x301   : > { %9336 = vmatprep.mubr.msk.bf16.mxu0 %vm14424_vm15, %v2464_v22  ;;  %v2478_v57 = vpack.c.bf16 %v2446_v46, %v2444_v45 }
 0x308   : > { %2744 = vmatmul.mubr.bf16.gmra.mrb[32].mxu0 %v2463_v41 }
 0x309   : > { %9337 = vmatprep.mubr.msk.bf16.mxu0 %vm14424_vm15, %v2466_v47 }
 0x310   : > { %2752 = vmatmul.mubr.bf16.gmra.mrb[36].mxu0 %v2465_v61 }
 0x311   : > { %9338 = vmatprep.mubr.msk.bf16.mxu0 %vm14424_vm15, %v2468_v4 }
 0x318   : > { %2760 = vmatmul.mubr.bf16.gmra.mrb[40].mxu0 %v2467_v18 }
 0x319   : > { %9339 = vmatprep.mubr.msk.bf16.mxu0 %vm14424_vm15, %v2470_v15 }
 0x320   : > { %2768 = vmatmul.mubr.bf16.gmra.mrb[44].mxu0 %v2469_v60 }
 0x321   : > { %9340 = vmatprep.mubr.msk.bf16.mxu0 %vm14424_vm15, %v2472_v9 }
 0x328   : > { %2776 = vmatmul.mubr.bf16.gmra.mrb[48].mxu0 %v2471_v21 }
 0x329   : > { %9341 = vmatprep.mubr.msk.bf16.mxu0 %vm14424_vm15, %v2474_v29 }
 0x330   : > { %2784 = vmatmul.mubr.bf16.gmra.mrb[52].mxu0 %v2473_v34 }
 0x331   : > { %9342 = vmatprep.mubr.msk.bf16.mxu0 %vm14424_vm15, %v2476_v40 }
 0x338   : > { %2792 = vmatmul.mubr.bf16.gmra.mrb[56].mxu0 %v2475_v58 }
 0x339   : > { %9343 = vmatprep.mubr.msk.bf16.mxu0 %vm14424_vm15, %v2478_v57  ;;  %vm3676_vm15 = vcmask 326912  }
 0x340   : > { %2800 = vmatmul.mubr.bf16.gmra.mrb[60].mxu0 %v2477_v6 }
 0x348   : > { %v3002_v12 = vpop.permute.xlu0 %3001 }
 0x349   : > { %3098 = vst.msk [vmem:[#allocation4] sm:$0xff] %vm3097_vm2, %v3002_v12 }
 0x34c   : > { %v3006_v50 = vpop.permute.xlu0 %3005 }
 0x34d   : > { %3100 = vst.msk [vmem:[#allocation4 + $0x20] sm:$0xff] %vm3097_vm2, %v3006_v50 }
 0x354   : > { %v3004_v14 = vpop.permute.xlu1 %3003 }
 0x355   : > { %3099 = vst.msk [vmem:[#allocation4 + $0x10] sm:$0xff] %vm3097_vm2, %v3004_v14 }
 0x358   : > { %v3008_v38 = vpop.permute.xlu1 %3007 }
 0x359   : > { %3101 = vst.msk [vmem:[#allocation4 + $0x30] sm:$0xff] %vm3097_vm2, %v3008_v38 }
 0x39b   : > { %v2681_v5 = vpop.f32.mrb[0].mxu0 }
 0x39c   : > { %v2682_v44 = vadd.f32 %v11156_v32, %v2681_v5  ;;  %v2683_v31 = vpop.f32.mrb[1].mxu0 }
 0x39d   : > { %v2684_v22 = vpop.f32.mrb[2].mxu0 }
 0x39e   : > { %v2808_v11 = vmax.f32 %v2682_v44, 0.0  ;;  %v2685_v35 = vadd.f32 %v11156_v32, %v2684_v22  ;;  %v2686_v37 = vpop.f32.mrb[3].mxu0 }
 0x3a0   : > { %2840 = vst.msk [vmem:[#allocation3 + $0x64] sm:$0xff] %vm515_vm3, %v2808_v11  ;;  %v2809_v41 = vmax.f32 %v2685_v35, 0.0 }
 0x3a2   : > { %2841 = vst.msk [vmem:[#allocation3 + $0x6c] sm:$0xff] %vm515_vm3, %v2809_v41 }
 0x3a3   : > { %v2689_v43 = vpop.f32.mrb[4].mxu0 }
 0x3a4   : > { %v2690_v47 = vadd.f32 %v11156_v32, %v2689_v43  ;;  %v2691_v49 = vpop.f32.mrb[5].mxu0 }
 0x3a5   : > { %v2692_v53 = vpop.f32.mrb[6].mxu0 }
 0x3a6   : > { %v2810_v59 = vmax.f32 %v2690_v47, 0.0  ;;  %v2693_v61 = vadd.f32 %v11156_v32, %v2692_v53  ;;  %v2694_v2 = vpop.f32.mrb[7].mxu0 }
 0x3a7   : > { %v11170_v4 = vld [vmem:[#allocation3 + $0x64] sm:$0xff] }
 0x3a8   : > { %v11172_v54 = vld [vmem:[#allocation3 + $0x62] sm:$0xff]  ;;  %2842 = vst.msk [vmem:[#allocation3 + $0x7c] sm:$0xff] %vm515_vm3, %v2810_v59  ;;  %v2811_v8 = vmax.f32 %v2693_v61, 0.0  ;;  %3009 = vrot.lane.b32.xlu0 %v11170_v4, %s9642_s20 }
 0x3a9   : > { %2909 = vst.msk [vmem:[#allocation4 + $0x40] sm:$0xff] %vm515_vm3, %v11172_v54  ;;  %v11179_v10 = vld [vmem:[#allocation3 + $0x6c] sm:$0xff] }
 0x3aa   : > { %v11181_v18 = vld [vmem:[#allocation3 + $0x6a] sm:$0xff]  ;;  %2843 = vst.msk [vmem:[#allocation3 + $0x84] sm:$0xff] %vm515_vm3, %v2811_v8  ;;  %3011 = vrot.lane.b32.xlu1 %v11179_v10, %s9642_s20 }
 0x3ab   : > { %2910 = vst.msk [vmem:[#allocation4 + $0x50] sm:$0xff] %vm515_vm3, %v11181_v18  ;;  %v2697_v24 = vpop.f32.mrb[8].mxu0 }
 0x3ac   : > { %v2698_v15 = vadd.f32 %v11156_v32, %v2697_v24  ;;  %v2699_v20 = vpop.f32.mrb[9].mxu0 }
 0x3ad   : > { %v2700_v36 = vpop.f32.mrb[10].mxu0 }
 0x3ae   : > { %v2812_v42 = vmax.f32 %v2698_v15, 0.0  ;;  %v2701_v60 = vadd.f32 %v11156_v32, %v2700_v36  ;;  %v2702_v62 = vpop.f32.mrb[11].mxu0 }
 0x3af   : > { %v11190_v9 = vld [vmem:[#allocation3 + $0x7c] sm:$0xff] }
 0x3b0   : > { %v11192_v56 = vld [vmem:[#allocation3 + $0x7a] sm:$0xff]  ;;  %2844 = vst.msk [vmem:[#allocation3 + $0x94] sm:$0xff] %vm515_vm3, %v2812_v42  ;;  %v2813_v0 = vmax.f32 %v2701_v60, 0.0  ;;  %3013 = vrot.lane.b32.xlu0 %v11190_v9, %s9642_s20 }
 0x3b1   : > { %2911 = vst.msk [vmem:[#allocation4 + $0x60] sm:$0xff] %vm515_vm3, %v11192_v56  ;;  %v11199_v13 = vld [vmem:[#allocation3 + $0x84] sm:$0xff] }
 0x3b2   : > { %2845 = vst.msk [vmem:[#allocation3 + $0x9c] sm:$0xff] %vm515_vm3, %v2813_v0  ;;  %3015 = vrot.lane.b32.xlu1 %v11199_v13, %s9642_s20  ;;  %v11204_v17 = vld [vmem:[#allocation3 + $0x82] sm:$0xff] }
 0x3b3   : > { %v2705_v19 = vpop.f32.mrb[12].mxu0  ;;  %2912 = vst.msk [vmem:[#allocation4 + $0x70] sm:$0xff] %vm515_vm3, %v11204_v17 }
 0x3b4   : > { %v2706_v26 = vadd.f32 %v11156_v32, %v2705_v19  ;;  %v2707_v21 = vpop.f32.mrb[13].mxu0 }
 0x3b5   : > { %v2708_v25 = vpop.f32.mrb[14].mxu0 }
 0x3b6   : > { %v2814_v16 = vmax.f32 %v2706_v26, 0.0  ;;  %v2709_v29 = vadd.f32 %v11156_v32, %v2708_v25  ;;  %v2710_v23 = vpop.f32.mrb[15].mxu0 }
 0x3b7   : > { %v11210_v27 = vld [vmem:[#allocation3 + $0x94] sm:$0xff] }
 0x3b8   : > { %v11212_v28 = vld [vmem:[#allocation3 + $0x92] sm:$0xff]  ;;  %2846 = vst.msk [vmem:[#allocation3 + $0xac] sm:$0xff] %vm515_vm3, %v2814_v16  ;;  %v2815_v33 = vmax.f32 %v2709_v29, 0.0  ;;  %3017 = vrot.lane.b32.xlu0 %v11210_v27, %s9642_s20 }
 0x3b9   : > { %2913 = vst.msk [vmem:[#allocation4 + $0x80] sm:$0xff] %vm515_vm3, %v11212_v28  ;;  %v11219_v34 = vld [vmem:[#allocation3 + $0x9c] sm:$0xff] }
 0x3ba   : > { %2847 = vst.msk [vmem:[#allocation3 + $0xb4] sm:$0xff] %vm515_vm3, %v2815_v33  ;;  %3019 = vrot.lane.b32.xlu1 %v11219_v34, %s9642_s20  ;;  %v11224_v39 = vld [vmem:[#allocation3 + $0x9a] sm:$0xff] }
 0x3bb   : > { %v2713_v40 = vpop.f32.mrb[16].mxu0  ;;  %2914 = vst.msk [vmem:[#allocation4 + $0x90] sm:$0xff] %vm515_vm3, %v11224_v39 }
 0x3bc   : > { %v2714_v45 = vadd.f32 %v11156_v32, %v2713_v40  ;;  %v2715_v46 = vpop.f32.mrb[17].mxu0 }
 0x3bd   : > { %v2716_v51 = vpop.f32.mrb[18].mxu0 }
 0x3be   : > { %v2816_v52 = vmax.f32 %v2714_v45, 0.0  ;;  %v2717_v57 = vadd.f32 %v11156_v32, %v2716_v51  ;;  %v2718_v58 = vpop.f32.mrb[19].mxu0 }
 0x3bf   : > { %v11230_v63 = vld [vmem:[#allocation3 + $0xac] sm:$0xff] }
 0x3c0   : > { %v11232_v1 = vld [vmem:[#allocation3 + $0xaa] sm:$0xff]  ;;  %2848 = vst.msk [vmem:[#allocation3 + $0xc4] sm:$0xff] %vm515_vm3, %v2816_v52  ;;  %v2817_v6 = vmax.f32 %v2717_v57, 0.0  ;;  %3021 = vrot.lane.b32.xlu0 %v11230_v63, %s9642_s20 }
 0x3c1   : > { %2915 = vst.msk [vmem:[#allocation4 + $0xa0] sm:$0xff] %vm515_vm3, %v11232_v1  ;;  %v11239_v7 = vld [vmem:[#allocation3 + $0xb4] sm:$0xff] }
 0x3c2   : > { %2849 = vst.msk [vmem:[#allocation3 + $0xcc] sm:$0xff] %vm515_vm3, %v2817_v6  ;;  %3023 = vrot.lane.b32.xlu1 %v11239_v7, %s9642_s20  ;;  %v11244_v12 = vld [vmem:[#allocation3 + $0xb2] sm:$0xff] }
 0x3c3   : > { %v2721_v14 = vpop.f32.mrb[20].mxu0  ;;  %2916 = vst.msk [vmem:[#allocation4 + $0xb0] sm:$0xff] %vm515_vm3, %v11244_v12 }
 0x3c4   : > { %v2722_v30 = vadd.f32 %v11156_v32, %v2721_v14  ;;  %v2723_v48 = vpop.f32.mrb[21].mxu0 }
 0x3c5   : > { %v2724_v50 = vpop.f32.mrb[22].mxu0 }
 0x3c6   : > { %v2818_v3 = vmax.f32 %v2722_v30, 0.0  ;;  %v2725_v5 = vadd.f32 %v11156_v32, %v2724_v50  ;;  %v2726_v38 = vpop.f32.mrb[23].mxu0 }
 0x3c7   : > { %v11250_v44 = vld [vmem:[#allocation3 + $0xc4] sm:$0xff] }
 0x3c8   : > { %v11252_v31 = vld [vmem:[#allocation3 + $0xc2] sm:$0xff]  ;;  %2850 = vst.msk [vmem:[#allocation3 + $0xdc] sm:$0xff] %vm515_vm3, %v2818_v3  ;;  %v2819_v22 = vmax.f32 %v2725_v5, 0.0  ;;  %3025 = vrot.lane.b32.xlu0 %v11250_v44, %s9642_s20 }
 0x3c9   : > { %2917 = vst.msk [vmem:[#allocation4 + $0xc0] sm:$0xff] %vm515_vm3, %v11252_v31  ;;  %v11259_v11 = vld [vmem:[#allocation3 + $0xcc] sm:$0xff] }
 0x3ca   : > { %2851 = vst.msk [vmem:[#allocation3 + $0xe4] sm:$0xff] %vm515_vm3, %v2819_v22  ;;  %3027 = vrot.lane.b32.xlu1 %v11259_v11, %s9642_s20  ;;  %v11264_v35 = vld [vmem:[#allocation3 + $0xca] sm:$0xff] }
 0x3cb   : > { %v2729_v37 = vpop.f32.mrb[24].mxu0  ;;  %2918 = vst.msk [vmem:[#allocation4 + $0xd0] sm:$0xff] %vm515_vm3, %v11264_v35 }
 0x3cc   : > { %v2730_v41 = vadd.f32 %v11156_v32, %v2729_v37  ;;  %v2731_v43 = vpop.f32.mrb[25].mxu0 }
 0x3cd   : > { %v2732_v47 = vpop.f32.mrb[26].mxu0 }
 0x3ce   : > { %v2820_v49 = vmax.f32 %v2730_v41, 0.0  ;;  %v2733_v53 = vadd.f32 %v11156_v32, %v2732_v47  ;;  %v2734_v59 = vpop.f32.mrb[27].mxu0 }
 0x3cf   : > { %v11270_v61 = vld [vmem:[#allocation3 + $0xdc] sm:$0xff] }
 0x3d0   : > { %v11272_v2 = vld [vmem:[#allocation3 + $0xda] sm:$0xff]  ;;  %2852 = vst.msk [vmem:[#allocation3 + $0xf4] sm:$0xff] %vm515_vm3, %v2820_v49  ;;  %v2821_v8 = vmax.f32 %v2733_v53, 0.0  ;;  %3029 = vrot.lane.b32.xlu0 %v11270_v61, %s9642_s20 }
 0x3d1   : > { %2919 = vst.msk [vmem:[#allocation4 + $0xe0] sm:$0xff] %vm515_vm3, %v11272_v2  ;;  %v11279_v24 = vld [vmem:[#allocation3 + $0xe4] sm:$0xff] }
 0x3d2   : > { %2853 = vst.msk [vmem:[#allocation3 + $0xfc] sm:$0xff] %vm515_vm3, %v2821_v8  ;;  %3031 = vrot.lane.b32.xlu1 %v11279_v24, %s9642_s20  ;;  %v11284_v15 = vld [vmem:[#allocation3 + $0xe2] sm:$0xff] }
 0x3d3   : > { %v2737_v20 = vpop.f32.mrb[28].mxu0  ;;  %2920 = vst.msk [vmem:[#allocation4 + $0xf0] sm:$0xff] %vm515_vm3, %v11284_v15 }
 0x3d4   : > { %v2738_v36 = vadd.f32 %v11156_v32, %v2737_v20  ;;  %v2739_v42 = vpop.f32.mrb[29].mxu0 }
 0x3d5   : > { %v2740_v60 = vpop.f32.mrb[30].mxu0 }
 0x3d6   : > { %v2822_v62 = vmax.f32 %v2738_v36, 0.0  ;;  %v2741_v0 = vadd.f32 %v11156_v32, %v2740_v60  ;;  %v2742_v19 = vpop.f32.mrb[31].mxu0 }
 0x3d7   : > { %v11290_v26 = vld [vmem:[#allocation3 + $0xf4] sm:$0xff] }
 0x3d8   : > { %v11292_v21 = vld [vmem:[#allocation3 + $0xf2] sm:$0xff]  ;;  %2854 = vst.msk [vmem:[#allocation3 + $0x10c] sm:$0xff] %vm515_vm3, %v2822_v62  ;;  %v2823_v25 = vmax.f32 %v2741_v0, 0.0  ;;  %3033 = vrot.lane.b32.xlu0 %v11290_v26, %s9642_s20 }
 0x3d9   : > { %2921 = vst.msk [vmem:[#allocation4 + $0x100] sm:$0xff] %vm515_vm3, %v11292_v21  ;;  %v11299_v16 = vld [vmem:[#allocation3 + $0xfc] sm:$0xff] }
 0x3da   : > { %2855 = vst.msk [vmem:[#allocation3 + $0x114] sm:$0xff] %vm515_vm3, %v2823_v25  ;;  %3035 = vrot.lane.b32.xlu1 %v11299_v16, %s9642_s20  ;;  %v11304_v29 = vld [vmem:[#allocation3 + $0xfa] sm:$0xff] }
 0x3db   : > { %v2745_v23 = vpop.f32.mrb[32].mxu0  ;;  %2922 = vst.msk [vmem:[#allocation4 + $0x110] sm:$0xff] %vm515_vm3, %v11304_v29 }
 0x3dc   : > { %v2746_v33 = vadd.f32 %v11156_v32, %v2745_v23  ;;  %v2747_v40 = vpop.f32.mrb[33].mxu0 }
 0x3dd   : > { %v2748_v45 = vpop.f32.mrb[34].mxu0 }
 0x3de   : > { %v2824_v46 = vmax.f32 %v2746_v33, 0.0  ;;  %v2749_v51 = vadd.f32 %v11156_v32, %v2748_v45  ;;  %v2750_v52 = vpop.f32.mrb[35].mxu0 }
 0x3df   : > { %v11310_v57 = vld [vmem:[#allocation3 + $0x10c] sm:$0xff] }
 0x3e0   : > { %v11312_v58 = vld [vmem:[#allocation3 + $0x10a] sm:$0xff]  ;;  %2856 = vst.msk [vmem:[#allocation3 + $0x124] sm:$0xff] %vm515_vm3, %v2824_v46  ;;  %v2825_v6 = vmax.f32 %v2749_v51, 0.0  ;;  %3037 = vrot.lane.b32.xlu0 %v11310_v57, %s9642_s20 }
 0x3e1   : > { %2923 = vst.msk [vmem:[#allocation4 + $0x120] sm:$0xff] %vm515_vm3, %v11312_v58  ;;  %v11319_v14 = vld [vmem:[#allocation3 + $0x114] sm:$0xff] }
 0x3e2   : > { %2857 = vst.msk [vmem:[#allocation3 + $0x12c] sm:$0xff] %vm515_vm3, %v2825_v6  ;;  %3039 = vrot.lane.b32.xlu1 %v11319_v14, %s9642_s20  ;;  %v11324_v30 = vld [vmem:[#allocation3 + $0x112] sm:$0xff] }
 0x3e3   : > { %v2753_v48 = vpop.f32.mrb[36].mxu0  ;;  %2924 = vst.msk [vmem:[#allocation4 + $0x130] sm:$0xff] %vm515_vm3, %v11324_v30 }
 0x3e4   : > { %v2754_v50 = vadd.f32 %v11156_v32, %v2753_v48  ;;  %v2755_v3 = vpop.f32.mrb[37].mxu0 }
 0x3e5   : > { %v2756_v5 = vpop.f32.mrb[38].mxu0 }
 0x3e6   : > { %v2826_v38 = vmax.f32 %v2754_v50, 0.0  ;;  %v2757_v22 = vadd.f32 %v11156_v32, %v2756_v5  ;;  %v2758_v37 = vpop.f32.mrb[39].mxu0 }
 0x3e7   : > { %v11330_v41 = vld [vmem:[#allocation3 + $0x124] sm:$0xff] }
 0x3e8   : > { %v11332_v43 = vld [vmem:[#allocation3 + $0x122] sm:$0xff]  ;;  %2858 = vst.msk [vmem:[#allocation3 + $0x13c] sm:$0xff] %vm515_vm3, %v2826_v38  ;;  %v2827_v47 = vmax.f32 %v2757_v22, 0.0  ;;  %3041 = vrot.lane.b32.xlu0 %v11330_v41, %s9642_s20 }
 0x3e9   : > { %2925 = vst.msk [vmem:[#allocation4 + $0x140] sm:$0xff] %vm515_vm3, %v11332_v43  ;;  %v11339_v49 = vld [vmem:[#allocation3 + $0x12c] sm:$0xff] }
 0x3ea   : > { %2859 = vst.msk [vmem:[#allocation3 + $0x144] sm:$0xff] %vm515_vm3, %v2827_v47  ;;  %3043 = vrot.lane.b32.xlu1 %v11339_v49, %s9642_s20  ;;  %v11344_v53 = vld [vmem:[#allocation3 + $0x12a] sm:$0xff] }
 0x3eb   : > { %v2761_v59 = vpop.f32.mrb[40].mxu0  ;;  %2926 = vst.msk [vmem:[#allocation4 + $0x150] sm:$0xff] %vm515_vm3, %v11344_v53 }
 0x3ec   : > { %v2762_v8 = vadd.f32 %v11156_v32, %v2761_v59  ;;  %v2763_v20 = vpop.f32.mrb[41].mxu0 }
 0x3ed   : > { %v2764_v36 = vpop.f32.mrb[42].mxu0 }
 0x3ee   : > { %v2828_v42 = vmax.f32 %v2762_v8, 0.0  ;;  %v2765_v60 = vadd.f32 %v11156_v32, %v2764_v36  ;;  %v2766_v62 = vpop.f32.mrb[43].mxu0 }
 0x3ef   : > { %v11350_v0 = vld [vmem:[#allocation3 + $0x13c] sm:$0xff] }
 0x3f0   : > { %v11352_v19 = vld [vmem:[#allocation3 + $0x13a] sm:$0xff]  ;;  %2860 = vst.msk [vmem:[#allocation3 + $0x154] sm:$0xff] %vm515_vm3, %v2828_v42  ;;  %v2829_v25 = vmax.f32 %v2765_v60, 0.0  ;;  %3045 = vrot.lane.b32.xlu0 %v11350_v0, %s9642_s20 }
 0x3f1   : > { %2927 = vst.msk [vmem:[#allocation4 + $0x160] sm:$0xff] %vm515_vm3, %v11352_v19  ;;  %v11359_v23 = vld [vmem:[#allocation3 + $0x144] sm:$0xff] }
 0x3f2   : > { %2861 = vst.msk [vmem:[#allocation3 + $0x15c] sm:$0xff] %vm515_vm3, %v2829_v25  ;;  %3047 = vrot.lane.b32.xlu1 %v11359_v23, %s9642_s20  ;;  %v11364_v33 = vld [vmem:[#allocation3 + $0x142] sm:$0xff] }
 0x3f3   : > { %v2769_v40 = vpop.f32.mrb[44].mxu0  ;;  %2928 = vst.msk [vmem:[#allocation4 + $0x170] sm:$0xff] %vm515_vm3, %v11364_v33 }
 0x3f4   : > { %v2770_v45 = vadd.f32 %v11156_v32, %v2769_v40  ;;  %v2771_v46 = vpop.f32.mrb[45].mxu0 }
 0x3f5   : > { %v2772_v51 = vpop.f32.mrb[46].mxu0 }
 0x3f6   : > { %v2830_v52 = vmax.f32 %v2770_v45, 0.0  ;;  %v2773_v6 = vadd.f32 %v11156_v32, %v2772_v51  ;;  %v2774_v48 = vpop.f32.mrb[47].mxu0 }
 0x3f7   : > { %v11370_v50 = vld [vmem:[#allocation3 + $0x154] sm:$0xff] }
 0x3f8   : > { %v11372_v3 = vld [vmem:[#allocation3 + $0x152] sm:$0xff]  ;;  %2862 = vst.msk [vmem:[#allocation3 + $0x16c] sm:$0xff] %vm515_vm3, %v2830_v52  ;;  %v2831_v5 = vmax.f32 %v2773_v6, 0.0  ;;  %3049 = vrot.lane.b32.xlu0 %v11370_v50, %s9642_s20 }
 0x3f9   : > { %2929 = vst.msk [vmem:[#allocation4 + $0x180] sm:$0xff] %vm515_vm3, %v11372_v3  ;;  %v11379_v38 = vld [vmem:[#allocation3 + $0x15c] sm:$0xff] }
 0x3fa   : > { %2863 = vst.msk [vmem:[#allocation3 + $0x174] sm:$0xff] %vm515_vm3, %v2831_v5  ;;  %3051 = vrot.lane.b32.xlu1 %v11379_v38, %s9642_s20  ;;  %v11384_v22 = vld [vmem:[#allocation3 + $0x15a] sm:$0xff] }
 0x3fb   : > { %v2777_v37 = vpop.f32.mrb[48].mxu0  ;;  %2930 = vst.msk [vmem:[#allocation4 + $0x190] sm:$0xff] %vm515_vm3, %v11384_v22 }
 0x3fc   : > { %v2778_v47 = vadd.f32 %v11156_v32, %v2777_v37  ;;  %v2779_v59 = vpop.f32.mrb[49].mxu0 }
 0x3fd   : > { %v2780_v8 = vpop.f32.mrb[50].mxu0 }
 0x3fe   : > { %v2832_v20 = vmax.f32 %v2778_v47, 0.0  ;;  %v2781_v36 = vadd.f32 %v11156_v32, %v2780_v8  ;;  %v2782_v42 = vpop.f32.mrb[51].mxu0 }
 0x3ff   : > { %v11390_v60 = vld [vmem:[#allocation3 + $0x16c] sm:$0xff] }
 0x400   : > { %v11392_v62 = vld [vmem:[#allocation3 + $0x16a] sm:$0xff]  ;;  %2864 = vst.msk [vmem:[#allocation3 + $0x184] sm:$0xff] %vm515_vm3, %v2832_v20  ;;  %v2833_v25 = vmax.f32 %v2781_v36, 0.0  ;;  %3053 = vrot.lane.b32.xlu0 %v11390_v60, %s9642_s20 }
 0x401   : > { %2931 = vst.msk [vmem:[#allocation4 + $0x1a0] sm:$0xff] %vm515_vm3, %v11392_v62  ;;  %v11399_v40 = vld [vmem:[#allocation3 + $0x174] sm:$0xff] }
 0x402   : > { %14492 = vst [vmem:[#allocation5_spill] sm:$0xff] %v11399_v40  ;;  %2865 = vst.msk [vmem:[#allocation3 + $0x18c] sm:$0xff] %vm515_vm3, %v2833_v25  ;;  %3055 = vrot.lane.b32.xlu1 %v11399_v40, %s9642_s20  ;;  %v11404_v45 = vld [vmem:[#allocation3 + $0x172] sm:$0xff] }
 0x403   : > { %v2785_v46 = vpop.f32.mrb[52].mxu0  ;;  %2932 = vst.msk [vmem:[#allocation4 + $0x1b0] sm:$0xff] %vm515_vm3, %v11404_v45 }
 0x404   : > { %v2786_v51 = vadd.f32 %v11156_v32, %v2785_v46  ;;  %v2787_v52 = vpop.f32.mrb[53].mxu0 }
 0x405   : > { %v2788_v6 = vpop.f32.mrb[54].mxu0 }
 0x406   : > { %v2834_v48 = vmax.f32 %v2786_v51, 0.0  ;;  %v2789_v5 = vadd.f32 %v11156_v32, %v2788_v6  ;;  %v2790_v37 = vpop.f32.mrb[55].mxu0 }
 0x407   : > { %v11410_v47 = vld [vmem:[#allocation3 + $0x184] sm:$0xff] }
 0x408   : > { %14493 = vst [vmem:[#allocation6_spill] sm:$0xff] %v11410_v47  ;;  %v11412_v59 = vld [vmem:[#allocation3 + $0x182] sm:$0xff]  ;;  %2866 = vst.msk [vmem:[#allocation3 + $0x19c] sm:$0xff] %vm515_vm3, %v2834_v48  ;;  %v2835_v8 = vmax.f32 %v2789_v5, 0.0  ;;  %3057 = vrot.lane.b32.xlu0 %v11410_v47, %s9642_s20 }
 0x409   : > { %2933 = vst.msk [vmem:[#allocation4 + $0x1c0] sm:$0xff] %vm515_vm3, %v11412_v59  ;;  %v11419_v20 = vld [vmem:[#allocation3 + $0x18c] sm:$0xff] }
 0x40a   : > { %14494 = vst [vmem:[#allocation7_spill] sm:$0xff] %v11419_v20  ;;  %2867 = vst.msk [vmem:[#allocation3 + $0x1a4] sm:$0xff] %vm515_vm3, %v2835_v8  ;;  %3059 = vrot.lane.b32.xlu1 %v11419_v20, %s9642_s20  ;;  %v11424_v36 = vld [vmem:[#allocation3 + $0x18a] sm:$0xff] }
 0x40b   : > { %v2793_v42 = vpop.f32.mrb[56].mxu0  ;;  %2934 = vst.msk [vmem:[#allocation4 + $0x1d0] sm:$0xff] %vm515_vm3, %v11424_v36 }
 0x40c   : > { %v2794_v25 = vadd.f32 %v11156_v32, %v2793_v42  ;;  %v2795_v46 = vpop.f32.mrb[57].mxu0 }
 0x40d   : > { %v2796_v51 = vpop.f32.mrb[58].mxu0  ;;  %v3130_v46 = vld [vmem:[#allocation3 + $0x36] sm:$0xff] }
 0x40e   : > { %v2836_v52 = vmax.f32 %v2794_v25, 0.0  ;;  %v2797_v6 = vadd.f32 %v11156_v32, %v2796_v51  ;;  %v2798_v48 = vpop.f32.mrb[59].mxu0 }
 0x40f   : > { %v11430_v5 = vld [vmem:[#allocation3 + $0x19c] sm:$0xff] }
 0x410   : > { %14495 = vst [vmem:[#allocation8_spill] sm:$0xff] %v11430_v5  ;;  %v11432_v37 = vld [vmem:[#allocation3 + $0x19a] sm:$0xff]  ;;  %2868 = vst.msk [vmem:[#allocation3 + $0x1b4] sm:$0xff] %vm515_vm3, %v2836_v52  ;;  %v2837_v8 = vmax.f32 %v2797_v6, 0.0  ;;  %3061 = vrot.lane.b32.xlu0 %v11430_v5, %s9642_s20  ;;  %v3132_v5 = vld [vmem:[#allocation3 + $0x4e] sm:$0xff] }
 0x411   : > { %2935 = vst.msk [vmem:[#allocation4 + $0x1e0] sm:$0xff] %vm515_vm3, %v11432_v37  ;;  %v11439_v42 = vld [vmem:[#allocation3 + $0x1a4] sm:$0xff] }
 0x412   : > { %14496 = vst [vmem:[#allocation9_spill] sm:$0xff] %v11439_v42  ;;  %2869 = vst.msk [vmem:[#allocation3 + $0x1bc] sm:$0xff] %vm515_vm3, %v2837_v8  ;;  %3063 = vrot.lane.b32.xlu1 %v11439_v42, %s9642_s20  ;;  %v11444_v25 = vld [vmem:[#allocation3 + $0x1a2] sm:$0xff]  ;;  %v3133_v42 = vld [vmem:[#allocation3 + $0x56] sm:$0xff] }
 0x413   : > { %v2801_v51 = vpop.f32.mrb[60].mxu0  ;;  %v3131_v48 = vld [vmem:[#allocation3 + $0x3e] sm:$0xff]  ;;  %2936 = vst.msk [vmem:[#allocation4 + $0x1f0] sm:$0xff] %vm515_vm3, %v11444_v25 }
 0x414   : > { %v2802_v52 = vadd.f32 %v11156_v32, %v2801_v51  ;;  %v2803_v6 = vpop.f32.mrb[61].mxu0  ;;  %3194 = vrot.lane.b32.xlu0 %v3130_v46, %s9648_s29  ;;  %v11457_v46 = vld [vmem:[#allocation3 + $0x66] sm:$0xff] }
 0x415   : > { %v2804_v55 = vpop.f32.mrb[62].mxu0  ;;  %v11488_v6 = vld [vmem:[#allocation3 + $0xb6] sm:$0xff] }
 0x416   : > { %v2838_v20 = vmax.f32 %v2802_v52, 0.0  ;;  %v2805_v8 = vadd.f32 %v11156_v32, %v2804_v55  ;;  %v2806_v47 = vpop.f32.mrb[63].mxu0  ;;  %3196 = vrot.lane.b32.xlu1 %v3131_v48, %s9648_s29  ;;  %v11462_v55 = vld [vmem:[#allocation3 + $0x6e] sm:$0xff]  ;;  %v11466_v32 = vld [vmem:[#allocation3 + $0x7e] sm:$0xff]  ;;  %14497 = vst [vmem:[#allocation10_spill] sm:$0xff] %v11488_v6 }
 0x417   : > { %v11484_v48 = vld [vmem:[#allocation3 + $0xae] sm:$0xff] }
 0x418   : > { %2870 = vst.msk [vmem:[#allocation3 + $0x1cc] sm:$0xff] %vm515_vm3, %v2838_v20  ;;  %v2839_v40 = vmax.f32 %v2805_v8, 0.0  ;;  %3198 = vrot.lane.b32.xlu0 %v3132_v5, %s9648_s29  ;;  %v11475_v20 = vld [vmem:[#allocation3 + $0x96] sm:$0xff] }
 0x41a   : > { %2871 = vst.msk [vmem:[#allocation3 + $0x1d4] sm:$0xff] %vm515_vm3, %v2839_v40  ;;  %v3010_v51 = vpop.permute.xlu0 %3009  ;;  %3200 = vrot.lane.b32.xlu1 %v3133_v42, %s9648_s29  ;;  %v11470_v40 = vld [vmem:[#allocation3 + $0x86] sm:$0xff]  ;;  %v11480_v42 = vld [vmem:[#allocation3 + $0x9e] sm:$0xff] }
 0x41b   : > { %3102 = vst.msk [vmem:[#allocation4 + $0x40] sm:$0xff] %vm3097_vm2, %v3010_v51  ;;  %v11493_v51 = vld [vmem:[#allocation3 + $0xc6] sm:$0xff] }
 0x41c   : > { %v3012_v52 = vpop.permute.xlu1 %3011  ;;  %3202 = vrot.lane.b32.xlu0 %v11457_v46, %s9648_s29  ;;  %14498 = vst [vmem:[#allocation11_spill] sm:$0xff] %v11493_v51 }
 0x41d   : > { %3103 = vst.msk [vmem:[#allocation4 + $0x50] sm:$0xff] %vm3097_vm2, %v3012_v52 }
 0x41e   : > { %3204 = vrot.lane.b32.xlu1 %v11462_v55, %s9648_s29 }
 0x420   : > { %3206 = vrot.lane.b32.xlu0 %v11466_v32, %s9648_s29 }
 0x422   : > { %3208 = vrot.lane.b32.xlu1 %v11470_v40, %s9648_s29  ;;  %v3014_v47 = vpop.permute.xlu0 %3013 }
 0x423   : > { %3104 = vst.msk [vmem:[#allocation4 + $0x60] sm:$0xff] %vm3097_vm2, %v3014_v47  ;;  %v11498_v47 = vld [vmem:[#allocation3 + $0xce] sm:$0xff] }
 0x424   : > { %v3016_v5 = vpop.permute.xlu1 %3015  ;;  %3210 = vrot.lane.b32.xlu0 %v11475_v20, %s9648_s29  ;;  %14499 = vst [vmem:[#allocation12_spill] sm:$0xff] %v11498_v47 }
 0x425   : > { %3105 = vst.msk [vmem:[#allocation4 + $0x70] sm:$0xff] %vm3097_vm2, %v3016_v5  ;;  %v11502_v5 = vld [vmem:[#allocation3 + $0xde] sm:$0xff] }
 0x426   : > { %3212 = vrot.lane.b32.xlu1 %v11480_v42, %s9648_s29  ;;  %14500 = vst [vmem:[#allocation13_spill] sm:$0xff] %v11502_v5 }
 0x428   : > { %3214 = vrot.lane.b32.xlu0 %v11484_v48, %s9648_s29 }
 0x42a   : > { %3216 = vrot.lane.b32.xlu1 %v11488_v6, %s9648_s29  ;;  %v3018_v8 = vpop.permute.xlu0 %3017  ;;  %v11506_v6 = vld [vmem:[#allocation3 + $0xe6] sm:$0xff] }
 0x42b   : > { %3106 = vst.msk [vmem:[#allocation4 + $0x80] sm:$0xff] %vm3097_vm2, %v3018_v8  ;;  %14501 = vst [vmem:[#allocation14_spill] sm:$0xff] %v11506_v6 }
 0x42c   : > { %v3020_v52 = vpop.permute.xlu1 %3019  ;;  %3218 = vrot.lane.b32.xlu0 %v11493_v51, %s9648_s29  ;;  %v11511_v51 = vld [vmem:[#allocation3 + $0xf6] sm:$0xff] }
 0x42d   : > { %3107 = vst.msk [vmem:[#allocation4 + $0x90] sm:$0xff] %vm3097_vm2, %v3020_v52  ;;  %14502 = vst [vmem:[#allocation15_spill] sm:$0xff] %v11511_v51 }
 0x42e   : > { %3220 = vrot.lane.b32.xlu1 %v11498_v47, %s9648_s29  ;;  %v11516_v47 = vld [vmem:[#allocation3 + $0xfe] sm:$0xff] }
 0x42f   : > { %14503 = vst [vmem:[#allocation16_spill] sm:$0xff] %v11516_v47 }
 0x430   : > { %3222 = vrot.lane.b32.xlu0 %v11502_v5, %s9648_s29  ;;  %v11520_v5 = vld [vmem:[#allocation3 + $0x10e] sm:$0xff] }
 0x431   : > { %14504 = vst [vmem:[#allocation17_spill] sm:$0xff] %v11520_v5 }
 0x432   : > { %3224 = vrot.lane.b32.xlu1 %v11506_v6, %s9648_s29  ;;  %v3022_v8 = vpop.permute.xlu0 %3021  ;;  %v11524_v6 = vld [vmem:[#allocation3 + $0x116] sm:$0xff] }
 0x433   : > { %3108 = vst.msk [vmem:[#allocation4 + $0xa0] sm:$0xff] %vm3097_vm2, %v3022_v8  ;;  %14505 = vst [vmem:[#allocation18_spill] sm:$0xff] %v11524_v6 }
 0x434   : > { %v3024_v52 = vpop.permute.xlu1 %3023  ;;  %3226 = vrot.lane.b32.xlu0 %v11511_v51, %s9648_s29  ;;  %v11529_v51 = vld [vmem:[#allocation3 + $0x126] sm:$0xff] }
 0x435   : > { %3109 = vst.msk [vmem:[#allocation4 + $0xb0] sm:$0xff] %vm3097_vm2, %v3024_v52  ;;  %14506 = vst [vmem:[#allocation19_spill] sm:$0xff] %v11529_v51 }
 0x436   : > { %3228 = vrot.lane.b32.xlu1 %v11516_v47, %s9648_s29  ;;  %v11534_v47 = vld [vmem:[#allocation3 + $0x12e] sm:$0xff] }
 0x437   : > { %14507 = vst [vmem:[#allocation20_spill] sm:$0xff] %v11534_v47 }
 0x438   : > { %3230 = vrot.lane.b32.xlu0 %v11520_v5, %s9648_s29  ;;  %v11538_v5 = vld [vmem:[#allocation3 + $0x13e] sm:$0xff] }
 0x439   : > { %14508 = vst [vmem:[#allocation21_spill] sm:$0xff] %v11538_v5 }
 0x43a   : > { %3232 = vrot.lane.b32.xlu1 %v11524_v6, %s9648_s29  ;;  %v3026_v8 = vpop.permute.xlu0 %3025  ;;  %v11542_v6 = vld [vmem:[#allocation3 + $0x146] sm:$0xff] }
 0x43b   : > { %3110 = vst.msk [vmem:[#allocation4 + $0xc0] sm:$0xff] %vm3097_vm2, %v3026_v8  ;;  %14509 = vst [vmem:[#allocation22_spill] sm:$0xff] %v11542_v6 }
 0x43c   : > { %v3028_v52 = vpop.permute.xlu1 %3027  ;;  %3234 = vrot.lane.b32.xlu0 %v11529_v51, %s9648_s29  ;;  %v11547_v51 = vld [vmem:[#allocation3 + $0x156] sm:$0xff] }
 0x43d   : > { %3111 = vst.msk [vmem:[#allocation4 + $0xd0] sm:$0xff] %vm3097_vm2, %v3028_v52  ;;  %14510 = vst [vmem:[#allocation23_spill] sm:$0xff] %v11547_v51 }
 0x43e   : > { %3236 = vrot.lane.b32.xlu1 %v11534_v47, %s9648_s29  ;;  %v11552_v47 = vld [vmem:[#allocation3 + $0x15e] sm:$0xff] }
 0x43f   : > { %14511 = vst [vmem:[#allocation24_spill] sm:$0xff] %v11552_v47 }
 0x440   : > { %3238 = vrot.lane.b32.xlu0 %v11538_v5, %s9648_s29  ;;  %v11556_v5 = vld [vmem:[#allocation3 + $0x16e] sm:$0xff] }
 0x441   : > { %14512 = vst [vmem:[#allocation25_spill] sm:$0xff] %v11556_v5 }
 0x442   : > { %3240 = vrot.lane.b32.xlu1 %v11542_v6, %s9648_s29  ;;  %v3030_v8 = vpop.permute.xlu0 %3029  ;;  %v11560_v6 = vld [vmem:[#allocation3 + $0x176] sm:$0xff] }
 0x443   : > { %3112 = vst.msk [vmem:[#allocation4 + $0xe0] sm:$0xff] %vm3097_vm2, %v3030_v8  ;;  %14513 = vst [vmem:[#allocation26_spill] sm:$0xff] %v11560_v6 }
 0x444   : > { %v3032_v52 = vpop.permute.xlu1 %3031  ;;  %3242 = vrot.lane.b32.xlu0 %v11547_v51, %s9648_s29  ;;  %v11565_v51 = vld [vmem:[#allocation3 + $0x186] sm:$0xff] }
 0x445   : > { %3113 = vst.msk [vmem:[#allocation4 + $0xf0] sm:$0xff] %vm3097_vm2, %v3032_v52  ;;  %14514 = vst [vmem:[#allocation27_spill] sm:$0xff] %v11565_v51 }
 0x446   : > { %3244 = vrot.lane.b32.xlu1 %v11552_v47, %s9648_s29  ;;  %v11570_v47 = vld [vmem:[#allocation3 + $0x18e] sm:$0xff] }
 0x448   : > { %3246 = vrot.lane.b32.xlu0 %v11556_v5, %s9648_s29  ;;  %v11574_v5 = vld [vmem:[#allocation3 + $0x19e] sm:$0xff] }
 0x44a   : > { %3248 = vrot.lane.b32.xlu1 %v11560_v6, %s9648_s29  ;;  %v3034_v8 = vpop.permute.xlu0 %3033  ;;  %v11578_v6 = vld [vmem:[#allocation3 + $0x1a6] sm:$0xff] }
 0x44b   : > { %3114 = vst.msk [vmem:[#allocation4 + $0x100] sm:$0xff] %vm3097_vm2, %v3034_v8  ;;  %14515 = vst [vmem:[#allocation28_spill] sm:$0xff] %v11578_v6 }
 0x44c   : > { %v3036_v52 = vpop.permute.xlu1 %3035  ;;  %3250 = vrot.lane.b32.xlu0 %v11565_v51, %s9648_s29 }
 0x44d   : > { %3115 = vst.msk [vmem:[#allocation4 + $0x110] sm:$0xff] %vm3097_vm2, %v3036_v52 }
 0x44e   : > { %3252 = vrot.lane.b32.xlu1 %v11570_v47, %s9648_s29 }
 0x450   : > { %3254 = vrot.lane.b32.xlu0 %v11574_v5, %s9648_s29 }
 0x452   : > { %3256 = vrot.lane.b32.xlu1 %v11578_v6, %s9648_s29  ;;  %v3038_v8 = vpop.permute.xlu0 %3037 }
 0x453   : > { %3116 = vst.msk [vmem:[#allocation4 + $0x120] sm:$0xff] %vm3097_vm2, %v3038_v8 }
 0x454   : > { %v3040_v51 = vpop.permute.xlu1 %3039  ;;  %3387 = vrot.lane.b32.xlu0 %v11172_v54, %s9643_s24 }
 0x455   : > { %3117 = vst.msk [vmem:[#allocation4 + $0x130] sm:$0xff] %vm3097_vm2, %v3040_v51 }
 0x456   : > { %3389 = vrot.lane.b32.xlu1 %v11181_v18, %s9643_s24 }
 0x458   : > { %3391 = vrot.lane.b32.xlu0 %v11192_v56, %s9643_s24 }
 0x45a   : > { %3393 = vrot.lane.b32.xlu1 %v11204_v17, %s9643_s24  ;;  %v3042_v52 = vpop.permute.xlu0 %3041 }
 0x45b   : > { %3118 = vst.msk [vmem:[#allocation4 + $0x140] sm:$0xff] %vm3097_vm2, %v3042_v52 }
 0x45c   : > { %v3044_v6 = vpop.permute.xlu1 %3043  ;;  %3395 = vrot.lane.b32.xlu0 %v11212_v28, %s9643_s24 }
 0x45d   : > { %3119 = vst.msk [vmem:[#allocation4 + $0x150] sm:$0xff] %vm3097_vm2, %v3044_v6 }
 0x45e   : > { %3397 = vrot.lane.b32.xlu1 %v11224_v39, %s9643_s24 }
 0x460   : > { %3399 = vrot.lane.b32.xlu0 %v11232_v1, %s9643_s24 }
 0x462   : > { %3401 = vrot.lane.b32.xlu1 %v11244_v12, %s9643_s24  ;;  %v3046_v54 = vpop.permute.xlu0 %3045 }
 0x463   : > { %3120 = vst.msk [vmem:[#allocation4 + $0x160] sm:$0xff] %vm3097_vm2, %v3046_v54 }
 0x464   : > { %v3048_v18 = vpop.permute.xlu1 %3047  ;;  %3403 = vrot.lane.b32.xlu0 %v11252_v31, %s9643_s24 }
 0x465   : > { %3121 = vst.msk [vmem:[#allocation4 + $0x170] sm:$0xff] %vm3097_vm2, %v3048_v18 }
 0x466   : > { %3405 = vrot.lane.b32.xlu1 %v11264_v35, %s9643_s24 }
 0x468   : > { %3407 = vrot.lane.b32.xlu0 %v11272_v2, %s9643_s24 }
 0x46a   : > { %3409 = vrot.lane.b32.xlu1 %v11284_v15, %s9643_s24  ;;  %v3050_v56 = vpop.permute.xlu0 %3049 }
 0x46b   : > { %3122 = vst.msk [vmem:[#allocation4 + $0x180] sm:$0xff] %vm3097_vm2, %v3050_v56 }
 0x46c   : > { %v3052_v17 = vpop.permute.xlu1 %3051  ;;  %3411 = vrot.lane.b32.xlu0 %v11292_v21, %s9643_s24 }
 0x46d   : > { %3123 = vst.msk [vmem:[#allocation4 + $0x190] sm:$0xff] %vm3097_vm2, %v3052_v17 }
 0x46e   : > { %3413 = vrot.lane.b32.xlu1 %v11304_v29, %s9643_s24 }
 0x470   : > { %3415 = vrot.lane.b32.xlu0 %v11312_v58, %s9643_s24 }
 0x472   : > { %3417 = vrot.lane.b32.xlu1 %v11324_v30, %s9643_s24  ;;  %v3054_v6 = vpop.permute.xlu0 %3053 }
 0x473   : > { %3124 = vst.msk [vmem:[#allocation4 + $0x1a0] sm:$0xff] %vm3097_vm2, %v3054_v6 }
 0x474   : > { %v3056_v51 = vpop.permute.xlu1 %3055  ;;  %3419 = vrot.lane.b32.xlu0 %v11332_v43, %s9643_s24 }
 0x475   : > { %3125 = vst.msk [vmem:[#allocation4 + $0x1b0] sm:$0xff] %vm3097_vm2, %v3056_v51  ;;  %v11655_v51 = vld [vmem:[#allocation3 + $0x1b2] sm:$0xff] }
 0x476   : > { %3421 = vrot.lane.b32.xlu1 %v11344_v53, %s9643_s24 }
 0x478   : > { %3423 = vrot.lane.b32.xlu0 %v11352_v19, %s9643_s24 }
 0x47a   : > { %3425 = vrot.lane.b32.xlu1 %v11364_v33, %s9643_s24  ;;  %v3058_v8 = vpop.permute.xlu0 %3057 }
 0x47b   : > { %3126 = vst.msk [vmem:[#allocation4 + $0x1c0] sm:$0xff] %vm3097_vm2, %v3058_v8 }
 0x47c   : > { %v3060_v52 = vpop.permute.xlu1 %3059  ;;  %3427 = vrot.lane.b32.xlu0 %v11372_v3, %s9643_s24 }
 0x47d   : > { %3127 = vst.msk [vmem:[#allocation4 + $0x1d0] sm:$0xff] %vm3097_vm2, %v3060_v52  ;;  %v11660_v52 = vld [vmem:[#allocation3 + $0x1ba] sm:$0xff] }
 0x47e   : > { %3429 = vrot.lane.b32.xlu1 %v11384_v22, %s9643_s24 }
 0x480   : > { %3431 = vrot.lane.b32.xlu0 %v11392_v62, %s9643_s24 }
 0x482   : > { %3433 = vrot.lane.b32.xlu1 %v11404_v45, %s9643_s24  ;;  %v3062_v54 = vpop.permute.xlu0 %3061 }
 0x483   : > { %3128 = vst.msk [vmem:[#allocation4 + $0x1e0] sm:$0xff] %vm3097_vm2, %v3062_v54 }
 0x484   : > { %v3064_v18 = vpop.permute.xlu1 %3063  ;;  %3435 = vrot.lane.b32.xlu0 %v11412_v59, %s9643_s24 }
 0x485   : > { %3129 = vst.msk [vmem:[#allocation4 + $0x1f0] sm:$0xff] %vm3097_vm2, %v3064_v18  ;;  %v11665_v18 = vld [vmem:[#allocation3 + $0x1ca] sm:$0xff] }
 0x486   : > { %3437 = vrot.lane.b32.xlu1 %v11424_v36, %s9643_s24  ;;  %v3195_v56 = vpop.permute.xlu0 %3194 }
 0x487   : > { %3291 = vst.msk [vmem:[#allocation4] sm:$0xff] %vm3290_vm4, %v3195_v56 }
 0x488   : > { %v3197_v17 = vpop.permute.xlu1 %3196  ;;  %3439 = vrot.lane.b32.xlu0 %v11432_v37, %s9643_s24 }
 0x489   : > { %3292 = vst.msk [vmem:[#allocation4 + $0x10] sm:$0xff] %vm3290_vm4, %v3197_v17  ;;  %v11670_v17 = vld [vmem:[#allocation3 + $0x1d2] sm:$0xff] }
 0x48a   : > { %3441 = vrot.lane.b32.xlu1 %v11444_v25, %s9643_s24  ;;  %v3199_v6 = vpop.permute.xlu0 %3198 }
 0x48b   : > { %3293 = vst.msk [vmem:[#allocation4 + $0x20] sm:$0xff] %vm3290_vm4, %v3199_v6 }
 0x48c   : > { %v3201_v8 = vpop.permute.xlu1 %3200  ;;  %3443 = vrot.lane.b32.xlu0 %v11655_v51, %s9643_s24 }
 0x48d   : > { %3294 = vst.msk [vmem:[#allocation4 + $0x30] sm:$0xff] %vm3290_vm4, %v3201_v8 }
 0x48e   : > { %3445 = vrot.lane.b32.xlu1 %v11660_v52, %s9643_s24  ;;  %v3203_v54 = vpop.permute.xlu0 %3202 }
 0x48f   : > { %3295 = vst.msk [vmem:[#allocation4 + $0x40] sm:$0xff] %vm3290_vm4, %v3203_v54 }
 0x490   : > { %v3205_v56 = vpop.permute.xlu1 %3204  ;;  %3447 = vrot.lane.b32.xlu0 %v11665_v18, %s9643_s24 }
 0x491   : > { %3296 = vst.msk [vmem:[#allocation4 + $0x50] sm:$0xff] %vm3290_vm4, %v3205_v56 }
 0x492   : > { %3449 = vrot.lane.b32.xlu1 %v11670_v17, %s9643_s24  ;;  %v3207_v6 = vpop.permute.xlu0 %3206 }
 0x493   : > { %3297 = vst.msk [vmem:[#allocation4 + $0x60] sm:$0xff] %vm3290_vm4, %v3207_v6 }
 0x494   : > { %v3209_v8 = vpop.permute.xlu1 %3208  ;;  %3580 = vrot.lane.b32.xlu0 %v11170_v4, %s9652_s12 }
 0x495   : > { %3298 = vst.msk [vmem:[#allocation4 + $0x70] sm:$0xff] %vm3290_vm4, %v3209_v8 }
 0x496   : > { %3582 = vrot.lane.b32.xlu1 %v11179_v10, %s9652_s12  ;;  %v3211_v54 = vpop.permute.xlu0 %3210 }
 0x497   : > { %3299 = vst.msk [vmem:[#allocation4 + $0x80] sm:$0xff] %vm3290_vm4, %v3211_v54  ;;  %v14517_v54 = vld [vmem:[#allocation6_spill] sm:$0xff] }
 0x498   : > { %v3213_v56 = vpop.permute.xlu1 %3212  ;;  %3584 = vrot.lane.b32.xlu0 %v11190_v9, %s9652_s12 }
 0x499   : > { %3300 = vst.msk [vmem:[#allocation4 + $0x90] sm:$0xff] %vm3290_vm4, %v3213_v56 }
 0x49a   : > { %3586 = vrot.lane.b32.xlu1 %v11199_v13, %s9652_s12  ;;  %v3215_v6 = vpop.permute.xlu0 %3214 }
 0x49b   : > { %3301 = vst.msk [vmem:[#allocation4 + $0xa0] sm:$0xff] %vm3290_vm4, %v3215_v6  ;;  %v14519_v6 = vld [vmem:[#allocation8_spill] sm:$0xff] }
 0x49c   : > { %v3217_v4 = vpop.permute.xlu1 %3216  ;;  %3588 = vrot.lane.b32.xlu0 %v11210_v27, %s9652_s12 }
 0x49d   : > { %3302 = vst.msk [vmem:[#allocation4 + $0xb0] sm:$0xff] %vm3290_vm4, %v3217_v4  ;;  %v14520_v4 = vld [vmem:[#allocation9_spill] sm:$0xff] }
 0x49e   : > { %3590 = vrot.lane.b32.xlu1 %v11219_v34, %s9652_s12  ;;  %v3219_v10 = vpop.permute.xlu0 %3218 }
 0x49f   : > { %3303 = vst.msk [vmem:[#allocation4 + $0xc0] sm:$0xff] %vm3290_vm4, %v3219_v10 }
 0x4a0   : > { %v3221_v9 = vpop.permute.xlu1 %3220  ;;  %3592 = vrot.lane.b32.xlu0 %v11230_v63, %s9652_s12 }
 0x4a1   : > { %3304 = vst.msk [vmem:[#allocation4 + $0xd0] sm:$0xff] %vm3290_vm4, %v3221_v9  ;;  %v11759_v9 = vld [vmem:[#allocation3 + $0x1b4] sm:$0xff] }
 0x4a2   : > { %3594 = vrot.lane.b32.xlu1 %v11239_v7, %s9652_s12  ;;  %v3223_v13 = vpop.permute.xlu0 %3222 }
 0x4a3   : > { %3305 = vst.msk [vmem:[#allocation4 + $0xe0] sm:$0xff] %vm3290_vm4, %v3223_v13 }
 0x4a4   : > { %v3225_v27 = vpop.permute.xlu1 %3224  ;;  %3596 = vrot.lane.b32.xlu0 %v11250_v44, %s9652_s12 }
 0x4a5   : > { %3306 = vst.msk [vmem:[#allocation4 + $0xf0] sm:$0xff] %vm3290_vm4, %v3225_v27  ;;  %v11764_v27 = vld [vmem:[#allocation3 + $0x1bc] sm:$0xff] }
 0x4a6   : > { %3598 = vrot.lane.b32.xlu1 %v11259_v11, %s9652_s12  ;;  %v3227_v34 = vpop.permute.xlu0 %3226 }
 0x4a7   : > { %3307 = vst.msk [vmem:[#allocation4 + $0x100] sm:$0xff] %vm3290_vm4, %v3227_v34 }
 0x4a8   : > { %v3229_v63 = vpop.permute.xlu1 %3228  ;;  %3600 = vrot.lane.b32.xlu0 %v11270_v61, %s9652_s12 }
 0x4a9   : > { %3308 = vst.msk [vmem:[#allocation4 + $0x110] sm:$0xff] %vm3290_vm4, %v3229_v63  ;;  %v11769_v63 = vld [vmem:[#allocation3 + $0x1cc] sm:$0xff] }
 0x4aa   : > { %3602 = vrot.lane.b32.xlu1 %v11279_v24, %s9652_s12  ;;  %v3231_v7 = vpop.permute.xlu0 %3230 }
 0x4ab   : > { %3309 = vst.msk [vmem:[#allocation4 + $0x120] sm:$0xff] %vm3290_vm4, %v3231_v7 }
 0x4ac   : > { %v3233_v44 = vpop.permute.xlu1 %3232  ;;  %3604 = vrot.lane.b32.xlu0 %v11290_v26, %s9652_s12 }
 0x4ad   : > { %3310 = vst.msk [vmem:[#allocation4 + $0x130] sm:$0xff] %vm3290_vm4, %v3233_v44  ;;  %v11774_v44 = vld [vmem:[#allocation3 + $0x1d4] sm:$0xff] }
 0x4ae   : > { %3606 = vrot.lane.b32.xlu1 %v11299_v16, %s9652_s12  ;;  %v3235_v11 = vpop.permute.xlu0 %3234 }
 0x4af   : > { %3311 = vst.msk [vmem:[#allocation4 + $0x140] sm:$0xff] %vm3290_vm4, %v3235_v11 }
 0x4b0   : > { %v3237_v61 = vpop.permute.xlu1 %3236  ;;  %3608 = vrot.lane.b32.xlu0 %v11310_v57, %s9652_s12 }
 0x4b1   : > { %3312 = vst.msk [vmem:[#allocation4 + $0x150] sm:$0xff] %vm3290_vm4, %v3237_v61 }
 0x4b2   : > { %3610 = vrot.lane.b32.xlu1 %v11319_v14, %s9652_s12  ;;  %v3239_v24 = vpop.permute.xlu0 %3238 }
 0x4b3   : > { %3313 = vst.msk [vmem:[#allocation4 + $0x160] sm:$0xff] %vm3290_vm4, %v3239_v24 }
 0x4b4   : > { %v3241_v26 = vpop.permute.xlu1 %3240  ;;  %3612 = vrot.lane.b32.xlu0 %v11330_v41, %s9652_s12 }
 0x4b5   : > { %3314 = vst.msk [vmem:[#allocation4 + $0x170] sm:$0xff] %vm3290_vm4, %v3241_v26 }
 0x4b6   : > { %3614 = vrot.lane.b32.xlu1 %v11339_v49, %s9652_s12  ;;  %v3243_v16 = vpop.permute.xlu0 %3242 }
 0x4b7   : > { %3315 = vst.msk [vmem:[#allocation4 + $0x180] sm:$0xff] %vm3290_vm4, %v3243_v16 }
 0x4b8   : > { %v3245_v57 = vpop.permute.xlu1 %3244  ;;  %3616 = vrot.lane.b32.xlu0 %v11350_v0, %s9652_s12 }
 0x4b9   : > { %3316 = vst.msk [vmem:[#allocation4 + $0x190] sm:$0xff] %vm3290_vm4, %v3245_v57 }
 0x4ba   : > { %3618 = vrot.lane.b32.xlu1 %v11359_v23, %s9652_s12  ;;  %v3247_v14 = vpop.permute.xlu0 %3246  ;;  %v14516_v23 = vld [vmem:[#allocation5_spill] sm:$0xff] }
 0x4bb   : > { %3317 = vst.msk [vmem:[#allocation4 + $0x1a0] sm:$0xff] %vm3290_vm4, %v3247_v14  ;;  %v14522_v14 = vld [vmem:[#allocation11_spill] sm:$0xff] }
 0x4bc   : > { %v3249_v41 = vpop.permute.xlu1 %3248  ;;  %3620 = vrot.lane.b32.xlu0 %v11370_v50, %s9652_s12 }
 0x4bd   : > { %3318 = vst.msk [vmem:[#allocation4 + $0x1b0] sm:$0xff] %vm3290_vm4, %v3249_v41 }
 0x4be   : > { %3622 = vrot.lane.b32.xlu1 %v11379_v38, %s9652_s12  ;;  %v3251_v49 = vpop.permute.xlu0 %3250  ;;  %v14518_v38 = vld [vmem:[#allocation7_spill] sm:$0xff] }
 0x4bf   : > { %3319 = vst.msk [vmem:[#allocation4 + $0x1c0] sm:$0xff] %vm3290_vm4, %v3251_v49  ;;  %v14524_v49 = vld [vmem:[#allocation13_spill] sm:$0xff] }
 0x4c0   : > { %v3253_v0 = vpop.permute.xlu1 %3252  ;;  %3624 = vrot.lane.b32.xlu0 %v11390_v60, %s9652_s12 }
 0x4c1   : > { %3320 = vst.msk [vmem:[#allocation4 + $0x1d0] sm:$0xff] %vm3290_vm4, %v3253_v0  ;;  %v14525_v0 = vld [vmem:[#allocation14_spill] sm:$0xff] }
 0x4c2   : > { %3626 = vrot.lane.b32.xlu1 %v14516_v23, %s9652_s12  ;;  %v3255_v8 = vpop.permute.xlu0 %3254 }
 0x4c3   : > { %3321 = vst.msk [vmem:[#allocation4 + $0x1e0] sm:$0xff] %vm3290_vm4, %v3255_v8 }
 0x4c4   : > { %v3257_v50 = vpop.permute.xlu1 %3256  ;;  %3628 = vrot.lane.b32.xlu0 %v14517_v54, %s9652_s12  ;;  %v14527_v54 = vld [vmem:[#allocation16_spill] sm:$0xff] }
 0x4c5   : > { %3322 = vst.msk [vmem:[#allocation4 + $0x1f0] sm:$0xff] %vm3290_vm4, %v3257_v50  ;;  %v14526_v50 = vld [vmem:[#allocation15_spill] sm:$0xff] }
 0x4c6   : > { %3630 = vrot.lane.b32.xlu1 %v14518_v38, %s9652_s12  ;;  %v3388_v56 = vpop.permute.xlu0 %3387 }
 0x4c7   : > { %3484 = vst.msk [vmem:[#allocation4] sm:$0xff] %vm3483_vm1, %v3388_v56 }
 0x4c8   : > { %v3390_v60 = vpop.permute.xlu1 %3389  ;;  %3632 = vrot.lane.b32.xlu0 %v14519_v6, %s9652_s12  ;;  %v14529_v6 = vld [vmem:[#allocation18_spill] sm:$0xff] }
 0x4c9   : > { %3485 = vst.msk [vmem:[#allocation4 + $0x10] sm:$0xff] %vm3483_vm1, %v3390_v60  ;;  %v14528_v60 = vld [vmem:[#allocation17_spill] sm:$0xff] }
 0x4ca   : > { %3634 = vrot.lane.b32.xlu1 %v14520_v4, %s9652_s12  ;;  %v3392_v10 = vpop.permute.xlu0 %3391 }
 0x4cb   : > { %3486 = vst.msk [vmem:[#allocation4 + $0x20] sm:$0xff] %vm3483_vm1, %v3392_v10 }
 0x4cc   : > { %v3394_v13 = vpop.permute.xlu1 %3393  ;;  %3636 = vrot.lane.b32.xlu0 %v11759_v9, %s9652_s12 }
 0x4cd   : > { %3487 = vst.msk [vmem:[#allocation4 + $0x30] sm:$0xff] %vm3483_vm1, %v3394_v13  ;;  %v14530_v13 = vld [vmem:[#allocation19_spill] sm:$0xff] }
 0x4ce   : > { %3638 = vrot.lane.b32.xlu1 %v11764_v27, %s9652_s12  ;;  %v3396_v34 = vpop.permute.xlu0 %3395 }
 0x4cf   : > { %3488 = vst.msk [vmem:[#allocation4 + $0x40] sm:$0xff] %vm3483_vm1, %v3396_v34  ;;  %v14531_v34 = vld [vmem:[#allocation20_spill] sm:$0xff] }
 0x4d0   : > { %v3398_v7 = vpop.permute.xlu1 %3397  ;;  %3640 = vrot.lane.b32.xlu0 %v11769_v63, %s9652_s12 }
 0x4d1   : > { %3489 = vst.msk [vmem:[#allocation4 + $0x50] sm:$0xff] %vm3483_vm1, %v3398_v7 }
 0x4d2   : > { %3642 = vrot.lane.b32.xlu1 %v11774_v44, %s9652_s12  ;;  %v3400_v11 = vpop.permute.xlu0 %3399 }
 0x4d3   : > { %3490 = vst.msk [vmem:[#allocation4 + $0x60] sm:$0xff] %vm3483_vm1, %v3400_v11 }
 0x4d4   : > { %v3402_v61 = vpop.permute.xlu1 %3401  ;;  %3773 = vrot.lane.b32.xlu0 %v11457_v46, %s9649_s30 }
 0x4d5   : > { %3491 = vst.msk [vmem:[#allocation4 + $0x70] sm:$0xff] %vm3483_vm1, %v3402_v61  ;;  %v14532_v61 = vld [vmem:[#allocation21_spill] sm:$0xff] }
 0x4d6   : > { %3775 = vrot.lane.b32.xlu1 %v11462_v55, %s9649_s30  ;;  %v3404_v24 = vpop.permute.xlu0 %3403 }
 0x4d7   : > { %3492 = vst.msk [vmem:[#allocation4 + $0x80] sm:$0xff] %vm3483_vm1, %v3404_v24  ;;  %v14533_v24 = vld [vmem:[#allocation22_spill] sm:$0xff] }
 0x4d8   : > { %v3406_v26 = vpop.permute.xlu1 %3405  ;;  %3777 = vrot.lane.b32.xlu0 %v11466_v32, %s9649_s30 }
 0x4d9   : > { %3493 = vst.msk [vmem:[#allocation4 + $0x90] sm:$0xff] %vm3483_vm1, %v3406_v26 }
 0x4da   : > { %3779 = vrot.lane.b32.xlu1 %v11470_v40, %s9649_s30  ;;  %v3408_v16 = vpop.permute.xlu0 %3407  ;;  %v14521_v40 = vld [vmem:[#allocation10_spill] sm:$0xff] }
 0x4db   : > { %3494 = vst.msk [vmem:[#allocation4 + $0xa0] sm:$0xff] %vm3483_vm1, %v3408_v16 }
 0x4dc   : > { %v3410_v46 = vpop.permute.xlu1 %3409  ;;  %3781 = vrot.lane.b32.xlu0 %v11475_v20, %s9649_s30 }
 0x4dd   : > { %3495 = vst.msk [vmem:[#allocation4 + $0xb0] sm:$0xff] %vm3483_vm1, %v3410_v46  ;;  %v14534_v46 = vld [vmem:[#allocation23_spill] sm:$0xff] }
 0x4de   : > { %3783 = vrot.lane.b32.xlu1 %v11480_v42, %s9649_s30  ;;  %v3412_v55 = vpop.permute.xlu0 %3411  ;;  %v14523_v42 = vld [vmem:[#allocation12_spill] sm:$0xff] }
 0x4df   : > { %3496 = vst.msk [vmem:[#allocation4 + $0xc0] sm:$0xff] %vm3483_vm1, %v3412_v55  ;;  %v14535_v55 = vld [vmem:[#allocation24_spill] sm:$0xff] }
 0x4e0   : > { %v3414_v32 = vpop.permute.xlu1 %3413  ;;  %3785 = vrot.lane.b32.xlu0 %v11484_v48, %s9649_s30 }
 0x4e1   : > { %3497 = vst.msk [vmem:[#allocation4 + $0xd0] sm:$0xff] %vm3483_vm1, %v3414_v32 }
 0x4e2   : > { %3787 = vrot.lane.b32.xlu1 %v14521_v40, %s9649_s30  ;;  %v3416_v57 = vpop.permute.xlu0 %3415 }
 0x4e3   : > { %3498 = vst.msk [vmem:[#allocation4 + $0xe0] sm:$0xff] %vm3483_vm1, %v3416_v57  ;;  %v14536_v57 = vld [vmem:[#allocation25_spill] sm:$0xff] }
 0x4e4   : > { %v3418_v20 = vpop.permute.xlu1 %3417  ;;  %3789 = vrot.lane.b32.xlu0 %v14522_v14, %s9649_s30 }
 0x4e5   : > { %3499 = vst.msk [vmem:[#allocation4 + $0xf0] sm:$0xff] %vm3483_vm1, %v3418_v20  ;;  %v14537_v20 = vld [vmem:[#allocation26_spill] sm:$0xff] }
 0x4e6   : > { %3791 = vrot.lane.b32.xlu1 %v14523_v42, %s9649_s30  ;;  %v3420_v41 = vpop.permute.xlu0 %3419 }
 0x4e7   : > { %3500 = vst.msk [vmem:[#allocation4 + $0x100] sm:$0xff] %vm3483_vm1, %v3420_v41  ;;  %v14538_v41 = vld [vmem:[#allocation27_spill] sm:$0xff] }
 0x4e8   : > { %v3422_v48 = vpop.permute.xlu1 %3421  ;;  %3793 = vrot.lane.b32.xlu0 %v14524_v49, %s9649_s30 }
 0x4e9   : > { %3501 = vst.msk [vmem:[#allocation4 + $0x110] sm:$0xff] %vm3483_vm1, %v3422_v48 }
 0x4ea   : > { %3795 = vrot.lane.b32.xlu1 %v14525_v0, %s9649_s30  ;;  %v3424_v23 = vpop.permute.xlu0 %3423  ;;  %v14539_v0 = vld [vmem:[#allocation28_spill] sm:$0xff] }
 0x4eb   : > { %3502 = vst.msk [vmem:[#allocation4 + $0x120] sm:$0xff] %vm3483_vm1, %v3424_v23 }
 0x4ec   : > { %v3426_v8 = vpop.permute.xlu1 %3425  ;;  %3797 = vrot.lane.b32.xlu0 %v14526_v50, %s9649_s30 }
 0x4ed   : > { %3503 = vst.msk [vmem:[#allocation4 + $0x130] sm:$0xff] %vm3483_vm1, %v3426_v8  ;;  %v11863_v8 = vld [vmem:[#allocation3 + $0x1b6] sm:$0xff] }
 0x4ee   : > { %3799 = vrot.lane.b32.xlu1 %v14527_v54, %s9649_s30  ;;  %v3428_v38 = vpop.permute.xlu0 %3427  ;;  %v11873_v54 = vld [vmem:[#allocation3 + $0x1ce] sm:$0xff] }
 0x4ef   : > { %3504 = vst.msk [vmem:[#allocation4 + $0x140] sm:$0xff] %vm3483_vm1, %v3428_v38 }
 0x4f0   : > { %v3430_v56 = vpop.permute.xlu1 %3429  ;;  %3801 = vrot.lane.b32.xlu0 %v14528_v60, %s9649_s30 }
 0x4f1   : > { %3505 = vst.msk [vmem:[#allocation4 + $0x150] sm:$0xff] %vm3483_vm1, %v3430_v56  ;;  %v11878_v56 = vld [vmem:[#allocation3 + $0x1d6] sm:$0xff] }
 0x4f2   : > { %3803 = vrot.lane.b32.xlu1 %v14529_v6, %s9649_s30  ;;  %v3432_v4 = vpop.permute.xlu0 %3431 }
 0x4f3   : > { %3506 = vst.msk [vmem:[#allocation4 + $0x160] sm:$0xff] %vm3483_vm1, %v3432_v4  ;;  %v9609_v4 = vld [vmem:[%s14359_s4] sm:$0xff]  }
 0x4f4   : > { %v3434_v10 = vpop.permute.xlu1 %3433  ;;  %3805 = vrot.lane.b32.xlu0 %v14530_v13, %s9649_s30  ;;  %9466 = vmatprep.subr.bf16.mxu0 %v9609_v4 }
 0x4f5   : > { %3507 = vst.msk [vmem:[#allocation4 + $0x170] sm:$0xff] %vm3483_vm1, %v3434_v10  ;;  %9550 = vmatprep.subr.bf16.mxu1 %v9609_v4  ;;  %9467 = vmatpush3.bf16.msra.mxu0 %v9609_v4 }
 0x4f6   : > { %3807 = vrot.lane.b32.xlu1 %v14531_v34, %s9649_s30  ;;  %v3436_v7 = vpop.permute.xlu0 %3435  ;;  %9555 = vmatpush3.bf16.msra.mxu1 %v9609_v4 }
 0x4f7   : > { %3508 = vst.msk [vmem:[#allocation4 + $0x180] sm:$0xff] %vm3483_vm1, %v3436_v7 }
 0x4f8   : > { %v3438_v11 = vpop.permute.xlu1 %3437  ;;  %3809 = vrot.lane.b32.xlu0 %v14532_v61, %s9649_s30 }
 0x4f9   : > { %3509 = vst.msk [vmem:[#allocation4 + $0x190] sm:$0xff] %vm3483_vm1, %v3438_v11 }
 0x4fa   : > { %3811 = vrot.lane.b32.xlu1 %v14533_v24, %s9649_s30  ;;  %v3440_v26 = vpop.permute.xlu0 %3439 }
 0x4fb   : > { %3510 = vst.msk [vmem:[#allocation4 + $0x1a0] sm:$0xff] %vm3483_vm1, %v3440_v26 }
 0x4fc   : > { %v3442_v16 = vpop.permute.xlu1 %3441  ;;  %3813 = vrot.lane.b32.xlu0 %v14534_v46, %s9649_s30  ;;  %v4096_v46 = vld [vmem:[#allocation3 + $0x94] sm:$0xff] }
 0x4fd   : > { %3511 = vst.msk [vmem:[#allocation4 + $0x1b0] sm:$0xff] %vm3483_vm1, %v3442_v16 }
 0x4fe   : > { %3815 = vrot.lane.b32.xlu1 %v14535_v55, %s9649_s30  ;;  %v3444_v32 = vpop.permute.xlu0 %3443 }
 0x4ff   : > { %3512 = vst.msk [vmem:[#allocation4 + $0x1c0] sm:$0xff] %vm3483_vm1, %v3444_v32  ;;  %v4097_v32 = vld [vmem:[#allocation3 + $0x9c] sm:$0xff] }
 0x500   : > { %v3446_v40 = vpop.permute.xlu1 %3445  ;;  %3817 = vrot.lane.b32.xlu0 %v14536_v57, %s9649_s30  ;;  %v4098_v57 = vld [vmem:[#allocation3 + $0xac] sm:$0xff] }
 0x501   : > { %3513 = vst.msk [vmem:[#allocation4 + $0x1d0] sm:$0xff] %vm3483_vm1, %v3446_v40 }
 0x502   : > { %3819 = vrot.lane.b32.xlu1 %v14537_v20, %s9649_s30  ;;  %v3448_v14 = vpop.permute.xlu0 %3447 }
 0x503   : > { %3514 = vst.msk [vmem:[#allocation4 + $0x1e0] sm:$0xff] %vm3483_vm1, %v3448_v14  ;;  %v4099_v14 = vld [vmem:[#allocation3 + $0xb4] sm:$0xff] }
 0x504   : > { %v3450_v42 = vpop.permute.xlu1 %3449  ;;  %3821 = vrot.lane.b32.xlu0 %v14538_v41, %s9649_s30  ;;  %v4100_v41 = vld [vmem:[#allocation3 + $0xc4] sm:$0xff] }
 0x505   : > { %3515 = vst.msk [vmem:[#allocation4 + $0x1f0] sm:$0xff] %vm3483_vm1, %v3450_v42 }
 0x506   : > { %3823 = vrot.lane.b32.xlu1 %v11570_v47, %s9649_s30  ;;  %v3581_v48 = vpop.permute.xlu0 %3580  ;;  %v11868_v47 = vld [vmem:[#allocation3 + $0x1be] sm:$0xff] }
 0x507   : > { %3677 = vst.msk [vmem:[#allocation4] sm:$0xff] %vm3676_vm15, %v3581_v48 }
 0x508   : > { %v3583_v49 = vpop.permute.xlu1 %3582  ;;  %3825 = vrot.lane.b32.xlu0 %v11574_v5, %s9649_s30 }
 0x509   : > { %3678 = vst.msk [vmem:[#allocation4 + $0x10] sm:$0xff] %vm3676_vm15, %v3583_v49  ;;  %v4101_v49 = vld [vmem:[#allocation3 + $0xcc] sm:$0xff] }
 0x50a   : > { %3827 = vrot.lane.b32.xlu1 %v14539_v0, %s9649_s30  ;;  %v3585_v23 = vpop.permute.xlu0 %3584 }
 0x50b   : > { %3679 = vst.msk [vmem:[#allocation4 + $0x20] sm:$0xff] %vm3676_vm15, %v3585_v23  ;;  %v4102_v23 = vld [vmem:[#allocation3 + $0xdc] sm:$0xff] }
 0x50c   : > { %v3587_v50 = vpop.permute.xlu1 %3586  ;;  %3829 = vrot.lane.b32.xlu0 %v11863_v8, %s9649_s30 }
 0x50d   : > { %3680 = vst.msk [vmem:[#allocation4 + $0x30] sm:$0xff] %vm3676_vm15, %v3587_v50 }
 0x50e   : > { %3831 = vrot.lane.b32.xlu1 %v11868_v47, %s9649_s30  ;;  %v3589_v5 = vpop.permute.xlu0 %3588 }
 0x50f   : > { %3681 = vst.msk [vmem:[#allocation4 + $0x40] sm:$0xff] %vm3676_vm15, %v3589_v5  ;;  %v4103_v5 = vld [vmem:[#allocation3 + $0xe4] sm:$0xff] }
 0x510   : > { %v3591_v38 = vpop.permute.xlu1 %3590  ;;  %3833 = vrot.lane.b32.xlu0 %v11873_v54, %s9649_s30 }
 0x511   : > { %3682 = vst.msk [vmem:[#allocation4 + $0x50] sm:$0xff] %vm3676_vm15, %v3591_v38 }
 0x512   : > { %3835 = vrot.lane.b32.xlu1 %v11878_v56, %s9649_s30  ;;  %v3593_v60 = vpop.permute.xlu0 %3592 }
 0x513   : > { %3683 = vst.msk [vmem:[#allocation4 + $0x60] sm:$0xff] %vm3676_vm15, %v3593_v60  ;;  %v4104_v60 = vld [vmem:[#allocation3 + $0xf4] sm:$0xff] }
 0x514   : > { %v3595_v6 = vpop.permute.xlu1 %3594  ;;  %3967 = vrot.lane.b32.xlu0 %v11212_v28, %s9644_s25 }
 0x515   : > { %3684 = vst.msk [vmem:[#allocation4 + $0x70] sm:$0xff] %vm3676_vm15, %v3595_v6  ;;  %v9612_v6 = vld [vmem:[%s14359_s4 + $0x18] sm:$0xff]  }
 0x516   : > { %3969 = vrot.lane.b32.xlu1 %v11224_v39, %s9644_s25  ;;  %v3597_v10 = vpop.permute.xlu0 %3596 }
 0x517   : > { %3685 = vst.msk [vmem:[#allocation4 + $0x80] sm:$0xff] %vm3676_vm15, %v3597_v10  ;;  %v4105_v10 = vld [vmem:[#allocation3 + $0xfc] sm:$0xff] }
 0x518   : > { %v3599_v13 = vpop.permute.xlu1 %3598  ;;  %3971 = vrot.lane.b32.xlu0 %v11232_v1, %s9644_s25 }
 0x519   : > { %3686 = vst.msk [vmem:[#allocation4 + $0x90] sm:$0xff] %vm3676_vm15, %v3599_v13 }
 0x51a   : > { %3973 = vrot.lane.b32.xlu1 %v11244_v12, %s9644_s25  ;;  %v3601_v28 = vpop.permute.xlu0 %3600 }
 0x51b   : > { %3687 = vst.msk [vmem:[#allocation4 + $0xa0] sm:$0xff] %vm3676_vm15, %v3601_v28  ;;  %v4106_v28 = vld [vmem:[#allocation3 + $0x10c] sm:$0xff] }
 0x51c   : > { %v3603_v39 = vpop.permute.xlu1 %3602  ;;  %3975 = vrot.lane.b32.xlu0 %v11252_v31, %s9644_s25 }
 0x51d   : > { %3688 = vst.msk [vmem:[#allocation4 + $0xb0] sm:$0xff] %vm3676_vm15, %v3603_v39 }
 0x51e   : > { %3977 = vrot.lane.b32.xlu1 %v11264_v35, %s9644_s25  ;;  %v3605_v1 = vpop.permute.xlu0 %3604 }
 0x51f   : > { %3689 = vst.msk [vmem:[#allocation4 + $0xc0] sm:$0xff] %vm3676_vm15, %v3605_v1  ;;  %v4107_v1 = vld [vmem:[#allocation3 + $0x114] sm:$0xff] }
 0x520   : > { %v3607_v34 = vpop.permute.xlu1 %3606  ;;  %3979 = vrot.lane.b32.xlu0 %v11272_v2, %s9644_s25 }
 0x521   : > { %3690 = vst.msk [vmem:[#allocation4 + $0xd0] sm:$0xff] %vm3676_vm15, %v3607_v34 }
 0x522   : > { %3981 = vrot.lane.b32.xlu1 %v11284_v15, %s9644_s25  ;;  %v3609_v12 = vpop.permute.xlu0 %3608 }
 0x523   : > { %3691 = vst.msk [vmem:[#allocation4 + $0xe0] sm:$0xff] %vm3676_vm15, %v3609_v12  ;;  %v4108_v12 = vld [vmem:[#allocation3 + $0x124] sm:$0xff] }
 0x524   : > { %v3611_v31 = vpop.permute.xlu1 %3610  ;;  %3983 = vrot.lane.b32.xlu0 %v11292_v21, %s9644_s25 }
 0x525   : > { %3692 = vst.msk [vmem:[#allocation4 + $0xf0] sm:$0xff] %vm3676_vm15, %v3611_v31 }
 0x526   : > { %3985 = vrot.lane.b32.xlu1 %v11304_v29, %s9644_s25  ;;  %v3613_v35 = vpop.permute.xlu0 %3612 }
 0x527   : > { %3693 = vst.msk [vmem:[#allocation4 + $0x100] sm:$0xff] %vm3676_vm15, %v3613_v35  ;;  %v4109_v35 = vld [vmem:[#allocation3 + $0x12c] sm:$0xff] }
 0x528   : > { %v3615_v2 = vpop.permute.xlu1 %3614  ;;  %3987 = vrot.lane.b32.xlu0 %v11312_v58, %s9644_s25  ;;  %v9610_v58 = vld [vmem:[%s14359_s4 + $0x8] sm:$0xff]  }
 0x529   : > { %3694 = vst.msk [vmem:[#allocation4 + $0x110] sm:$0xff] %vm3676_vm15, %v3615_v2  ;;  %9468 = vmatprep.subr.bf16.mxu0 %v9610_v58  ;;  %9551 = vmatprep.subr.bf16.mxu1 %v9610_v58 }
 0x52a   : > { %3989 = vrot.lane.b32.xlu1 %v11324_v30, %s9644_s25  ;;  %v3617_v15 = vpop.permute.xlu0 %3616  ;;  %9469 = vmatpush3.bf16.msra.mxu0 %v9610_v58 }
 0x52b   : > { %3695 = vst.msk [vmem:[#allocation4 + $0x120] sm:$0xff] %vm3676_vm15, %v3617_v15  ;;  %9556 = vmatpush3.bf16.msra.mxu1 %v9610_v58  ;;  %v4110_v15 = vld [vmem:[#allocation3 + $0x13c] sm:$0xff] }
 0x52c   : > { %v3619_v21 = vpop.permute.xlu1 %3618  ;;  %3991 = vrot.lane.b32.xlu0 %v11332_v43, %s9644_s25 }
 0x52d   : > { %3696 = vst.msk [vmem:[#allocation4 + $0x130] sm:$0xff] %vm3676_vm15, %v3619_v21 }
 0x52e   : > { %3993 = vrot.lane.b32.xlu1 %v11344_v53, %s9644_s25  ;;  %v3621_v29 = vpop.permute.xlu0 %3620 }
 0x52f   : > { %3697 = vst.msk [vmem:[#allocation4 + $0x140] sm:$0xff] %vm3676_vm15, %v3621_v29  ;;  %v4111_v29 = vld [vmem:[#allocation3 + $0x144] sm:$0xff] }
 0x530   : > { %v3623_v30 = vpop.permute.xlu1 %3622  ;;  %3995 = vrot.lane.b32.xlu0 %v11352_v19, %s9644_s25 }
 0x531   : > { %3698 = vst.msk [vmem:[#allocation4 + $0x150] sm:$0xff] %vm3676_vm15, %v3623_v30  ;;  %v4112_v30 = vld [vmem:[#allocation3 + $0x154] sm:$0xff] }
 0x532   : > { %3997 = vrot.lane.b32.xlu1 %v11364_v33, %s9644_s25  ;;  %v3625_v43 = vpop.permute.xlu0 %3624 }
 0x533   : > { %3699 = vst.msk [vmem:[#allocation4 + $0x160] sm:$0xff] %vm3676_vm15, %v3625_v43 }
 0x534   : > { %v3627_v53 = vpop.permute.xlu1 %3626  ;;  %3999 = vrot.lane.b32.xlu0 %v11372_v3, %s9644_s25 }
 0x535   : > { %3700 = vst.msk [vmem:[#allocation4 + $0x170] sm:$0xff] %vm3676_vm15, %v3627_v53  ;;  %v4113_v53 = vld [vmem:[#allocation3 + $0x15c] sm:$0xff] }
 0x536   : > { %4001 = vrot.lane.b32.xlu1 %v11384_v22, %s9644_s25  ;;  %v3629_v19 = vpop.permute.xlu0 %3628 }
 0x537   : > { %3701 = vst.msk [vmem:[#allocation4 + $0x180] sm:$0xff] %vm3676_vm15, %v3629_v19 }
 0x538   : > { %v3631_v7 = vpop.permute.xlu1 %3630  ;;  %4003 = vrot.lane.b32.xlu0 %v11392_v62, %s9644_s25 }
 0x539   : > { %3702 = vst.msk [vmem:[#allocation4 + $0x190] sm:$0xff] %vm3676_vm15, %v3631_v7  ;;  %v4114_v7 = vld [vmem:[#allocation3 + $0x16c] sm:$0xff] }
 0x53a   : > { %4005 = vrot.lane.b32.xlu1 %v11404_v45, %s9644_s25  ;;  %v3633_v33 = vpop.permute.xlu0 %3632 }
 0x53b   : > { %3703 = vst.msk [vmem:[#allocation4 + $0x1a0] sm:$0xff] %vm3676_vm15, %v3633_v33 }
 0x53c   : > { %v3635_v3 = vpop.permute.xlu1 %3634  ;;  %4007 = vrot.lane.b32.xlu0 %v11412_v59, %s9644_s25 }
 0x53d   : > { %3704 = vst.msk [vmem:[#allocation4 + $0x1b0] sm:$0xff] %vm3676_vm15, %v3635_v3  ;;  %v4115_v3 = vld [vmem:[#allocation3 + $0x174] sm:$0xff] }
 0x53e   : > { %4009 = vrot.lane.b32.xlu1 %v11424_v36, %s9644_s25  ;;  %v3637_v22 = vpop.permute.xlu0 %3636 }
 0x53f   : > { %3705 = vst.msk [vmem:[#allocation4 + $0x1c0] sm:$0xff] %vm3676_vm15, %v3637_v22 }
 0x540   : > { %v3639_v62 = vpop.permute.xlu1 %3638  ;;  %4011 = vrot.lane.b32.xlu0 %v11432_v37, %s9644_s25 }
 0x541   : > { %3706 = vst.msk [vmem:[#allocation4 + $0x1d0] sm:$0xff] %vm3676_vm15, %v3639_v62  ;;  %v4116_v62 = vld [vmem:[#allocation3 + $0x184] sm:$0xff] }
 0x542   : > { %4013 = vrot.lane.b32.xlu1 %v11444_v25, %s9644_s25  ;;  %v3641_v45 = vpop.permute.xlu0 %3640  ;;  %v3931_v25 = vld [vmem:[#allocation3 + $0x1e2] sm:$0xff] }
 0x543   : > { %3707 = vst.msk [vmem:[#allocation4 + $0x1e0] sm:$0xff] %vm3676_vm15, %v3641_v45 }
 0x544   : > { %v3643_v59 = vpop.permute.xlu1 %3642  ;;  %4015 = vrot.lane.b32.xlu0 %v11655_v51, %s9644_s25  ;;  %v9611_v51 = vld [vmem:[%s14359_s4 + $0x10] sm:$0xff]  }
 0x545   : > { %3708 = vst.msk [vmem:[#allocation4 + $0x1f0] sm:$0xff] %vm3676_vm15, %v3643_v59  ;;  %9470 = vmatprep.subr.bf16.mxu0 %v9611_v51  ;;  %9552 = vmatprep.subr.bf16.mxu1 %v9611_v51  ;;  %v4117_v59 = vld [vmem:[#allocation3 + $0x18c] sm:$0xff] }
 0x546   : > { %4017 = vrot.lane.b32.xlu1 %v11660_v52, %s9644_s25  ;;  %v3774_v36 = vpop.permute.xlu0 %3773  ;;  %v3932_v52 = vld [vmem:[#allocation3 + $0x1ea] sm:$0xff]  ;;  %9471 = vmatpush3.bf16.msra.mxu0 %v9611_v51 }
 0x547   : > { %3870 = vst.msk [vmem:[#allocation4] sm:$0xff] %vm3869_vm14, %v3774_v36  ;;  %9557 = vmatpush3.bf16.msra.mxu1 %v9611_v51  ;;  %9472 = vmatprep.subr.bf16.mxu0 %v9612_v6  ;;  %v9613_v36 = vld [vmem:[%s14359_s4 + $0x20] ss:$0 sps:$4 sm:$0xff]  }
 0x548   : > { %v3776_v37 = vpop.permute.xlu1 %3775  ;;  %4019 = vrot.lane.b32.xlu0 %v11665_v18, %s9644_s25  ;;  %v3933_v18 = vld [vmem:[#allocation3 + $0x1fa] sm:$0xff]  ;;  %9553 = vmatprep.subr.bf16.mxu1 %v9612_v6  ;;  %v4623_v51 = vsel %vm2643_vm12, %v9613_v36, 0 }
 0x549   : > { %3871 = vst.msk [vmem:[#allocation4 + $0x10] sm:$0xff] %vm3869_vm14, %v3776_v37 }
 0x54a   : > { %4021 = vrot.lane.b32.xlu1 %v11670_v17, %s9644_s25  ;;  %v3778_v11 = vpop.permute.xlu0 %3777  ;;  %v3934_v17 = vld [vmem:[#allocation3 + $0x202] sm:$0xff]  ;;  %9473 = vmatpush3.bf16.msra.mxu0 %v9612_v6 }
 0x54b   : > { %3872 = vst.msk [vmem:[#allocation4 + $0x20] sm:$0xff] %vm3869_vm14, %v3778_v11  ;;  %9558 = vmatpush3.bf16.msra.mxu1 %v9612_v6  ;;  %9570 = vmatprep.subr.msk.bf16.mxu0 %vm2643_vm12, %v9613_v36  ;;  %v4296_v6 = vld [vmem:[#allocation3 + $0xe6] sm:$0xff] }
 0x54c   : > { %v3780_v61 = vpop.permute.xlu1 %3779  ;;  %4023 = vrot.lane.b32.xlu0 %v3931_v25, %s9644_s25  ;;  %v4118_v25 = vld [vmem:[#allocation3 + $0x19c] sm:$0xff]  ;;  %9571 = vmatprep.subr.msk.bf16.mxu1 %vm2643_vm12, %v9613_v36 }
 0x54d   : > { %3873 = vst.msk [vmem:[#allocation4 + $0x30] sm:$0xff] %vm3869_vm14, %v3780_v61 }
 0x54e   : > { %4025 = vrot.lane.b32.xlu1 %v3932_v52, %s9644_s25  ;;  %v3782_v24 = vpop.permute.xlu0 %3781  ;;  %9475 = vmatpush3.bf16.msra.mxu0 %v4623_v51  ;;  %v4119_v52 = vld [vmem:[#allocation3 + $0x1a4] sm:$0xff] }
 0x54f   : > { %3874 = vst.msk [vmem:[#allocation4 + $0x40] sm:$0xff] %vm3869_vm14, %v3782_v24  ;;  %9559 = vmatpush3.bf16.msra.mxu1 %v4623_v51  ;;  %v4311_v51 = vld [vmem:[#allocation3 + $0x19e] sm:$0xff] }
 0x550   : > { %v3784_v26 = vpop.permute.xlu1 %3783  ;;  %4027 = vrot.lane.b32.xlu0 %v3933_v18, %s9644_s25 }
 0x551   : > { %3875 = vst.msk [vmem:[#allocation4 + $0x50] sm:$0xff] %vm3869_vm14, %v3784_v26  ;;  %v4124_v26 = vld [vmem:[#allocation3 + $0x1e4] sm:$0xff] }
 0x552   : > { %4029 = vrot.lane.b32.xlu1 %v3934_v17, %s9644_s25  ;;  %v3786_v16 = vpop.permute.xlu0 %3785 }
 0x553   : > { %3876 = vst.msk [vmem:[#allocation4 + $0x60] sm:$0xff] %vm3869_vm14, %v3786_v16  ;;  %v4125_v16 = vld [vmem:[#allocation3 + $0x1ec] sm:$0xff] }
 0x554   : > { %v3788_v55 = vpop.permute.xlu1 %3787  ;;  %4160 = vrot.lane.b32.xlu0 %v4096_v46, %s9653_s23 }
 0x555   : > { %3877 = vst.msk [vmem:[#allocation4 + $0x70] sm:$0xff] %vm3869_vm14, %v3788_v55 }
 0x556   : > { %4162 = vrot.lane.b32.xlu1 %v4097_v32, %s9653_s23  ;;  %v3790_v40 = vpop.permute.xlu0 %3789 }
 0x557   : > { %3878 = vst.msk [vmem:[#allocation4 + $0x80] sm:$0xff] %vm3869_vm14, %v3790_v40  ;;  %v4289_v40 = vld [vmem:[#allocation3 + $0x96] sm:$0xff] }
 0x558   : > { %v3792_v20 = vpop.permute.xlu1 %3791  ;;  %4164 = vrot.lane.b32.xlu0 %v4098_v57, %s9653_s23 }
 0x559   : > { %3879 = vst.msk [vmem:[#allocation4 + $0x90] sm:$0xff] %vm3869_vm14, %v3792_v20  ;;  %v4290_v20 = vld [vmem:[#allocation3 + $0x9e] sm:$0xff] }
 0x55a   : > { %4166 = vrot.lane.b32.xlu1 %v4099_v14, %s9653_s23  ;;  %v3794_v42 = vpop.permute.xlu0 %3793 }
 0x55b   : > { %3880 = vst.msk [vmem:[#allocation4 + $0xa0] sm:$0xff] %vm3869_vm14, %v3794_v42  ;;  %v4291_v42 = vld [vmem:[#allocation3 + $0xae] sm:$0xff] }
 0x55c   : > { %v3796_v48 = vpop.permute.xlu1 %3795  ;;  %4168 = vrot.lane.b32.xlu0 %v4100_v41, %s9653_s23 }
 0x55d   : > { %3881 = vst.msk [vmem:[#allocation4 + $0xb0] sm:$0xff] %vm3869_vm14, %v3796_v48  ;;  %v4292_v48 = vld [vmem:[#allocation3 + $0xb6] sm:$0xff] }
 0x55e   : > { %4170 = vrot.lane.b32.xlu1 %v4101_v49, %s9653_s23  ;;  %v3798_v0 = vpop.permute.xlu0 %3797 }
 0x55f   : > { %3882 = vst.msk [vmem:[#allocation4 + $0xc0] sm:$0xff] %vm3869_vm14, %v3798_v0  ;;  %v4293_v0 = vld [vmem:[#allocation3 + $0xc6] sm:$0xff] }
 0x560   : > { %v3800_v50 = vpop.permute.xlu1 %3799  ;;  %4172 = vrot.lane.b32.xlu0 %v4102_v23, %s9653_s23 }
 0x561   : > { %3883 = vst.msk [vmem:[#allocation4 + $0xd0] sm:$0xff] %vm3869_vm14, %v3800_v50  ;;  %v4294_v50 = vld [vmem:[#allocation3 + $0xce] sm:$0xff] }
 0x562   : > { %4174 = vrot.lane.b32.xlu1 %v4103_v5, %s9653_s23  ;;  %v3802_v38 = vpop.permute.xlu0 %3801 }
 0x563   : > { %3884 = vst.msk [vmem:[#allocation4 + $0xe0] sm:$0xff] %vm3869_vm14, %v3802_v38  ;;  %v4295_v38 = vld [vmem:[#allocation3 + $0xde] sm:$0xff] }
 0x564   : > { %v3804_v4 = vpop.permute.xlu1 %3803  ;;  %4176 = vrot.lane.b32.xlu0 %v4104_v60, %s9653_s23 }
 0x565   : > { %3885 = vst.msk [vmem:[#allocation4 + $0xf0] sm:$0xff] %vm3869_vm14, %v3804_v4 }
 0x566   : > { %4178 = vrot.lane.b32.xlu1 %v4105_v10, %s9653_s23  ;;  %v3806_v13 = vpop.permute.xlu0 %3805  ;;  %v4297_v10 = vld [vmem:[#allocation3 + $0xf6] sm:$0xff] }
 0x567   : > { %3886 = vst.msk [vmem:[#allocation4 + $0x100] sm:$0xff] %vm3869_vm14, %v3806_v13 }
 0x568   : > { %v3808_v39 = vpop.permute.xlu1 %3807  ;;  %4180 = vrot.lane.b32.xlu0 %v4106_v28, %s9653_s23  ;;  %v4298_v28 = vld [vmem:[#allocation3 + $0xfe] sm:$0xff] }
 0x569   : > { %3887 = vst.msk [vmem:[#allocation4 + $0x110] sm:$0xff] %vm3869_vm14, %v3808_v39 }
 0x56a   : > { %4182 = vrot.lane.b32.xlu1 %v4107_v1, %s9653_s23  ;;  %v3810_v34 = vpop.permute.xlu0 %3809  ;;  %v4299_v1 = vld [vmem:[#allocation3 + $0x10e] sm:$0xff] }
 0x56b   : > { %3888 = vst.msk [vmem:[#allocation4 + $0x120] sm:$0xff] %vm3869_vm14, %v3810_v34 }
 0x56c   : > { %v3812_v31 = vpop.permute.xlu1 %3811  ;;  %4184 = vrot.lane.b32.xlu0 %v4108_v12, %s9653_s23  ;;  %v4300_v12 = vld [vmem:[#allocation3 + $0x116] sm:$0xff] }
 0x56d   : > { %3889 = vst.msk [vmem:[#allocation4 + $0x130] sm:$0xff] %vm3869_vm14, %v3812_v31 }
 0x56e   : > { %4186 = vrot.lane.b32.xlu1 %v4109_v35, %s9653_s23  ;;  %v3814_v2 = vpop.permute.xlu0 %3813  ;;  %v4301_v35 = vld [vmem:[#allocation3 + $0x126] sm:$0xff] }
 0x56f   : > { %3890 = vst.msk [vmem:[#allocation4 + $0x140] sm:$0xff] %vm3869_vm14, %v3814_v2 }
 0x570   : > { %v3816_v21 = vpop.permute.xlu1 %3815  ;;  %4188 = vrot.lane.b32.xlu0 %v4110_v15, %s9653_s23  ;;  %v4302_v15 = vld [vmem:[#allocation3 + $0x12e] sm:$0xff] }
 0x571   : > { %3891 = vst.msk [vmem:[#allocation4 + $0x150] sm:$0xff] %vm3869_vm14, %v3816_v21 }
 0x572   : > { %4190 = vrot.lane.b32.xlu1 %v4111_v29, %s9653_s23  ;;  %v3818_v58 = vpop.permute.xlu0 %3817  ;;  %v4303_v29 = vld [vmem:[#allocation3 + $0x13e] sm:$0xff] }
 0x573   : > { %3892 = vst.msk [vmem:[#allocation4 + $0x160] sm:$0xff] %vm3869_vm14, %v3818_v58 }
 0x574   : > { %v3820_v43 = vpop.permute.xlu1 %3819  ;;  %4192 = vrot.lane.b32.xlu0 %v4112_v30, %s9653_s23  ;;  %v4304_v30 = vld [vmem:[#allocation3 + $0x146] sm:$0xff] }
 0x575   : > { %3893 = vst.msk [vmem:[#allocation4 + $0x170] sm:$0xff] %vm3869_vm14, %v3820_v43 }
 0x576   : > { %4194 = vrot.lane.b32.xlu1 %v4113_v53, %s9653_s23  ;;  %v3822_v19 = vpop.permute.xlu0 %3821  ;;  %v4305_v53 = vld [vmem:[#allocation3 + $0x156] sm:$0xff] }
 0x577   : > { %3894 = vst.msk [vmem:[#allocation4 + $0x180] sm:$0xff] %vm3869_vm14, %v3822_v19 }
 0x578   : > { %v3824_v33 = vpop.permute.xlu1 %3823  ;;  %4196 = vrot.lane.b32.xlu0 %v4114_v7, %s9653_s23  ;;  %v4306_v7 = vld [vmem:[#allocation3 + $0x15e] sm:$0xff] }
 0x579   : > { %3895 = vst.msk [vmem:[#allocation4 + $0x190] sm:$0xff] %vm3869_vm14, %v3824_v33 }
 0x57a   : > { %4198 = vrot.lane.b32.xlu1 %v4115_v3, %s9653_s23  ;;  %v3826_v22 = vpop.permute.xlu0 %3825  ;;  %v4307_v3 = vld [vmem:[#allocation3 + $0x16e] sm:$0xff] }
 0x57b   : > { %3896 = vst.msk [vmem:[#allocation4 + $0x1a0] sm:$0xff] %vm3869_vm14, %v3826_v22 }
 0x57c   : > { %v3828_v45 = vpop.permute.xlu1 %3827  ;;  %4200 = vrot.lane.b32.xlu0 %v4116_v62, %s9653_s23  ;;  %v4308_v62 = vld [vmem:[#allocation3 + $0x176] sm:$0xff] }
 0x57d   : > { %3897 = vst.msk [vmem:[#allocation4 + $0x1b0] sm:$0xff] %vm3869_vm14, %v3828_v45 }
 0x57e   : > { %4202 = vrot.lane.b32.xlu1 %v4117_v59, %s9653_s23  ;;  %v3830_v37 = vpop.permute.xlu0 %3829  ;;  %v4309_v59 = vld [vmem:[#allocation3 + $0x186] sm:$0xff] }
 0x57f   : > { %3898 = vst.msk [vmem:[#allocation4 + $0x1c0] sm:$0xff] %vm3869_vm14, %v3830_v37  ;;  %v4310_v37 = vld [vmem:[#allocation3 + $0x18e] sm:$0xff] }
 0x580   : > { %v3832_v11 = vpop.permute.xlu1 %3831  ;;  %4204 = vrot.lane.b32.xlu0 %v4118_v25, %s9653_s23 }
 0x581   : > { %3899 = vst.msk [vmem:[#allocation4 + $0x1d0] sm:$0xff] %vm3869_vm14, %v3832_v11 }
 0x582   : > { %4206 = vrot.lane.b32.xlu1 %v4119_v52, %s9653_s23  ;;  %v3834_v61 = vpop.permute.xlu0 %3833  ;;  %v4312_v52 = vld [vmem:[#allocation3 + $0x1a6] sm:$0xff] }
 0x583   : > { %3900 = vst.msk [vmem:[#allocation4 + $0x1e0] sm:$0xff] %vm3869_vm14, %v3834_v61 }
 0x584   : > { %v3836_v18 = vpop.permute.xlu1 %3835  ;;  %4208 = vrot.lane.b32.xlu0 %v11759_v9, %s9653_s23 }
 0x585   : > { %3901 = vst.msk [vmem:[#allocation4 + $0x1f0] sm:$0xff] %vm3869_vm14, %v3836_v18 }
 0x586   : > { %4210 = vrot.lane.b32.xlu1 %v11764_v27, %s9653_s23  ;;  %v3968_v24 = vpop.permute.xlu0 %3967  ;;  %v4126_v27 = vld [vmem:[#allocation3 + $0x1fc] sm:$0xff] }
 0x587   : > { %4064 = vst.msk [vmem:[#allocation4] sm:$0xff] %vm4063_vm9, %v3968_v24 }
 0x588   : > { %v3970_v17 = vpop.permute.xlu1 %3969  ;;  %4212 = vrot.lane.b32.xlu0 %v11769_v63, %s9653_s23  ;;  %v4127_v63 = vld [vmem:[#allocation3 + $0x204] sm:$0xff] }
 0x589   : > { %4065 = vst.msk [vmem:[#allocation4 + $0x10] sm:$0xff] %vm4063_vm9, %v3970_v17 }
 0x58a   : > { %4214 = vrot.lane.b32.xlu1 %v11774_v44, %s9653_s23  ;;  %v3972_v9 = vpop.permute.xlu0 %3971 }
 0x58b   : > { %4066 = vst.msk [vmem:[#allocation4 + $0x20] sm:$0xff] %vm4063_vm9, %v3972_v9  ;;  %v4318_v9 = vld [vmem:[#allocation3 + $0x1ee] sm:$0xff] }
 0x58c   : > { %v3974_v46 = vpop.permute.xlu1 %3973  ;;  %4216 = vrot.lane.b32.xlu0 %v4124_v26, %s9653_s23  ;;  %v4317_v26 = vld [vmem:[#allocation3 + $0x1e6] sm:$0xff] }
 0x58d   : > { %4067 = vst.msk [vmem:[#allocation4 + $0x30] sm:$0xff] %vm4063_vm9, %v3974_v46 }
 0x58e   : > { %4218 = vrot.lane.b32.xlu1 %v4125_v16, %s9653_s23  ;;  %v3976_v55 = vpop.permute.xlu0 %3975 }
 0x58f   : > { %4068 = vst.msk [vmem:[#allocation4 + $0x40] sm:$0xff] %vm4063_vm9, %v3976_v55 }
 0x590   : > { %v3978_v32 = vpop.permute.xlu1 %3977  ;;  %4220 = vrot.lane.b32.xlu0 %v4126_v27, %s9653_s23 }
 0x591   : > { %4069 = vst.msk [vmem:[#allocation4 + $0x50] sm:$0xff] %vm4063_vm9, %v3978_v32 }
 0x592   : > { %4222 = vrot.lane.b32.xlu1 %v4127_v63, %s9653_s23  ;;  %v3980_v44 = vpop.permute.xlu0 %3979 }
 0x593   : > { %4070 = vst.msk [vmem:[#allocation4 + $0x60] sm:$0xff] %vm4063_vm9, %v3980_v44 }
 0x594   : > { %v3982_v57 = vpop.permute.xlu1 %3981  ;;  %4353 = vrot.lane.b32.xlu0 %v4289_v40, %s9651_s22 }
 0x595   : > { %4071 = vst.msk [vmem:[#allocation4 + $0x70] sm:$0xff] %vm4063_vm9, %v3982_v57 }
 0x596   : > { %4355 = vrot.lane.b32.xlu1 %v4290_v20, %s9651_s22  ;;  %v3984_v14 = vpop.permute.xlu0 %3983 }
 0x597   : > { %4072 = vst.msk [vmem:[#allocation4 + $0x80] sm:$0xff] %vm4063_vm9, %v3984_v14 }
 0x598   : > { %v3986_v41 = vpop.permute.xlu1 %3985  ;;  %4357 = vrot.lane.b32.xlu0 %v4291_v42, %s9651_s22 }
 0x599   : > { %4073 = vst.msk [vmem:[#allocation4 + $0x90] sm:$0xff] %vm4063_vm9, %v3986_v41 }
 0x59a   : > { %4359 = vrot.lane.b32.xlu1 %v4292_v48, %s9651_s22  ;;  %v3988_v49 = vpop.permute.xlu0 %3987 }
 0x59b   : > { %4074 = vst.msk [vmem:[#allocation4 + $0xa0] sm:$0xff] %vm4063_vm9, %v3988_v49 }
 0x59c   : > { %v3990_v23 = vpop.permute.xlu1 %3989  ;;  %4361 = vrot.lane.b32.xlu0 %v4293_v0, %s9651_s22 }
 0x59d   : > { %4075 = vst.msk [vmem:[#allocation4 + $0xb0] sm:$0xff] %vm4063_vm9, %v3990_v23 }
 0x59e   : > { %4363 = vrot.lane.b32.xlu1 %v4294_v50, %s9651_s22  ;;  %v3992_v5 = vpop.permute.xlu0 %3991 }
 0x59f   : > { %4076 = vst.msk [vmem:[#allocation4 + $0xc0] sm:$0xff] %vm4063_vm9, %v3992_v5 }
 0x5a0   : > { %v3994_v60 = vpop.permute.xlu1 %3993  ;;  %4365 = vrot.lane.b32.xlu0 %v4295_v38, %s9651_s22 }
 0x5a1   : > { %4077 = vst.msk [vmem:[#allocation4 + $0xd0] sm:$0xff] %vm4063_vm9, %v3994_v60 }
 0x5a2   : > { %4367 = vrot.lane.b32.xlu1 %v4296_v6, %s9651_s22  ;;  %v3996_v4 = vpop.permute.xlu0 %3995 }
 0x5a3   : > { %4078 = vst.msk [vmem:[#allocation4 + $0xe0] sm:$0xff] %vm4063_vm9, %v3996_v4 }
 0x5a4   : > { %v3998_v13 = vpop.permute.xlu1 %3997  ;;  %4369 = vrot.lane.b32.xlu0 %v4297_v10, %s9651_s22 }
 0x5a5   : > { %4079 = vst.msk [vmem:[#allocation4 + $0xf0] sm:$0xff] %vm4063_vm9, %v3998_v13 }
 0x5a6   : > { %4371 = vrot.lane.b32.xlu1 %v4298_v28, %s9651_s22  ;;  %v4000_v39 = vpop.permute.xlu0 %3999 }
 0x5a7   : > { %4080 = vst.msk [vmem:[#allocation4 + $0x100] sm:$0xff] %vm4063_vm9, %v4000_v39 }
 0x5a8   : > { %v4002_v34 = vpop.permute.xlu1 %4001  ;;  %4373 = vrot.lane.b32.xlu0 %v4299_v1, %s9651_s22 }
 0x5a9   : > { %4081 = vst.msk [vmem:[#allocation4 + $0x110] sm:$0xff] %vm4063_vm9, %v4002_v34 }
 0x5aa   : > { %4375 = vrot.lane.b32.xlu1 %v4300_v12, %s9651_s22  ;;  %v4004_v31 = vpop.permute.xlu0 %4003 }
 0x5ab   : > { %4082 = vst.msk [vmem:[#allocation4 + $0x120] sm:$0xff] %vm4063_vm9, %v4004_v31 }
 0x5ac   : > { %v4006_v2 = vpop.permute.xlu1 %4005  ;;  %4377 = vrot.lane.b32.xlu0 %v4301_v35, %s9651_s22 }
 0x5ad   : > { %4083 = vst.msk [vmem:[#allocation4 + $0x130] sm:$0xff] %vm4063_vm9, %v4006_v2 }
 0x5ae   : > { %4379 = vrot.lane.b32.xlu1 %v4302_v15, %s9651_s22  ;;  %v4008_v21 = vpop.permute.xlu0 %4007 }
 0x5af   : > { %4084 = vst.msk [vmem:[#allocation4 + $0x140] sm:$0xff] %vm4063_vm9, %v4008_v21 }
 0x5b0   : > { %v4010_v58 = vpop.permute.xlu1 %4009  ;;  %4381 = vrot.lane.b32.xlu0 %v4303_v29, %s9651_s22 }
 0x5b1   : > { %4085 = vst.msk [vmem:[#allocation4 + $0x150] sm:$0xff] %vm4063_vm9, %v4010_v58 }
 0x5b2   : > { %4383 = vrot.lane.b32.xlu1 %v4304_v30, %s9651_s22  ;;  %v4012_v43 = vpop.permute.xlu0 %4011 }
 0x5b3   : > { %4086 = vst.msk [vmem:[#allocation4 + $0x160] sm:$0xff] %vm4063_vm9, %v4012_v43 }
 0x5b4   : > { %v4014_v19 = vpop.permute.xlu1 %4013  ;;  %4385 = vrot.lane.b32.xlu0 %v4305_v53, %s9651_s22 }
 0x5b5   : > { %4087 = vst.msk [vmem:[#allocation4 + $0x170] sm:$0xff] %vm4063_vm9, %v4014_v19 }
 0x5b6   : > { %4387 = vrot.lane.b32.xlu1 %v4306_v7, %s9651_s22  ;;  %v4016_v33 = vpop.permute.xlu0 %4015 }
 0x5b7   : > { %4088 = vst.msk [vmem:[#allocation4 + $0x180] sm:$0xff] %vm4063_vm9, %v4016_v33 }
 0x5b8   : > { %v4018_v22 = vpop.permute.xlu1 %4017  ;;  %4389 = vrot.lane.b32.xlu0 %v4307_v3, %s9651_s22 }
 0x5b9   : > { %4089 = vst.msk [vmem:[#allocation4 + $0x190] sm:$0xff] %vm4063_vm9, %v4018_v22 }
 0x5ba   : > { %4391 = vrot.lane.b32.xlu1 %v4308_v62, %s9651_s22  ;;  %v4020_v45 = vpop.permute.xlu0 %4019 }
 0x5bb   : > { %4090 = vst.msk [vmem:[#allocation4 + $0x1a0] sm:$0xff] %vm4063_vm9, %v4020_v45 }
 0x5bc   : > { %v4022_v36 = vpop.permute.xlu1 %4021  ;;  %4393 = vrot.lane.b32.xlu0 %v4309_v59, %s9651_s22 }
 0x5bd   : > { %4091 = vst.msk [vmem:[#allocation4 + $0x1b0] sm:$0xff] %vm4063_vm9, %v4022_v36 }
 0x5be   : > { %4395 = vrot.lane.b32.xlu1 %v4310_v37, %s9651_s22  ;;  %v4024_v25 = vpop.permute.xlu0 %4023 }
 0x5bf   : > { %4092 = vst.msk [vmem:[#allocation4 + $0x1c0] sm:$0xff] %vm4063_vm9, %v4024_v25 }
 0x5c0   : > { %v4026_v11 = vpop.permute.xlu1 %4025  ;;  %4397 = vrot.lane.b32.xlu0 %v4311_v51, %s9651_s22 }
 0x5c1   : > { %4093 = vst.msk [vmem:[#allocation4 + $0x1d0] sm:$0xff] %vm4063_vm9, %v4026_v11 }
 0x5c2   : > { %4399 = vrot.lane.b32.xlu1 %v4312_v52, %s9651_s22  ;;  %v4028_v61 = vpop.permute.xlu0 %4027 }
 0x5c3   : > { %4094 = vst.msk [vmem:[#allocation4 + $0x1e0] sm:$0xff] %vm4063_vm9, %v4028_v61 }
 0x5c4   : > { %v4030_v18 = vpop.permute.xlu1 %4029  ;;  %4401 = vrot.lane.b32.xlu0 %v11863_v8, %s9651_s22 }
 0x5c5   : > { %4095 = vst.msk [vmem:[#allocation4 + $0x1f0] sm:$0xff] %vm4063_vm9, %v4030_v18 }
 0x5c6   : > { %4403 = vrot.lane.b32.xlu1 %v11868_v47, %s9651_s22  ;;  %v4161_v24 = vpop.permute.xlu0 %4160  ;;  %v4319_v47 = vld [vmem:[#allocation3 + $0x1fe] sm:$0xff] }
 0x5c7   : > { %4257 = vst.msk [vmem:[#allocation4] sm:$0xff] %vm4256_vm8, %v4161_v24 }
 0x5c8   : > { %v4163_v17 = vpop.permute.xlu1 %4162  ;;  %4405 = vrot.lane.b32.xlu0 %v11873_v54, %s9651_s22  ;;  %v4320_v54 = vld [vmem:[#allocation3 + $0x206] sm:$0xff] }
 0x5c9   : > { %4258 = vst.msk [vmem:[#allocation4 + $0x10] sm:$0xff] %vm4256_vm8, %v4163_v17 }
 0x5ca   : > { %4407 = vrot.lane.b32.xlu1 %v11878_v56, %s9651_s22  ;;  %v4165_v8 = vpop.permute.xlu0 %4164 }
 0x5cb   : > { %4259 = vst.msk [vmem:[#allocation4 + $0x20] sm:$0xff] %vm4256_vm8, %v4165_v8 }
 0x5cc   : > { %v4167_v16 = vpop.permute.xlu1 %4166  ;;  %4409 = vrot.lane.b32.xlu0 %v4317_v26, %s9651_s22 }
 0x5cd   : > { %4260 = vst.msk [vmem:[#allocation4 + $0x30] sm:$0xff] %vm4256_vm8, %v4167_v16 }
 0x5ce   : > { %v4169_v46 = vpop.permute.xlu0 %4168  ;;  %4411 = vrot.lane.b32.xlu1 %v4318_v9, %s9651_s22 }
 0x5cf   : > { %4261 = vst.msk [vmem:[#allocation4 + $0x40] sm:$0xff] %vm4256_vm8, %v4169_v46 }
 0x5d0   : > { %v4171_v27 = vpop.permute.xlu1 %4170  ;;  %4413 = vrot.lane.b32.xlu0 %v4319_v47, %s9651_s22 }
 0x5d1   : > { %4262 = vst.msk [vmem:[#allocation4 + $0x50] sm:$0xff] %vm4256_vm8, %v4171_v27 }
 0x5d2   : > { %v4173_v56 = vpop.permute.xlu0 %4172  ;;  %4415 = vrot.lane.b32.xlu1 %v4320_v54, %s9651_s22 }
 0x5d3   : > { %4263 = vst.msk [vmem:[#allocation4 + $0x60] sm:$0xff] %vm4256_vm8, %v4173_v56 }
 0x5d4   : > { %v4175_v55 = vpop.permute.xlu1 %4174 }
 0x5d5   : > { %4264 = vst.msk [vmem:[#allocation4 + $0x70] sm:$0xff] %vm4256_vm8, %v4175_v55 }
 0x5d6   : > { %v4177_v63 = vpop.permute.xlu0 %4176 }
 0x5d7   : > { %4265 = vst.msk [vmem:[#allocation4 + $0x80] sm:$0xff] %vm4256_vm8, %v4177_v63 }
 0x5d8   : > { %v4179_v32 = vpop.permute.xlu1 %4178 }
 0x5d9   : > { %4266 = vst.msk [vmem:[#allocation4 + $0x90] sm:$0xff] %vm4256_vm8, %v4179_v32 }
 0x5da   : > { %v4181_v44 = vpop.permute.xlu0 %4180 }
 0x5db   : > { %4267 = vst.msk [vmem:[#allocation4 + $0xa0] sm:$0xff] %vm4256_vm8, %v4181_v44 }
 0x5dc   : > { %v4183_v40 = vpop.permute.xlu1 %4182 }
 0x5dd   : > { %4268 = vst.msk [vmem:[#allocation4 + $0xb0] sm:$0xff] %vm4256_vm8, %v4183_v40 }
 0x5de   : > { %v4185_v57 = vpop.permute.xlu0 %4184 }
 0x5df   : > { %4269 = vst.msk [vmem:[#allocation4 + $0xc0] sm:$0xff] %vm4256_vm8, %v4185_v57 }
 0x5e0   : > { %v4187_v20 = vpop.permute.xlu1 %4186 }
 0x5e1   : > { %4270 = vst.msk [vmem:[#allocation4 + $0xd0] sm:$0xff] %vm4256_vm8, %v4187_v20 }
 0x5e2   : > { %v4189_v14 = vpop.permute.xlu0 %4188 }
 0x5e3   : > { %4271 = vst.msk [vmem:[#allocation4 + $0xe0] sm:$0xff] %vm4256_vm8, %v4189_v14 }
 0x5e4   : > { %v4191_v42 = vpop.permute.xlu1 %4190 }
 0x5e5   : > { %4272 = vst.msk [vmem:[#allocation4 + $0xf0] sm:$0xff] %vm4256_vm8, %v4191_v42 }
 0x5e6   : > { %v4193_v41 = vpop.permute.xlu0 %4192 }
 0x5e7   : > { %4273 = vst.msk [vmem:[#allocation4 + $0x100] sm:$0xff] %vm4256_vm8, %v4193_v41 }
 0x5e8   : > { %v4195_v48 = vpop.permute.xlu1 %4194 }
 0x5e9   : > { %4274 = vst.msk [vmem:[#allocation4 + $0x110] sm:$0xff] %vm4256_vm8, %v4195_v48 }
 0x5ea   : > { %v4197_v49 = vpop.permute.xlu0 %4196 }
 0x5eb   : > { %4275 = vst.msk [vmem:[#allocation4 + $0x120] sm:$0xff] %vm4256_vm8, %v4197_v49 }
 0x5ec   : > { %v4199_v0 = vpop.permute.xlu1 %4198 }
 0x5ed   : > { %4276 = vst.msk [vmem:[#allocation4 + $0x130] sm:$0xff] %vm4256_vm8, %v4199_v0 }
 0x5ee   : > { %v4201_v23 = vpop.permute.xlu0 %4200 }
 0x5ef   : > { %4277 = vst.msk [vmem:[#allocation4 + $0x140] sm:$0xff] %vm4256_vm8, %v4201_v23 }
 0x5f0   : > { %v4203_v50 = vpop.permute.xlu1 %4202 }
 0x5f1   : > { %4278 = vst.msk [vmem:[#allocation4 + $0x150] sm:$0xff] %vm4256_vm8, %v4203_v50 }
 0x5f2   : > { %v4205_v5 = vpop.permute.xlu0 %4204 }
 0x5f3   : > { %4279 = vst.msk [vmem:[#allocation4 + $0x160] sm:$0xff] %vm4256_vm8, %v4205_v5 }
 0x5f4   : > { %v4207_v38 = vpop.permute.xlu1 %4206 }
 0x5f5   : > { %4280 = vst.msk [vmem:[#allocation4 + $0x170] sm:$0xff] %vm4256_vm8, %v4207_v38 }
 0x5f6   : > { %v4209_v60 = vpop.permute.xlu0 %4208 }
 0x5f7   : > { %4281 = vst.msk [vmem:[#allocation4 + $0x180] sm:$0xff] %vm4256_vm8, %v4209_v60 }
 0x5f8   : > { %v4211_v6 = vpop.permute.xlu1 %4210 }
 0x5f9   : > { %4282 = vst.msk [vmem:[#allocation4 + $0x190] sm:$0xff] %vm4256_vm8, %v4211_v6 }
 0x5fa   : > { %v4213_v4 = vpop.permute.xlu0 %4212 }
 0x5fb   : > { %4283 = vst.msk [vmem:[#allocation4 + $0x1a0] sm:$0xff] %vm4256_vm8, %v4213_v4 }
 0x5fc   : > { %v4215_v10 = vpop.permute.xlu1 %4214 }
 0x5fd   : > { %4284 = vst.msk [vmem:[#allocation4 + $0x1b0] sm:$0xff] %vm4256_vm8, %v4215_v10 }
 0x5fe   : > { %v4217_v13 = vpop.permute.xlu0 %4216 }
 0x5ff   : > { %4285 = vst.msk [vmem:[#allocation4 + $0x1c0] sm:$0xff] %vm4256_vm8, %v4217_v13 }
 0x600   : > { %v4219_v28 = vpop.permute.xlu1 %4218 }
 0x601   : > { %4286 = vst.msk [vmem:[#allocation4 + $0x1d0] sm:$0xff] %vm4256_vm8, %v4219_v28 }
 0x602   : > { %v4221_v39 = vpop.permute.xlu0 %4220 }
 0x603   : > { %4287 = vst.msk [vmem:[#allocation4 + $0x1e0] sm:$0xff] %vm4256_vm8, %v4221_v39 }
 0x604   : > { %v4223_v1 = vpop.permute.xlu1 %4222 }
 0x605   : > { %4288 = vst.msk [vmem:[#allocation4 + $0x1f0] sm:$0xff] %vm4256_vm8, %v4223_v1 }
 0x606   : > { %v4354_v34 = vpop.permute.xlu0 %4353 }
 0x607   : > { %4450 = vst.msk [vmem:[#allocation4] sm:$0xff] %vm4449_vm13, %v4354_v34 }
 0x608   : > { %v4356_v12 = vpop.permute.xlu1 %4355 }
 0x609   : > { %4451 = vst.msk [vmem:[#allocation4 + $0x10] sm:$0xff] %vm4449_vm13, %v4356_v12 }
 0x60a   : > { %v4358_v31 = vpop.permute.xlu0 %4357 }
 0x60b   : > { %4452 = vst.msk [vmem:[#allocation4 + $0x20] sm:$0xff] %vm4449_vm13, %v4358_v31 }
 0x60c   : > { %v4360_v35 = vpop.permute.xlu1 %4359 }
 0x60d   : > { %4453 = vst.msk [vmem:[#allocation4 + $0x30] sm:$0xff] %vm4449_vm13, %v4360_v35 }
 0x60e   : > { %v4362_v2 = vpop.permute.xlu0 %4361  ;;  %v4482_v21 = vld [vmem:[#allocation4] sm:$0xff] }
 0x60f   : > { %4454 = vst.msk [vmem:[#allocation4 + $0x40] sm:$0xff] %vm4449_vm13, %v4362_v2 }
 0x610   : > { %v4364_v15 = vpop.permute.xlu1 %4363  ;;  %v4483_v29 = vld [vmem:[#allocation4 + $0x10] sm:$0xff] }
 0x611   : > { %4455 = vst.msk [vmem:[#allocation4 + $0x50] sm:$0xff] %vm4449_vm13, %v4364_v15  ;;  %v4514_v58 = vpack.c.bf16 %v4483_v29, %v4482_v21 }
 0x612   : > { %v4366_v30 = vpop.permute.xlu0 %4365  ;;  %v4484_v53 = vld [vmem:[#allocation4 + $0x20] sm:$0xff] }
 0x613   : > { %4456 = vst.msk [vmem:[#allocation4 + $0x60] sm:$0xff] %vm4449_vm13, %v4366_v30  ;;  %9476 = vmatprep.mubr.msk.bf16.mxu0 %vm4573_vm11, %v4514_v58 }
 0x614   : > { %v4368_v43 = vpop.permute.xlu1 %4367  ;;  %v4485_v19 = vld [vmem:[#allocation4 + $0x30] sm:$0xff] }
 0x615   : > { %4457 = vst.msk [vmem:[#allocation4 + $0x70] sm:$0xff] %vm4449_vm13, %v4368_v43  ;;  %v4515_v7 = vpack.c.bf16 %v4485_v19, %v4484_v53 }
 0x616   : > { %v4370_v33 = vpop.permute.xlu0 %4369  ;;  %v4486_v22 = vld [vmem:[#allocation4 + $0x40] sm:$0xff] }
 0x617   : > { %4458 = vst.msk [vmem:[#allocation4 + $0x80] sm:$0xff] %vm4449_vm13, %v4370_v33  ;;  %9477 = vmatmul.mubr.msk.bf16.vlgmr.msra.gmra.mrb[64].mxu0 %vm4573_vm11, %v4515_v7 }
 0x618   : > { %v4372_v3 = vpop.permute.xlu1 %4371  ;;  %v4487_v62 = vld [vmem:[#allocation4 + $0x50] sm:$0xff] }
 0x619   : > { %4459 = vst.msk [vmem:[#allocation4 + $0x90] sm:$0xff] %vm4449_vm13, %v4372_v3  ;;  %v4516_v45 = vpack.c.bf16 %v4487_v62, %v4486_v22  ;;  %v12205_v22 = vld [vmem:[%s14360_s5] ss:$0 sm:$0xff] }
 0x61a   : > { %v4374_v59 = vpop.permute.xlu0 %4373  ;;  %v4488_v37 = vld [vmem:[#allocation4 + $0x60] sm:$0xff] }
 0x61b   : > { %4460 = vst.msk [vmem:[#allocation4 + $0xa0] sm:$0xff] %vm4449_vm13, %v4374_v59  ;;  %9480 = vmatprep.mubr.msk.bf16.mxu0 %vm4573_vm11, %v4516_v45 }
 0x61c   : > { %v4376_v36 = vpop.permute.xlu1 %4375  ;;  %v4489_v25 = vld [vmem:[#allocation4 + $0x70] sm:$0xff] }
 0x61d   : > { %4461 = vst.msk [vmem:[#allocation4 + $0xb0] sm:$0xff] %vm4449_vm13, %v4376_v36  ;;  %v4517_v51 = vpack.c.bf16 %v4489_v25, %v4488_v37 }
 0x61e   : > { %v4378_v11 = vpop.permute.xlu0 %4377  ;;  %v4490_v61 = vld [vmem:[#allocation4 + $0x80] sm:$0xff] }
 0x61f   : > { %4462 = vst.msk [vmem:[#allocation4 + $0xc0] sm:$0xff] %vm4449_vm13, %v4378_v11  ;;  %9481 = vmatmul.mubr.msk.bf16.gmra.mrb[68].mxu0 %vm4573_vm11, %v4517_v51 }
 0x620   : > { %v4380_v52 = vpop.permute.xlu1 %4379  ;;  %v4491_v18 = vld [vmem:[#allocation4 + $0x90] sm:$0xff] }
 0x621   : > { %4463 = vst.msk [vmem:[#allocation4 + $0xd0] sm:$0xff] %vm4449_vm13, %v4380_v52  ;;  %v4518_v24 = vpack.c.bf16 %v4491_v18, %v4490_v61 }
 0x622   : > { %v4382_v17 = vpop.permute.xlu0 %4381  ;;  %v4492_v8 = vld [vmem:[#allocation4 + $0xa0] sm:$0xff] }
 0x623   : > { %4464 = vst.msk [vmem:[#allocation4 + $0xe0] sm:$0xff] %vm4449_vm13, %v4382_v17  ;;  %9484 = vmatprep.mubr.msk.bf16.mxu0 %vm4573_vm11, %v4518_v24 }
 0x624   : > { %v4384_v26 = vpop.permute.xlu1 %4383  ;;  %v4493_v9 = vld [vmem:[#allocation4 + $0xb0] sm:$0xff] }
 0x625   : > { %4465 = vst.msk [vmem:[#allocation4 + $0xf0] sm:$0xff] %vm4449_vm13, %v4384_v26  ;;  %v4519_v16 = vpack.c.bf16 %v4493_v9, %v4492_v8 }
 0x626   : > { %v4386_v47 = vpop.permute.xlu0 %4385  ;;  %v4494_v54 = vld [vmem:[#allocation4 + $0xc0] sm:$0xff] }
 0x627   : > { %4466 = vst.msk [vmem:[#allocation4 + $0x100] sm:$0xff] %vm4449_vm13, %v4386_v47  ;;  %9485 = vmatmul.mubr.msk.bf16.gmra.mrb[72].mxu0 %vm4573_vm11, %v4519_v16 }
 0x628   : > { %v4388_v46 = vpop.permute.xlu1 %4387  ;;  %v4495_v27 = vld [vmem:[#allocation4 + $0xd0] sm:$0xff] }
 0x629   : > { %4467 = vst.msk [vmem:[#allocation4 + $0x110] sm:$0xff] %vm4449_vm13, %v4388_v46  ;;  %v4520_v56 = vpack.c.bf16 %v4495_v27, %v4494_v54 }
 0x62a   : > { %v4390_v55 = vpop.permute.xlu0 %4389  ;;  %v4496_v32 = vld [vmem:[#allocation4 + $0xe0] sm:$0xff] }
 0x62b   : > { %4468 = vst.msk [vmem:[#allocation4 + $0x120] sm:$0xff] %vm4449_vm13, %v4390_v55  ;;  %9488 = vmatprep.mubr.msk.bf16.mxu0 %vm4573_vm11, %v4520_v56 }
 0x62c   : > { %v4392_v63 = vpop.permute.xlu1 %4391  ;;  %v4497_v44 = vld [vmem:[#allocation4 + $0xf0] sm:$0xff] }
 0x62d   : > { %4469 = vst.msk [vmem:[#allocation4 + $0x130] sm:$0xff] %vm4449_vm13, %v4392_v63  ;;  %v4521_v40 = vpack.c.bf16 %v4497_v44, %v4496_v32 }
 0x62e   : > { %v4394_v57 = vpop.permute.xlu0 %4393  ;;  %v4498_v14 = vld [vmem:[#allocation4 + $0x100] sm:$0xff] }
 0x62f   : > { %4470 = vst.msk [vmem:[#allocation4 + $0x140] sm:$0xff] %vm4449_vm13, %v4394_v57  ;;  %9489 = vmatmul.mubr.msk.bf16.gmra.mrb[76].mxu0 %vm4573_vm11, %v4521_v40 }
 0x630   : > { %v4396_v20 = vpop.permute.xlu1 %4395  ;;  %v4499_v42 = vld [vmem:[#allocation4 + $0x110] sm:$0xff] }
 0x631   : > { %4471 = vst.msk [vmem:[#allocation4 + $0x150] sm:$0xff] %vm4449_vm13, %v4396_v20  ;;  %v4522_v41 = vpack.c.bf16 %v4499_v42, %v4498_v14 }
 0x632   : > { %v4398_v48 = vpop.permute.xlu0 %4397  ;;  %v4500_v0 = vld [vmem:[#allocation4 + $0x120] sm:$0xff] }
 0x633   : > { %4472 = vst.msk [vmem:[#allocation4 + $0x160] sm:$0xff] %vm4449_vm13, %v4398_v48  ;;  %9492 = vmatprep.mubr.msk.bf16.mxu0 %vm4573_vm11, %v4522_v41 }
 0x634   : > { %v4400_v49 = vpop.permute.xlu1 %4399  ;;  %v4501_v23 = vld [vmem:[#allocation4 + $0x130] sm:$0xff] }
 0x635   : > { %4473 = vst.msk [vmem:[#allocation4 + $0x170] sm:$0xff] %vm4449_vm13, %v4400_v49  ;;  %v4523_v50 = vpack.c.bf16 %v4501_v23, %v4500_v0 }
 0x636   : > { %v4402_v5 = vpop.permute.xlu0 %4401  ;;  %v4502_v60 = vld [vmem:[#allocation4 + $0x140] sm:$0xff] }
 0x637   : > { %4474 = vst.msk [vmem:[#allocation4 + $0x180] sm:$0xff] %vm4449_vm13, %v4402_v5  ;;  %9493 = vmatmul.mubr.msk.bf16.gmra.mrb[80].mxu0 %vm4573_vm11, %v4523_v50 }
 0x638   : > { %v4404_v38 = vpop.permute.xlu1 %4403  ;;  %v4503_v6 = vld [vmem:[#allocation4 + $0x150] sm:$0xff] }
 0x639   : > { %4475 = vst.msk [vmem:[#allocation4 + $0x190] sm:$0xff] %vm4449_vm13, %v4404_v38  ;;  %v4524_v4 = vpack.c.bf16 %v4503_v6, %v4502_v60 }
 0x63a   : > { %v4406_v10 = vpop.permute.xlu0 %4405  ;;  %v4504_v28 = vld [vmem:[#allocation4 + $0x160] sm:$0xff] }
 0x63b   : > { %4476 = vst.msk [vmem:[#allocation4 + $0x1a0] sm:$0xff] %vm4449_vm13, %v4406_v10  ;;  %9496 = vmatprep.mubr.msk.bf16.mxu1 %vm4573_vm11, %v4524_v4 }
 0x63c   : > { %v4408_v13 = vpop.permute.xlu1 %4407  ;;  %v4505_v39 = vld [vmem:[#allocation4 + $0x170] sm:$0xff] }
 0x63d   : > { %4477 = vst.msk [vmem:[#allocation4 + $0x1b0] sm:$0xff] %vm4449_vm13, %v4408_v13  ;;  %v4525_v1 = vpack.c.bf16 %v4505_v39, %v4504_v28 }
 0x63e   : > { %v4410_v34 = vpop.permute.xlu0 %4409  ;;  %v4506_v12 = vld [vmem:[#allocation4 + $0x180] sm:$0xff] }
 0x63f   : > { %9497 = vmatmul.mubr.msk.bf16.vlgmr.msra.gmra.mrb[0].mxu1 %vm4573_vm11, %v4525_v1  ;;  %4478 = vst.msk [vmem:[#allocation4 + $0x1c0] sm:$0xff] %vm4449_vm13, %v4410_v34 }
 0x640   : > { %v4507_v31 = vld [vmem:[#allocation4 + $0x190] sm:$0xff]  ;;  %v4412_v35 = vpop.permute.xlu1 %4411 }
 0x641   : > { %v4526_v2 = vpack.c.bf16 %v4507_v31, %v4506_v12  ;;  %4479 = vst.msk [vmem:[#allocation4 + $0x1d0] sm:$0xff] %vm4449_vm13, %v4412_v35 }
 0x642   : > { %v4414_v15 = vpop.permute.xlu0 %4413  ;;  %v4508_v21 = vld [vmem:[#allocation4 + $0x1a0] sm:$0xff] }
 0x643   : > { %9500 = vmatprep.mubr.msk.bf16.mxu1 %vm4573_vm11, %v4526_v2  ;;  %4480 = vst.msk [vmem:[#allocation4 + $0x1e0] sm:$0xff] %vm4449_vm13, %v4414_v15 }
 0x644   : > { %v4509_v29 = vld [vmem:[#allocation4 + $0x1b0] sm:$0xff]  ;;  %v4416_v58 = vpop.permute.xlu1 %4415 }
 0x645   : > { %v4527_v30 = vpack.c.bf16 %v4509_v29, %v4508_v21  ;;  %4481 = vst.msk [vmem:[#allocation4 + $0x1f0] sm:$0xff] %vm4449_vm13, %v4416_v58 }
 0x646   : > { %v4510_v43 = vld [vmem:[#allocation4 + $0x1c0] sm:$0xff] }
 0x647   : > { %9501 = vmatmul.mubr.msk.bf16.gmra.mrb[4].mxu1 %vm4573_vm11, %v4527_v30 }
 0x648   : > { %v4511_v53 = vld [vmem:[#allocation4 + $0x1d0] sm:$0xff] }
 0x649   : > { %v4528_v19 = vpack.c.bf16 %v4511_v53, %v4510_v43 }
 0x64a   : > { %v4512_v7 = vld [vmem:[#allocation4 + $0x1e0] sm:$0xff] }
 0x64b   : > { %9504 = vmatprep.mubr.msk.bf16.mxu1 %vm4573_vm11, %v4528_v19 }
 0x64c   : > { %v4513_v33 = vld [vmem:[#allocation4 + $0x1f0] sm:$0xff] }
 0x64d   : > { %v4529_v3 = vpack.c.bf16 %v4513_v33, %v4512_v7 }
 0x64f   : > { %9505 = vmatmul.mubr.msk.bf16.gmra.mrb[8].mxu1 %vm4573_vm11, %v4529_v3 }
 0x6ea   : > { %v9478_v62 = vpop.f32.mrb[64].mxu0 }
 0x6eb   : > { %v4659_v45 = vpop.f32.mrb[65].mxu0  ;;  %v4668_v25 = vadd.f32 %v9478_v62, %v12205_v22 }
 0x6ec   : > { %v4660_v59 = vadd.f32 %v12205_v22, %v4659_v45  ;;  %v9479_v36 = vpop.f32.mrb[66].mxu0 }
 0x6ed   : > { %v4662_v37 = vpop.f32.mrb[67].mxu0  ;;  %v4671_v52 = vadd.f32 %v9479_v36, %v12205_v22  ;;  %v4788_v18 = vmax.f32 %v4668_v25, 0.0 }
 0x6ee   : > { %v4786_v51 = vmax.f32 %v4660_v59, 0.0  ;;  %v4663_v11 = vadd.f32 %v12205_v22, %v4662_v37 }
 0x6ef   : > { %v4789_v26 = vmax.f32 %v4671_v52, 0.0 }
 0x6f0   : > { %v4787_v61 = vmax.f32 %v4663_v11, 0.0  ;;  %4850 = vrot.lane.b32.xlu0 %v4786_v51, %s9642_s20 }
 0x6f2   : > { %4852 = vrot.lane.b32.xlu1 %v4787_v61, %s9642_s20  ;;  %v9482_v24 = vpop.f32.mrb[68].mxu0 }
 0x6f3   : > { %v4675_v17 = vpop.f32.mrb[69].mxu0  ;;  %v4684_v47 = vadd.f32 %v9482_v24, %v12205_v22 }
 0x6f4   : > { %v4676_v8 = vadd.f32 %v12205_v22, %v4675_v17  ;;  %4854 = vrot.lane.b32.xlu0 %v4788_v18, %s9642_s20  ;;  %v9483_v9 = vpop.f32.mrb[70].mxu0 }
 0x6f5   : > { %v4678_v16 = vpop.f32.mrb[71].mxu0  ;;  %v4687_v27 = vadd.f32 %v9483_v9, %v12205_v22  ;;  %v4792_v55 = vmax.f32 %v4684_v47, 0.0 }
 0x6f6   : > { %v4790_v46 = vmax.f32 %v4676_v8, 0.0  ;;  %v4679_v54 = vadd.f32 %v12205_v22, %v4678_v16  ;;  %4856 = vrot.lane.b32.xlu1 %v4789_v26, %s9642_s20 }
 0x6f7   : > { %v4793_v44 = vmax.f32 %v4687_v27, 0.0 }
 0x6f8   : > { %v4791_v56 = vmax.f32 %v4679_v54, 0.0  ;;  %4858 = vrot.lane.b32.xlu0 %v4790_v46, %s9642_s20 }
 0x6fa   : > { %v9486_v63 = vpop.f32.mrb[72].mxu0  ;;  %4860 = vrot.lane.b32.xlu1 %v4791_v56, %s9642_s20 }
 0x6fb   : > { %v4691_v32 = vpop.f32.mrb[73].mxu0  ;;  %v4700_v14 = vadd.f32 %v9486_v63, %v12205_v22 }
 0x6fc   : > { %v4692_v40 = vadd.f32 %v12205_v22, %v4691_v32  ;;  %v9487_v57 = vpop.f32.mrb[74].mxu0  ;;  %4862 = vrot.lane.b32.xlu0 %v4792_v55, %s9642_s20 }
 0x6fd   : > { %v4694_v20 = vpop.f32.mrb[75].mxu0  ;;  %v4703_v48 = vadd.f32 %v9487_v57, %v12205_v22  ;;  %v4796_v0 = vmax.f32 %v4700_v14, 0.0 }
 0x6fe   : > { %v4794_v42 = vmax.f32 %v4692_v40, 0.0  ;;  %v4695_v41 = vadd.f32 %v12205_v22, %v4694_v20  ;;  %4864 = vrot.lane.b32.xlu1 %v4793_v44, %s9642_s20 }
 0x6ff   : > { %v4797_v5 = vmax.f32 %v4703_v48, 0.0 }
 0x700   : > { %v4795_v49 = vmax.f32 %v4695_v41, 0.0  ;;  %4866 = vrot.lane.b32.xlu0 %v4794_v42, %s9642_s20 }
 0x702   : > { %v9490_v23 = vpop.f32.mrb[76].mxu0  ;;  %4868 = vrot.lane.b32.xlu1 %v4795_v49, %s9642_s20  ;;  %v4978_v49 = vld [vmem:[#allocation3] sm:$0xff] }
 0x703   : > { %v4707_v50 = vpop.f32.mrb[77].mxu0  ;;  %v4716_v4 = vadd.f32 %v9490_v23, %v12205_v22  ;;  %v4980_v23 = vld [vmem:[#allocation3 + $0x18] sm:$0xff] }
 0x704   : > { %v4708_v38 = vadd.f32 %v12205_v22, %v4707_v50  ;;  %v9491_v60 = vpop.f32.mrb[78].mxu0  ;;  %4870 = vrot.lane.b32.xlu0 %v4796_v0, %s9642_s20  ;;  %v12271_v0 = vld [vmem:[#allocation3 + $0x8] sm:$0xff]  ;;  %v4982_v50 = vld [vmem:[#allocation3 + $0x30] sm:$0xff] }
 0x705   : > { %v4710_v6 = vpop.f32.mrb[79].mxu0  ;;  %v4719_v28 = vadd.f32 %v9491_v60, %v12205_v22  ;;  %v4800_v1 = vmax.f32 %v4716_v4, 0.0  ;;  %v12286_v60 = vld [vmem:[#allocation3 + $0x50] sm:$0xff] }
 0x706   : > { %v4798_v10 = vmax.f32 %v4708_v38, 0.0  ;;  %v4711_v13 = vadd.f32 %v12205_v22, %v4710_v6  ;;  %4872 = vrot.lane.b32.xlu1 %v4797_v5, %s9642_s20  ;;  %v12281_v5 = vld [vmem:[#allocation3 + $0x38] sm:$0xff]  ;;  %v4984_v38 = vld [vmem:[#allocation3 + $0x48] sm:$0xff] }
 0x707   : > { %v4801_v31 = vmax.f32 %v4719_v28, 0.0 }
 0x708   : > { %v4799_v39 = vmax.f32 %v4711_v13, 0.0  ;;  %4874 = vrot.lane.b32.xlu0 %v4798_v10, %s9642_s20 }
 0x70a   : > { %v9494_v34 = vpop.f32.mrb[80].mxu0  ;;  %4876 = vrot.lane.b32.xlu1 %v4799_v39, %s9642_s20 }
 0x70b   : > { %v4723_v12 = vpop.f32.mrb[81].mxu0  ;;  %v4732_v21 = vadd.f32 %v9494_v34, %v12205_v22 }
 0x70c   : > { %v4724_v35 = vadd.f32 %v12205_v22, %v4723_v12  ;;  %v9495_v2 = vpop.f32.mrb[82].mxu0  ;;  %4878 = vrot.lane.b32.xlu0 %v4800_v1, %s9642_s20 }
 0x70d   : > { %v4726_v15 = vpop.f32.mrb[83].mxu0  ;;  %v4735_v30 = vadd.f32 %v9495_v2, %v12205_v22  ;;  %v4804_v53 = vmax.f32 %v4732_v21, 0.0 }
 0x70e   : > { %v4802_v29 = vmax.f32 %v4724_v35, 0.0  ;;  %v4727_v58 = vadd.f32 %v12205_v22, %v4726_v15  ;;  %4880 = vrot.lane.b32.xlu1 %v4801_v31, %s9642_s20 }
 0x70f   : > { %v4805_v33 = vmax.f32 %v4735_v30, 0.0 }
 0x710   : > { %v4803_v43 = vmax.f32 %v4727_v58, 0.0  ;;  %4882 = vrot.lane.b32.xlu0 %v4802_v29, %s9642_s20 }
 0x712   : > { %v9498_v19 = vpop.f32.mrb[0].mxu1  ;;  %4884 = vrot.lane.b32.xlu1 %v4803_v43, %s9642_s20 }
 0x713   : > { %v4739_v7 = vpop.f32.mrb[1].mxu1  ;;  %v4748_v59 = vadd.f32 %v9498_v19, %v12205_v22 }
 0x714   : > { %v4740_v3 = vadd.f32 %v12205_v22, %v4739_v7  ;;  %v9499_v62 = vpop.f32.mrb[2].mxu1  ;;  %4886 = vrot.lane.b32.xlu0 %v4804_v53, %s9642_s20 }
 0x715   : > { %v4742_v45 = vpop.f32.mrb[3].mxu1  ;;  %v4751_v25 = vadd.f32 %v9499_v62, %v12205_v22  ;;  %v4808_v11 = vmax.f32 %v4748_v59, 0.0 }
 0x716   : > { %v4806_v36 = vmax.f32 %v4740_v3, 0.0  ;;  %v4743_v37 = vadd.f32 %v12205_v22, %v4742_v45  ;;  %4888 = vrot.lane.b32.xlu1 %v4805_v33, %s9642_s20 }
 0x717   : > { %v4809_v18 = vmax.f32 %v4751_v25, 0.0 }
 0x718   : > { %v4807_v51 = vmax.f32 %v4743_v37, 0.0  ;;  %4890 = vrot.lane.b32.xlu0 %v4806_v36, %s9642_s20 }
 0x71a   : > { %v9502_v52 = vpop.f32.mrb[4].mxu1  ;;  %4892 = vrot.lane.b32.xlu1 %v4807_v51, %s9642_s20 }
 0x71b   : > { %v4755_v61 = vpop.f32.mrb[5].mxu1  ;;  %v4764_v8 = vadd.f32 %v9502_v52, %v12205_v22 }
 0x71c   : > { %v4756_v24 = vadd.f32 %v12205_v22, %v4755_v61  ;;  %v9503_v17 = vpop.f32.mrb[6].mxu1  ;;  %4894 = vrot.lane.b32.xlu0 %v4808_v11, %s9642_s20 }
 0x71d   : > { %v4758_v26 = vpop.f32.mrb[7].mxu1  ;;  %v4767_v47 = vadd.f32 %v9503_v17, %v12205_v22  ;;  %v4812_v54 = vmax.f32 %v4764_v8, 0.0 }
 0x71e   : > { %v4810_v9 = vmax.f32 %v4756_v24, 0.0  ;;  %v4759_v16 = vadd.f32 %v12205_v22, %v4758_v26  ;;  %4896 = vrot.lane.b32.xlu1 %v4809_v18, %s9642_s20 }
 0x71f   : > { %v4813_v55 = vmax.f32 %v4767_v47, 0.0 }
 0x720   : > { %v4811_v46 = vmax.f32 %v4759_v16, 0.0  ;;  %4898 = vrot.lane.b32.xlu0 %v4810_v9, %s9642_s20 }
 0x722   : > { %4900 = vrot.lane.b32.xlu1 %v4811_v46, %s9642_s20  ;;  %v9506_v27 = vpop.f32.mrb[8].mxu1 }
 0x723   : > { %v4771_v56 = vpop.f32.mrb[9].mxu1  ;;  %v4780_v63 = vadd.f32 %v9506_v27, %v12205_v22 }
 0x724   : > { %4902 = vrot.lane.b32.xlu0 %v4812_v54, %s9642_s20  ;;  %v4772_v32 = vadd.f32 %v12205_v22, %v4771_v56  ;;  %v9507_v44 = vpop.f32.mrb[10].mxu1 }
 0x725   : > { %v4774_v40 = vpop.f32.mrb[11].mxu1  ;;  %v4783_v20 = vadd.f32 %v9507_v44, %v12205_v22  ;;  %v4816_v42 = vmax.f32 %v4780_v63, 0.0 }
 0x726   : > { %4904 = vrot.lane.b32.xlu1 %v4813_v55, %s9642_s20  ;;  %v4814_v57 = vmax.f32 %v4772_v32, 0.0  ;;  %v4775_v14 = vadd.f32 %v12205_v22, %v4774_v40  ;;  %v12276_v22 = vld [vmem:[#allocation3 + $0x20] sm:$0xff] }
 0x727   : > { %v4817_v48 = vmax.f32 %v4783_v20, 0.0 }
 0x728   : > { %v4815_v41 = vmax.f32 %v4775_v14, 0.0  ;;  %4906 = vrot.lane.b32.xlu0 %v4814_v57, %s9642_s20  ;;  %v5235_v14 = vld [vmem:[#allocation3 + $0x10] sm:$0xff] }
 0x72a   : > { %4908 = vrot.lane.b32.xlu1 %v4815_v41, %s9642_s20 }
 0x72c   : > { %4910 = vrot.lane.b32.xlu0 %v4816_v42, %s9642_s20 }
 0x72e   : > { %4912 = vrot.lane.b32.xlu1 %v4817_v48, %s9642_s20  ;;  %v5237_v48 = vld [vmem:[#allocation3 + $0x28] sm:$0xff] }
 0x730   : > { %5042 = vrot.lane.b32.xlu0 %v4978_v49, %s9647_s28 }
 0x732   : > { %5044 = vrot.lane.b32.xlu1 %v12271_v0, %s9647_s28 }
 0x734   : > { %5046 = vrot.lane.b32.xlu0 %v4980_v23, %s9647_s28 }
 0x736   : > { %5048 = vrot.lane.b32.xlu1 %v12276_v22, %s9647_s28 }
 0x738   : > { %5050 = vrot.lane.b32.xlu0 %v4982_v50, %s9647_s28  ;;  %v5239_v50 = vld [vmem:[#allocation3 + $0x40] sm:$0xff] }
 0x73a   : > { %5052 = vrot.lane.b32.xlu1 %v12281_v5, %s9647_s28 }
 0x73c   : > { %5054 = vrot.lane.b32.xlu0 %v4984_v38, %s9647_s28 }
 0x73e   : > { %5056 = vrot.lane.b32.xlu1 %v12286_v60, %s9647_s28 }
 0x762   : > { %v4851_v6 = vpop.permute.xlu0 %4850 }
 0x763   : > { %4946 = vst.msk [vmem:[#allocation3 + $0x64] sm:$0xff] %vm3097_vm2, %v4851_v6  ;;  %v5171_v6 = vld [vmem:[#allocation3 + $0xc] sm:$0xff] }
 0x764   : > { %v4853_v4 = vpop.permute.xlu1 %4852 }
 0x765   : > { %4947 = vst.msk [vmem:[#allocation3 + $0x6c] sm:$0xff] %vm3097_vm2, %v4853_v4 }
 0x766   : > { %v4855_v10 = vpop.permute.xlu0 %4854 }
 0x767   : > { %4948 = vst.msk [vmem:[#allocation3 + $0x7c] sm:$0xff] %vm3097_vm2, %v4855_v10  ;;  %v5241_v10 = vld [vmem:[#allocation3 + $0x58] sm:$0xff] }
 0x768   : > { %v4857_v13 = vpop.permute.xlu1 %4856 }
 0x769   : > { %4949 = vst.msk [vmem:[#allocation3 + $0x84] sm:$0xff] %vm3097_vm2, %v4857_v13 }
 0x76a   : > { %v4859_v28 = vpop.permute.xlu0 %4858  ;;  %v12295_v39 = vld [vmem:[#allocation3 + $0x60] sm:$0xff] }
 0x76b   : > { %4950 = vst.msk [vmem:[#allocation3 + $0x94] sm:$0xff] %vm3097_vm2, %v4859_v28  ;;  %5058 = vrot.lane.b32.xlu0 %v12295_v39, %s9647_s28 }
 0x76c   : > { %v4861_v1 = vpop.permute.xlu1 %4860  ;;  %v12300_v34 = vld [vmem:[#allocation3 + $0x68] sm:$0xff] }
 0x76d   : > { %4951 = vst.msk [vmem:[#allocation3 + $0x9c] sm:$0xff] %vm3097_vm2, %v4861_v1  ;;  %5060 = vrot.lane.b32.xlu1 %v12300_v34, %s9647_s28  ;;  %v5174_v1 = vld [vmem:[#allocation3 + $0x34] sm:$0xff] }
 0x76e   : > { %v4863_v12 = vpop.permute.xlu0 %4862  ;;  %v12305_v31 = vld [vmem:[#allocation3 + $0x78] sm:$0xff] }
 0x76f   : > { %4952 = vst.msk [vmem:[#allocation3 + $0xac] sm:$0xff] %vm3097_vm2, %v4863_v12  ;;  %5062 = vrot.lane.b32.xlu0 %v12305_v31, %s9647_s28 }
 0x770   : > { %v4865_v35 = vpop.permute.xlu1 %4864  ;;  %v12310_v2 = vld [vmem:[#allocation3 + $0x80] sm:$0xff] }
 0x771   : > { %4953 = vst.msk [vmem:[#allocation3 + $0xb4] sm:$0xff] %vm3097_vm2, %v4865_v35  ;;  %5064 = vrot.lane.b32.xlu1 %v12310_v2, %s9647_s28  ;;  %v12442_v35 = vld [vmem:[#allocation3 + $0x70] sm:$0xff] }
 0x772   : > { %v4867_v15 = vpop.permute.xlu0 %4866  ;;  %v12315_v21 = vld [vmem:[#allocation3 + $0x90] sm:$0xff] }
 0x773   : > { %4954 = vst.msk [vmem:[#allocation3 + $0xc4] sm:$0xff] %vm3097_vm2, %v4867_v15  ;;  %5066 = vrot.lane.b32.xlu0 %v12315_v21, %s9647_s28 }
 0x774   : > { %v4869_v29 = vpop.permute.xlu1 %4868  ;;  %v12320_v58 = vld [vmem:[#allocation3 + $0x98] sm:$0xff] }
 0x775   : > { %4955 = vst.msk [vmem:[#allocation3 + $0xcc] sm:$0xff] %vm3097_vm2, %v4869_v29  ;;  %5068 = vrot.lane.b32.xlu1 %v12320_v58, %s9647_s28  ;;  %v5176_v29 = vld [vmem:[#allocation3 + $0x4c] sm:$0xff] }
 0x776   : > { %v4871_v30 = vpop.permute.xlu0 %4870  ;;  %v12325_v43 = vld [vmem:[#allocation3 + $0xa8] sm:$0xff] }
 0x777   : > { %4956 = vst.msk [vmem:[#allocation3 + $0xdc] sm:$0xff] %vm3097_vm2, %v4871_v30  ;;  %5070 = vrot.lane.b32.xlu0 %v12325_v43, %s9647_s28 }
 0x778   : > { %v4873_v53 = vpop.permute.xlu1 %4872  ;;  %v12330_v19 = vld [vmem:[#allocation3 + $0xb0] sm:$0xff] }
 0x779   : > { %4957 = vst.msk [vmem:[#allocation3 + $0xe4] sm:$0xff] %vm3097_vm2, %v4873_v53  ;;  %5072 = vrot.lane.b32.xlu1 %v12330_v19, %s9647_s28  ;;  %v5177_v53 = vld [vmem:[#allocation3 + $0x54] sm:$0xff] }
 0x77a   : > { %v4875_v7 = vpop.permute.xlu0 %4874  ;;  %v12335_v33 = vld [vmem:[#allocation3 + $0xc0] sm:$0xff] }
 0x77b   : > { %4958 = vst.msk [vmem:[#allocation3 + $0xf4] sm:$0xff] %vm3097_vm2, %v4875_v7  ;;  %5074 = vrot.lane.b32.xlu0 %v12335_v33, %s9647_s28  ;;  %v12452_v7 = vld [vmem:[#allocation3 + $0x88] sm:$0xff] }
 0x77c   : > { %v4877_v3 = vpop.permute.xlu1 %4876  ;;  %v12340_v62 = vld [vmem:[#allocation3 + $0xc8] sm:$0xff] }
 0x77d   : > { %4959 = vst.msk [vmem:[#allocation3 + $0xfc] sm:$0xff] %vm3097_vm2, %v4877_v3  ;;  %5076 = vrot.lane.b32.xlu1 %v12340_v62, %s9647_s28 }
 0x77e   : > { %v4879_v45 = vpop.permute.xlu0 %4878  ;;  %v12345_v59 = vld [vmem:[#allocation3 + $0xd8] sm:$0xff] }
 0x77f   : > { %4960 = vst.msk [vmem:[#allocation3 + $0x10c] sm:$0xff] %vm3097_vm2, %v4879_v45  ;;  %5078 = vrot.lane.b32.xlu0 %v12345_v59, %s9647_s28  ;;  %v12461_v45 = vld [vmem:[#allocation3 + $0xa0] sm:$0xff] }
 0x780   : > { %v4881_v36 = vpop.permute.xlu1 %4880  ;;  %v12350_v37 = vld [vmem:[#allocation3 + $0xe0] sm:$0xff] }
 0x781   : > { %4961 = vst.msk [vmem:[#allocation3 + $0x114] sm:$0xff] %vm3097_vm2, %v4881_v36  ;;  %5080 = vrot.lane.b32.xlu1 %v12350_v37, %s9647_s28  ;;  %v12467_v36 = vld [vmem:[#allocation3 + $0xb8] sm:$0xff] }
 0x782   : > { %v4883_v25 = vpop.permute.xlu0 %4882  ;;  %v12355_v51 = vld [vmem:[#allocation3 + $0xf0] sm:$0xff] }
 0x783   : > { %4962 = vst.msk [vmem:[#allocation3 + $0x124] sm:$0xff] %vm3097_vm2, %v4883_v25  ;;  %5082 = vrot.lane.b32.xlu0 %v12355_v51, %s9647_s28  ;;  %v12473_v25 = vld [vmem:[#allocation3 + $0xd0] sm:$0xff] }
 0x784   : > { %v4885_v11 = vpop.permute.xlu1 %4884  ;;  %v12360_v52 = vld [vmem:[#allocation3 + $0xf8] sm:$0xff] }
 0x785   : > { %4963 = vst.msk [vmem:[#allocation3 + $0x12c] sm:$0xff] %vm3097_vm2, %v4885_v11  ;;  %5084 = vrot.lane.b32.xlu1 %v12360_v52, %s9647_s28  ;;  %v12479_v11 = vld [vmem:[#allocation3 + $0xe8] sm:$0xff] }
 0x786   : > { %v4887_v61 = vpop.permute.xlu0 %4886  ;;  %v12365_v18 = vld [vmem:[#allocation3 + $0x108] sm:$0xff] }
 0x787   : > { %4964 = vst.msk [vmem:[#allocation3 + $0x13c] sm:$0xff] %vm3097_vm2, %v4887_v61  ;;  %5086 = vrot.lane.b32.xlu0 %v12365_v18, %s9647_s28  ;;  %v12485_v61 = vld [vmem:[#allocation3 + $0x100] sm:$0xff] }
 0x788   : > { %v4889_v24 = vpop.permute.xlu1 %4888  ;;  %v12370_v17 = vld [vmem:[#allocation3 + $0x110] sm:$0xff] }
 0x789   : > { %4965 = vst.msk [vmem:[#allocation3 + $0x144] sm:$0xff] %vm3097_vm2, %v4889_v24  ;;  %5088 = vrot.lane.b32.xlu1 %v12370_v17, %s9647_s28  ;;  %v12491_v24 = vld [vmem:[#allocation3 + $0x118] sm:$0xff] }
 0x78a   : > { %v4891_v26 = vpop.permute.xlu0 %4890  ;;  %v12375_v8 = vld [vmem:[#allocation3 + $0x120] sm:$0xff] }
 0x78b   : > { %4966 = vst.msk [vmem:[#allocation3 + $0x154] sm:$0xff] %vm3097_vm2, %v4891_v26  ;;  %5090 = vrot.lane.b32.xlu0 %v12375_v8, %s9647_s28 }
 0x78c   : > { %v4893_v9 = vpop.permute.xlu1 %4892  ;;  %v12380_v16 = vld [vmem:[#allocation3 + $0x128] sm:$0xff]  ;;  %v12497_v26 = vld [vmem:[#allocation3 + $0x130] sm:$0xff] }
 0x78d   : > { %4967 = vst.msk [vmem:[#allocation3 + $0x15c] sm:$0xff] %vm3097_vm2, %v4893_v9  ;;  %5092 = vrot.lane.b32.xlu1 %v12380_v16, %s9647_s28 }
 0x78e   : > { %v4895_v47 = vpop.permute.xlu0 %4894  ;;  %v12385_v46 = vld [vmem:[#allocation3 + $0x138] sm:$0xff] }
 0x78f   : > { %4968 = vst.msk [vmem:[#allocation3 + $0x16c] sm:$0xff] %vm3097_vm2, %v4895_v47  ;;  %5094 = vrot.lane.b32.xlu0 %v12385_v46, %s9647_s28 }
 0x790   : > { %v4897_v54 = vpop.permute.xlu1 %4896  ;;  %v12390_v27 = vld [vmem:[#allocation3 + $0x140] sm:$0xff]  ;;  %v12503_v9 = vld [vmem:[#allocation3 + $0x148] sm:$0xff] }
 0x791   : > { %4969 = vst.msk [vmem:[#allocation3 + $0x174] sm:$0xff] %vm3097_vm2, %v4897_v54  ;;  %5096 = vrot.lane.b32.xlu1 %v12390_v27, %s9647_s28 }
 0x792   : > { %v4899_v56 = vpop.permute.xlu0 %4898  ;;  %v12395_v55 = vld [vmem:[#allocation3 + $0x150] sm:$0xff] }
 0x793   : > { %4970 = vst.msk [vmem:[#allocation3 + $0x184] sm:$0xff] %vm3097_vm2, %v4899_v56  ;;  %5098 = vrot.lane.b32.xlu0 %v12395_v55, %s9647_s28 }
 0x794   : > { %v4901_v63 = vpop.permute.xlu1 %4900  ;;  %v12400_v32 = vld [vmem:[#allocation3 + $0x158] sm:$0xff]  ;;  %v12509_v47 = vld [vmem:[#allocation3 + $0x160] sm:$0xff] }
 0x795   : > { %4971 = vst.msk [vmem:[#allocation3 + $0x18c] sm:$0xff] %vm3097_vm2, %v4901_v63  ;;  %5100 = vrot.lane.b32.xlu1 %v12400_v32, %s9647_s28  ;;  %v12524_v63 = vld [vmem:[#allocation3 + $0x64] sm:$0xff] }
 0x796   : > { %v4903_v44 = vpop.permute.xlu0 %4902  ;;  %v12405_v40 = vld [vmem:[#allocation3 + $0x168] sm:$0xff] }
 0x797   : > { %4972 = vst.msk [vmem:[#allocation3 + $0x19c] sm:$0xff] %vm3097_vm2, %v4903_v44  ;;  %5102 = vrot.lane.b32.xlu0 %v12405_v40, %s9647_s28 }
 0x798   : > { %v4905_v57 = vpop.permute.xlu1 %4904  ;;  %v12410_v20 = vld [vmem:[#allocation3 + $0x170] sm:$0xff]  ;;  %v12515_v54 = vld [vmem:[#allocation3 + $0x178] sm:$0xff] }
 0x799   : > { %4973 = vst.msk [vmem:[#allocation3 + $0x1a4] sm:$0xff] %vm3097_vm2, %v4905_v57  ;;  %5104 = vrot.lane.b32.xlu1 %v12410_v20, %s9647_s28  ;;  %v12531_v57 = vld [vmem:[#allocation3 + $0x6c] sm:$0xff] }
 0x79a   : > { %v4907_v42 = vpop.permute.xlu0 %4906 }
 0x79b   : > { %5298 = vrot.lane.b32.xlu0 %v12271_v0, %s9642_s20  ;;  %4974 = vst.msk [vmem:[#allocation3 + $0x1b4] sm:$0xff] %vm3097_vm2, %v4907_v42  ;;  %v5170_v0 = vld [vmem:[#allocation3 + $0x4] sm:$0xff] }
 0x79c   : > { %v4909_v41 = vpop.permute.xlu1 %4908 }
 0x79d   : > { %5300 = vrot.lane.b32.xlu1 %v5235_v14, %s9642_s20  ;;  %4975 = vst.msk [vmem:[#allocation3 + $0x1bc] sm:$0xff] %vm3097_vm2, %v4909_v41  ;;  %v12538_v14 = vld [vmem:[#allocation3 + $0x7c] sm:$0xff] }
 0x79e   : > { %v4911_v49 = vpop.permute.xlu0 %4910 }
 0x79f   : > { %5302 = vrot.lane.b32.xlu0 %v12276_v22, %s9642_s20  ;;  %4976 = vst.msk [vmem:[#allocation3 + $0x1cc] sm:$0xff] %vm3097_vm2, %v4911_v49  ;;  %v5172_v22 = vld [vmem:[#allocation3 + $0x1c] sm:$0xff] }
 0x7a0   : > { %v4913_v23 = vpop.permute.xlu1 %4912 }
 0x7a1   : > { %5304 = vrot.lane.b32.xlu1 %v5237_v48, %s9642_s20  ;;  %4977 = vst.msk [vmem:[#allocation3 + $0x1d4] sm:$0xff] %vm3097_vm2, %v4913_v23  ;;  %v12552_v48 = vld [vmem:[#allocation3 + $0x94] sm:$0xff] }
 0x7a2   : > { %v5043_v38 = vpop.permute.xlu0 %5042 }
 0x7a3   : > { %5306 = vrot.lane.b32.xlu0 %v12281_v5, %s9642_s20  ;;  %5138 = vst.msk [vmem:[#allocation4] sm:$0xff] %vm515_vm3, %v5043_v38  ;;  %v5173_v5 = vld [vmem:[#allocation3 + $0x24] sm:$0xff] }
 0x7a4   : > { %v5045_v4 = vpop.permute.xlu1 %5044  ;;  %5202 = vst.msk [vmem:[#allocation4] sm:$0xff] %vm3097_vm2, %v5170_v0  ;;  %v12566_v0 = vld [vmem:[#allocation3 + $0xac] sm:$0xff] }
 0x7a5   : > { %5308 = vrot.lane.b32.xlu1 %v5239_v50, %s9642_s20  ;;  %5139 = vst.msk [vmem:[#allocation4 + $0x10] sm:$0xff] %vm515_vm3, %v5045_v4 }
 0x7a6   : > { %v5047_v13 = vpop.permute.xlu0 %5046  ;;  %5203 = vst.msk [vmem:[#allocation4 + $0x10] sm:$0xff] %vm3097_vm2, %v5171_v6  ;;  %v12580_v6 = vld [vmem:[#allocation3 + $0xc4] sm:$0xff] }
 0x7a7   : > { %5310 = vrot.lane.b32.xlu0 %v12286_v60, %s9642_s20  ;;  %5140 = vst.msk [vmem:[#allocation4 + $0x20] sm:$0xff] %vm515_vm3, %v5047_v13  ;;  %v5175_v60 = vld [vmem:[#allocation3 + $0x3c] sm:$0xff] }
 0x7a8   : > { %v5049_v28 = vpop.permute.xlu1 %5048  ;;  %5204 = vst.msk [vmem:[#allocation4 + $0x20] sm:$0xff] %vm3097_vm2, %v5172_v22 }
 0x7a9   : > { %5312 = vrot.lane.b32.xlu1 %v5241_v10, %s9642_s20  ;;  %5141 = vst.msk [vmem:[#allocation4 + $0x30] sm:$0xff] %vm515_vm3, %v5049_v28  ;;  %v12594_v10 = vld [vmem:[#allocation3 + $0xdc] sm:$0xff]  ;;  %v12608_v28 = vld [vmem:[#allocation3 + $0xf4] sm:$0xff] }
 0x7aa   : > { %v5051_v12 = vpop.permute.xlu0 %5050  ;;  %5205 = vst.msk [vmem:[#allocation4 + $0x30] sm:$0xff] %vm3097_vm2, %v5173_v5 }
 0x7ab   : > { %5314 = vrot.lane.b32.xlu0 %v12300_v34, %s9642_s20  ;;  %5142 = vst.msk [vmem:[#allocation4 + $0x40] sm:$0xff] %vm515_vm3, %v5051_v12 }
 0x7ac   : > { %v5053_v15 = vpop.permute.xlu1 %5052  ;;  %5206 = vst.msk [vmem:[#allocation4 + $0x40] sm:$0xff] %vm3097_vm2, %v5174_v1 }
 0x7ad   : > { %5316 = vrot.lane.b32.xlu1 %v12442_v35, %s9642_s20  ;;  %5143 = vst.msk [vmem:[#allocation4 + $0x50] sm:$0xff] %vm515_vm3, %v5053_v15 }
 0x7ae   : > { %v5055_v30 = vpop.permute.xlu0 %5054  ;;  %5207 = vst.msk [vmem:[#allocation4 + $0x50] sm:$0xff] %vm3097_vm2, %v5175_v60  ;;  %v12622_v60 = vld [vmem:[#allocation3 + $0x10c] sm:$0xff] }
 0x7af   : > { %5318 = vrot.lane.b32.xlu0 %v12310_v2, %s9642_s20  ;;  %5144 = vst.msk [vmem:[#allocation4 + $0x60] sm:$0xff] %vm515_vm3, %v5055_v30  ;;  %v12636_v30 = vld [vmem:[#allocation3 + $0x124] sm:$0xff] }
 0x7b0   : > { %v5057_v3 = vpop.permute.xlu1 %5056  ;;  %5208 = vst.msk [vmem:[#allocation4 + $0x60] sm:$0xff] %vm3097_vm2, %v5176_v29 }
 0x7b1   : > { %5320 = vrot.lane.b32.xlu1 %v12452_v7, %s9642_s20  ;;  %5145 = vst.msk [vmem:[#allocation4 + $0x70] sm:$0xff] %vm515_vm3, %v5057_v3 }
 0x7b2   : > { %5209 = vst.msk [vmem:[#allocation4 + $0x70] sm:$0xff] %vm3097_vm2, %v5177_v53 }
 0x7b3   : > { %5322 = vrot.lane.b32.xlu0 %v12320_v58, %s9642_s20 }
 0x7b5   : > { %5324 = vrot.lane.b32.xlu1 %v12461_v45, %s9642_s20 }
 0x7b7   : > { %5326 = vrot.lane.b32.xlu0 %v12330_v19, %s9642_s20 }
 0x7b9   : > { %5328 = vrot.lane.b32.xlu1 %v12467_v36, %s9642_s20 }
 0x7bb   : > { %5330 = vrot.lane.b32.xlu0 %v12340_v62, %s9642_s20 }
 0x7bd   : > { %5332 = vrot.lane.b32.xlu1 %v12473_v25, %s9642_s20 }
 0x7bf   : > { %5334 = vrot.lane.b32.xlu0 %v12350_v37, %s9642_s20 }
 0x7c1   : > { %5336 = vrot.lane.b32.xlu1 %v12479_v11, %s9642_s20 }
 0x7c3   : > { %5338 = vrot.lane.b32.xlu0 %v12360_v52, %s9642_s20 }
 0x7c5   : > { %5340 = vrot.lane.b32.xlu1 %v12485_v61, %s9642_s20 }
 0x7c7   : > { %5342 = vrot.lane.b32.xlu0 %v12370_v17, %s9642_s20 }
 0x7c9   : > { %5344 = vrot.lane.b32.xlu1 %v12491_v24, %s9642_s20 }
 0x7cb   : > { %5346 = vrot.lane.b32.xlu0 %v12380_v16, %s9642_s20 }
 0x7cd   : > { %5348 = vrot.lane.b32.xlu1 %v12497_v26, %s9642_s20 }
 0x7cf   : > { %5350 = vrot.lane.b32.xlu0 %v12390_v27, %s9642_s20 }
 0x7d1   : > { %5352 = vrot.lane.b32.xlu1 %v12503_v9, %s9642_s20 }
 0x7d3   : > { %5354 = vrot.lane.b32.xlu0 %v12400_v32, %s9642_s20 }
 0x7d5   : > { %5356 = vrot.lane.b32.xlu1 %v12509_v47, %s9642_s20 }
 0x7d7   : > { %5358 = vrot.lane.b32.xlu0 %v12410_v20, %s9642_s20 }
 0x7d9   : > { %5360 = vrot.lane.b32.xlu1 %v12515_v54, %s9642_s20 }
 0x7db   : > { %5490 = vrot.lane.b32.xlu0 %v12295_v39, %s9648_s29 }
 0x7dd   : > { %5492 = vrot.lane.b32.xlu1 %v12300_v34, %s9648_s29  ;;  %v5059_v56 = vpop.permute.xlu0 %5058 }
 0x7de   : > { %5146 = vst.msk [vmem:[#allocation4 + $0x80] sm:$0xff] %vm515_vm3, %v5059_v56  ;;  %v12650_v56 = vld [vmem:[#allocation3 + $0x13c] sm:$0xff] }
 0x7df   : > { %v5061_v44 = vpop.permute.xlu1 %5060  ;;  %5494 = vrot.lane.b32.xlu0 %v12305_v31, %s9648_s29  ;;  %5210 = vst.msk [vmem:[#allocation4 + $0x80] sm:$0xff] %vm3097_vm2, %v12524_v63  ;;  %v12545_v31 = vld [vmem:[#allocation3 + $0x84] sm:$0xff] }
 0x7e0   : > { %5147 = vst.msk [vmem:[#allocation4 + $0x90] sm:$0xff] %vm515_vm3, %v5061_v44 }
 0x7e1   : > { %5496 = vrot.lane.b32.xlu1 %v12310_v2, %s9648_s29  ;;  %v5063_v39 = vpop.permute.xlu0 %5062  ;;  %5211 = vst.msk [vmem:[#allocation4 + $0x90] sm:$0xff] %vm3097_vm2, %v12531_v57 }
 0x7e2   : > { %5148 = vst.msk [vmem:[#allocation4 + $0xa0] sm:$0xff] %vm515_vm3, %v5063_v39 }
 0x7e3   : > { %v5065_v42 = vpop.permute.xlu1 %5064  ;;  %5498 = vrot.lane.b32.xlu0 %v12315_v21, %s9648_s29  ;;  %5212 = vst.msk [vmem:[#allocation4 + $0xa0] sm:$0xff] %vm3097_vm2, %v12538_v14  ;;  %v12559_v21 = vld [vmem:[#allocation3 + $0x9c] sm:$0xff] }
 0x7e4   : > { %5149 = vst.msk [vmem:[#allocation4 + $0xb0] sm:$0xff] %vm515_vm3, %v5065_v42  ;;  %v12664_v42 = vld [vmem:[#allocation3 + $0x154] sm:$0xff] }
 0x7e5   : > { %5500 = vrot.lane.b32.xlu1 %v12320_v58, %s9648_s29  ;;  %v5067_v41 = vpop.permute.xlu0 %5066  ;;  %5213 = vst.msk [vmem:[#allocation4 + $0xb0] sm:$0xff] %vm3097_vm2, %v12545_v31 }
 0x7e6   : > { %5150 = vst.msk [vmem:[#allocation4 + $0xc0] sm:$0xff] %vm515_vm3, %v5067_v41 }
 0x7e7   : > { %v5069_v49 = vpop.permute.xlu1 %5068  ;;  %5502 = vrot.lane.b32.xlu0 %v12325_v43, %s9648_s29  ;;  %5214 = vst.msk [vmem:[#allocation4 + $0xc0] sm:$0xff] %vm3097_vm2, %v12552_v48  ;;  %v12573_v43 = vld [vmem:[#allocation3 + $0xb4] sm:$0xff] }
 0x7e8   : > { %5151 = vst.msk [vmem:[#allocation4 + $0xd0] sm:$0xff] %vm515_vm3, %v5069_v49 }
 0x7e9   : > { %5504 = vrot.lane.b32.xlu1 %v12330_v19, %s9648_s29  ;;  %v5071_v23 = vpop.permute.xlu0 %5070  ;;  %5215 = vst.msk [vmem:[#allocation4 + $0xd0] sm:$0xff] %vm3097_vm2, %v12559_v21 }
 0x7ea   : > { %5152 = vst.msk [vmem:[#allocation4 + $0xe0] sm:$0xff] %vm515_vm3, %v5071_v23  ;;  %v12678_v23 = vld [vmem:[#allocation3 + $0x180] sm:$0xff] }
 0x7eb   : > { %v5073_v50 = vpop.permute.xlu1 %5072  ;;  %5506 = vrot.lane.b32.xlu0 %v12335_v33, %s9648_s29  ;;  %5216 = vst.msk [vmem:[#allocation4 + $0xe0] sm:$0xff] %vm3097_vm2, %v12566_v0  ;;  %v12587_v33 = vld [vmem:[#allocation3 + $0xcc] sm:$0xff] }
 0x7ec   : > { %5153 = vst.msk [vmem:[#allocation4 + $0xf0] sm:$0xff] %vm515_vm3, %v5073_v50  ;;  %v12680_v50 = vld [vmem:[#allocation3 + $0x16c] sm:$0xff] }
 0x7ed   : > { %5508 = vrot.lane.b32.xlu1 %v12340_v62, %s9648_s29  ;;  %v5075_v38 = vpop.permute.xlu0 %5074  ;;  %5217 = vst.msk [vmem:[#allocation4 + $0xf0] sm:$0xff] %vm3097_vm2, %v12573_v43 }
 0x7ee   : > { %5154 = vst.msk [vmem:[#allocation4 + $0x100] sm:$0xff] %vm515_vm3, %v5075_v38  ;;  %v12687_v38 = vld [vmem:[#allocation3 + $0x188] sm:$0xff] }
 0x7ef   : > { %v5077_v4 = vpop.permute.xlu1 %5076  ;;  %5510 = vrot.lane.b32.xlu0 %v12345_v59, %s9648_s29  ;;  %5218 = vst.msk [vmem:[#allocation4 + $0x100] sm:$0xff] %vm3097_vm2, %v12580_v6  ;;  %v12601_v59 = vld [vmem:[#allocation3 + $0xe4] sm:$0xff] }
 0x7f0   : > { %5155 = vst.msk [vmem:[#allocation4 + $0x110] sm:$0xff] %vm515_vm3, %v5077_v4  ;;  %v12689_v4 = vld [vmem:[#allocation3 + $0x174] sm:$0xff] }
 0x7f1   : > { %5512 = vrot.lane.b32.xlu1 %v12350_v37, %s9648_s29  ;;  %v5079_v22 = vpop.permute.xlu0 %5078  ;;  %5219 = vst.msk [vmem:[#allocation4 + $0x110] sm:$0xff] %vm3097_vm2, %v12587_v33 }
 0x7f2   : > { %5156 = vst.msk [vmem:[#allocation4 + $0x120] sm:$0xff] %vm515_vm3, %v5079_v22 }
 0x7f3   : > { %v5081_v13 = vpop.permute.xlu1 %5080  ;;  %5514 = vrot.lane.b32.xlu0 %v12355_v51, %s9648_s29  ;;  %5220 = vst.msk [vmem:[#allocation4 + $0x120] sm:$0xff] %vm3097_vm2, %v12594_v10  ;;  %v12615_v51 = vld [vmem:[#allocation3 + $0xfc] sm:$0xff] }
 0x7f4   : > { %5157 = vst.msk [vmem:[#allocation4 + $0x130] sm:$0xff] %vm515_vm3, %v5081_v13  ;;  %v12696_v13 = vld [vmem:[#allocation3 + $0x198] sm:$0xff] }
 0x7f5   : > { %5516 = vrot.lane.b32.xlu1 %v12360_v52, %s9648_s29  ;;  %v5083_v5 = vpop.permute.xlu0 %5082  ;;  %5221 = vst.msk [vmem:[#allocation4 + $0x130] sm:$0xff] %vm3097_vm2, %v12601_v59 }
 0x7f6   : > { %5158 = vst.msk [vmem:[#allocation4 + $0x140] sm:$0xff] %vm515_vm3, %v5083_v5 }
 0x7f7   : > { %v5085_v1 = vpop.permute.xlu1 %5084  ;;  %5518 = vrot.lane.b32.xlu0 %v12365_v18, %s9648_s29  ;;  %5222 = vst.msk [vmem:[#allocation4 + $0x140] sm:$0xff] %vm3097_vm2, %v12608_v28  ;;  %v12629_v18 = vld [vmem:[#allocation3 + $0x114] sm:$0xff] }
 0x7f8   : > { %5159 = vst.msk [vmem:[#allocation4 + $0x150] sm:$0xff] %vm515_vm3, %v5085_v1  ;;  %v12701_v1 = vld [vmem:[#allocation3 + $0x1a0] sm:$0xff] }
 0x7f9   : > { %5520 = vrot.lane.b32.xlu1 %v12370_v17, %s9648_s29  ;;  %v5087_v12 = vpop.permute.xlu0 %5086  ;;  %5223 = vst.msk [vmem:[#allocation4 + $0x150] sm:$0xff] %vm3097_vm2, %v12615_v51 }
 0x7fa   : > { %5160 = vst.msk [vmem:[#allocation4 + $0x160] sm:$0xff] %vm515_vm3, %v5087_v12 }
 0x7fb   : > { %v5089_v15 = vpop.permute.xlu1 %5088  ;;  %5522 = vrot.lane.b32.xlu0 %v12375_v8, %s9648_s29  ;;  %5224 = vst.msk [vmem:[#allocation4 + $0x160] sm:$0xff] %vm3097_vm2, %v12622_v60  ;;  %v12643_v8 = vld [vmem:[#allocation3 + $0x12c] sm:$0xff] }
 0x7fc   : > { %5161 = vst.msk [vmem:[#allocation4 + $0x170] sm:$0xff] %vm515_vm3, %v5089_v15  ;;  %v5454_v15 = vld [vmem:[#allocation3 + $0x1b0] sm:$0xff] }
 0x7fd   : > { %5524 = vrot.lane.b32.xlu1 %v12380_v16, %s9648_s29  ;;  %v5091_v29 = vpop.permute.xlu0 %5090  ;;  %5225 = vst.msk [vmem:[#allocation4 + $0x170] sm:$0xff] %vm3097_vm2, %v12629_v18 }
 0x7fe   : > { %5162 = vst.msk [vmem:[#allocation4 + $0x180] sm:$0xff] %vm515_vm3, %v5091_v29 }
 0x7ff   : > { %v5093_v53 = vpop.permute.xlu1 %5092  ;;  %5526 = vrot.lane.b32.xlu0 %v12385_v46, %s9648_s29  ;;  %5226 = vst.msk [vmem:[#allocation4 + $0x180] sm:$0xff] %vm3097_vm2, %v12636_v30  ;;  %v12657_v46 = vld [vmem:[#allocation3 + $0x144] sm:$0xff] }
 0x800   : > { %5163 = vst.msk [vmem:[#allocation4 + $0x190] sm:$0xff] %vm515_vm3, %v5093_v53  ;;  %v12708_v53 = vld [vmem:[#allocation3 + $0x1b8] sm:$0xff] }
 0x801   : > { %5528 = vrot.lane.b32.xlu1 %v12390_v27, %s9648_s29  ;;  %v5095_v3 = vpop.permute.xlu0 %5094  ;;  %5227 = vst.msk [vmem:[#allocation4 + $0x190] sm:$0xff] %vm3097_vm2, %v12643_v8 }
 0x802   : > { %5164 = vst.msk [vmem:[#allocation4 + $0x1a0] sm:$0xff] %vm515_vm3, %v5095_v3 }
 0x803   : > { %v5097_v44 = vpop.permute.xlu1 %5096  ;;  %5530 = vrot.lane.b32.xlu0 %v12395_v55, %s9648_s29  ;;  %5228 = vst.msk [vmem:[#allocation4 + $0x1a0] sm:$0xff] %vm3097_vm2, %v12650_v56  ;;  %v12671_v55 = vld [vmem:[#allocation3 + $0x15c] sm:$0xff] }
 0x804   : > { %5165 = vst.msk [vmem:[#allocation4 + $0x1b0] sm:$0xff] %vm515_vm3, %v5097_v44  ;;  %v5456_v44 = vld [vmem:[#allocation3 + $0x1c8] sm:$0xff] }
 0x805   : > { %5532 = vrot.lane.b32.xlu1 %v12400_v32, %s9648_s29  ;;  %v5099_v39 = vpop.permute.xlu0 %5098  ;;  %5229 = vst.msk [vmem:[#allocation4 + $0x1b0] sm:$0xff] %vm3097_vm2, %v12657_v46 }
 0x806   : > { %5166 = vst.msk [vmem:[#allocation4 + $0x1c0] sm:$0xff] %vm515_vm3, %v5099_v39 }
 0x807   : > { %v5101_v41 = vpop.permute.xlu1 %5100  ;;  %5534 = vrot.lane.b32.xlu0 %v12405_v40, %s9648_s29  ;;  %5230 = vst.msk [vmem:[#allocation4 + $0x1c0] sm:$0xff] %vm3097_vm2, %v12664_v42 }
 0x808   : > { %5167 = vst.msk [vmem:[#allocation4 + $0x1d0] sm:$0xff] %vm515_vm3, %v5101_v41  ;;  %v12715_v41 = vld [vmem:[#allocation3 + $0x1d0] sm:$0xff] }
 0x809   : > { %5536 = vrot.lane.b32.xlu1 %v12410_v20, %s9648_s29  ;;  %v5103_v49 = vpop.permute.xlu0 %5102  ;;  %5231 = vst.msk [vmem:[#allocation4 + $0x1d0] sm:$0xff] %vm3097_vm2, %v12671_v55 }
 0x80a   : > { %5168 = vst.msk [vmem:[#allocation4 + $0x1e0] sm:$0xff] %vm515_vm3, %v5103_v49 }
 0x80b   : > { %v5105_v40 = vpop.permute.xlu1 %5104  ;;  %5538 = vrot.lane.b32.xlu0 %v12678_v23, %s9648_s29  ;;  %5232 = vst.msk [vmem:[#allocation4 + $0x1e0] sm:$0xff] %vm3097_vm2, %v12680_v50 }
 0x80c   : > { %5169 = vst.msk [vmem:[#allocation4 + $0x1f0] sm:$0xff] %vm515_vm3, %v5105_v40 }
 0x80d   : > { %5540 = vrot.lane.b32.xlu1 %v12687_v38, %s9648_s29  ;;  %v5299_v22 = vpop.permute.xlu0 %5298  ;;  %5233 = vst.msk [vmem:[#allocation4 + $0x1f0] sm:$0xff] %vm3097_vm2, %v12689_v4 }
 0x80e   : > { %5394 = vst.msk [vmem:[#allocation4] sm:$0xff] %vm3290_vm4, %v5299_v22 }
 0x80f   : > { %v5301_v5 = vpop.permute.xlu1 %5300  ;;  %5542 = vrot.lane.b32.xlu0 %v12696_v13, %s9648_s29 }
 0x810   : > { %5395 = vst.msk [vmem:[#allocation4 + $0x10] sm:$0xff] %vm3290_vm4, %v5301_v5 }
 0x811   : > { %5544 = vrot.lane.b32.xlu1 %v12701_v1, %s9648_s29  ;;  %v5303_v12 = vpop.permute.xlu0 %5302 }
 0x812   : > { %5396 = vst.msk [vmem:[#allocation4 + $0x20] sm:$0xff] %vm3290_vm4, %v5303_v12 }
 0x813   : > { %v5305_v29 = vpop.permute.xlu1 %5304  ;;  %5546 = vrot.lane.b32.xlu0 %v5454_v15, %s9648_s29 }
 0x814   : > { %5397 = vst.msk [vmem:[#allocation4 + $0x30] sm:$0xff] %vm3290_vm4, %v5305_v29 }
 0x815   : > { %5548 = vrot.lane.b32.xlu1 %v12708_v53, %s9648_s29  ;;  %v5307_v3 = vpop.permute.xlu0 %5306 }
 0x816   : > { %5398 = vst.msk [vmem:[#allocation4 + $0x40] sm:$0xff] %vm3290_vm4, %v5307_v3 }
 0x817   : > { %v5309_v39 = vpop.permute.xlu1 %5308  ;;  %5550 = vrot.lane.b32.xlu0 %v5456_v44, %s9648_s29 }
 0x818   : > { %5399 = vst.msk [vmem:[#allocation4 + $0x50] sm:$0xff] %vm3290_vm4, %v5309_v39 }
 0x819   : > { %5552 = vrot.lane.b32.xlu1 %v12715_v41, %s9648_s29  ;;  %v5311_v49 = vpop.permute.xlu0 %5310 }
 0x81a   : > { %5400 = vst.msk [vmem:[#allocation4 + $0x60] sm:$0xff] %vm3290_vm4, %v5311_v49 }
 0x81b   : > { %v5313_v40 = vpop.permute.xlu1 %5312  ;;  %5682 = vrot.lane.b32.xlu0 %v12524_v63, %s9643_s24 }
 0x81c   : > { %5401 = vst.msk [vmem:[#allocation4 + $0x70] sm:$0xff] %vm3290_vm4, %v5313_v40 }
 0x81d   : > { %5684 = vrot.lane.b32.xlu1 %v12531_v57, %s9643_s24  ;;  %v5315_v22 = vpop.permute.xlu0 %5314 }
 0x81e   : > { %5402 = vst.msk [vmem:[#allocation4 + $0x80] sm:$0xff] %vm3290_vm4, %v5315_v22 }
 0x81f   : > { %v5317_v5 = vpop.permute.xlu1 %5316  ;;  %5686 = vrot.lane.b32.xlu0 %v12538_v14, %s9643_s24 }
 0x820   : > { %5403 = vst.msk [vmem:[#allocation4 + $0x90] sm:$0xff] %vm3290_vm4, %v5317_v5 }
 0x821   : > { %5688 = vrot.lane.b32.xlu1 %v12545_v31, %s9643_s24  ;;  %v5319_v12 = vpop.permute.xlu0 %5318 }
 0x822   : > { %5404 = vst.msk [vmem:[#allocation4 + $0xa0] sm:$0xff] %vm3290_vm4, %v5319_v12 }
 0x823   : > { %v5321_v63 = vpop.permute.xlu1 %5320  ;;  %5690 = vrot.lane.b32.xlu0 %v12552_v48, %s9643_s24 }
 0x824   : > { %5405 = vst.msk [vmem:[#allocation4 + $0xb0] sm:$0xff] %vm3290_vm4, %v5321_v63 }
 0x825   : > { %5692 = vrot.lane.b32.xlu1 %v12559_v21, %s9643_s24  ;;  %v5323_v57 = vpop.permute.xlu0 %5322 }
 0x826   : > { %5406 = vst.msk [vmem:[#allocation4 + $0xc0] sm:$0xff] %vm3290_vm4, %v5323_v57 }
 0x827   : > { %v5325_v14 = vpop.permute.xlu1 %5324  ;;  %5694 = vrot.lane.b32.xlu0 %v12566_v0, %s9643_s24 }
 0x828   : > { %5407 = vst.msk [vmem:[#allocation4 + $0xd0] sm:$0xff] %vm3290_vm4, %v5325_v14  ;;  %v12792_v14 = vld [vmem:[#allocation3 + $0x184] sm:$0xff] }
 0x829   : > { %5696 = vrot.lane.b32.xlu1 %v12573_v43, %s9643_s24  ;;  %v5327_v31 = vpop.permute.xlu0 %5326 }
 0x82a   : > { %5408 = vst.msk [vmem:[#allocation4 + $0xe0] sm:$0xff] %vm3290_vm4, %v5327_v31 }
 0x82b   : > { %v5329_v48 = vpop.permute.xlu1 %5328  ;;  %5698 = vrot.lane.b32.xlu0 %v12580_v6, %s9643_s24 }
 0x82c   : > { %5409 = vst.msk [vmem:[#allocation4 + $0xf0] sm:$0xff] %vm3290_vm4, %v5329_v48  ;;  %v12797_v48 = vld [vmem:[#allocation3 + $0x18c] sm:$0xff] }
 0x82d   : > { %5700 = vrot.lane.b32.xlu1 %v12587_v33, %s9643_s24  ;;  %v5331_v21 = vpop.permute.xlu0 %5330 }
 0x82e   : > { %5410 = vst.msk [vmem:[#allocation4 + $0x100] sm:$0xff] %vm3290_vm4, %v5331_v21 }
 0x82f   : > { %v5333_v0 = vpop.permute.xlu1 %5332  ;;  %5702 = vrot.lane.b32.xlu0 %v12594_v10, %s9643_s24 }
 0x830   : > { %5411 = vst.msk [vmem:[#allocation4 + $0x110] sm:$0xff] %vm3290_vm4, %v5333_v0  ;;  %v12802_v0 = vld [vmem:[#allocation3 + $0x19c] sm:$0xff] }
 0x831   : > { %5704 = vrot.lane.b32.xlu1 %v12601_v59, %s9643_s24  ;;  %v5335_v43 = vpop.permute.xlu0 %5334 }
 0x832   : > { %5412 = vst.msk [vmem:[#allocation4 + $0x120] sm:$0xff] %vm3290_vm4, %v5335_v43 }
 0x833   : > { %v5337_v15 = vpop.permute.xlu1 %5336  ;;  %5706 = vrot.lane.b32.xlu0 %v12608_v28, %s9643_s24 }
 0x834   : > { %5413 = vst.msk [vmem:[#allocation4 + $0x130] sm:$0xff] %vm3290_vm4, %v5337_v15  ;;  %v12807_v15 = vld [vmem:[#allocation3 + $0x1a4] sm:$0xff] }
 0x835   : > { %5708 = vrot.lane.b32.xlu1 %v12615_v51, %s9643_s24  ;;  %v5339_v29 = vpop.permute.xlu0 %5338 }
 0x836   : > { %5414 = vst.msk [vmem:[#allocation4 + $0x140] sm:$0xff] %vm3290_vm4, %v5339_v29 }
 0x837   : > { %v5341_v3 = vpop.permute.xlu1 %5340  ;;  %5710 = vrot.lane.b32.xlu0 %v12622_v60, %s9643_s24 }
 0x838   : > { %5415 = vst.msk [vmem:[#allocation4 + $0x150] sm:$0xff] %vm3290_vm4, %v5341_v3  ;;  %v12812_v3 = vld [vmem:[#allocation3 + $0x1b4] sm:$0xff] }
 0x839   : > { %5712 = vrot.lane.b32.xlu1 %v12629_v18, %s9643_s24  ;;  %v5343_v44 = vpop.permute.xlu0 %5342 }
 0x83a   : > { %5416 = vst.msk [vmem:[#allocation4 + $0x160] sm:$0xff] %vm3290_vm4, %v5343_v44 }
 0x83b   : > { %v5345_v39 = vpop.permute.xlu1 %5344  ;;  %5714 = vrot.lane.b32.xlu0 %v12636_v30, %s9643_s24 }
 0x83c   : > { %5417 = vst.msk [vmem:[#allocation4 + $0x170] sm:$0xff] %vm3290_vm4, %v5345_v39  ;;  %v12817_v39 = vld [vmem:[#allocation3 + $0x1bc] sm:$0xff] }
 0x83d   : > { %5716 = vrot.lane.b32.xlu1 %v12643_v8, %s9643_s24  ;;  %v5347_v49 = vpop.permute.xlu0 %5346 }
 0x83e   : > { %5418 = vst.msk [vmem:[#allocation4 + $0x180] sm:$0xff] %vm3290_vm4, %v5347_v49 }
 0x83f   : > { %v5349_v40 = vpop.permute.xlu1 %5348  ;;  %5718 = vrot.lane.b32.xlu0 %v12650_v56, %s9643_s24 }
 0x840   : > { %5419 = vst.msk [vmem:[#allocation4 + $0x190] sm:$0xff] %vm3290_vm4, %v5349_v40  ;;  %v12822_v40 = vld [vmem:[#allocation3 + $0x1cc] sm:$0xff] }
 0x841   : > { %5720 = vrot.lane.b32.xlu1 %v12657_v46, %s9643_s24  ;;  %v5351_v22 = vpop.permute.xlu0 %5350 }
 0x842   : > { %5420 = vst.msk [vmem:[#allocation4 + $0x1a0] sm:$0xff] %vm3290_vm4, %v5351_v22 }
 0x843   : > { %v5353_v5 = vpop.permute.xlu1 %5352  ;;  %5722 = vrot.lane.b32.xlu0 %v12664_v42, %s9643_s24 }
 0x844   : > { %5421 = vst.msk [vmem:[#allocation4 + $0x1b0] sm:$0xff] %vm3290_vm4, %v5353_v5  ;;  %v12827_v5 = vld [vmem:[#allocation3 + $0x1d4] sm:$0xff] }
 0x845   : > { %5724 = vrot.lane.b32.xlu1 %v12671_v55, %s9643_s24  ;;  %v5355_v12 = vpop.permute.xlu0 %5354 }
 0x846   : > { %5422 = vst.msk [vmem:[#allocation4 + $0x1c0] sm:$0xff] %vm3290_vm4, %v5355_v12 }
 0x847   : > { %v5357_v63 = vpop.permute.xlu1 %5356  ;;  %5726 = vrot.lane.b32.xlu0 %v12680_v50, %s9643_s24 }
 0x848   : > { %5423 = vst.msk [vmem:[#allocation4 + $0x1d0] sm:$0xff] %vm3290_vm4, %v5357_v63 }
 0x849   : > { %5728 = vrot.lane.b32.xlu1 %v12689_v4, %s9643_s24  ;;  %v5359_v57 = vpop.permute.xlu0 %5358 }
 0x84a   : > { %5424 = vst.msk [vmem:[#allocation4 + $0x1e0] sm:$0xff] %vm3290_vm4, %v5359_v57 }
 0x84b   : > { %v5361_v31 = vpop.permute.xlu1 %5360  ;;  %5730 = vrot.lane.b32.xlu0 %v12792_v14, %s9643_s24 }
 0x84c   : > { %5425 = vst.msk [vmem:[#allocation4 + $0x1f0] sm:$0xff] %vm3290_vm4, %v5361_v31 }
 0x84d   : > { %5732 = vrot.lane.b32.xlu1 %v12797_v48, %s9643_s24  ;;  %v5491_v21 = vpop.permute.xlu0 %5490 }
 0x84e   : > { %5586 = vst.msk [vmem:[#allocation4] sm:$0xff] %vm3483_vm1, %v5491_v21 }
 0x84f   : > { %v5493_v43 = vpop.permute.xlu1 %5492  ;;  %5734 = vrot.lane.b32.xlu0 %v12802_v0, %s9643_s24 }
 0x850   : > { %5587 = vst.msk [vmem:[#allocation4 + $0x10] sm:$0xff] %vm3483_vm1, %v5493_v43 }
 0x851   : > { %5736 = vrot.lane.b32.xlu1 %v12807_v15, %s9643_s24  ;;  %v5495_v29 = vpop.permute.xlu0 %5494 }
 0x852   : > { %5588 = vst.msk [vmem:[#allocation4 + $0x20] sm:$0xff] %vm3483_vm1, %v5495_v29 }
 0x853   : > { %v5497_v44 = vpop.permute.xlu1 %5496  ;;  %5738 = vrot.lane.b32.xlu0 %v12812_v3, %s9643_s24 }
 0x854   : > { %5589 = vst.msk [vmem:[#allocation4 + $0x30] sm:$0xff] %vm3483_vm1, %v5497_v44 }
 0x855   : > { %5740 = vrot.lane.b32.xlu1 %v12817_v39, %s9643_s24  ;;  %v5499_v49 = vpop.permute.xlu0 %5498 }
 0x856   : > { %5590 = vst.msk [vmem:[#allocation4 + $0x40] sm:$0xff] %vm3483_vm1, %v5499_v49  ;;  %v12923_v49 = vld [vmem:[#allocation3 + $0x1c0] sm:$0xff] }
 0x857   : > { %v5501_v22 = vpop.permute.xlu1 %5500  ;;  %5742 = vrot.lane.b32.xlu0 %v12822_v40, %s9643_s24 }
 0x858   : > { %5591 = vst.msk [vmem:[#allocation4 + $0x50] sm:$0xff] %vm3483_vm1, %v5501_v22 }
 0x859   : > { %5744 = vrot.lane.b32.xlu1 %v12827_v5, %s9643_s24  ;;  %v5503_v12 = vpop.permute.xlu0 %5502 }
 0x85a   : > { %5592 = vst.msk [vmem:[#allocation4 + $0x60] sm:$0xff] %vm3483_vm1, %v5503_v12 }
 0x85b   : > { %v5505_v63 = vpop.permute.xlu1 %5504  ;;  %5874 = vrot.lane.b32.xlu0 %v12300_v34, %s9652_s12 }
 0x85c   : > { %5593 = vst.msk [vmem:[#allocation4 + $0x70] sm:$0xff] %vm3483_vm1, %v5505_v63  ;;  %v12931_v63 = vld [vmem:[#allocation3 + $0x1d8] sm:$0xff] }
 0x85d   : > { %5876 = vrot.lane.b32.xlu1 %v12442_v35, %s9652_s12  ;;  %v5507_v57 = vpop.permute.xlu0 %5506 }
 0x85e   : > { %5594 = vst.msk [vmem:[#allocation4 + $0x80] sm:$0xff] %vm3483_vm1, %v5507_v57  ;;  %v6003_v57 = vld [vmem:[#allocation3 + $0xc0] sm:$0xff] }
 0x85f   : > { %v5509_v31 = vpop.permute.xlu1 %5508  ;;  %5878 = vrot.lane.b32.xlu0 %v12310_v2, %s9652_s12 }
 0x860   : > { %5595 = vst.msk [vmem:[#allocation4 + $0x90] sm:$0xff] %vm3483_vm1, %v5509_v31 }
 0x861   : > { %5880 = vrot.lane.b32.xlu1 %v12452_v7, %s9652_s12  ;;  %v5511_v21 = vpop.permute.xlu0 %5510 }
 0x862   : > { %5596 = vst.msk [vmem:[#allocation4 + $0xa0] sm:$0xff] %vm3483_vm1, %v5511_v21  ;;  %v12938_v21 = vld [vmem:[#allocation3 + $0xc8] sm:$0xff] }
 0x863   : > { %v5513_v34 = vpop.permute.xlu1 %5512  ;;  %5882 = vrot.lane.b32.xlu0 %v12320_v58, %s9652_s12 }
 0x864   : > { %5597 = vst.msk [vmem:[#allocation4 + $0xb0] sm:$0xff] %vm3483_vm1, %v5513_v34  ;;  %v6005_v34 = vld [vmem:[#allocation3 + $0xd8] sm:$0xff] }
 0x865   : > { %5884 = vrot.lane.b32.xlu1 %v12461_v45, %s9652_s12  ;;  %v5515_v35 = vpop.permute.xlu0 %5514 }
 0x866   : > { %5598 = vst.msk [vmem:[#allocation4 + $0xc0] sm:$0xff] %vm3483_vm1, %v5515_v35 }
 0x867   : > { %v5517_v2 = vpop.permute.xlu1 %5516  ;;  %5886 = vrot.lane.b32.xlu0 %v12330_v19, %s9652_s12 }
 0x868   : > { %5599 = vst.msk [vmem:[#allocation4 + $0xd0] sm:$0xff] %vm3483_vm1, %v5517_v2  ;;  %v12945_v2 = vld [vmem:[#allocation3 + $0xe0] sm:$0xff] }
 0x869   : > { %5888 = vrot.lane.b32.xlu1 %v12467_v36, %s9652_s12  ;;  %v5519_v7 = vpop.permute.xlu0 %5518 }
 0x86a   : > { %5600 = vst.msk [vmem:[#allocation4 + $0xe0] sm:$0xff] %vm3483_vm1, %v5519_v7 }
 0x86b   : > { %v5521_v58 = vpop.permute.xlu1 %5520  ;;  %5890 = vrot.lane.b32.xlu0 %v12340_v62, %s9652_s12 }
 0x86c   : > { %5601 = vst.msk [vmem:[#allocation4 + $0xf0] sm:$0xff] %vm3483_vm1, %v5521_v58  ;;  %v6007_v58 = vld [vmem:[#allocation3 + $0xf0] sm:$0xff] }
 0x86d   : > { %5892 = vrot.lane.b32.xlu1 %v12473_v25, %s9652_s12  ;;  %v5523_v45 = vpop.permute.xlu0 %5522 }
 0x86e   : > { %5602 = vst.msk [vmem:[#allocation4 + $0x100] sm:$0xff] %vm3483_vm1, %v5523_v45 }
 0x86f   : > { %v5525_v19 = vpop.permute.xlu1 %5524  ;;  %5894 = vrot.lane.b32.xlu0 %v12350_v37, %s9652_s12 }
 0x870   : > { %5603 = vst.msk [vmem:[#allocation4 + $0x110] sm:$0xff] %vm3483_vm1, %v5525_v19  ;;  %v12952_v19 = vld [vmem:[#allocation3 + $0xf8] sm:$0xff] }
 0x871   : > { %5896 = vrot.lane.b32.xlu1 %v12479_v11, %s9652_s12  ;;  %v5527_v36 = vpop.permute.xlu0 %5526 }
 0x872   : > { %5604 = vst.msk [vmem:[#allocation4 + $0x120] sm:$0xff] %vm3483_vm1, %v5527_v36 }
 0x873   : > { %v5529_v62 = vpop.permute.xlu1 %5528  ;;  %5898 = vrot.lane.b32.xlu0 %v12360_v52, %s9652_s12 }
 0x874   : > { %5605 = vst.msk [vmem:[#allocation4 + $0x130] sm:$0xff] %vm3483_vm1, %v5529_v62  ;;  %v6009_v62 = vld [vmem:[#allocation3 + $0x108] sm:$0xff] }
 0x875   : > { %5900 = vrot.lane.b32.xlu1 %v12485_v61, %s9652_s12  ;;  %v5531_v25 = vpop.permute.xlu0 %5530 }
 0x876   : > { %5606 = vst.msk [vmem:[#allocation4 + $0x140] sm:$0xff] %vm3483_vm1, %v5531_v25 }
 0x877   : > { %v5533_v37 = vpop.permute.xlu1 %5532  ;;  %5902 = vrot.lane.b32.xlu0 %v12370_v17, %s9652_s12 }
 0x878   : > { %5607 = vst.msk [vmem:[#allocation4 + $0x150] sm:$0xff] %vm3483_vm1, %v5533_v37  ;;  %v12959_v37 = vld [vmem:[#allocation3 + $0x110] sm:$0xff] }
 0x879   : > { %5904 = vrot.lane.b32.xlu1 %v12491_v24, %s9652_s12  ;;  %v5535_v11 = vpop.permute.xlu0 %5534 }
 0x87a   : > { %5608 = vst.msk [vmem:[#allocation4 + $0x160] sm:$0xff] %vm3483_vm1, %v5535_v11 }
 0x87b   : > { %v5537_v52 = vpop.permute.xlu1 %5536  ;;  %5906 = vrot.lane.b32.xlu0 %v12380_v16, %s9652_s12 }
 0x87c   : > { %5609 = vst.msk [vmem:[#allocation4 + $0x170] sm:$0xff] %vm3483_vm1, %v5537_v52  ;;  %v6011_v52 = vld [vmem:[#allocation3 + $0x120] sm:$0xff] }
 0x87d   : > { %5908 = vrot.lane.b32.xlu1 %v12497_v26, %s9652_s12  ;;  %v5539_v61 = vpop.permute.xlu0 %5538 }
 0x87e   : > { %5610 = vst.msk [vmem:[#allocation4 + $0x180] sm:$0xff] %vm3483_vm1, %v5539_v61 }
 0x87f   : > { %v5541_v17 = vpop.permute.xlu1 %5540  ;;  %5910 = vrot.lane.b32.xlu0 %v12390_v27, %s9652_s12 }
 0x880   : > { %5611 = vst.msk [vmem:[#allocation4 + $0x190] sm:$0xff] %vm3483_vm1, %v5541_v17  ;;  %v12966_v17 = vld [vmem:[#allocation3 + $0x128] sm:$0xff] }
 0x881   : > { %5912 = vrot.lane.b32.xlu1 %v12503_v9, %s9652_s12  ;;  %v5543_v24 = vpop.permute.xlu0 %5542 }
 0x882   : > { %5612 = vst.msk [vmem:[#allocation4 + $0x1a0] sm:$0xff] %vm3483_vm1, %v5543_v24 }
 0x883   : > { %v5545_v16 = vpop.permute.xlu1 %5544  ;;  %5914 = vrot.lane.b32.xlu0 %v12400_v32, %s9652_s12 }
 0x884   : > { %5613 = vst.msk [vmem:[#allocation4 + $0x1b0] sm:$0xff] %vm3483_vm1, %v5545_v16  ;;  %v6013_v16 = vld [vmem:[#allocation3 + $0x138] sm:$0xff] }
 0x885   : > { %5916 = vrot.lane.b32.xlu1 %v12509_v47, %s9652_s12  ;;  %v5547_v26 = vpop.permute.xlu0 %5546  ;;  %v12907_v47 = vld [vmem:[#allocation3 + $0x190] sm:$0xff] }
 0x886   : > { %5614 = vst.msk [vmem:[#allocation4 + $0x1c0] sm:$0xff] %vm3483_vm1, %v5547_v26 }
 0x887   : > { %v5549_v27 = vpop.permute.xlu1 %5548  ;;  %5918 = vrot.lane.b32.xlu0 %v12410_v20, %s9652_s12 }
 0x888   : > { %5615 = vst.msk [vmem:[#allocation4 + $0x1d0] sm:$0xff] %vm3483_vm1, %v5549_v27  ;;  %v12973_v27 = vld [vmem:[#allocation3 + $0x140] sm:$0xff] }
 0x889   : > { %5920 = vrot.lane.b32.xlu1 %v12515_v54, %s9652_s12  ;;  %v5551_v9 = vpop.permute.xlu0 %5550  ;;  %v12915_v54 = vld [vmem:[#allocation3 + $0x1a8] sm:$0xff] }
 0x88a   : > { %5616 = vst.msk [vmem:[#allocation4 + $0x1e0] sm:$0xff] %vm3483_vm1, %v5551_v9 }
 0x88b   : > { %v5553_v32 = vpop.permute.xlu1 %5552  ;;  %5922 = vrot.lane.b32.xlu0 %v12687_v38, %s9652_s12 }
 0x88c   : > { %5617 = vst.msk [vmem:[#allocation4 + $0x1f0] sm:$0xff] %vm3483_vm1, %v5553_v32  ;;  %v6015_v32 = vld [vmem:[#allocation3 + $0x150] sm:$0xff]  ;;  %vm14554_vm1 = vcmask 719872  }
 0x88d   : > { %5924 = vrot.lane.b32.xlu1 %v12907_v47, %s9652_s12  ;;  %v5683_v20 = vpop.permute.xlu0 %5682 }
 0x88e   : > { %5778 = vst.msk [vmem:[#allocation4] sm:$0xff] %vm3676_vm15, %v5683_v20 }
 0x88f   : > { %v5685_v43 = vpop.permute.xlu1 %5684  ;;  %5926 = vrot.lane.b32.xlu0 %v12701_v1, %s9652_s12 }
 0x890   : > { %5779 = vst.msk [vmem:[#allocation4 + $0x10] sm:$0xff] %vm3676_vm15, %v5685_v43  ;;  %v12980_v43 = vld [vmem:[#allocation3 + $0x158] sm:$0xff] }
 0x891   : > { %5928 = vrot.lane.b32.xlu1 %v12915_v54, %s9652_s12  ;;  %v5687_v29 = vpop.permute.xlu0 %5686 }
 0x892   : > { %5780 = vst.msk [vmem:[#allocation4 + $0x20] sm:$0xff] %vm3676_vm15, %v5687_v29 }
 0x893   : > { %v5689_v44 = vpop.permute.xlu1 %5688  ;;  %5930 = vrot.lane.b32.xlu0 %v12708_v53, %s9652_s12 }
 0x894   : > { %5781 = vst.msk [vmem:[#allocation4 + $0x30] sm:$0xff] %vm3676_vm15, %v5689_v44  ;;  %v6017_v44 = vld [vmem:[#allocation3 + $0x168] sm:$0xff] }
 0x895   : > { %5932 = vrot.lane.b32.xlu1 %v12923_v49, %s9652_s12  ;;  %v5691_v22 = vpop.permute.xlu0 %5690 }
 0x896   : > { %5782 = vst.msk [vmem:[#allocation4 + $0x40] sm:$0xff] %vm3676_vm15, %v5691_v22 }
 0x897   : > { %v5693_v12 = vpop.permute.xlu1 %5692  ;;  %5934 = vrot.lane.b32.xlu0 %v12715_v41, %s9652_s12 }
 0x898   : > { %5783 = vst.msk [vmem:[#allocation4 + $0x50] sm:$0xff] %vm3676_vm15, %v5693_v12  ;;  %v12987_v12 = vld [vmem:[#allocation3 + $0x170] sm:$0xff] }
 0x899   : > { %5936 = vrot.lane.b32.xlu1 %v12931_v63, %s9652_s12  ;;  %v5695_v53 = vpop.permute.xlu0 %5694 }
 0x89a   : > { %5784 = vst.msk [vmem:[#allocation4 + $0x60] sm:$0xff] %vm3676_vm15, %v5695_v53 }
 0x89b   : > { %v5697_v31 = vpop.permute.xlu1 %5696  ;;  %6067 = vrot.lane.b32.xlu0 %v6003_v57, %s9649_s30  ;;  %v9614_v57 = vld [vmem:[%s14361_s6] sm:$0xff]  }
 0x89c   : > { %5785 = vst.msk [vmem:[#allocation4 + $0x70] sm:$0xff] %vm3676_vm15, %v5697_v31  ;;  %9508 = vmatprep.subr.bf16.mxu0 %v9614_v57  ;;  %9560 = vmatprep.subr.bf16.mxu1 %v9614_v57 }
 0x89d   : > { %6069 = vrot.lane.b32.xlu1 %v12938_v21, %s9649_s30  ;;  %v5699_v41 = vpop.permute.xlu0 %5698  ;;  %9509 = vmatpush3.bf16.msra.mxu0 %v9614_v57 }
 0x89e   : > { %5786 = vst.msk [vmem:[#allocation4 + $0x80] sm:$0xff] %vm3676_vm15, %v5699_v41  ;;  %9565 = vmatpush3.bf16.msra.mxu1 %v9614_v57 }
 0x89f   : > { %v5701_v35 = vpop.permute.xlu1 %5700  ;;  %6071 = vrot.lane.b32.xlu0 %v6005_v34, %s9649_s30  ;;  %v9615_v34 = vld [vmem:[%s14361_s6 + $0x8] sm:$0xff]  }
 0x8a0   : > { %5787 = vst.msk [vmem:[#allocation4 + $0x90] sm:$0xff] %vm3676_vm15, %v5701_v35  ;;  %9510 = vmatprep.subr.bf16.mxu0 %v9615_v34  ;;  %9561 = vmatprep.subr.bf16.mxu1 %v9615_v34 }
 0x8a1   : > { %6073 = vrot.lane.b32.xlu1 %v12945_v2, %s9649_s30  ;;  %v5703_v7 = vpop.permute.xlu0 %5702  ;;  %9511 = vmatpush3.bf16.msra.mxu0 %v9615_v34 }
 0x8a2   : > { %5788 = vst.msk [vmem:[#allocation4 + $0xa0] sm:$0xff] %vm3676_vm15, %v5703_v7  ;;  %9566 = vmatpush3.bf16.msra.mxu1 %v9615_v34 }
 0x8a3   : > { %v5705_v45 = vpop.permute.xlu1 %5704  ;;  %6075 = vrot.lane.b32.xlu0 %v6007_v58, %s9649_s30 }
 0x8a4   : > { %5789 = vst.msk [vmem:[#allocation4 + $0xb0] sm:$0xff] %vm3676_vm15, %v5705_v45 }
 0x8a5   : > { %6077 = vrot.lane.b32.xlu1 %v12952_v19, %s9649_s30  ;;  %v5707_v36 = vpop.permute.xlu0 %5706 }
 0x8a6   : > { %5790 = vst.msk [vmem:[#allocation4 + $0xc0] sm:$0xff] %vm3676_vm15, %v5707_v36 }
 0x8a7   : > { %v5709_v25 = vpop.permute.xlu1 %5708  ;;  %6079 = vrot.lane.b32.xlu0 %v6009_v62, %s9649_s30 }
 0x8a8   : > { %5791 = vst.msk [vmem:[#allocation4 + $0xd0] sm:$0xff] %vm3676_vm15, %v5709_v25  ;;  %v6390_v25 = vld [vmem:[#allocation3 + $0xe8] sm:$0xff] }
 0x8a9   : > { %6081 = vrot.lane.b32.xlu1 %v12959_v37, %s9649_s30  ;;  %v5711_v11 = vpop.permute.xlu0 %5710 }
 0x8aa   : > { %5792 = vst.msk [vmem:[#allocation4 + $0xe0] sm:$0xff] %vm3676_vm15, %v5711_v11 }
 0x8ab   : > { %v5713_v61 = vpop.permute.xlu1 %5712  ;;  %6083 = vrot.lane.b32.xlu0 %v6011_v52, %s9649_s30 }
 0x8ac   : > { %5793 = vst.msk [vmem:[#allocation4 + $0xf0] sm:$0xff] %vm3676_vm15, %v5713_v61 }
 0x8ad   : > { %6085 = vrot.lane.b32.xlu1 %v12966_v17, %s9649_s30  ;;  %v5715_v24 = vpop.permute.xlu0 %5714 }
 0x8ae   : > { %5794 = vst.msk [vmem:[#allocation4 + $0x100] sm:$0xff] %vm3676_vm15, %v5715_v24 }
 0x8af   : > { %v5717_v26 = vpop.permute.xlu1 %5716  ;;  %6087 = vrot.lane.b32.xlu0 %v6013_v16, %s9649_s30 }
 0x8b0   : > { %5795 = vst.msk [vmem:[#allocation4 + $0x110] sm:$0xff] %vm3676_vm15, %v5717_v26 }
 0x8b1   : > { %6089 = vrot.lane.b32.xlu1 %v12973_v27, %s9649_s30  ;;  %v5719_v9 = vpop.permute.xlu0 %5718 }
 0x8b2   : > { %5796 = vst.msk [vmem:[#allocation4 + $0x120] sm:$0xff] %vm3676_vm15, %v5719_v9 }
 0x8b3   : > { %v5721_v20 = vpop.permute.xlu1 %5720  ;;  %6091 = vrot.lane.b32.xlu0 %v6015_v32, %s9649_s30 }
 0x8b4   : > { %5797 = vst.msk [vmem:[#allocation4 + $0x130] sm:$0xff] %vm3676_vm15, %v5721_v20 }
 0x8b5   : > { %6093 = vrot.lane.b32.xlu1 %v12980_v43, %s9649_s30  ;;  %v5723_v29 = vpop.permute.xlu0 %5722 }
 0x8b6   : > { %5798 = vst.msk [vmem:[#allocation4 + $0x140] sm:$0xff] %vm3676_vm15, %v5723_v29 }
 0x8b7   : > { %v5725_v22 = vpop.permute.xlu1 %5724  ;;  %6095 = vrot.lane.b32.xlu0 %v6017_v44, %s9649_s30 }
 0x8b8   : > { %5799 = vst.msk [vmem:[#allocation4 + $0x150] sm:$0xff] %vm3676_vm15, %v5725_v22 }
 0x8b9   : > { %6097 = vrot.lane.b32.xlu1 %v12987_v12, %s9649_s30  ;;  %v5727_v53 = vpop.permute.xlu0 %5726 }
 0x8ba   : > { %5800 = vst.msk [vmem:[#allocation4 + $0x160] sm:$0xff] %vm3676_vm15, %v5727_v53 }
 0x8bb   : > { %v5729_v31 = vpop.permute.xlu1 %5728  ;;  %6099 = vrot.lane.b32.xlu0 %v12678_v23, %s9649_s30 }
 0x8bc   : > { %5801 = vst.msk [vmem:[#allocation4 + $0x170] sm:$0xff] %vm3676_vm15, %v5729_v31 }
 0x8bd   : > { %6101 = vrot.lane.b32.xlu1 %v12687_v38, %s9649_s30  ;;  %v5731_v41 = vpop.permute.xlu0 %5730  ;;  %v9616_v38 = vld [vmem:[%s14361_s6 + $0x10] sm:$0xff]  }
 0x8be   : > { %5802 = vst.msk [vmem:[#allocation4 + $0x180] sm:$0xff] %vm3676_vm15, %v5731_v41  ;;  %9512 = vmatprep.subr.bf16.mxu0 %v9616_v38  ;;  %9562 = vmatprep.subr.bf16.mxu1 %v9616_v38 }
 0x8bf   : > { %v5733_v35 = vpop.permute.xlu1 %5732  ;;  %6103 = vrot.lane.b32.xlu0 %v12696_v13, %s9649_s30  ;;  %9513 = vmatpush3.bf16.msra.mxu0 %v9616_v38 }
 0x8c0   : > { %5803 = vst.msk [vmem:[#allocation4 + $0x190] sm:$0xff] %vm3676_vm15, %v5733_v35  ;;  %9567 = vmatpush3.bf16.msra.mxu1 %v9616_v38 }
 0x8c1   : > { %6105 = vrot.lane.b32.xlu1 %v12701_v1, %s9649_s30  ;;  %v5735_v23 = vpop.permute.xlu0 %5734  ;;  %v9617_v1 = vld [vmem:[%s14361_s6 + $0x18] sm:$0xff]  }
 0x8c2   : > { %5804 = vst.msk [vmem:[#allocation4 + $0x1a0] sm:$0xff] %vm3676_vm15, %v5735_v23  ;;  %9514 = vmatprep.subr.bf16.mxu0 %v9617_v1  ;;  %9563 = vmatprep.subr.bf16.mxu1 %v9617_v1  ;;  %v6023_v23 = vld [vmem:[#allocation3 + $0x1b0] sm:$0xff] }
 0x8c3   : > { %v5737_v7 = vpop.permute.xlu1 %5736  ;;  %6259 = vrot.lane.b32.xlu0 %v12580_v6, %s9644_s25  ;;  %9515 = vmatpush3.bf16.msra.mxu0 %v9617_v1 }
 0x8c4   : > { %5805 = vst.msk [vmem:[#allocation4 + $0x1b0] sm:$0xff] %vm3676_vm15, %v5737_v7  ;;  %9568 = vmatpush3.bf16.msra.mxu1 %v9617_v1 }
 0x8c5   : > { %6261 = vrot.lane.b32.xlu1 %v12587_v33, %s9644_s25  ;;  %v5739_v13 = vpop.permute.xlu0 %5738  ;;  %v9618_v33 = vld [vmem:[%s14361_s6 + $0x20] ss:$0 sps:$4 sm:$0xff]  }
 0x8c6   : > { %5806 = vst.msk [vmem:[#allocation4 + $0x1c0] sm:$0xff] %vm3676_vm15, %v5739_v13  ;;  %9572 = vmatprep.subr.msk.bf16.mxu0 %vm2643_vm12, %v9618_v33  ;;  %9573 = vmatprep.subr.msk.bf16.mxu1 %vm2643_vm12, %v9618_v33  ;;  %v6025_v13 = vld [vmem:[#allocation3 + $0x1c8] sm:$0xff] }
 0x8c7   : > { %v5741_v58 = vpop.permute.xlu1 %5740  ;;  %6263 = vrot.lane.b32.xlu0 %v12594_v10, %s9644_s25  ;;  %v6388_v10 = vld [vmem:[#allocation3 + $0xd0] sm:$0xff] }
 0x8c8   : > { %5807 = vst.msk [vmem:[#allocation4 + $0x1d0] sm:$0xff] %vm3676_vm15, %v5741_v58 }
 0x8c9   : > { %6265 = vrot.lane.b32.xlu1 %v12601_v59, %s9644_s25  ;;  %v5743_v6 = vpop.permute.xlu0 %5742  ;;  %v6719_v59 = vsel %vm2643_vm12, %v9618_v33, 0 }
 0x8ca   : > { %5808 = vst.msk [vmem:[#allocation4 + $0x1e0] sm:$0xff] %vm3676_vm15, %v5743_v6  ;;  %9517 = vmatpush3.bf16.msra.mxu0 %v6719_v59  ;;  %9569 = vmatpush3.bf16.msra.mxu1 %v6719_v59 }
 0x8cb   : > { %v5745_v45 = vpop.permute.xlu1 %5744  ;;  %6451 = vrot.lane.b32.xlu0 %v12938_v21, %s9653_s23  ;;  %v14540_v21 = vmov 0  }
 0x8cc   : > { %5809 = vst.msk [vmem:[#allocation4 + $0x1f0] sm:$0xff] %vm3676_vm15, %v5745_v45  ;;  %8970 = vmatprep.subr.bf16.mxu1 %v14540_v21 }
 0x8cd   : > { %6453 = vrot.lane.b32.xlu1 %v6388_v10, %s9653_s23  ;;  %v5875_v36 = vpop.permute.xlu0 %5874 }
 0x8ce   : > { %5970 = vst.msk [vmem:[#allocation4] sm:$0xff] %vm3869_vm14, %v5875_v36  ;;  %v6028_v36 = vld [vmem:[#allocation3 + $0x1e8] sm:$0xff] }
 0x8cf   : > { %v5877_v62 = vpop.permute.xlu1 %5876  ;;  %6455 = vrot.lane.b32.xlu0 %v12945_v2, %s9653_s23 }
 0x8d0   : > { %5971 = vst.msk [vmem:[#allocation4 + $0x10] sm:$0xff] %vm3869_vm14, %v5877_v62 }
 0x8d1   : > { %6457 = vrot.lane.b32.xlu1 %v6390_v25, %s9653_s23  ;;  %v5879_v11 = vpop.permute.xlu0 %5878 }
 0x8d2   : > { %5972 = vst.msk [vmem:[#allocation4 + $0x20] sm:$0xff] %vm3869_vm14, %v5879_v11  ;;  %v6030_v11 = vld [vmem:[#allocation3 + $0x200] sm:$0xff] }
 0x8d3   : > { %v5881_v52 = vpop.permute.xlu1 %5880  ;;  %6267 = vrot.lane.b32.xlu0 %v12608_v28, %s9644_s25 }
 0x8d4   : > { %5973 = vst.msk [vmem:[#allocation4 + $0x30] sm:$0xff] %vm3869_vm14, %v5881_v52 }
 0x8d5   : > { %6269 = vrot.lane.b32.xlu1 %v12615_v51, %s9644_s25  ;;  %v5883_v2 = vpop.permute.xlu0 %5882  ;;  %v6392_v51 = vld [vmem:[#allocation3 + $0x100] sm:$0xff] }
 0x8d6   : > { %5974 = vst.msk [vmem:[#allocation4 + $0x40] sm:$0xff] %vm3869_vm14, %v5883_v2 }
 0x8d7   : > { %v5885_v61 = vpop.permute.xlu1 %5884  ;;  %6271 = vrot.lane.b32.xlu0 %v12622_v60, %s9644_s25 }
 0x8d8   : > { %5975 = vst.msk [vmem:[#allocation4 + $0x50] sm:$0xff] %vm3869_vm14, %v5885_v61  ;;  %v6220_v61 = vld [vmem:[#allocation3 + $0x1ec] sm:$0xff] }
 0x8d9   : > { %6273 = vrot.lane.b32.xlu1 %v12629_v18, %s9644_s25  ;;  %v5887_v24 = vpop.permute.xlu0 %5886  ;;  %v6394_v18 = vld [vmem:[#allocation3 + $0x118] sm:$0xff] }
 0x8da   : > { %5976 = vst.msk [vmem:[#allocation4 + $0x60] sm:$0xff] %vm3869_vm14, %v5887_v24 }
 0x8db   : > { %v5889_v28 = vpop.permute.xlu1 %5888  ;;  %6459 = vrot.lane.b32.xlu0 %v12952_v19, %s9653_s23 }
 0x8dc   : > { %5977 = vst.msk [vmem:[#allocation4 + $0x70] sm:$0xff] %vm3869_vm14, %v5889_v28  ;;  %v6221_v28 = vld [vmem:[#allocation3 + $0x1fc] sm:$0xff] }
 0x8dd   : > { %6461 = vrot.lane.b32.xlu1 %v6392_v51, %s9653_s23  ;;  %v5891_v16 = vpop.permute.xlu0 %5890 }
 0x8de   : > { %5978 = vst.msk [vmem:[#allocation4 + $0x80] sm:$0xff] %vm3869_vm14, %v5891_v16  ;;  %v6222_v16 = vld [vmem:[#allocation3 + $0x204] sm:$0xff] }
 0x8df   : > { %v5893_v60 = vpop.permute.xlu1 %5892  ;;  %6463 = vrot.lane.b32.xlu0 %v12959_v37, %s9653_s23 }
 0x8e0   : > { %5979 = vst.msk [vmem:[#allocation4 + $0x90] sm:$0xff] %vm3869_vm14, %v5893_v60 }
 0x8e1   : > { %6465 = vrot.lane.b32.xlu1 %v6394_v18, %s9653_s23  ;;  %v5895_v26 = vpop.permute.xlu0 %5894 }
 0x8e2   : > { %5980 = vst.msk [vmem:[#allocation4 + $0xa0] sm:$0xff] %vm3869_vm14, %v5895_v26  ;;  %v6412_v26 = vld [vmem:[#allocation3 + $0x1f0] sm:$0xff] }
 0x8e3   : > { %v5897_v19 = vpop.permute.xlu1 %5896  ;;  %6275 = vrot.lane.b32.xlu0 %v12636_v30, %s9644_s25 }
 0x8e4   : > { %5981 = vst.msk [vmem:[#allocation4 + $0xb0] sm:$0xff] %vm3869_vm14, %v5897_v19 }
 0x8e5   : > { %6277 = vrot.lane.b32.xlu1 %v12643_v8, %s9644_s25  ;;  %v5899_v9 = vpop.permute.xlu0 %5898  ;;  %v6396_v8 = vld [vmem:[#allocation3 + $0x130] sm:$0xff] }
 0x8e6   : > { %5982 = vst.msk [vmem:[#allocation4 + $0xc0] sm:$0xff] %vm3869_vm14, %v5899_v9 }
 0x8e7   : > { %v5901_v37 = vpop.permute.xlu1 %5900  ;;  %6279 = vrot.lane.b32.xlu0 %v12650_v56, %s9644_s25 }
 0x8e8   : > { %5983 = vst.msk [vmem:[#allocation4 + $0xd0] sm:$0xff] %vm3869_vm14, %v5901_v37  ;;  %v6414_v37 = vld [vmem:[#allocation3 + $0x208] sm:$0xff] }
 0x8e9   : > { %6281 = vrot.lane.b32.xlu1 %v12657_v46, %s9644_s25  ;;  %v5903_v32 = vpop.permute.xlu0 %5902  ;;  %v6398_v46 = vld [vmem:[#allocation3 + $0x148] sm:$0xff] }
 0x8ea   : > { %5984 = vst.msk [vmem:[#allocation4 + $0xe0] sm:$0xff] %vm3869_vm14, %v5903_v32 }
 0x8eb   : > { %v5905_v30 = vpop.permute.xlu1 %5904  ;;  %6467 = vrot.lane.b32.xlu0 %v12966_v17, %s9653_s23 }
 0x8ec   : > { %5985 = vst.msk [vmem:[#allocation4 + $0xf0] sm:$0xff] %vm3869_vm14, %v5905_v30  ;;  %v6031_v30 = vld [vmem:[#allocation3 + $0x210] sm:$0xff] }
 0x8ed   : > { %6469 = vrot.lane.b32.xlu1 %v6396_v8, %s9653_s23  ;;  %v5907_v20 = vpop.permute.xlu0 %5906 }
 0x8ee   : > { %5986 = vst.msk [vmem:[#allocation4 + $0x100] sm:$0xff] %vm3869_vm14, %v5907_v20  ;;  %v6032_v20 = vld [vmem:[#allocation3 + $0x218] sm:$0xff] }
 0x8ef   : > { %v5909_v56 = vpop.permute.xlu1 %5908  ;;  %6471 = vrot.lane.b32.xlu0 %v12973_v27, %s9653_s23 }
 0x8f0   : > { %5987 = vst.msk [vmem:[#allocation4 + $0x110] sm:$0xff] %vm3869_vm14, %v5909_v56 }
 0x8f1   : > { %6473 = vrot.lane.b32.xlu1 %v6398_v46, %s9653_s23  ;;  %v5911_v29 = vpop.permute.xlu0 %5910  ;;  %v6033_v46 = vld [vmem:[#allocation3 + $0x228] sm:$0xff] }
 0x8f2   : > { %5988 = vst.msk [vmem:[#allocation4 + $0x120] sm:$0xff] %vm3869_vm14, %v5911_v29 }
 0x8f3   : > { %v5913_v17 = vpop.permute.xlu1 %5912  ;;  %6283 = vrot.lane.b32.xlu0 %v12664_v42, %s9644_s25 }
 0x8f4   : > { %5989 = vst.msk [vmem:[#allocation4 + $0x130] sm:$0xff] %vm3869_vm14, %v5913_v17  ;;  %v6034_v17 = vld [vmem:[#allocation3 + $0x230] sm:$0xff] }
 0x8f5   : > { %6285 = vrot.lane.b32.xlu1 %v12671_v55, %s9644_s25  ;;  %v5915_v44 = vpop.permute.xlu0 %5914  ;;  %v6400_v55 = vld [vmem:[#allocation3 + $0x160] sm:$0xff] }
 0x8f6   : > { %5990 = vst.msk [vmem:[#allocation4 + $0x140] sm:$0xff] %vm3869_vm14, %v5915_v44 }
 0x8f7   : > { %v5917_v27 = vpop.permute.xlu1 %5916  ;;  %6287 = vrot.lane.b32.xlu0 %v12680_v50, %s9644_s25 }
 0x8f8   : > { %5991 = vst.msk [vmem:[#allocation4 + $0x150] sm:$0xff] %vm3869_vm14, %v5917_v27 }
 0x8f9   : > { %6289 = vrot.lane.b32.xlu1 %v12689_v4, %s9644_s25  ;;  %v5919_v22 = vpop.permute.xlu0 %5918  ;;  %v6402_v4 = vld [vmem:[#allocation3 + $0x178] sm:$0xff] }
 0x8fa   : > { %5992 = vst.msk [vmem:[#allocation4 + $0x160] sm:$0xff] %vm3869_vm14, %v5919_v22 }
 0x8fb   : > { %v5921_v42 = vpop.permute.xlu1 %5920  ;;  %6475 = vrot.lane.b32.xlu0 %v12980_v43, %s9653_s23 }
 0x8fc   : > { %5993 = vst.msk [vmem:[#allocation4 + $0x170] sm:$0xff] %vm3869_vm14, %v5921_v42 }
 0x8fd   : > { %6477 = vrot.lane.b32.xlu1 %v6400_v55, %s9653_s23  ;;  %v5923_v53 = vpop.permute.xlu0 %5922  ;;  %v6223_v55 = vld [vmem:[#allocation3 + $0x214] sm:$0xff] }
 0x8fe   : > { %5994 = vst.msk [vmem:[#allocation4 + $0x180] sm:$0xff] %vm3869_vm14, %v5923_v53 }
 0x8ff   : > { %v5925_v50 = vpop.permute.xlu1 %5924  ;;  %6479 = vrot.lane.b32.xlu0 %v12987_v12, %s9653_s23 }
 0x900   : > { %5995 = vst.msk [vmem:[#allocation4 + $0x190] sm:$0xff] %vm3869_vm14, %v5925_v50  ;;  %v6224_v50 = vld [vmem:[#allocation3 + $0x21c] sm:$0xff] }
 0x901   : > { %6481 = vrot.lane.b32.xlu1 %v6402_v4, %s9653_s23  ;;  %v5927_v57 = vpop.permute.xlu0 %5926 }
 0x902   : > { %5996 = vst.msk [vmem:[#allocation4 + $0x1a0] sm:$0xff] %vm3869_vm14, %v5927_v57 }
 0x903   : > { %v5929_v43 = vpop.permute.xlu1 %5928  ;;  %6291 = vrot.lane.b32.xlu0 %v12792_v14, %s9644_s25  ;;  %v6403_v14 = vld [vmem:[#allocation3 + $0x188] sm:$0xff] }
 0x904   : > { %5997 = vst.msk [vmem:[#allocation4 + $0x1b0] sm:$0xff] %vm3869_vm14, %v5929_v43 }
 0x905   : > { %6293 = vrot.lane.b32.xlu1 %v12797_v48, %s9644_s25  ;;  %v5931_v31 = vpop.permute.xlu0 %5930 }
 0x906   : > { %5998 = vst.msk [vmem:[#allocation4 + $0x1c0] sm:$0xff] %vm3869_vm14, %v5931_v31 }
 0x907   : > { %v5933_v12 = vpop.permute.xlu1 %5932  ;;  %6295 = vrot.lane.b32.xlu0 %v12802_v0, %s9644_s25  ;;  %v6405_v0 = vld [vmem:[#allocation3 + $0x1a0] sm:$0xff] }
 0x908   : > { %5999 = vst.msk [vmem:[#allocation4 + $0x1d0] sm:$0xff] %vm3869_vm14, %v5933_v12  ;;  %v6225_v12 = vld [vmem:[#allocation3 + $0x22c] sm:$0xff] }
 0x909   : > { %6297 = vrot.lane.b32.xlu1 %v12807_v15, %s9644_s25  ;;  %v5935_v41 = vpop.permute.xlu0 %5934 }
 0x90a   : > { %6000 = vst.msk [vmem:[#allocation4 + $0x1e0] sm:$0xff] %vm3869_vm14, %v5935_v41 }
 0x90b   : > { %v5937_v34 = vpop.permute.xlu1 %5936  ;;  %6483 = vrot.lane.b32.xlu0 %v6403_v14, %s9653_s23  ;;  %v6226_v14 = vld [vmem:[#allocation3 + $0x234] sm:$0xff] }
 0x90c   : > { %6001 = vst.msk [vmem:[#allocation4 + $0x1f0] sm:$0xff] %vm3869_vm14, %v5937_v34 }
 0x90d   : > { %6485 = vrot.lane.b32.xlu1 %v12907_v47, %s9653_s23  ;;  %v6068_v48 = vpop.permute.xlu0 %6067  ;;  %v6024_v47 = vld [vmem:[#allocation3 + $0x1b8] sm:$0xff] }
 0x90e   : > { %6163 = vst.msk [vmem:[#allocation4] sm:$0xff] %vm4063_vm9, %v6068_v48 }
 0x90f   : > { %v6070_v35 = vpop.permute.xlu1 %6069  ;;  %6487 = vrot.lane.b32.xlu0 %v6405_v0, %s9653_s23  ;;  %v6416_v0 = vld [vmem:[#allocation3 + $0x220] sm:$0xff] }
 0x910   : > { %6164 = vst.msk [vmem:[#allocation4 + $0x10] sm:$0xff] %vm4063_vm9, %v6070_v35 }
 0x911   : > { %6489 = vrot.lane.b32.xlu1 %v12915_v54, %s9653_s23  ;;  %v6072_v15 = vpop.permute.xlu0 %6071  ;;  %v6026_v54 = vld [vmem:[#allocation3 + $0x1d0] sm:$0xff] }
 0x912   : > { %6165 = vst.msk [vmem:[#allocation4 + $0x20] sm:$0xff] %vm4063_vm9, %v6072_v15 }
 0x913   : > { %v6074_v38 = vpop.permute.xlu1 %6073  ;;  %6107 = vrot.lane.b32.xlu0 %v6023_v23, %s9649_s30  ;;  %v6418_v23 = vld [vmem:[#allocation3 + $0x238] sm:$0xff] }
 0x914   : > { %6166 = vst.msk [vmem:[#allocation4 + $0x30] sm:$0xff] %vm4063_vm9, %v6074_v38 }
 0x915   : > { %6109 = vrot.lane.b32.xlu1 %v6024_v47, %s9649_s30  ;;  %v6076_v7 = vpop.permute.xlu0 %6075 }
 0x916   : > { %6167 = vst.msk [vmem:[#allocation4 + $0x40] sm:$0xff] %vm4063_vm9, %v6076_v7 }
 0x917   : > { %v6078_v1 = vpop.permute.xlu1 %6077  ;;  %6111 = vrot.lane.b32.xlu0 %v6025_v13, %s9649_s30 }
 0x918   : > { %6168 = vst.msk [vmem:[#allocation4 + $0x50] sm:$0xff] %vm4063_vm9, %v6078_v1 }
 0x919   : > { %6113 = vrot.lane.b32.xlu1 %v6026_v54, %s9649_s30  ;;  %v6080_v58 = vpop.permute.xlu0 %6079 }
 0x91a   : > { %6169 = vst.msk [vmem:[#allocation4 + $0x60] sm:$0xff] %vm4063_vm9, %v6080_v58 }
 0x91b   : > { %v6082_v6 = vpop.permute.xlu1 %6081  ;;  %6299 = vrot.lane.b32.xlu0 %v12812_v3, %s9644_s25 }
 0x91c   : > { %6170 = vst.msk [vmem:[#allocation4 + $0x70] sm:$0xff] %vm4063_vm9, %v6082_v6 }
 0x91d   : > { %6301 = vrot.lane.b32.xlu1 %v12817_v39, %s9644_s25  ;;  %v6084_v33 = vpop.permute.xlu0 %6083 }
 0x91e   : > { %6171 = vst.msk [vmem:[#allocation4 + $0x80] sm:$0xff] %vm4063_vm9, %v6084_v33 }
 0x91f   : > { %v6086_v45 = vpop.permute.xlu1 %6085  ;;  %6303 = vrot.lane.b32.xlu0 %v12822_v40, %s9644_s25 }
 0x920   : > { %6172 = vst.msk [vmem:[#allocation4 + $0x90] sm:$0xff] %vm4063_vm9, %v6086_v45 }
 0x921   : > { %6305 = vrot.lane.b32.xlu1 %v12827_v5, %s9644_s25  ;;  %v6088_v10 = vpop.permute.xlu0 %6087  ;;  %v6027_v5 = vld [vmem:[#allocation3 + $0x1e0] sm:$0xff] }
 0x922   : > { %6173 = vst.msk [vmem:[#allocation4 + $0xa0] sm:$0xff] %vm4063_vm9, %v6088_v10 }
 0x923   : > { %v6090_v3 = vpop.permute.xlu1 %6089  ;;  %6491 = vrot.lane.b32.xlu0 %v6024_v47, %s9653_s23 }
 0x924   : > { %6174 = vst.msk [vmem:[#allocation4 + $0xb0] sm:$0xff] %vm4063_vm9, %v6090_v3 }
 0x925   : > { %6493 = vrot.lane.b32.xlu1 %v12923_v49, %s9653_s23  ;;  %v6092_v39 = vpop.permute.xlu0 %6091  ;;  %v6029_v49 = vld [vmem:[#allocation3 + $0x1f8] sm:$0xff] }
 0x926   : > { %6175 = vst.msk [vmem:[#allocation4 + $0xc0] sm:$0xff] %vm4063_vm9, %v6092_v39 }
 0x927   : > { %v6094_v40 = vpop.permute.xlu1 %6093  ;;  %6495 = vrot.lane.b32.xlu0 %v6026_v54, %s9653_s23 }
 0x928   : > { %6176 = vst.msk [vmem:[#allocation4 + $0xd0] sm:$0xff] %vm4063_vm9, %v6094_v40 }
 0x929   : > { %6497 = vrot.lane.b32.xlu1 %v12931_v63, %s9653_s23  ;;  %v6096_v59 = vpop.permute.xlu0 %6095  ;;  %v6219_v63 = vld [vmem:[#allocation3 + $0x1e4] sm:$0xff] }
 0x92a   : > { %6177 = vst.msk [vmem:[#allocation4 + $0xe0] sm:$0xff] %vm4063_vm9, %v6096_v59 }
 0x92b   : > { %v6098_v62 = vpop.permute.xlu1 %6097  ;;  %6115 = vrot.lane.b32.xlu0 %v6027_v5, %s9649_s30 }
 0x92c   : > { %6178 = vst.msk [vmem:[#allocation4 + $0xf0] sm:$0xff] %vm4063_vm9, %v6098_v62 }
 0x92d   : > { %6117 = vrot.lane.b32.xlu1 %v6028_v36, %s9649_s30  ;;  %v6100_v25 = vpop.permute.xlu0 %6099 }
 0x92e   : > { %6179 = vst.msk [vmem:[#allocation4 + $0x100] sm:$0xff] %vm4063_vm9, %v6100_v25 }
 0x92f   : > { %v6102_v52 = vpop.permute.xlu1 %6101  ;;  %6119 = vrot.lane.b32.xlu0 %v6029_v49, %s9649_s30 }
 0x930   : > { %6180 = vst.msk [vmem:[#allocation4 + $0x110] sm:$0xff] %vm4063_vm9, %v6102_v52 }
 0x931   : > { %6121 = vrot.lane.b32.xlu1 %v6030_v11, %s9649_s30  ;;  %v6104_v2 = vpop.permute.xlu0 %6103 }
 0x932   : > { %6181 = vst.msk [vmem:[#allocation4 + $0x120] sm:$0xff] %vm4063_vm9, %v6104_v2 }
 0x933   : > { %v6106_v24 = vpop.permute.xlu1 %6105  ;;  %6307 = vrot.lane.b32.xlu0 %v6219_v63, %s9644_s25 }
 0x934   : > { %6182 = vst.msk [vmem:[#allocation4 + $0x130] sm:$0xff] %vm4063_vm9, %v6106_v24 }
 0x935   : > { %6309 = vrot.lane.b32.xlu1 %v6220_v61, %s9644_s25  ;;  %v6260_v51 = vpop.permute.xlu0 %6259 }
 0x936   : > { %6355 = vst.msk [vmem:[#allocation4] sm:$0xff] %vm4256_vm8, %v6260_v51 }
 0x937   : > { %v6262_v60 = vpop.permute.xlu1 %6261  ;;  %6311 = vrot.lane.b32.xlu0 %v6221_v28, %s9644_s25 }
 0x938   : > { %6356 = vst.msk [vmem:[#allocation4 + $0x10] sm:$0xff] %vm4256_vm8, %v6262_v60 }
 0x939   : > { %6313 = vrot.lane.b32.xlu1 %v6222_v16, %s9644_s25  ;;  %v6264_v18 = vpop.permute.xlu0 %6263 }
 0x93a   : > { %6357 = vst.msk [vmem:[#allocation4 + $0x20] sm:$0xff] %vm4256_vm8, %v6264_v18 }
 0x93b   : > { %v6266_v19 = vpop.permute.xlu1 %6265  ;;  %6499 = vrot.lane.b32.xlu0 %v6028_v36, %s9653_s23 }
 0x93c   : > { %6358 = vst.msk [vmem:[#allocation4 + $0x30] sm:$0xff] %vm4256_vm8, %v6266_v19 }
 0x93d   : > { %6501 = vrot.lane.b32.xlu1 %v6412_v26, %s9653_s23  ;;  %v6452_v9 = vpop.permute.xlu0 %6451 }
 0x93e   : > { %6547 = vst.msk [vmem:[#allocation4] sm:$0xff] %vm4449_vm13, %v6452_v9 }
 0x93f   : > { %v6454_v32 = vpop.permute.xlu1 %6453  ;;  %6503 = vrot.lane.b32.xlu0 %v6030_v11, %s9653_s23 }
 0x940   : > { %6548 = vst.msk [vmem:[#allocation4 + $0x10] sm:$0xff] %vm4449_vm13, %v6454_v32 }
 0x941   : > { %6505 = vrot.lane.b32.xlu1 %v6414_v37, %s9653_s23  ;;  %v6456_v8 = vpop.permute.xlu0 %6455 }
 0x942   : > { %6549 = vst.msk [vmem:[#allocation4 + $0x20] sm:$0xff] %vm4449_vm13, %v6456_v8 }
 0x943   : > { %v6458_v56 = vpop.permute.xlu1 %6457  ;;  %6123 = vrot.lane.b32.xlu0 %v6031_v30, %s9649_s30 }
 0x944   : > { %6550 = vst.msk [vmem:[#allocation4 + $0x30] sm:$0xff] %vm4449_vm13, %v6458_v56 }
 0x945   : > { %6125 = vrot.lane.b32.xlu1 %v6032_v20, %s9649_s30  ;;  %v6268_v29 = vpop.permute.xlu0 %6267  ;;  %v6579_v27 = vld [vmem:[#allocation4] sm:$0xff] }
 0x946   : > { %6359 = vst.msk [vmem:[#allocation4 + $0x40] sm:$0xff] %vm4256_vm8, %v6268_v29 }
 0x947   : > { %v6270_v44 = vpop.permute.xlu1 %6269  ;;  %6127 = vrot.lane.b32.xlu0 %v6033_v46, %s9649_s30  ;;  %v6580_v22 = vld [vmem:[#allocation4 + $0x10] sm:$0xff] }
 0x948   : > { %6360 = vst.msk [vmem:[#allocation4 + $0x50] sm:$0xff] %vm4256_vm8, %v6270_v44  ;;  %v6611_v42 = vpack.c.bf16 %v6580_v22, %v6579_v27 }
 0x949   : > { %6129 = vrot.lane.b32.xlu1 %v6034_v17, %s9649_s30  ;;  %v6272_v53 = vpop.permute.xlu0 %6271  ;;  %v6581_v57 = vld [vmem:[#allocation4 + $0x20] sm:$0xff] }
 0x94a   : > { %6361 = vst.msk [vmem:[#allocation4 + $0x60] sm:$0xff] %vm4256_vm8, %v6272_v53  ;;  %9518 = vmatprep.mubr.msk.bf16.mxu0 %vm4573_vm11, %v6611_v42 }
 0x94b   : > { %v6274_v4 = vpop.permute.xlu1 %6273  ;;  %6315 = vrot.lane.b32.xlu0 %v6223_v55, %s9644_s25  ;;  %v6582_v43 = vld [vmem:[#allocation4 + $0x30] sm:$0xff] }
 0x94c   : > { %6362 = vst.msk [vmem:[#allocation4 + $0x70] sm:$0xff] %vm4256_vm8, %v6274_v4  ;;  %v6612_v31 = vpack.c.bf16 %v6582_v43, %v6581_v57 }
 0x94d   : > { %6317 = vrot.lane.b32.xlu1 %v6224_v50, %s9644_s25  ;;  %v6460_v41 = vpop.permute.xlu0 %6459 }
 0x94e   : > { %6551 = vst.msk [vmem:[#allocation4 + $0x40] sm:$0xff] %vm4449_vm13, %v6460_v41  ;;  %9519 = vmatmul.mubr.msk.bf16.vlgmr.msra.gmra.mrb[84].mxu0 %vm4573_vm11, %v6612_v31 }
 0x94f   : > { %v6462_v34 = vpop.permute.xlu1 %6461  ;;  %6319 = vrot.lane.b32.xlu0 %v6225_v12, %s9644_s25 }
 0x950   : > { %6552 = vst.msk [vmem:[#allocation4 + $0x50] sm:$0xff] %vm4449_vm13, %v6462_v34 }
 0x951   : > { %6321 = vrot.lane.b32.xlu1 %v6226_v14, %s9644_s25  ;;  %v6464_v48 = vpop.permute.xlu0 %6463 }
 0x952   : > { %6553 = vst.msk [vmem:[#allocation4 + $0x60] sm:$0xff] %vm4449_vm13, %v6464_v48 }
 0x953   : > { %v6466_v35 = vpop.permute.xlu1 %6465  ;;  %6507 = vrot.lane.b32.xlu0 %v6032_v20, %s9653_s23 }
 0x954   : > { %6554 = vst.msk [vmem:[#allocation4 + $0x70] sm:$0xff] %vm4449_vm13, %v6466_v35 }
 0x955   : > { %6509 = vrot.lane.b32.xlu1 %v6416_v0, %s9653_s23  ;;  %v6276_v15 = vpop.permute.xlu0 %6275  ;;  %v6583_v47 = vld [vmem:[#allocation4 + $0x40] sm:$0xff] }
 0x956   : > { %6363 = vst.msk [vmem:[#allocation4 + $0x80] sm:$0xff] %vm4256_vm8, %v6276_v15 }
 0x957   : > { %v6278_v38 = vpop.permute.xlu1 %6277  ;;  %6511 = vrot.lane.b32.xlu0 %v6034_v17, %s9653_s23  ;;  %v6584_v7 = vld [vmem:[#allocation4 + $0x50] sm:$0xff] }
 0x958   : > { %6364 = vst.msk [vmem:[#allocation4 + $0x90] sm:$0xff] %vm4256_vm8, %v6278_v38  ;;  %v6613_v13 = vpack.c.bf16 %v6584_v7, %v6583_v47 }
 0x959   : > { %6513 = vrot.lane.b32.xlu1 %v6418_v23, %s9653_s23  ;;  %v6280_v1 = vpop.permute.xlu0 %6279  ;;  %v6585_v58 = vld [vmem:[#allocation4 + $0x60] sm:$0xff] }
 0x95a   : > { %6365 = vst.msk [vmem:[#allocation4 + $0xa0] sm:$0xff] %vm4256_vm8, %v6280_v1  ;;  %9522 = vmatprep.mubr.msk.bf16.mxu1 %vm4573_vm11, %v6613_v13 }
 0x95b   : > { %v6282_v54 = vpop.permute.xlu1 %6281  ;;  %v6586_v6 = vld [vmem:[#allocation4 + $0x70] sm:$0xff] }
 0x95c   : > { %6366 = vst.msk [vmem:[#allocation4 + $0xb0] sm:$0xff] %vm4256_vm8, %v6282_v54  ;;  %v6614_v33 = vpack.c.bf16 %v6586_v6, %v6585_v58 }
 0x95d   : > { %v6468_v45 = vpop.permute.xlu0 %6467 }
 0x95e   : > { %6555 = vst.msk [vmem:[#allocation4 + $0x80] sm:$0xff] %vm4449_vm13, %v6468_v45  ;;  %9523 = vmatmul.mubr.msk.bf16.vlgmr.msra.gmra.mrb[12].mxu1 %vm4573_vm11, %v6614_v33 }
 0x95f   : > { %v6470_v10 = vpop.permute.xlu1 %6469 }
 0x960   : > { %6556 = vst.msk [vmem:[#allocation4 + $0x90] sm:$0xff] %vm4449_vm13, %v6470_v10 }
 0x961   : > { %v6472_v3 = vpop.permute.xlu0 %6471 }
 0x962   : > { %6557 = vst.msk [vmem:[#allocation4 + $0xa0] sm:$0xff] %vm4449_vm13, %v6472_v3 }
 0x963   : > { %v6474_v39 = vpop.permute.xlu1 %6473 }
 0x964   : > { %6558 = vst.msk [vmem:[#allocation4 + $0xb0] sm:$0xff] %vm4449_vm13, %v6474_v39 }
 0x965   : > { %v6284_v40 = vpop.permute.xlu0 %6283  ;;  %v6587_v59 = vld [vmem:[#allocation4 + $0x80] sm:$0xff] }
 0x966   : > { %6367 = vst.msk [vmem:[#allocation4 + $0xc0] sm:$0xff] %vm4256_vm8, %v6284_v40 }
 0x967   : > { %v6286_v5 = vpop.permute.xlu1 %6285  ;;  %v6588_v36 = vld [vmem:[#allocation4 + $0x90] sm:$0xff] }
 0x968   : > { %6368 = vst.msk [vmem:[#allocation4 + $0xd0] sm:$0xff] %vm4256_vm8, %v6286_v5  ;;  %v6615_v62 = vpack.c.bf16 %v6588_v36, %v6587_v59 }
 0x969   : > { %v6288_v49 = vpop.permute.xlu0 %6287  ;;  %v6589_v11 = vld [vmem:[#allocation4 + $0xa0] sm:$0xff] }
 0x96a   : > { %6369 = vst.msk [vmem:[#allocation4 + $0xe0] sm:$0xff] %vm4256_vm8, %v6288_v49  ;;  %9526 = vmatprep.mubr.msk.bf16.mxu1 %vm4573_vm11, %v6615_v62 }
 0x96b   : > { %v6290_v25 = vpop.permute.xlu1 %6289  ;;  %v6590_v52 = vld [vmem:[#allocation4 + $0xb0] sm:$0xff] }
 0x96c   : > { %6370 = vst.msk [vmem:[#allocation4 + $0xf0] sm:$0xff] %vm4256_vm8, %v6290_v25  ;;  %v6616_v63 = vpack.c.bf16 %v6590_v52, %v6589_v11 }
 0x96d   : > { %v6476_v2 = vpop.permute.xlu0 %6475 }
 0x96e   : > { %6559 = vst.msk [vmem:[#allocation4 + $0xc0] sm:$0xff] %vm4449_vm13, %v6476_v2  ;;  %9527 = vmatmul.mubr.msk.bf16.gmra.mrb[16].mxu1 %vm4573_vm11, %v6616_v63 }
 0x96f   : > { %v6478_v61 = vpop.permute.xlu1 %6477 }
 0x970   : > { %6560 = vst.msk [vmem:[#allocation4 + $0xd0] sm:$0xff] %vm4449_vm13, %v6478_v61 }
 0x971   : > { %v6480_v24 = vpop.permute.xlu0 %6479 }
 0x972   : > { %6561 = vst.msk [vmem:[#allocation4 + $0xe0] sm:$0xff] %vm4449_vm13, %v6480_v24 }
 0x973   : > { %v6482_v28 = vpop.permute.xlu1 %6481 }
 0x974   : > { %6562 = vst.msk [vmem:[#allocation4 + $0xf0] sm:$0xff] %vm4449_vm13, %v6482_v28 }
 0x975   : > { %v6292_v51 = vpop.permute.xlu0 %6291  ;;  %v6591_v60 = vld [vmem:[#allocation4 + $0xc0] sm:$0xff] }
 0x976   : > { %6371 = vst.msk [vmem:[#allocation4 + $0x100] sm:$0xff] %vm4256_vm8, %v6292_v51 }
 0x977   : > { %v6294_v16 = vpop.permute.xlu1 %6293  ;;  %v6592_v18 = vld [vmem:[#allocation4 + $0xd0] sm:$0xff] }
 0x978   : > { %6372 = vst.msk [vmem:[#allocation4 + $0x110] sm:$0xff] %vm4256_vm8, %v6294_v16  ;;  %v6617_v26 = vpack.c.bf16 %v6592_v18, %v6591_v60 }
 0x979   : > { %v6296_v19 = vpop.permute.xlu0 %6295  ;;  %v6593_v37 = vld [vmem:[#allocation4 + $0xe0] sm:$0xff] }
 0x97a   : > { %6373 = vst.msk [vmem:[#allocation4 + $0x120] sm:$0xff] %vm4256_vm8, %v6296_v19  ;;  %9530 = vmatprep.mubr.msk.bf16.mxu1 %vm4573_vm11, %v6617_v26 }
 0x97b   : > { %v6298_v9 = vpop.permute.xlu1 %6297  ;;  %v6594_v32 = vld [vmem:[#allocation4 + $0xf0] sm:$0xff] }
 0x97c   : > { %6374 = vst.msk [vmem:[#allocation4 + $0x130] sm:$0xff] %vm4256_vm8, %v6298_v9  ;;  %v6618_v30 = vpack.c.bf16 %v6594_v32, %v6593_v37 }
 0x97d   : > { %v6484_v8 = vpop.permute.xlu0 %6483 }
 0x97e   : > { %6563 = vst.msk [vmem:[#allocation4 + $0x100] sm:$0xff] %vm4449_vm13, %v6484_v8  ;;  %9531 = vmatmul.mubr.msk.bf16.gmra.mrb[20].mxu1 %vm4573_vm11, %v6618_v30 }
 0x97f   : > { %v6486_v20 = vpop.permute.xlu1 %6485 }
 0x980   : > { %6564 = vst.msk [vmem:[#allocation4 + $0x110] sm:$0xff] %vm4449_vm13, %v6486_v20  ;;  %v13287_v20 = vld [vmem:[%s14362_s7] ss:$0 sm:$0xff] }
 0x981   : > { %v6488_v56 = vpop.permute.xlu0 %6487 }
 0x982   : > { %6565 = vst.msk [vmem:[#allocation4 + $0x120] sm:$0xff] %vm4449_vm13, %v6488_v56 }
 0x983   : > { %v6490_v46 = vpop.permute.xlu1 %6489 }
 0x984   : > { %6566 = vst.msk [vmem:[#allocation4 + $0x130] sm:$0xff] %vm4449_vm13, %v6490_v46 }
 0x985   : > { %v6108_v29 = vpop.permute.xlu0 %6107  ;;  %v6595_v44 = vld [vmem:[#allocation4 + $0x100] sm:$0xff] }
 0x986   : > { %6183 = vst.msk [vmem:[#allocation4 + $0x140] sm:$0xff] %vm4063_vm9, %v6108_v29 }
 0x987   : > { %v6110_v17 = vpop.permute.xlu1 %6109  ;;  %v6596_v27 = vld [vmem:[#allocation4 + $0x110] sm:$0xff] }
 0x988   : > { %6184 = vst.msk [vmem:[#allocation4 + $0x150] sm:$0xff] %vm4063_vm9, %v6110_v17  ;;  %v6619_v22 = vpack.c.bf16 %v6596_v27, %v6595_v44 }
 0x989   : > { %v6112_v42 = vpop.permute.xlu0 %6111  ;;  %v6597_v53 = vld [vmem:[#allocation4 + $0x120] sm:$0xff] }
 0x98a   : > { %6185 = vst.msk [vmem:[#allocation4 + $0x160] sm:$0xff] %vm4063_vm9, %v6112_v42  ;;  %9534 = vmatprep.mubr.msk.bf16.mxu1 %vm4573_vm11, %v6619_v22 }
 0x98b   : > { %v6114_v55 = vpop.permute.xlu1 %6113  ;;  %v6598_v50 = vld [vmem:[#allocation4 + $0x130] sm:$0xff] }
 0x98c   : > { %6186 = vst.msk [vmem:[#allocation4 + $0x170] sm:$0xff] %vm4063_vm9, %v6114_v55  ;;  %v6620_v4 = vpack.c.bf16 %v6598_v50, %v6597_v53 }
 0x98d   : > { %v6300_v57 = vpop.permute.xlu0 %6299 }
 0x98e   : > { %6375 = vst.msk [vmem:[#allocation4 + $0x140] sm:$0xff] %vm4256_vm8, %v6300_v57  ;;  %9535 = vmatmul.mubr.msk.bf16.gmra.mrb[24].mxu1 %vm4573_vm11, %v6620_v4 }
 0x98f   : > { %v6302_v43 = vpop.permute.xlu1 %6301 }
 0x990   : > { %6376 = vst.msk [vmem:[#allocation4 + $0x150] sm:$0xff] %vm4256_vm8, %v6302_v43 }
 0x991   : > { %v6304_v31 = vpop.permute.xlu0 %6303 }
 0x992   : > { %6377 = vst.msk [vmem:[#allocation4 + $0x160] sm:$0xff] %vm4256_vm8, %v6304_v31 }
 0x993   : > { %v6306_v12 = vpop.permute.xlu1 %6305 }
 0x994   : > { %6378 = vst.msk [vmem:[#allocation4 + $0x170] sm:$0xff] %vm4256_vm8, %v6306_v12 }
 0x995   : > { %v6492_v41 = vpop.permute.xlu0 %6491 }
 0x996   : > { %6567 = vst.msk [vmem:[#allocation4 + $0x140] sm:$0xff] %vm4449_vm13, %v6492_v41 }
 0x997   : > { %v6494_v14 = vpop.permute.xlu1 %6493 }
 0x998   : > { %6568 = vst.msk [vmem:[#allocation4 + $0x150] sm:$0xff] %vm4449_vm13, %v6494_v14 }
 0x999   : > { %v6496_v34 = vpop.permute.xlu0 %6495 }
 0x99a   : > { %6569 = vst.msk [vmem:[#allocation4 + $0x160] sm:$0xff] %vm4449_vm13, %v6496_v34 }
 0x99b   : > { %v6498_v48 = vpop.permute.xlu1 %6497 }
 0x99c   : > { %6570 = vst.msk [vmem:[#allocation4 + $0x170] sm:$0xff] %vm4449_vm13, %v6498_v48 }
 0x99d   : > { %v6116_v0 = vpop.permute.xlu0 %6115  ;;  %v6599_v15 = vld [vmem:[#allocation4 + $0x140] sm:$0xff] }
 0x99e   : > { %6187 = vst.msk [vmem:[#allocation4 + $0x180] sm:$0xff] %vm4063_vm9, %v6116_v0 }
 0x99f   : > { %v6118_v35 = vpop.permute.xlu1 %6117  ;;  %v6600_v23 = vld [vmem:[#allocation4 + $0x150] sm:$0xff] }
 0x9a0   : > { %6188 = vst.msk [vmem:[#allocation4 + $0x190] sm:$0xff] %vm4063_vm9, %v6118_v35  ;;  %v6621_v38 = vpack.c.bf16 %v6600_v23, %v6599_v15 }
 0x9a1   : > { %v6120_v47 = vpop.permute.xlu0 %6119  ;;  %v6601_v13 = vld [vmem:[#allocation4 + $0x160] sm:$0xff] }
 0x9a2   : > { %9538 = vmatprep.mubr.msk.bf16.mxu1 %vm4573_vm11, %v6621_v38  ;;  %6189 = vst.msk [vmem:[#allocation4 + $0x1a0] sm:$0xff] %vm4063_vm9, %v6120_v47 }
 0x9a3   : > { %v6122_v7 = vpop.permute.xlu1 %6121  ;;  %v6602_v1 = vld [vmem:[#allocation4 + $0x170] sm:$0xff] }
 0x9a4   : > { %6190 = vst.msk [vmem:[#allocation4 + $0x1b0] sm:$0xff] %vm4063_vm9, %v6122_v7  ;;  %v6622_v54 = vpack.c.bf16 %v6602_v1, %v6601_v13 }
 0x9a5   : > { %v6308_v58 = vpop.permute.xlu0 %6307 }
 0x9a6   : > { %9539 = vmatmul.mubr.msk.bf16.gmra.mrb[28].mxu1 %vm4573_vm11, %v6622_v54  ;;  %6379 = vst.msk [vmem:[#allocation4 + $0x180] sm:$0xff] %vm4256_vm8, %v6308_v58 }
 0x9a7   : > { %v6310_v6 = vpop.permute.xlu1 %6309 }
 0x9a8   : > { %6380 = vst.msk [vmem:[#allocation4 + $0x190] sm:$0xff] %vm4256_vm8, %v6310_v6 }
 0x9a9   : > { %v6312_v33 = vpop.permute.xlu0 %6311 }
 0x9aa   : > { %6381 = vst.msk [vmem:[#allocation4 + $0x1a0] sm:$0xff] %vm4256_vm8, %v6312_v33 }
 0x9ab   : > { %v6314_v45 = vpop.permute.xlu1 %6313 }
 0x9ac   : > { %6382 = vst.msk [vmem:[#allocation4 + $0x1b0] sm:$0xff] %vm4256_vm8, %v6314_v45 }
 0x9ad   : > { %v6500_v10 = vpop.permute.xlu0 %6499 }
 0x9ae   : > { %6571 = vst.msk [vmem:[#allocation4 + $0x180] sm:$0xff] %vm4449_vm13, %v6500_v10 }
 0x9af   : > { %v6502_v3 = vpop.permute.xlu1 %6501 }
 0x9b0   : > { %6572 = vst.msk [vmem:[#allocation4 + $0x190] sm:$0xff] %vm4449_vm13, %v6502_v3 }
 0x9b1   : > { %v6504_v39 = vpop.permute.xlu0 %6503 }
 0x9b2   : > { %6573 = vst.msk [vmem:[#allocation4 + $0x1a0] sm:$0xff] %vm4449_vm13, %v6504_v39 }
 0x9b3   : > { %v6506_v40 = vpop.permute.xlu1 %6505 }
 0x9b4   : > { %6574 = vst.msk [vmem:[#allocation4 + $0x1b0] sm:$0xff] %vm4449_vm13, %v6506_v40 }
 0x9b5   : > { %v6124_v5 = vpop.permute.xlu0 %6123  ;;  %v6603_v59 = vld [vmem:[#allocation4 + $0x180] sm:$0xff] }
 0x9b6   : > { %6191 = vst.msk [vmem:[#allocation4 + $0x1c0] sm:$0xff] %vm4063_vm9, %v6124_v5 }
 0x9b7   : > { %v6126_v36 = vpop.permute.xlu1 %6125  ;;  %v6604_v62 = vld [vmem:[#allocation4 + $0x190] sm:$0xff] }
 0x9b8   : > { %6192 = vst.msk [vmem:[#allocation4 + $0x1d0] sm:$0xff] %vm4063_vm9, %v6126_v36  ;;  %v6623_v49 = vpack.c.bf16 %v6604_v62, %v6603_v59 }
 0x9b9   : > { %v6128_v25 = vpop.permute.xlu0 %6127  ;;  %v6605_v11 = vld [vmem:[#allocation4 + $0x1a0] sm:$0xff] }
 0x9ba   : > { %9542 = vmatprep.mubr.msk.bf16.mxu1 %vm4573_vm11, %v6623_v49  ;;  %6193 = vst.msk [vmem:[#allocation4 + $0x1e0] sm:$0xff] %vm4063_vm9, %v6128_v25 }
 0x9bb   : > { %v6130_v52 = vpop.permute.xlu1 %6129  ;;  %v6606_v63 = vld [vmem:[#allocation4 + $0x1b0] sm:$0xff] }
 0x9bc   : > { %6194 = vst.msk [vmem:[#allocation4 + $0x1f0] sm:$0xff] %vm4063_vm9, %v6130_v52  ;;  %v6624_v2 = vpack.c.bf16 %v6606_v63, %v6605_v11  ;;  %vm14546_vm9 = vcmask 1048512  }
 0x9bd   : > { %v6316_v61 = vpop.permute.xlu0 %6315 }
 0x9be   : > { %9543 = vmatmul.mubr.msk.bf16.gmra.mrb[32].mxu1 %vm4573_vm11, %v6624_v2  ;;  %6383 = vst.msk [vmem:[#allocation4 + $0x1c0] sm:$0xff] %vm4256_vm8, %v6316_v61 }
 0x9bf   : > { %v6318_v24 = vpop.permute.xlu1 %6317 }
 0x9c0   : > { %6384 = vst.msk [vmem:[#allocation4 + $0x1d0] sm:$0xff] %vm4256_vm8, %v6318_v24 }
 0x9c1   : > { %v6320_v28 = vpop.permute.xlu0 %6319 }
 0x9c2   : > { %6385 = vst.msk [vmem:[#allocation4 + $0x1e0] sm:$0xff] %vm4256_vm8, %v6320_v28 }
 0x9c3   : > { %v6322_v51 = vpop.permute.xlu1 %6321 }
 0x9c4   : > { %6386 = vst.msk [vmem:[#allocation4 + $0x1f0] sm:$0xff] %vm4256_vm8, %v6322_v51  ;;  %vm14545_vm8 = vcmask 982784  }
 0x9c5   : > { %v6508_v16 = vpop.permute.xlu0 %6507 }
 0x9c6   : > { %6575 = vst.msk [vmem:[#allocation4 + $0x1c0] sm:$0xff] %vm4449_vm13, %v6508_v16 }
 0x9c7   : > { %v6510_v60 = vpop.permute.xlu1 %6509 }
 0x9c8   : > { %6576 = vst.msk [vmem:[#allocation4 + $0x1d0] sm:$0xff] %vm4449_vm13, %v6510_v60 }
 0x9c9   : > { %v6512_v18 = vpop.permute.xlu0 %6511 }
 0x9ca   : > { %6577 = vst.msk [vmem:[#allocation4 + $0x1e0] sm:$0xff] %vm4449_vm13, %v6512_v18 }
 0x9cb   : > { %v6514_v26 = vpop.permute.xlu1 %6513 }
 0x9cc   : > { %6578 = vst.msk [vmem:[#allocation4 + $0x1f0] sm:$0xff] %vm4449_vm13, %v6514_v26  ;;  %vm14549_vm13 = vcmask 720384  }
 0x9cd   : > { %v6607_v19 = vld [vmem:[#allocation4 + $0x1c0] sm:$0xff]  ;;  %vm14550_vm14 = vmmov %vm14549_vm13 }
 0x9cf   : > { %v6608_v9 = vld [vmem:[#allocation4 + $0x1d0] sm:$0xff] }
 0x9d0   : > { %v6625_v37 = vpack.c.bf16 %v6608_v9, %v6607_v19 }
 0x9d1   : > { %v6609_v32 = vld [vmem:[#allocation4 + $0x1e0] sm:$0xff] }
 0x9d2   : > { %9546 = vmatprep.mubr.msk.bf16.mxu1 %vm4573_vm11, %v6625_v37 }
 0x9d3   : > { %v6610_v30 = vld [vmem:[#allocation4 + $0x1f0] sm:$0xff] }
 0x9d4   : > { %v6626_v8 = vpack.c.bf16 %v6610_v30, %v6609_v32 }
 0x9d6   : > { %9547 = vmatmul.mubr.msk.bf16.gmra.mrb[36].mxu1 %vm4573_vm11, %v6626_v8  ;;  %vm14547_vm11 = vmmov %vm14545_vm8 }
 0xa21   : > { %v9520_v56 = vpop.f32.mrb[84].mxu0 }
 0xa22   : > { %v6755_v46 = vpop.f32.mrb[85].mxu0  ;;  %v6764_v27 = vadd.f32 %v9520_v56, %v13287_v20 }
 0xa23   : > { %v6756_v29 = vadd.f32 %v13287_v20, %v6755_v46  ;;  %v9521_v17 = vpop.f32.mrb[86].mxu0 }
 0xa24   : > { %v6758_v44 = vpop.f32.mrb[87].mxu0  ;;  %v6767_v55 = vadd.f32 %v9521_v17, %v13287_v20  ;;  %v6884_v50 = vmax.f32 %v6764_v27, 0.0 }
 0xa25   : > { %v6882_v22 = vmax.f32 %v6756_v29, 0.0  ;;  %v6759_v42 = vadd.f32 %v13287_v20, %v6758_v44 }
 0xa26   : > { %v6885_v4 = vmax.f32 %v6767_v55, 0.0 }
 0xa27   : > { %v6883_v53 = vmax.f32 %v6759_v42, 0.0  ;;  %6946 = vrot.lane.b32.xlu0 %v6882_v22, %s9648_s29 }
 0xa29   : > { %6948 = vrot.lane.b32.xlu1 %v6883_v53, %s9648_s29 }
 0xa2b   : > { %6950 = vrot.lane.b32.xlu0 %v6884_v50, %s9648_s29 }
 0xa2d   : > { %6952 = vrot.lane.b32.xlu1 %v6885_v4, %s9648_s29 }
 0xa31   : > { %v9524_v57 = vpop.f32.mrb[12].mxu1 }
 0xa32   : > { %v6771_v43 = vpop.f32.mrb[13].mxu1  ;;  %v6780_v14 = vadd.f32 %v9524_v57, %v13287_v20 }
 0xa33   : > { %v6772_v31 = vadd.f32 %v13287_v20, %v6771_v43  ;;  %v9525_v12 = vpop.f32.mrb[14].mxu1 }
 0xa34   : > { %v6774_v41 = vpop.f32.mrb[15].mxu1  ;;  %v6783_v0 = vadd.f32 %v9525_v12, %v13287_v20  ;;  %v6888_v15 = vmax.f32 %v6780_v14, 0.0 }
 0xa35   : > { %v6886_v34 = vmax.f32 %v6772_v31, 0.0  ;;  %v6775_v48 = vadd.f32 %v13287_v20, %v6774_v41 }
 0xa36   : > { %v6889_v23 = vmax.f32 %v6783_v0, 0.0 }
 0xa37   : > { %v6887_v35 = vmax.f32 %v6775_v48, 0.0  ;;  %6954 = vrot.lane.b32.xlu0 %v6886_v34, %s9648_s29 }
 0xa39   : > { %6956 = vrot.lane.b32.xlu1 %v6887_v35, %s9648_s29 }
 0xa3b   : > { %6958 = vrot.lane.b32.xlu0 %v6888_v15, %s9648_s29 }
 0xa3d   : > { %6960 = vrot.lane.b32.xlu1 %v6889_v23, %s9648_s29 }
 0xa41   : > { %v9528_v38 = vpop.f32.mrb[16].mxu1 }
 0xa42   : > { %v6787_v47 = vpop.f32.mrb[17].mxu1  ;;  %v6796_v54 = vadd.f32 %v9528_v38, %v13287_v20 }
 0xa43   : > { %v6788_v7 = vadd.f32 %v13287_v20, %v6787_v47  ;;  %v9529_v13 = vpop.f32.mrb[18].mxu1 }
 0xa44   : > { %v6790_v1 = vpop.f32.mrb[19].mxu1  ;;  %v6799_v33 = vadd.f32 %v9529_v13, %v13287_v20  ;;  %v6892_v10 = vmax.f32 %v6796_v54, 0.0 }
 0xa45   : > { %v6890_v58 = vmax.f32 %v6788_v7, 0.0  ;;  %v6791_v6 = vadd.f32 %v13287_v20, %v6790_v1 }
 0xa46   : > { %v6893_v3 = vmax.f32 %v6799_v33, 0.0 }
 0xa47   : > { %v6891_v45 = vmax.f32 %v6791_v6, 0.0  ;;  %6962 = vrot.lane.b32.xlu0 %v6890_v58, %s9648_s29  ;;  %v7075_v58 = vld [vmem:[#allocation3 + $0x4b] sm:$0xff] }
 0xa48   : > { %7107 = vst.msk [vmem:[#allocation4] sm:$0xff] %vm381_vm0, %v7075_v58 }
 0xa49   : > { %6964 = vrot.lane.b32.xlu1 %v6891_v45, %s9648_s29 }
 0xa4b   : > { %6966 = vrot.lane.b32.xlu0 %v6892_v10, %s9648_s29  ;;  %v7076_v10 = vld [vmem:[#allocation3 + $0x53] sm:$0xff] }
 0xa4c   : > { %7108 = vst.msk [vmem:[#allocation4 + $0x10] sm:$0xff] %vm381_vm0, %v7076_v10 }
 0xa4d   : > { %6968 = vrot.lane.b32.xlu1 %v6893_v3, %s9648_s29 }
 0xa51   : > { %v9532_v39 = vpop.f32.mrb[20].mxu1 }
 0xa52   : > { %v6803_v40 = vpop.f32.mrb[21].mxu1  ;;  %v6812_v62 = vadd.f32 %v9532_v39, %v13287_v20 }
 0xa53   : > { %v6804_v5 = vadd.f32 %v13287_v20, %v6803_v40  ;;  %v9533_v59 = vpop.f32.mrb[22].mxu1 }
 0xa54   : > { %v6806_v36 = vpop.f32.mrb[23].mxu1  ;;  %v6815_v11 = vadd.f32 %v9533_v59, %v13287_v20  ;;  %v6896_v63 = vmax.f32 %v6812_v62, 0.0 }
 0xa55   : > { %v6894_v49 = vmax.f32 %v6804_v5, 0.0  ;;  %v6807_v25 = vadd.f32 %v13287_v20, %v6806_v36 }
 0xa56   : > { %v6897_v2 = vmax.f32 %v6815_v11, 0.0 }
 0xa57   : > { %v6895_v52 = vmax.f32 %v6807_v25, 0.0  ;;  %6970 = vrot.lane.b32.xlu0 %v6894_v49, %s9648_s29 }
 0xa59   : > { %6972 = vrot.lane.b32.xlu1 %v6895_v52, %s9648_s29 }
 0xa5b   : > { %6974 = vrot.lane.b32.xlu0 %v6896_v63, %s9648_s29 }
 0xa5d   : > { %6976 = vrot.lane.b32.xlu1 %v6897_v2, %s9648_s29 }
 0xa61   : > { %v9536_v61 = vpop.f32.mrb[24].mxu1 }
 0xa62   : > { %v6819_v24 = vpop.f32.mrb[25].mxu1  ;;  %v6828_v60 = vadd.f32 %v9536_v61, %v13287_v20 }
 0xa63   : > { %v6820_v28 = vadd.f32 %v13287_v20, %v6819_v24  ;;  %v9537_v51 = vpop.f32.mrb[26].mxu1 }
 0xa64   : > { %v6822_v16 = vpop.f32.mrb[27].mxu1  ;;  %v6831_v19 = vadd.f32 %v9537_v51, %v13287_v20  ;;  %v6900_v37 = vmax.f32 %v6828_v60, 0.0  ;;  %v7140_v51 = vld [vmem:[#allocation3 + $0x54] sm:$0xff] }
 0xa65   : > { %v6898_v18 = vmax.f32 %v6820_v28, 0.0  ;;  %v6823_v26 = vadd.f32 %v13287_v20, %v6822_v16 }
 0xa66   : > { %v6901_v32 = vmax.f32 %v6831_v19, 0.0 }
 0xa67   : > { %v6899_v9 = vmax.f32 %v6823_v26, 0.0  ;;  %6978 = vrot.lane.b32.xlu0 %v6898_v18, %s9648_s29 }
 0xa69   : > { %6980 = vrot.lane.b32.xlu1 %v6899_v9, %s9648_s29 }
 0xa6b   : > { %6982 = vrot.lane.b32.xlu0 %v6900_v37, %s9648_s29 }
 0xa6d   : > { %6984 = vrot.lane.b32.xlu1 %v6901_v32, %s9648_s29 }
 0xa79   : > { %v9540_v30 = vpop.f32.mrb[28].mxu1 }
 0xa7a   : > { %v6835_v8 = vpop.f32.mrb[29].mxu1  ;;  %v6844_v17 = vadd.f32 %v9540_v30, %v13287_v20 }
 0xa7b   : > { %v6836_v56 = vadd.f32 %v13287_v20, %v6835_v8  ;;  %v9541_v46 = vpop.f32.mrb[30].mxu1 }
 0xa7c   : > { %v6838_v29 = vpop.f32.mrb[31].mxu1  ;;  %v6847_v22 = vadd.f32 %v9541_v46, %v13287_v20  ;;  %v6904_v55 = vmax.f32 %v6844_v17, 0.0 }
 0xa7d   : > { %v6902_v44 = vmax.f32 %v6836_v56, 0.0  ;;  %v6839_v27 = vadd.f32 %v13287_v20, %v6838_v29 }
 0xa7e   : > { %v6905_v53 = vmax.f32 %v6847_v22, 0.0 }
 0xa7f   : > { %v6903_v42 = vmax.f32 %v6839_v27, 0.0  ;;  %6986 = vrot.lane.b32.xlu0 %v6902_v44, %s9648_s29 }
 0xa81   : > { %6988 = vrot.lane.b32.xlu1 %v6903_v42, %s9648_s29 }
 0xa83   : > { %6990 = vrot.lane.b32.xlu0 %v6904_v55, %s9648_s29 }
 0xa85   : > { %6992 = vrot.lane.b32.xlu1 %v6905_v53, %s9648_s29 }
 0xa91   : > { %v9544_v50 = vpop.f32.mrb[32].mxu1 }
 0xa92   : > { %v6851_v4 = vpop.f32.mrb[33].mxu1  ;;  %v6860_v12 = vadd.f32 %v9544_v50, %v13287_v20 }
 0xa93   : > { %v6852_v57 = vadd.f32 %v13287_v20, %v6851_v4  ;;  %v9545_v43 = vpop.f32.mrb[34].mxu1 }
 0xa94   : > { %v6854_v31 = vpop.f32.mrb[35].mxu1  ;;  %v6863_v34 = vadd.f32 %v9545_v43, %v13287_v20  ;;  %v6908_v0 = vmax.f32 %v6860_v12, 0.0 }
 0xa95   : > { %v6906_v41 = vmax.f32 %v6852_v57, 0.0  ;;  %v6855_v14 = vadd.f32 %v13287_v20, %v6854_v31 }
 0xa96   : > { %v6909_v15 = vmax.f32 %v6863_v34, 0.0 }
 0xa97   : > { %v6907_v48 = vmax.f32 %v6855_v14, 0.0  ;;  %6994 = vrot.lane.b32.xlu0 %v6906_v41, %s9648_s29 }
 0xa99   : > { %6996 = vrot.lane.b32.xlu1 %v6907_v48, %s9648_s29  ;;  %v6947_v35 = vpop.permute.xlu0 %6946 }
 0xa9a   : > { %7042 = vst.msk [vmem:[#allocation3 + $0x64] sm:$0xff] %vm3290_vm4, %v6947_v35 }
 0xa9b   : > { %v6949_v23 = vpop.permute.xlu1 %6948  ;;  %6998 = vrot.lane.b32.xlu0 %v6908_v0, %s9648_s29 }
 0xa9c   : > { %7043 = vst.msk [vmem:[#allocation3 + $0x6c] sm:$0xff] %vm3290_vm4, %v6949_v23 }
 0xa9d   : > { %7000 = vrot.lane.b32.xlu1 %v6909_v15, %s9648_s29  ;;  %v6951_v38 = vpop.permute.xlu0 %6950 }
 0xa9e   : > { %7044 = vst.msk [vmem:[#allocation3 + $0x7c] sm:$0xff] %vm3290_vm4, %v6951_v38 }
 0xa9f   : > { %v6953_v47 = vpop.permute.xlu1 %6952 }
 0xaa0   : > { %7045 = vst.msk [vmem:[#allocation3 + $0x84] sm:$0xff] %vm3290_vm4, %v6953_v47 }
 0xaa1   : > { %v13349_v7 = vld [vmem:[#allocation3 + $0x63] sm:$0xff] }
 0xaa2   : > { %7109 = vst.msk [vmem:[#allocation4 + $0x20] sm:$0xff] %vm381_vm0, %v13349_v7  ;;  %v13398_v18 = vld [vmem:[#allocation3 + $0x64] sm:$0xff] }
 0xaa3   : > { %v13353_v13 = vld [vmem:[#allocation3 + $0x6b] sm:$0xff] }
 0xaa4   : > { %7110 = vst.msk [vmem:[#allocation4 + $0x30] sm:$0xff] %vm381_vm0, %v13353_v13  ;;  %v13403_v19 = vld [vmem:[#allocation3 + $0x6c] sm:$0xff] }
 0xaa5   : > { %v13357_v1 = vld [vmem:[#allocation3 + $0x7b] sm:$0xff] }
 0xaa6   : > { %7111 = vst.msk [vmem:[#allocation4 + $0x40] sm:$0xff] %vm381_vm0, %v13357_v1  ;;  %v13408_v37 = vld [vmem:[#allocation3 + $0x7c] sm:$0xff] }
 0xaa7   : > { %v13361_v54 = vld [vmem:[#allocation3 + $0x83] sm:$0xff] }
 0xaa8   : > { %7112 = vst.msk [vmem:[#allocation4 + $0x50] sm:$0xff] %vm381_vm0, %v13361_v54  ;;  %v13413_v30 = vld [vmem:[#allocation3 + $0x84] sm:$0xff] }
 0xaa9   : > { %v9548_v6 = vpop.f32.mrb[36].mxu1  ;;  %v6955_v33 = vpop.permute.xlu0 %6954 }
 0xaaa   : > { %7046 = vst.msk [vmem:[#allocation3 + $0x94] sm:$0xff] %vm3290_vm4, %v6955_v33  ;;  %v6867_v45 = vpop.f32.mrb[37].mxu1  ;;  %v6876_v59 = vadd.f32 %v9548_v6, %v13287_v20 }
 0xaab   : > { %v6868_v3 = vadd.f32 %v13287_v20, %v6867_v45  ;;  %v6957_v39 = vpop.permute.xlu1 %6956  ;;  %v9549_v40 = vpop.f32.mrb[38].mxu1 }
 0xaac   : > { %7047 = vst.msk [vmem:[#allocation3 + $0x9c] sm:$0xff] %vm3290_vm4, %v6957_v39  ;;  %v6870_v5 = vpop.f32.mrb[39].mxu1  ;;  %v6879_v25 = vadd.f32 %v9549_v40, %v13287_v20  ;;  %v6912_v63 = vmax.f32 %v6876_v59, 0.0 }
 0xaad   : > { %v6910_v36 = vmax.f32 %v6868_v3, 0.0  ;;  %v6871_v62 = vadd.f32 %v13287_v20, %v6870_v5  ;;  %v6959_v49 = vpop.permute.xlu0 %6958  ;;  %v7139_v20 = vld [vmem:[#allocation3 + $0x4c] sm:$0xff] }
 0xaae   : > { %7048 = vst.msk [vmem:[#allocation3 + $0xac] sm:$0xff] %vm3290_vm4, %v6959_v49  ;;  %v6913_v61 = vmax.f32 %v6879_v25, 0.0 }
 0xaaf   : > { %v6911_v11 = vmax.f32 %v6871_v62, 0.0  ;;  %v6961_v52 = vpop.permute.xlu1 %6960  ;;  %7002 = vrot.lane.b32.xlu0 %v6910_v36, %s9648_s29 }
 0xab0   : > { %7049 = vst.msk [vmem:[#allocation3 + $0xb4] sm:$0xff] %vm3290_vm4, %v6961_v52 }
 0xab1   : > { %7004 = vrot.lane.b32.xlu1 %v6911_v11, %s9648_s29  ;;  %v13377_v2 = vld [vmem:[#allocation3 + $0x93] sm:$0xff] }
 0xab2   : > { %7113 = vst.msk [vmem:[#allocation4 + $0x60] sm:$0xff] %vm381_vm0, %v13377_v2  ;;  %v13419_v56 = vld [vmem:[#allocation3 + $0x94] sm:$0xff] }
 0xab3   : > { %7006 = vrot.lane.b32.xlu0 %v6912_v63, %s9648_s29  ;;  %v13382_v24 = vld [vmem:[#allocation3 + $0x9b] sm:$0xff] }
 0xab4   : > { %7114 = vst.msk [vmem:[#allocation4 + $0x70] sm:$0xff] %vm381_vm0, %v13382_v24  ;;  %v13427_v29 = vld [vmem:[#allocation3 + $0x9c] sm:$0xff] }
 0xab5   : > { %7008 = vrot.lane.b32.xlu1 %v6913_v61, %s9648_s29  ;;  %v13387_v28 = vld [vmem:[#allocation3 + $0xab] sm:$0xff] }
 0xab6   : > { %7115 = vst.msk [vmem:[#allocation4 + $0x80] sm:$0xff] %vm381_vm0, %v13387_v28  ;;  %v13435_v44 = vld [vmem:[#allocation3 + $0xac] sm:$0xff] }
 0xab7   : > { %7203 = vrot.lane.b32.xlu0 %v7139_v20, %s9643_s24  ;;  %v13392_v16 = vld [vmem:[#allocation3 + $0xb3] sm:$0xff] }
 0xab8   : > { %7116 = vst.msk [vmem:[#allocation4 + $0x90] sm:$0xff] %vm381_vm0, %v13392_v16  ;;  %v13443_v22 = vld [vmem:[#allocation3 + $0xb4] sm:$0xff] }
 0xab9   : > { %7205 = vrot.lane.b32.xlu1 %v7140_v51, %s9643_s24  ;;  %v6963_v60 = vpop.permute.xlu0 %6962 }
 0xaba   : > { %7050 = vst.msk [vmem:[#allocation3 + $0xc4] sm:$0xff] %vm3290_vm4, %v6963_v60 }
 0xabb   : > { %v6965_v26 = vpop.permute.xlu1 %6964  ;;  %7207 = vrot.lane.b32.xlu0 %v13398_v18, %s9643_s24 }
 0xabc   : > { %7051 = vst.msk [vmem:[#allocation3 + $0xcc] sm:$0xff] %vm3290_vm4, %v6965_v26 }
 0xabd   : > { %7209 = vrot.lane.b32.xlu1 %v13403_v19, %s9643_s24  ;;  %v6967_v9 = vpop.permute.xlu0 %6966 }
 0xabe   : > { %7052 = vst.msk [vmem:[#allocation3 + $0xdc] sm:$0xff] %vm3290_vm4, %v6967_v9 }
 0xabf   : > { %v6969_v32 = vpop.permute.xlu1 %6968  ;;  %7211 = vrot.lane.b32.xlu0 %v13408_v37, %s9643_s24 }
 0xac0   : > { %7053 = vst.msk [vmem:[#allocation3 + $0xe4] sm:$0xff] %vm3290_vm4, %v6969_v32 }
 0xac1   : > { %7213 = vrot.lane.b32.xlu1 %v13413_v30, %s9643_s24  ;;  %v13417_v8 = vld [vmem:[#allocation3 + $0xc3] sm:$0xff] }
 0xac2   : > { %7117 = vst.msk [vmem:[#allocation4 + $0xa0] sm:$0xff] %vm381_vm0, %v13417_v8  ;;  %v13450_v55 = vld [vmem:[#allocation3 + $0xc4] sm:$0xff] }
 0xac3   : > { %7215 = vrot.lane.b32.xlu0 %v13419_v56, %s9643_s24  ;;  %v13425_v46 = vld [vmem:[#allocation3 + $0xcb] sm:$0xff] }
 0xac4   : > { %7118 = vst.msk [vmem:[#allocation4 + $0xb0] sm:$0xff] %vm381_vm0, %v13425_v46  ;;  %v13455_v50 = vld [vmem:[#allocation3 + $0xcc] sm:$0xff] }
 0xac5   : > { %7217 = vrot.lane.b32.xlu1 %v13427_v29, %s9643_s24  ;;  %v13433_v17 = vld [vmem:[#allocation3 + $0xdb] sm:$0xff] }
 0xac6   : > { %7119 = vst.msk [vmem:[#allocation4 + $0xc0] sm:$0xff] %vm381_vm0, %v13433_v17  ;;  %v13460_v57 = vld [vmem:[#allocation3 + $0xdc] sm:$0xff] }
 0xac7   : > { %7219 = vrot.lane.b32.xlu0 %v13435_v44, %s9643_s24  ;;  %v13441_v27 = vld [vmem:[#allocation3 + $0xe3] sm:$0xff] }
 0xac8   : > { %7120 = vst.msk [vmem:[#allocation4 + $0xd0] sm:$0xff] %vm381_vm0, %v13441_v27  ;;  %v13465_v31 = vld [vmem:[#allocation3 + $0xe4] sm:$0xff] }
 0xac9   : > { %7221 = vrot.lane.b32.xlu1 %v13443_v22, %s9643_s24  ;;  %v6971_v42 = vpop.permute.xlu0 %6970 }
 0xaca   : > { %7054 = vst.msk [vmem:[#allocation3 + $0xf4] sm:$0xff] %vm3290_vm4, %v6971_v42 }
 0xacb   : > { %v6973_v53 = vpop.permute.xlu1 %6972  ;;  %7223 = vrot.lane.b32.xlu0 %v13450_v55, %s9643_s24 }
 0xacc   : > { %7055 = vst.msk [vmem:[#allocation3 + $0xfc] sm:$0xff] %vm3290_vm4, %v6973_v53 }
 0xacd   : > { %7225 = vrot.lane.b32.xlu1 %v13455_v50, %s9643_s24  ;;  %v6975_v4 = vpop.permute.xlu0 %6974 }
 0xace   : > { %7056 = vst.msk [vmem:[#allocation3 + $0x10c] sm:$0xff] %vm3290_vm4, %v6975_v4 }
 0xacf   : > { %v6977_v43 = vpop.permute.xlu1 %6976  ;;  %7227 = vrot.lane.b32.xlu0 %v13460_v57, %s9643_s24 }
 0xad0   : > { %7057 = vst.msk [vmem:[#allocation3 + $0x114] sm:$0xff] %vm3290_vm4, %v6977_v43 }
 0xad1   : > { %7229 = vrot.lane.b32.xlu1 %v13465_v31, %s9643_s24  ;;  %v7153_v12 = vld [vmem:[#allocation3 + $0xf4] sm:$0xff] }
 0xad2   : > { %v13469_v41 = vld [vmem:[#allocation3 + $0xf3] sm:$0xff] }
 0xad3   : > { %7121 = vst.msk [vmem:[#allocation4 + $0xe0] sm:$0xff] %vm381_vm0, %v13469_v41  ;;  %7231 = vrot.lane.b32.xlu0 %v7153_v12, %s9643_s24  ;;  %v7154_v14 = vld [vmem:[#allocation3 + $0xfc] sm:$0xff] }
 0xad4   : > { %v13474_v34 = vld [vmem:[#allocation3 + $0xfb] sm:$0xff] }
 0xad5   : > { %7122 = vst.msk [vmem:[#allocation4 + $0xf0] sm:$0xff] %vm381_vm0, %v13474_v34  ;;  %7233 = vrot.lane.b32.xlu1 %v7154_v14, %s9643_s24  ;;  %v7155_v48 = vld [vmem:[#allocation3 + $0x10c] sm:$0xff] }
 0xad6   : > { %v13479_v0 = vld [vmem:[#allocation3 + $0x10b] sm:$0xff] }
 0xad7   : > { %7123 = vst.msk [vmem:[#allocation4 + $0x100] sm:$0xff] %vm381_vm0, %v13479_v0  ;;  %7235 = vrot.lane.b32.xlu0 %v7155_v48, %s9643_s24  ;;  %v7156_v35 = vld [vmem:[#allocation3 + $0x114] sm:$0xff] }
 0xad8   : > { %v13484_v15 = vld [vmem:[#allocation3 + $0x113] sm:$0xff] }
 0xad9   : > { %7124 = vst.msk [vmem:[#allocation4 + $0x110] sm:$0xff] %vm381_vm0, %v13484_v15  ;;  %7237 = vrot.lane.b32.xlu1 %v7156_v35, %s9643_s24  ;;  %v6979_v23 = vpop.permute.xlu0 %6978 }
 0xada   : > { %7058 = vst.msk [vmem:[#allocation3 + $0x124] sm:$0xff] %vm3290_vm4, %v6979_v23 }
 0xadb   : > { %v6981_v38 = vpop.permute.xlu1 %6980 }
 0xadc   : > { %7059 = vst.msk [vmem:[#allocation3 + $0x12c] sm:$0xff] %vm3290_vm4, %v6981_v38 }
 0xadd   : > { %v6983_v47 = vpop.permute.xlu0 %6982 }
 0xade   : > { %7060 = vst.msk [vmem:[#allocation3 + $0x13c] sm:$0xff] %vm3290_vm4, %v6983_v47 }
 0xadf   : > { %v6985_v58 = vpop.permute.xlu1 %6984 }
 0xae0   : > { %7061 = vst.msk [vmem:[#allocation3 + $0x144] sm:$0xff] %vm3290_vm4, %v6985_v58 }
 0xae1   : > { %v7157_v6 = vld [vmem:[#allocation3 + $0x124] sm:$0xff] }
 0xae2   : > { %v13493_v33 = vld [vmem:[#allocation3 + $0x123] sm:$0xff]  ;;  %7239 = vrot.lane.b32.xlu0 %v7157_v6, %s9643_s24 }
 0xae3   : > { %7125 = vst.msk [vmem:[#allocation4 + $0x120] sm:$0xff] %vm381_vm0, %v13493_v33  ;;  %v7158_v45 = vld [vmem:[#allocation3 + $0x12c] sm:$0xff] }
 0xae4   : > { %7241 = vrot.lane.b32.xlu1 %v7158_v45, %s9643_s24  ;;  %v13499_v10 = vld [vmem:[#allocation3 + $0x12b] sm:$0xff] }
 0xae5   : > { %v7159_v3 = vld [vmem:[#allocation3 + $0x13c] sm:$0xff]  ;;  %7126 = vst.msk [vmem:[#allocation4 + $0x130] sm:$0xff] %vm381_vm0, %v13499_v10 }
 0xae6   : > { %v13503_v39 = vld [vmem:[#allocation3 + $0x13b] sm:$0xff]  ;;  %7243 = vrot.lane.b32.xlu0 %v7159_v3, %s9643_s24 }
 0xae7   : > { %7127 = vst.msk [vmem:[#allocation4 + $0x140] sm:$0xff] %vm381_vm0, %v13503_v39  ;;  %v7160_v40 = vld [vmem:[#allocation3 + $0x144] sm:$0xff] }
 0xae8   : > { %7245 = vrot.lane.b32.xlu1 %v7160_v40, %s9643_s24  ;;  %v13509_v5 = vld [vmem:[#allocation3 + $0x143] sm:$0xff] }
 0xae9   : > { %7128 = vst.msk [vmem:[#allocation4 + $0x150] sm:$0xff] %vm381_vm0, %v13509_v5 }
 0xaf1   : > { %v6987_v59 = vpop.permute.xlu0 %6986 }
 0xaf2   : > { %7062 = vst.msk [vmem:[#allocation3 + $0x154] sm:$0xff] %vm3290_vm4, %v6987_v59 }
 0xaf3   : > { %v6989_v36 = vpop.permute.xlu1 %6988 }
 0xaf4   : > { %7063 = vst.msk [vmem:[#allocation3 + $0x15c] sm:$0xff] %vm3290_vm4, %v6989_v36 }
 0xaf5   : > { %v6991_v62 = vpop.permute.xlu0 %6990 }
 0xaf6   : > { %7064 = vst.msk [vmem:[#allocation3 + $0x16c] sm:$0xff] %vm3290_vm4, %v6991_v62  ;;  %v7331_v62 = vld [vmem:[#allocation3 + $0x4d] sm:$0xff] }
 0xaf7   : > { %v6993_v49 = vpop.permute.xlu1 %6992 }
 0xaf8   : > { %7065 = vst.msk [vmem:[#allocation3 + $0x174] sm:$0xff] %vm3290_vm4, %v6993_v49 }
 0xaf9   : > { %v7161_v25 = vld [vmem:[#allocation3 + $0x154] sm:$0xff] }
 0xafa   : > { %v7097_v11 = vld [vmem:[#allocation3 + $0x153] sm:$0xff]  ;;  %7247 = vrot.lane.b32.xlu0 %v7161_v25, %s9643_s24 }
 0xafb   : > { %7129 = vst.msk [vmem:[#allocation4 + $0x160] sm:$0xff] %vm381_vm0, %v7097_v11  ;;  %v7162_v52 = vld [vmem:[#allocation3 + $0x15c] sm:$0xff] }
 0xafc   : > { %7249 = vrot.lane.b32.xlu1 %v7162_v52, %s9643_s24  ;;  %v7098_v63 = vld [vmem:[#allocation3 + $0x15b] sm:$0xff] }
 0xafd   : > { %v7163_v61 = vld [vmem:[#allocation3 + $0x16c] sm:$0xff]  ;;  %7130 = vst.msk [vmem:[#allocation4 + $0x170] sm:$0xff] %vm381_vm0, %v7098_v63  ;;  %v7332_v11 = vld [vmem:[#allocation3 + $0x55] sm:$0xff] }
 0xafe   : > { %v7099_v20 = vld [vmem:[#allocation3 + $0x16b] sm:$0xff]  ;;  %7251 = vrot.lane.b32.xlu0 %v7163_v61, %s9643_s24 }
 0xaff   : > { %7131 = vst.msk [vmem:[#allocation4 + $0x180] sm:$0xff] %vm381_vm0, %v7099_v20  ;;  %v7164_v51 = vld [vmem:[#allocation3 + $0x174] sm:$0xff]  ;;  %v13551_v61 = vld [vmem:[#allocation3 + $0x65] sm:$0xff] }
 0xb00   : > { %7253 = vrot.lane.b32.xlu1 %v7164_v51, %s9643_s24  ;;  %v7100_v60 = vld [vmem:[#allocation3 + $0x173] sm:$0xff] }
 0xb01   : > { %7132 = vst.msk [vmem:[#allocation4 + $0x190] sm:$0xff] %vm381_vm0, %v7100_v60  ;;  %v13556_v51 = vld [vmem:[#allocation3 + $0x6d] sm:$0xff] }
 0xb09   : > { %v6995_v26 = vpop.permute.xlu0 %6994 }
 0xb0a   : > { %7066 = vst.msk [vmem:[#allocation3 + $0x184] sm:$0xff] %vm3290_vm4, %v6995_v26  ;;  %v13561_v26 = vld [vmem:[#allocation3 + $0x7d] sm:$0xff] }
 0xb0b   : > { %v6997_v9 = vpop.permute.xlu1 %6996 }
 0xb0c   : > { %7067 = vst.msk [vmem:[#allocation3 + $0x18c] sm:$0xff] %vm3290_vm4, %v6997_v9 }
 0xb0d   : > { %v6999_v32 = vpop.permute.xlu0 %6998 }
 0xb0e   : > { %7068 = vst.msk [vmem:[#allocation3 + $0x19c] sm:$0xff] %vm3290_vm4, %v6999_v32  ;;  %v13566_v32 = vld [vmem:[#allocation3 + $0x85] sm:$0xff] }
 0xb0f   : > { %v7001_v42 = vpop.permute.xlu1 %7000 }
 0xb10   : > { %7069 = vst.msk [vmem:[#allocation3 + $0x1a4] sm:$0xff] %vm3290_vm4, %v7001_v42 }
 0xb11   : > { %v7165_v53 = vld [vmem:[#allocation3 + $0x184] sm:$0xff] }
 0xb12   : > { %v7101_v4 = vld [vmem:[#allocation3 + $0x183] sm:$0xff]  ;;  %7255 = vrot.lane.b32.xlu0 %v7165_v53, %s9643_s24  ;;  %v13571_v53 = vld [vmem:[#allocation3 + $0x95] sm:$0xff] }
 0xb13   : > { %7133 = vst.msk [vmem:[#allocation4 + $0x1a0] sm:$0xff] %vm381_vm0, %v7101_v4  ;;  %v7166_v43 = vld [vmem:[#allocation3 + $0x18c] sm:$0xff] }
 0xb14   : > { %7257 = vrot.lane.b32.xlu1 %v7166_v43, %s9643_s24  ;;  %v7102_v12 = vld [vmem:[#allocation3 + $0x18b] sm:$0xff]  ;;  %v13576_v43 = vld [vmem:[#allocation3 + $0x9d] sm:$0xff] }
 0xb15   : > { %v7167_v14 = vld [vmem:[#allocation3 + $0x19c] sm:$0xff]  ;;  %7134 = vst.msk [vmem:[#allocation4 + $0x1b0] sm:$0xff] %vm381_vm0, %v7102_v12 }
 0xb16   : > { %v7103_v48 = vld [vmem:[#allocation3 + $0x19b] sm:$0xff]  ;;  %7259 = vrot.lane.b32.xlu0 %v7167_v14, %s9643_s24  ;;  %v13581_v14 = vld [vmem:[#allocation3 + $0xad] sm:$0xff] }
 0xb17   : > { %7135 = vst.msk [vmem:[#allocation4 + $0x1c0] sm:$0xff] %vm381_vm0, %v7103_v48  ;;  %v7168_v35 = vld [vmem:[#allocation3 + $0x1a4] sm:$0xff] }
 0xb18   : > { %7261 = vrot.lane.b32.xlu1 %v7168_v35, %s9643_s24  ;;  %v7104_v23 = vld [vmem:[#allocation3 + $0x1a3] sm:$0xff]  ;;  %v13586_v35 = vld [vmem:[#allocation3 + $0xb5] sm:$0xff] }
 0xb19   : > { %7136 = vst.msk [vmem:[#allocation4 + $0x1d0] sm:$0xff] %vm381_vm0, %v7104_v23 }
 0xb21   : > { %v7003_v38 = vpop.permute.xlu0 %7002 }
 0xb22   : > { %7070 = vst.msk [vmem:[#allocation3 + $0x1b4] sm:$0xff] %vm3290_vm4, %v7003_v38  ;;  %v13591_v38 = vld [vmem:[#allocation3 + $0xc5] sm:$0xff] }
 0xb23   : > { %v7005_v47 = vpop.permute.xlu1 %7004 }
 0xb24   : > { %7071 = vst.msk [vmem:[#allocation3 + $0x1bc] sm:$0xff] %vm3290_vm4, %v7005_v47 }
 0xb25   : > { %v7007_v58 = vpop.permute.xlu0 %7006 }
 0xb26   : > { %7072 = vst.msk [vmem:[#allocation3 + $0x1cc] sm:$0xff] %vm3290_vm4, %v7007_v58  ;;  %v13596_v58 = vld [vmem:[#allocation3 + $0xcd] sm:$0xff] }
 0xb27   : > { %v7009_v6 = vpop.permute.xlu1 %7008 }
 0xb28   : > { %7073 = vst.msk [vmem:[#allocation3 + $0x1d4] sm:$0xff] %vm3290_vm4, %v7009_v6 }
 0xb29   : > { %v7204_v45 = vpop.permute.xlu0 %7203  ;;  %v7169_v3 = vld [vmem:[#allocation3 + $0x1b4] sm:$0xff] }
 0xb2a   : > { %v7105_v40 = vld [vmem:[#allocation3 + $0x1b3] sm:$0xff]  ;;  %7299 = vst.msk [vmem:[#allocation4] sm:$0xff] %vm965_vm5, %v7204_v45  ;;  %7263 = vrot.lane.b32.xlu0 %v7169_v3, %s9643_s24  ;;  %v13601_v45 = vld [vmem:[#allocation3 + $0xdd] sm:$0xff] }
 0xb2b   : > { %7137 = vst.msk [vmem:[#allocation4 + $0x1e0] sm:$0xff] %vm381_vm0, %v7105_v40  ;;  %v7206_v59 = vpop.permute.xlu1 %7205  ;;  %v7170_v36 = vld [vmem:[#allocation3 + $0x1bc] sm:$0xff]  ;;  %v13606_v40 = vld [vmem:[#allocation3 + $0xe5] sm:$0xff] }
 0xb2c   : > { %7300 = vst.msk [vmem:[#allocation4 + $0x10] sm:$0xff] %vm965_vm5, %v7206_v59  ;;  %7265 = vrot.lane.b32.xlu1 %v7170_v36, %s9643_s24  ;;  %v7106_v49 = vld [vmem:[#allocation3 + $0x1bb] sm:$0xff] }
 0xb2d   : > { %v7208_v25 = vpop.permute.xlu0 %7207  ;;  %7138 = vst.msk [vmem:[#allocation4 + $0x1f0] sm:$0xff] %vm381_vm0, %v7106_v49  ;;  %v13611_v36 = vld [vmem:[#allocation3 + $0xf5] sm:$0xff]  ;;  %v13616_v49 = vld [vmem:[#allocation3 + $0xfd] sm:$0xff]  ;;  %vm14541_vm0 = vcmask 326784  }
 0xb2e   : > { %7301 = vst.msk [vmem:[#allocation4 + $0x20] sm:$0xff] %vm965_vm5, %v7208_v25  ;;  %7395 = vrot.lane.b32.xlu0 %v7331_v62, %s9644_s25  ;;  %v13621_v25 = vld [vmem:[#allocation3 + $0x10d] sm:$0xff]  ;;  %vm14542_vm3 = vmmov %vm14541_vm0 }
 0xb2f   : > { %v7210_v52 = vpop.permute.xlu1 %7209  ;;  %vm14551_vm15 = vmmov %vm14541_vm0 }
 0xb30   : > { %7302 = vst.msk [vmem:[#allocation4 + $0x30] sm:$0xff] %vm965_vm5, %v7210_v52  ;;  %7397 = vrot.lane.b32.xlu1 %v7332_v11, %s9644_s25  ;;  %v13625_v11 = vld [vmem:[#allocation3 + $0x115] sm:$0xff]  ;;  %v13629_v52 = vld [vmem:[#allocation3 + $0x125] sm:$0xff]  ;;  %vm14552_vm2 = vmmov %vm14541_vm0 }
 0xb31   : > { %v7212_v63 = vpop.permute.xlu0 %7211 }
 0xb32   : > { %7303 = vst.msk [vmem:[#allocation4 + $0x40] sm:$0xff] %vm965_vm5, %v7212_v63  ;;  %7399 = vrot.lane.b32.xlu0 %v13551_v61, %s9644_s25  ;;  %v9619_v63 = vld [vmem:[%s14363_s8] sm:$0xff]  }
 0xb33   : > { %v7214_v20 = vpop.permute.xlu1 %7213  ;;  %8971 = vmatpush1.bf16.msra.mxu1 %v9619_v63  ;;  %v7356_v63 = vld [vmem:[#allocation3 + $0x175] sm:$0xff] }
 0xb34   : > { %7304 = vst.msk [vmem:[#allocation4 + $0x50] sm:$0xff] %vm965_vm5, %v7214_v20  ;;  %7401 = vrot.lane.b32.xlu1 %v13556_v51, %s9644_s25  ;;  %v13636_v20 = vld [vmem:[#allocation3 + $0x12d] sm:$0xff]  ;;  %8972 = vmatprep.subr.bf16.mxu1 %v14540_v21 }
 0xb35   : > { %v7216_v60 = vpop.permute.xlu0 %7215 }
 0xb36   : > { %7305 = vst.msk [vmem:[#allocation4 + $0x60] sm:$0xff] %vm965_vm5, %v7216_v60  ;;  %7403 = vrot.lane.b32.xlu0 %v13561_v26, %s9644_s25 }
 0xb37   : > { %v7218_v9 = vpop.permute.xlu1 %7217 }
 0xb38   : > { %7306 = vst.msk [vmem:[#allocation4 + $0x70] sm:$0xff] %vm965_vm5, %v7218_v9  ;;  %7405 = vrot.lane.b32.xlu1 %v13566_v32, %s9644_s25  ;;  %v7351_v9 = vld [vmem:[#allocation3 + $0x13d] sm:$0xff] }
 0xb39   : > { %v7220_v42 = vpop.permute.xlu0 %7219 }
 0xb3a   : > { %7307 = vst.msk [vmem:[#allocation4 + $0x80] sm:$0xff] %vm965_vm5, %v7220_v42  ;;  %7407 = vrot.lane.b32.xlu0 %v13571_v53, %s9644_s25  ;;  %v9620_v42 = vld [vmem:[%s14363_s8 + $0x8] sm:$0xff]  }
 0xb3b   : > { %v7222_v4 = vpop.permute.xlu1 %7221  ;;  %8973 = vmatpush1.bf16.msra.mxu1 %v9620_v42  ;;  %v7358_v42 = vld [vmem:[#allocation3 + $0x18d] sm:$0xff] }
 0xb3c   : > { %7308 = vst.msk [vmem:[#allocation4 + $0x90] sm:$0xff] %vm965_vm5, %v7222_v4  ;;  %7409 = vrot.lane.b32.xlu1 %v13576_v43, %s9644_s25  ;;  %8974 = vmatprep.subr.bf16.mxu1 %v14540_v21 }
 0xb3d   : > { %v7224_v12 = vpop.permute.xlu0 %7223 }
 0xb3e   : > { %7309 = vst.msk [vmem:[#allocation4 + $0xa0] sm:$0xff] %vm965_vm5, %v7224_v12  ;;  %7411 = vrot.lane.b32.xlu0 %v13581_v14, %s9644_s25  ;;  %v7352_v12 = vld [vmem:[#allocation3 + $0x145] sm:$0xff] }
 0xb3f   : > { %v7226_v48 = vpop.permute.xlu1 %7225 }
 0xb40   : > { %7310 = vst.msk [vmem:[#allocation4 + $0xb0] sm:$0xff] %vm965_vm5, %v7226_v48  ;;  %7413 = vrot.lane.b32.xlu1 %v13586_v35, %s9644_s25 }
 0xb41   : > { %v7228_v23 = vpop.permute.xlu0 %7227 }
 0xb42   : > { %7311 = vst.msk [vmem:[#allocation4 + $0xc0] sm:$0xff] %vm965_vm5, %v7228_v23  ;;  %7415 = vrot.lane.b32.xlu0 %v13591_v38, %s9644_s25  ;;  %v7353_v23 = vld [vmem:[#allocation3 + $0x155] sm:$0xff] }
 0xb43   : > { %v7230_v47 = vpop.permute.xlu1 %7229 }
 0xb44   : > { %7312 = vst.msk [vmem:[#allocation4 + $0xd0] sm:$0xff] %vm965_vm5, %v7230_v47  ;;  %7417 = vrot.lane.b32.xlu1 %v13596_v58, %s9644_s25  ;;  %v9621_v47 = vld [vmem:[%s14363_s8 + $0x10] sm:$0xff]  }
 0xb45   : > { %v7232_v6 = vpop.permute.xlu0 %7231  ;;  %8975 = vmatpush1.bf16.msra.mxu1 %v9621_v47  ;;  %v9625_v47 = vld [vmem:[%s14363_s8 + $0x30] sm:$0xff]  }
 0xb46   : > { %7313 = vst.msk [vmem:[#allocation4 + $0xe0] sm:$0xff] %vm965_vm5, %v7232_v6  ;;  %7419 = vrot.lane.b32.xlu0 %v13601_v45, %s9644_s25  ;;  %8976 = vmatprep.subr.bf16.mxu1 %v14540_v21 }
 0xb47   : > { %v7234_v3 = vpop.permute.xlu1 %7233 }
 0xb48   : > { %7314 = vst.msk [vmem:[#allocation4 + $0xf0] sm:$0xff] %vm965_vm5, %v7234_v3  ;;  %7421 = vrot.lane.b32.xlu1 %v13606_v40, %s9644_s25  ;;  %v7354_v3 = vld [vmem:[#allocation3 + $0x15d] sm:$0xff] }
 0xb49   : > { %v7236_v59 = vpop.permute.xlu0 %7235 }
 0xb4a   : > { %7315 = vst.msk [vmem:[#allocation4 + $0x100] sm:$0xff] %vm965_vm5, %v7236_v59  ;;  %7423 = vrot.lane.b32.xlu0 %v13611_v36, %s9644_s25  ;;  %v7355_v59 = vld [vmem:[#allocation3 + $0x16d] sm:$0xff] }
 0xb4b   : > { %v7238_v62 = vpop.permute.xlu1 %7237 }
 0xb4c   : > { %7316 = vst.msk [vmem:[#allocation4 + $0x110] sm:$0xff] %vm965_vm5, %v7238_v62  ;;  %7425 = vrot.lane.b32.xlu1 %v13616_v49, %s9644_s25  ;;  %v9622_v62 = vld [vmem:[%s14363_s8 + $0x18] sm:$0xff]  }
 0xb4d   : > { %8977 = vmatpush1.bf16.msra.mxu1 %v9622_v62 }
 0xb4e   : > { %7427 = vrot.lane.b32.xlu0 %v13621_v25, %s9644_s25  ;;  %8978 = vmatprep.subr.bf16.mxu1 %v14540_v21 }
 0xb50   : > { %7429 = vrot.lane.b32.xlu1 %v13625_v11, %s9644_s25 }
 0xb52   : > { %7431 = vrot.lane.b32.xlu0 %v13629_v52, %s9644_s25 }
 0xb54   : > { %7433 = vrot.lane.b32.xlu1 %v13636_v20, %s9644_s25  ;;  %v7240_v60 = vpop.permute.xlu0 %7239 }
 0xb55   : > { %7317 = vst.msk [vmem:[#allocation4 + $0x120] sm:$0xff] %vm965_vm5, %v7240_v60  ;;  %v7357_v60 = vld [vmem:[#allocation3 + $0x185] sm:$0xff] }
 0xb56   : > { %v7242_v4 = vpop.permute.xlu1 %7241  ;;  %7435 = vrot.lane.b32.xlu0 %v7351_v9, %s9644_s25  ;;  %v9623_v9 = vld [vmem:[%s14363_s8 + $0x20] sm:$0xff]  }
 0xb57   : > { %7318 = vst.msk [vmem:[#allocation4 + $0x130] sm:$0xff] %vm965_vm5, %v7242_v4  ;;  %8979 = vmatpush1.bf16.msra.mxu1 %v9623_v9  ;;  %v7359_v4 = vld [vmem:[#allocation3 + $0x19d] sm:$0xff] }
 0xb58   : > { %7437 = vrot.lane.b32.xlu1 %v7352_v12, %s9644_s25  ;;  %v7244_v48 = vpop.permute.xlu0 %7243  ;;  %8980 = vmatprep.subr.bf16.mxu1 %v14540_v21  ;;  %v9624_v12 = vld [vmem:[%s14363_s8 + $0x28] sm:$0xff]  }
 0xb59   : > { %7319 = vst.msk [vmem:[#allocation4 + $0x140] sm:$0xff] %vm965_vm5, %v7244_v48  ;;  %v7360_v48 = vld [vmem:[#allocation3 + $0x1a5] sm:$0xff] }
 0xb5a   : > { %v7246_v6 = vpop.permute.xlu1 %7245  ;;  %7439 = vrot.lane.b32.xlu0 %v7353_v23, %s9644_s25  ;;  %v7361_v23 = vld [vmem:[#allocation3 + $0x1b5] sm:$0xff] }
 0xb5b   : > { %7320 = vst.msk [vmem:[#allocation4 + $0x150] sm:$0xff] %vm965_vm5, %v7246_v6  ;;  %8981 = vmatpush1.bf16.msra.mxu1 %v9624_v12  ;;  %v7362_v6 = vld [vmem:[#allocation3 + $0x1bd] sm:$0xff] }
 0xb5c   : > { %7441 = vrot.lane.b32.xlu1 %v7354_v3, %s9644_s25  ;;  %8982 = vmatprep.subr.bf16.mxu1 %v14540_v21 }
 0xb5e   : > { %7443 = vrot.lane.b32.xlu0 %v7355_v59, %s9644_s25  ;;  %v9626_v59 = vld [vmem:[%s14363_s8 + $0x38] sm:$0xff]  }
 0xb5f   : > { %8983 = vmatpush1.bf16.msra.mxu1 %v9625_v47 }
 0xb60   : > { %7445 = vrot.lane.b32.xlu1 %v7356_v63, %s9644_s25  ;;  %8984 = vmatprep.subr.bf16.mxu1 %v14540_v21 }
 0xb62   : > { %7447 = vrot.lane.b32.xlu0 %v7357_v60, %s9644_s25  ;;  %v9627_v60 = vld [vmem:[%s14363_s8 + $0x40] sm:$0xff]  }
 0xb63   : > { %8985 = vmatpush1.bf16.msra.mxu1 %v9626_v59 }
 0xb64   : > { %7449 = vrot.lane.b32.xlu1 %v7358_v42, %s9644_s25  ;;  %8986 = vmatprep.subr.bf16.mxu1 %v14540_v21  ;;  %v9630_v42 = vld [vmem:[%s14363_s8 + $0x58] sm:$0xff]  }
 0xb66   : > { %7451 = vrot.lane.b32.xlu0 %v7359_v4, %s9644_s25 }
 0xb67   : > { %8987 = vmatpush1.bf16.msra.mxu1 %v9627_v60 }
 0xb68   : > { %7453 = vrot.lane.b32.xlu1 %v7360_v48, %s9644_s25  ;;  %8988 = vmatprep.subr.bf16.mxu1 %v14540_v21 }
 0xb6a   : > { %7455 = vrot.lane.b32.xlu0 %v7361_v23, %s9644_s25 }
 0xb6c   : > { %7457 = vrot.lane.b32.xlu1 %v7362_v6, %s9644_s25  ;;  %v7248_v3 = vpop.permute.xlu0 %7247 }
 0xb6d   : > { %7321 = vst.msk [vmem:[#allocation4 + $0x160] sm:$0xff] %vm965_vm5, %v7248_v3 }
 0xb6e   : > { %v7250_v62 = vpop.permute.xlu1 %7249  ;;  %7587 = vrot.lane.b32.xlu0 %v13349_v7, %s9645_s26  ;;  %v9628_v7 = vld [vmem:[%s14363_s8 + $0x48] sm:$0xff]  }
 0xb6f   : > { %7322 = vst.msk [vmem:[#allocation4 + $0x170] sm:$0xff] %vm965_vm5, %v7250_v62  ;;  %8989 = vmatpush1.bf16.msra.mxu1 %v9628_v7 }
 0xb70   : > { %7589 = vrot.lane.b32.xlu1 %v13353_v13, %s9645_s26  ;;  %v7252_v63 = vpop.permute.xlu0 %7251  ;;  %8990 = vmatprep.subr.bf16.mxu1 %v14540_v21  ;;  %v9629_v13 = vld [vmem:[%s14363_s8 + $0x50] sm:$0xff]  }
 0xb71   : > { %7323 = vst.msk [vmem:[#allocation4 + $0x180] sm:$0xff] %vm965_vm5, %v7252_v63 }
 0xb72   : > { %v7254_v9 = vpop.permute.xlu1 %7253  ;;  %7591 = vrot.lane.b32.xlu0 %v13357_v1, %s9645_s26 }
 0xb73   : > { %7324 = vst.msk [vmem:[#allocation4 + $0x190] sm:$0xff] %vm965_vm5, %v7254_v9  ;;  %8991 = vmatpush1.bf16.msra.mxu1 %v9629_v13 }
 0xb74   : > { %7593 = vrot.lane.b32.xlu1 %v13361_v54, %s9645_s26  ;;  %8992 = vmatprep.subr.bf16.mxu1 %v14540_v21 }
 0xb76   : > { %7595 = vrot.lane.b32.xlu0 %v13377_v2, %s9645_s26 }
 0xb77   : > { %8993 = vmatpush1.bf16.msra.mxu1 %v9630_v42 }
 0xb78   : > { %7971 = vrot.lane.b32.xlu1 %v13551_v61, %s9647_s28  ;;  %8994 = vmatprep.subr.bf16.mxu1 %v14540_v21 }
 0xb7a   : > { %7973 = vrot.lane.b32.xlu0 %v13556_v51, %s9647_s28 }
 0xb7c   : > { %8196 = vrot.lane.b32.xlu1 %v13357_v1, %s9648_s29  ;;  %v9631_v1 = vld [vmem:[%s14363_s8 + $0x60] sm:$0xff]  }
 0xb7d   : > { %8995 = vmatpush1.bf16.msra.mxu1 %v9631_v1 }
 0xb7e   : > { %8198 = vrot.lane.b32.xlu0 %v13361_v54, %s9648_s29  ;;  %8996 = vmatprep.subr.bf16.mxu1 %v14540_v21  ;;  %v9632_v54 = vld [vmem:[%s14363_s8 + $0x68] ss:$0 sps:$4 sm:$0xff]  }
 0xb7f   : > { %v8968_v4 = vsel %vm2643_vm12, %v9632_v54, 0  ;;  %v8334_v54 = vld [vmem:[#allocation3 + $0xf4] sm:$0xff]  ;;  %vm14548_vm12 = vmmov %vm14546_vm9 }
 0xb80   : > { %8388 = vrot.lane.b32.xlu1 %v13408_v37, %s9649_s30 }
 0xb81   : > { %8997 = vmatpush1.bf16.msra.mxu1 %v8968_v4  ;;  %v8335_v4 = vld [vmem:[#allocation3 + $0xfc] sm:$0xff] }
 0xb82   : > { %8390 = vrot.lane.b32.xlu0 %v13413_v30, %s9649_s30 }
 0xb84   : > { %7779 = vrot.lane.b32.xlu1 %v13398_v18, %s9646_s27  ;;  %v7256_v61 = vpop.permute.xlu0 %7255 }
 0xb85   : > { %7325 = vst.msk [vmem:[#allocation4 + $0x1a0] sm:$0xff] %vm965_vm5, %v7256_v61 }
 0xb86   : > { %v7258_v51 = vpop.permute.xlu1 %7257  ;;  %7781 = vrot.lane.b32.xlu0 %v13403_v19, %s9646_s27 }
 0xb87   : > { %7326 = vst.msk [vmem:[#allocation4 + $0x1b0] sm:$0xff] %vm965_vm5, %v7258_v51 }
 0xb88   : > { %8580 = vrot.lane.b32.xlu1 %v13561_v26, %s9651_s22  ;;  %v7260_v18 = vpop.permute.xlu0 %7259 }
 0xb89   : > { %7327 = vst.msk [vmem:[#allocation4 + $0x1c0] sm:$0xff] %vm965_vm5, %v7260_v18 }
 0xb8a   : > { %v7262_v21 = vpop.permute.xlu1 %7261  ;;  %8582 = vrot.lane.b32.xlu0 %v13566_v32, %s9651_s22 }
 0xb8b   : > { %7328 = vst.msk [vmem:[#allocation4 + $0x1d0] sm:$0xff] %vm965_vm5, %v7262_v21 }
 0xb8c   : > { %7975 = vrot.lane.b32.xlu1 %v13561_v26, %s9647_s28 }
 0xb8e   : > { %7977 = vrot.lane.b32.xlu0 %v13566_v32, %s9647_s28 }
 0xb90   : > { %8200 = vrot.lane.b32.xlu1 %v13377_v2, %s9648_s29 }
 0xb92   : > { %8202 = vrot.lane.b32.xlu0 %v13382_v24, %s9648_s29 }
 0xb94   : > { %8392 = vrot.lane.b32.xlu1 %v13419_v56, %s9649_s30 }
 0xb96   : > { %8394 = vrot.lane.b32.xlu0 %v13427_v29, %s9649_s30 }
 0xb98   : > { %7783 = vrot.lane.b32.xlu1 %v13408_v37, %s9646_s27 }
 0xb9a   : > { %7785 = vrot.lane.b32.xlu0 %v13413_v30, %s9646_s27 }
 0xb9c   : > { %8584 = vrot.lane.b32.xlu1 %v13571_v53, %s9651_s22  ;;  %v7264_v19 = vpop.permute.xlu0 %7263 }
 0xb9d   : > { %7329 = vst.msk [vmem:[#allocation4 + $0x1e0] sm:$0xff] %vm965_vm5, %v7264_v19 }
 0xb9e   : > { %v7266_v2 = vpop.permute.xlu1 %7265  ;;  %8586 = vrot.lane.b32.xlu0 %v13576_v43, %s9651_s22 }
 0xb9f   : > { %7330 = vst.msk [vmem:[#allocation4 + $0x1f0] sm:$0xff] %vm965_vm5, %v7266_v2  ;;  %vm14543_vm5 = vcmask 523584  }
 0xba0   : > { %7979 = vrot.lane.b32.xlu1 %v13571_v53, %s9647_s28  ;;  %v7396_v26 = vpop.permute.xlu0 %7395  ;;  %vm14553_vm4 = vmmov %vm14543_vm5 }
 0xba1   : > { %7491 = vst.msk [vmem:[#allocation4] sm:$0xff] %vm1158_vm6, %v7396_v26 }
 0xba2   : > { %v7398_v37 = vpop.permute.xlu1 %7397  ;;  %7981 = vrot.lane.b32.xlu0 %v13576_v43, %s9647_s28 }
 0xba3   : > { %7492 = vst.msk [vmem:[#allocation4 + $0x10] sm:$0xff] %vm1158_vm6, %v7398_v37 }
 0xba4   : > { %8204 = vrot.lane.b32.xlu1 %v13387_v28, %s9648_s29  ;;  %v7400_v30 = vpop.permute.xlu0 %7399 }
 0xba5   : > { %7493 = vst.msk [vmem:[#allocation4 + $0x20] sm:$0xff] %vm1158_vm6, %v7400_v30 }
 0xba6   : > { %v7402_v32 = vpop.permute.xlu1 %7401  ;;  %8206 = vrot.lane.b32.xlu0 %v13392_v16, %s9648_s29 }
 0xba7   : > { %7494 = vst.msk [vmem:[#allocation4 + $0x30] sm:$0xff] %vm1158_vm6, %v7402_v32 }
 0xba8   : > { %7597 = vrot.lane.b32.xlu1 %v13382_v24, %s9645_s26  ;;  %v7404_v53 = vpop.permute.xlu0 %7403 }
 0xba9   : > { %7495 = vst.msk [vmem:[#allocation4 + $0x40] sm:$0xff] %vm1158_vm6, %v7404_v53 }
 0xbaa   : > { %v7406_v43 = vpop.permute.xlu1 %7405  ;;  %8396 = vrot.lane.b32.xlu0 %v13435_v44, %s9649_s30 }
 0xbab   : > { %7496 = vst.msk [vmem:[#allocation4 + $0x50] sm:$0xff] %vm1158_vm6, %v7406_v43 }
 0xbac   : > { %8398 = vrot.lane.b32.xlu1 %v13443_v22, %s9649_s30  ;;  %v7408_v12 = vpop.permute.xlu0 %7407 }
 0xbad   : > { %7497 = vst.msk [vmem:[#allocation4 + $0x60] sm:$0xff] %vm1158_vm6, %v7408_v12 }
 0xbae   : > { %v7410_v48 = vpop.permute.xlu1 %7409  ;;  %7787 = vrot.lane.b32.xlu0 %v13419_v56, %s9646_s27 }
 0xbaf   : > { %7498 = vst.msk [vmem:[#allocation4 + $0x70] sm:$0xff] %vm1158_vm6, %v7410_v48 }
 0xbb0   : > { %7789 = vrot.lane.b32.xlu1 %v13427_v29, %s9646_s27  ;;  %v7412_v24 = vpop.permute.xlu0 %7411 }
 0xbb1   : > { %7499 = vst.msk [vmem:[#allocation4 + $0x80] sm:$0xff] %vm1158_vm6, %v7412_v24 }
 0xbb2   : > { %v7414_v23 = vpop.permute.xlu1 %7413  ;;  %8588 = vrot.lane.b32.xlu0 %v13581_v14, %s9651_s22 }
 0xbb3   : > { %7500 = vst.msk [vmem:[#allocation4 + $0x90] sm:$0xff] %vm1158_vm6, %v7414_v23 }
 0xbb4   : > { %8590 = vrot.lane.b32.xlu1 %v13586_v35, %s9651_s22  ;;  %v7416_v47 = vpop.permute.xlu0 %7415 }
 0xbb5   : > { %7501 = vst.msk [vmem:[#allocation4 + $0xa0] sm:$0xff] %vm1158_vm6, %v7416_v47 }
 0xbb6   : > { %v7418_v56 = vpop.permute.xlu1 %7417  ;;  %7983 = vrot.lane.b32.xlu0 %v13581_v14, %s9647_s28 }
 0xbb7   : > { %7502 = vst.msk [vmem:[#allocation4 + $0xb0] sm:$0xff] %vm1158_vm6, %v7418_v56  ;;  %v8336_v56 = vld [vmem:[#allocation3 + $0x10c] sm:$0xff] }
 0xbb8   : > { %7985 = vrot.lane.b32.xlu1 %v13586_v35, %s9647_s28  ;;  %v7420_v29 = vpop.permute.xlu0 %7419 }
 0xbb9   : > { %7503 = vst.msk [vmem:[#allocation4 + $0xc0] sm:$0xff] %vm1158_vm6, %v7420_v29 }
 0xbba   : > { %v7422_v6 = vpop.permute.xlu1 %7421  ;;  %8208 = vrot.lane.b32.xlu0 %v13417_v8, %s9648_s29 }
 0xbbb   : > { %7504 = vst.msk [vmem:[#allocation4 + $0xd0] sm:$0xff] %vm1158_vm6, %v7422_v6  ;;  %v8337_v6 = vld [vmem:[#allocation3 + $0x114] sm:$0xff] }
 0xbbc   : > { %8210 = vrot.lane.b32.xlu1 %v13425_v46, %s9648_s29  ;;  %v7424_v3 = vpop.permute.xlu0 %7423 }
 0xbbd   : > { %7505 = vst.msk [vmem:[#allocation4 + $0xe0] sm:$0xff] %vm1158_vm6, %v7424_v3 }
 0xbbe   : > { %v7426_v14 = vpop.permute.xlu1 %7425  ;;  %7599 = vrot.lane.b32.xlu0 %v13387_v28, %s9645_s26 }
 0xbbf   : > { %7506 = vst.msk [vmem:[#allocation4 + $0xf0] sm:$0xff] %vm1158_vm6, %v7426_v14 }
 0xbc0   : > { %7601 = vrot.lane.b32.xlu1 %v13392_v16, %s9645_s26  ;;  %v7428_v35 = vpop.permute.xlu0 %7427 }
 0xbc1   : > { %7507 = vst.msk [vmem:[#allocation4 + $0x100] sm:$0xff] %vm1158_vm6, %v7428_v35 }
 0xbc2   : > { %v7430_v59 = vpop.permute.xlu1 %7429  ;;  %8400 = vrot.lane.b32.xlu0 %v13450_v55, %s9649_s30 }
 0xbc3   : > { %7508 = vst.msk [vmem:[#allocation4 + $0x110] sm:$0xff] %vm1158_vm6, %v7430_v59 }
 0xbc4   : > { %8402 = vrot.lane.b32.xlu1 %v13455_v50, %s9649_s30  ;;  %v7432_v62 = vpop.permute.xlu0 %7431 }
 0xbc5   : > { %7509 = vst.msk [vmem:[#allocation4 + $0x120] sm:$0xff] %vm1158_vm6, %v7432_v62 }
 0xbc6   : > { %v7434_v28 = vpop.permute.xlu1 %7433  ;;  %7791 = vrot.lane.b32.xlu0 %v13435_v44, %s9646_s27 }
 0xbc7   : > { %7510 = vst.msk [vmem:[#allocation4 + $0x130] sm:$0xff] %vm1158_vm6, %v7434_v28 }
 0xbc8   : > { %7793 = vrot.lane.b32.xlu1 %v13443_v22, %s9646_s27  ;;  %v7436_v16 = vpop.permute.xlu0 %7435 }
 0xbc9   : > { %7511 = vst.msk [vmem:[#allocation4 + $0x140] sm:$0xff] %vm1158_vm6, %v7436_v16 }
 0xbca   : > { %v7438_v63 = vpop.permute.xlu1 %7437  ;;  %8592 = vrot.lane.b32.xlu0 %v13591_v38, %s9651_s22 }
 0xbcb   : > { %7512 = vst.msk [vmem:[#allocation4 + $0x150] sm:$0xff] %vm1158_vm6, %v7438_v63 }
 0xbcc   : > { %8594 = vrot.lane.b32.xlu1 %v13596_v58, %s9651_s22  ;;  %v7440_v60 = vpop.permute.xlu0 %7439 }
 0xbcd   : > { %7513 = vst.msk [vmem:[#allocation4 + $0x160] sm:$0xff] %vm1158_vm6, %v7440_v60 }
 0xbce   : > { %v7442_v44 = vpop.permute.xlu1 %7441  ;;  %7987 = vrot.lane.b32.xlu0 %v13591_v38, %s9647_s28 }
 0xbcf   : > { %7514 = vst.msk [vmem:[#allocation4 + $0x170] sm:$0xff] %vm1158_vm6, %v7442_v44 }
 0xbd0   : > { %7989 = vrot.lane.b32.xlu1 %v13596_v58, %s9647_s28  ;;  %v7444_v22 = vpop.permute.xlu0 %7443 }
 0xbd1   : > { %7515 = vst.msk [vmem:[#allocation4 + $0x180] sm:$0xff] %vm1158_vm6, %v7444_v22 }
 0xbd2   : > { %v7446_v9 = vpop.permute.xlu1 %7445  ;;  %8212 = vrot.lane.b32.xlu0 %v13433_v17, %s9648_s29 }
 0xbd3   : > { %7516 = vst.msk [vmem:[#allocation4 + $0x190] sm:$0xff] %vm1158_vm6, %v7446_v9 }
 0xbd4   : > { %8214 = vrot.lane.b32.xlu1 %v13441_v27, %s9648_s29  ;;  %v7448_v7 = vpop.permute.xlu0 %7447 }
 0xbd5   : > { %7517 = vst.msk [vmem:[#allocation4 + $0x1a0] sm:$0xff] %vm1158_vm6, %v7448_v7  ;;  %v8338_v7 = vld [vmem:[#allocation3 + $0x124] sm:$0xff] }
 0xbd6   : > { %v7450_v38 = vpop.permute.xlu1 %7449  ;;  %7603 = vrot.lane.b32.xlu0 %v13417_v8, %s9645_s26 }
 0xbd7   : > { %7518 = vst.msk [vmem:[#allocation4 + $0x1b0] sm:$0xff] %vm1158_vm6, %v7450_v38  ;;  %v8339_v38 = vld [vmem:[#allocation3 + $0x12c] sm:$0xff] }
 0xbd8   : > { %7605 = vrot.lane.b32.xlu1 %v13425_v46, %s9645_s26  ;;  %v7452_v58 = vpop.permute.xlu0 %7451 }
 0xbd9   : > { %7519 = vst.msk [vmem:[#allocation4 + $0x1c0] sm:$0xff] %vm1158_vm6, %v7452_v58 }
 0xbda   : > { %v7454_v13 = vpop.permute.xlu1 %7453  ;;  %8404 = vrot.lane.b32.xlu0 %v13460_v57, %s9649_s30 }
 0xbdb   : > { %7520 = vst.msk [vmem:[#allocation4 + $0x1d0] sm:$0xff] %vm1158_vm6, %v7454_v13 }
 0xbdc   : > { %8406 = vrot.lane.b32.xlu1 %v13465_v31, %s9649_s30  ;;  %v7456_v42 = vpop.permute.xlu0 %7455 }
 0xbdd   : > { %7521 = vst.msk [vmem:[#allocation4 + $0x1e0] sm:$0xff] %vm1158_vm6, %v7456_v42 }
 0xbde   : > { %v7458_v8 = vpop.permute.xlu1 %7457  ;;  %7795 = vrot.lane.b32.xlu0 %v13450_v55, %s9646_s27 }
 0xbdf   : > { %7522 = vst.msk [vmem:[#allocation4 + $0x1f0] sm:$0xff] %vm1158_vm6, %v7458_v8  ;;  %vm14544_vm6 = vmmov %vm14543_vm5 }
 0xbe0   : > { %7797 = vrot.lane.b32.xlu1 %v13455_v50, %s9646_s27  ;;  %v7588_v46 = vpop.permute.xlu0 %7587 }
 0xbe1   : > { %7683 = vst.msk [vmem:[#allocation4] sm:$0xff] %vm1351_vm7, %v7588_v46 }
 0xbe2   : > { %v7590_v57 = vpop.permute.xlu1 %7589  ;;  %8596 = vrot.lane.b32.xlu0 %v13601_v45, %s9651_s22 }
 0xbe3   : > { %7684 = vst.msk [vmem:[#allocation4 + $0x10] sm:$0xff] %vm1351_vm7, %v7590_v57 }
 0xbe4   : > { %8598 = vrot.lane.b32.xlu1 %v13606_v40, %s9651_s22  ;;  %v7592_v31 = vpop.permute.xlu0 %7591 }
 0xbe5   : > { %7685 = vst.msk [vmem:[#allocation4 + $0x20] sm:$0xff] %vm1351_vm7, %v7592_v31 }
 0xbe6   : > { %v7594_v55 = vpop.permute.xlu1 %7593  ;;  %7991 = vrot.lane.b32.xlu0 %v13601_v45, %s9647_s28 }
 0xbe7   : > { %7686 = vst.msk [vmem:[#allocation4 + $0x30] sm:$0xff] %vm1351_vm7, %v7594_v55 }
 0xbe8   : > { %7993 = vrot.lane.b32.xlu1 %v13606_v40, %s9647_s28  ;;  %v7596_v50 = vpop.permute.xlu0 %7595 }
 0xbe9   : > { %7687 = vst.msk [vmem:[#allocation4 + $0x40] sm:$0xff] %vm1351_vm7, %v7596_v50 }
 0xbea   : > { %v7972_v1 = vpop.permute.xlu1 %7971  ;;  %8216 = vrot.lane.b32.xlu0 %v13469_v41, %s9648_s29 }
 0xbeb   : > { %8068 = vst.msk [vmem:[#allocation4 + $0x8] sm:$0xff] %vm1739_vm10, %v7972_v1 }
 0xbec   : > { %8218 = vrot.lane.b32.xlu1 %v13474_v34, %s9648_s29  ;;  %v7974_v61 = vpop.permute.xlu0 %7973 }
 0xbed   : > { %8070 = vst.msk [vmem:[#allocation4 + $0x18] sm:$0xff] %vm1739_vm10, %v7974_v61 }
 0xbee   : > { %v8197_v45 = vpop.permute.xlu1 %8196  ;;  %7607 = vrot.lane.b32.xlu0 %v13433_v17, %s9645_s26  ;;  %v7725_v17 = vld [vmem:[#allocation3 + $0xdc] sm:$0xff] }
 0xbef   : > { %8292 = vst.msk [vmem:[#allocation4 + $0x8] sm:$0xff] %vm14541_vm0, %v8197_v45  ;;  %vm14555_vm0 = vmmov %vm14553_vm4 }
 0xbf0   : > { %7609 = vrot.lane.b32.xlu1 %v13441_v27, %s9645_s26  ;;  %v8199_v40 = vpop.permute.xlu0 %8198  ;;  %v7726_v27 = vld [vmem:[#allocation3 + $0xe4] sm:$0xff] }
 0xbf1   : > { %8293 = vst.msk [vmem:[#allocation4 + $0x18] sm:$0xff] %vm14542_vm3, %v8199_v40  ;;  %vm14556_vm3 = vmmov %vm14545_vm8 }
 0xbf2   : > { %v8389_v51 = vpop.permute.xlu1 %8388  ;;  %8408 = vrot.lane.b32.xlu0 %v8334_v54, %s9649_s30 }
 0xbf3   : > { %8484 = vst.msk [vmem:[#allocation4 + $0x8] sm:$0xff] %vm14543_vm5, %v8389_v51  ;;  %vm14557_vm5 = vmmov %vm14546_vm9 }
 0xbf4   : > { %8410 = vrot.lane.b32.xlu1 %v8335_v4, %s9649_s30  ;;  %v8391_v18 = vpop.permute.xlu0 %8390 }
 0xbf5   : > { %8485 = vst.msk [vmem:[#allocation4 + $0x18] sm:$0xff] %vm14544_vm6, %v8391_v18  ;;  %vm14558_vm6 = vmmov %vm14556_vm3 }
 0xbf6   : > { %v7780_v21 = vpop.permute.xlu1 %7779  ;;  %7799 = vrot.lane.b32.xlu0 %v7725_v17, %s9646_s27 }
 0xbf7   : > { %7875 = vst.msk [vmem:[#allocation4] sm:$0xff] %vm14545_vm8, %v7780_v21  ;;  %vm14559_vm8 = vmmov %vm14557_vm5 }
 0xbf8   : > { %8067 = vst.msk [vmem:[#allocation4] sm:$0xff] %vm14546_vm9, %v7972_v1  ;;  %7801 = vrot.lane.b32.xlu1 %v7726_v27, %s9646_s27  ;;  %v7782_v19 = vpop.permute.xlu0 %7781  ;;  %vm14560_vm9 = vmmov %vm14549_vm13  ;;  %v8532_v27 = vld [vmem:[#allocation3 + $0x13d] sm:$0xff] }
 0xbf9   : > { %7876 = vst.msk [vmem:[#allocation4 + $0x10] sm:$0xff] %vm14547_vm11, %v7782_v19  ;;  %vm14561_vm11 = vmmov %vm14560_vm9 }
 0xbfa   : > { %8069 = vst.msk [vmem:[#allocation4 + $0x10] sm:$0xff] %vm14548_vm12, %v7974_v61  ;;  %v8581_v2 = vpop.permute.xlu1 %8580  ;;  %8600 = vrot.lane.b32.xlu0 %v13611_v36, %s9651_s22  ;;  %vm14562_vm12 = vmmov %vm14552_vm2 }
 0xbfb   : > { %8676 = vst.msk [vmem:[#allocation4 + $0x8] sm:$0xff] %vm14549_vm13, %v8581_v2  ;;  %vm14563_vm13 = vmmov %vm14552_vm2  ;;  %v8533_v2 = vld [vmem:[#allocation3 + $0x145] sm:$0xff] }
 0xbfc   : > { %8602 = vrot.lane.b32.xlu1 %v13616_v49, %s9651_s22  ;;  %v8583_v26 = vpop.permute.xlu0 %8582 }
 0xbfd   : > { %8677 = vst.msk [vmem:[#allocation4 + $0x18] sm:$0xff] %vm14550_vm14, %v8583_v26  ;;  %vm14564_vm14 = vmmov %vm14554_vm1 }
 0xbfe   : > { %v7976_v37 = vpop.permute.xlu1 %7975  ;;  %7995 = vrot.lane.b32.xlu0 %v13611_v36, %s9647_s28 }
 0xbff   : > { %8072 = vst.msk [vmem:[#allocation4 + $0x28] sm:$0xff] %vm1739_vm10, %v7976_v37 }
 0xc00   : > { %7997 = vrot.lane.b32.xlu1 %v13616_v49, %s9647_s28  ;;  %v7978_v30 = vpop.permute.xlu0 %7977  ;;  %v8708_v49 = vld [vmem:[#allocation4] sm:$0xff] }
 0xc01   : > { %8074 = vst.msk [vmem:[#allocation4 + $0x38] sm:$0xff] %vm1739_vm10, %v7978_v30  ;;  %v8710_v53 = vld [vmem:[#allocation4 + $0x10] sm:$0xff] }
 0xc02   : > { %v8201_v32 = vpop.permute.xlu1 %8200  ;;  %8220 = vrot.lane.b32.xlu0 %v13479_v0, %s9648_s29  ;;  %v8709_v36 = vld [vmem:[#allocation4 + $0x8] sm:$0xff]  ;;  %v8772_v23 = vpack.c.bf16 %v8710_v53, %v8708_v49  ;;  %v14017_v49 = vld [vmem:[#allocation3 + $0x153] sm:$0xff] }
 0xc03   : > { %8294 = vst.msk [vmem:[#allocation4 + $0x28] sm:$0xff] %vm14551_vm15, %v8201_v32  ;;  %vm14565_vm15 = vmmov %vm14555_vm0 }
 0xc04   : > { %8222 = vrot.lane.b32.xlu1 %v13484_v15, %s9648_s29  ;;  %v8203_v43 = vpop.permute.xlu0 %8202  ;;  %v8711_v12 = vld [vmem:[#allocation4 + $0x18] sm:$0xff] }
 0xc05   : > { %8295 = vst.msk [vmem:[#allocation4 + $0x38] sm:$0xff] %vm14552_vm2, %v8203_v43  ;;  %v8773_v48 = vpack.c.bf16 %v8711_v12, %v8709_v36  ;;  %vm14566_vm2 = vmmov %vm14555_vm0 }
 0xc06   : > { %v8393_v24 = vpop.permute.xlu1 %8392  ;;  %7611 = vrot.lane.b32.xlu0 %v13469_v41, %s9645_s26 }
 0xc07   : > { %8486 = vst.msk [vmem:[#allocation4 + $0x28] sm:$0xff] %vm14553_vm4, %v8393_v24  ;;  %9403 = vmatprep.mubr.msk.bf16.mxu1 %vm14554_vm1, %v8773_v48  ;;  %vm14567_vm4 = vmmov %vm14556_vm3 }
 0xc08   : > { %7613 = vrot.lane.b32.xlu1 %v13474_v34, %s9645_s26  ;;  %9003 = vmatmul.mubr.bf16.vlgmr.msra.gmra.mrb[40].mxu1 %v8772_v23  ;;  %v8395_v47 = vpop.permute.xlu0 %8394  ;;  %vm14568_vm1 = vmmov %vm14557_vm5  ;;  %v8151_v23 = vld [vmem:[#allocation3 + $0x15b] sm:$0xff] }
 0xc09   : > { %8487 = vst.msk [vmem:[#allocation4 + $0x38] sm:$0xff] %vm14555_vm0, %v8395_v47  ;;  %vm14569_vm0 = vmmov %vm14556_vm3 }
 0xc0a   : > { %v7784_v29 = vpop.permute.xlu1 %7783  ;;  %8412 = vrot.lane.b32.xlu0 %v8336_v56, %s9649_s30 }
 0xc0b   : > { %7877 = vst.msk [vmem:[#allocation4 + $0x20] sm:$0xff] %vm14556_vm3, %v7784_v29  ;;  %vm14570_vm3 = vmmov %vm14568_vm1 }
 0xc0c   : > { %8071 = vst.msk [vmem:[#allocation4 + $0x20] sm:$0xff] %vm14557_vm5, %v7976_v37  ;;  %8414 = vrot.lane.b32.xlu1 %v8337_v6, %s9649_s30  ;;  %v7786_v41 = vpop.permute.xlu0 %7785  ;;  %vm14571_vm5 = vmmov %vm14560_vm9 }
 0xc0d   : > { %7878 = vst.msk [vmem:[#allocation4 + $0x30] sm:$0xff] %vm14558_vm6, %v7786_v41  ;;  %vm14572_vm6 = vmmov %vm14571_vm5 }
 0xc0e   : > { %8073 = vst.msk [vmem:[#allocation4 + $0x30] sm:$0xff] %vm14559_vm8, %v7978_v30  ;;  %v8585_v34 = vpop.permute.xlu1 %8584  ;;  %7803 = vrot.lane.b32.xlu0 %v8334_v54, %s9646_s27  ;;  %vm14573_vm8 = vmmov %vm14562_vm12  ;;  %v7540_v54 = vld [vmem:[#allocation3 + $0x12b] sm:$0xff] }
 0xc0f   : > { %8678 = vst.msk [vmem:[#allocation4 + $0x28] sm:$0xff] %vm14560_vm9, %v8585_v34  ;;  %vm14574_vm9 = vmmov %vm14573_vm8  ;;  %v8342_v34 = vld [vmem:[#allocation3 + $0x154] sm:$0xff] }
 0xc10   : > { %7805 = vrot.lane.b32.xlu1 %v8335_v4, %s9646_s27  ;;  %v8587_v3 = vpop.permute.xlu0 %8586  ;;  %v8341_v4 = vld [vmem:[#allocation3 + $0x144] sm:$0xff] }
 0xc11   : > { %8679 = vst.msk [vmem:[#allocation4 + $0x38] sm:$0xff] %vm14561_vm11, %v8587_v3  ;;  %vm14575_vm11 = vmmov %vm14564_vm14 }
 0xc12   : > { %v7980_v14 = vpop.permute.xlu1 %7979  ;;  %8604 = vrot.lane.b32.xlu0 %v13621_v25, %s9651_s22 }
 0xc13   : > { %8076 = vst.msk [vmem:[#allocation4 + $0x48] sm:$0xff] %vm1739_vm10, %v7980_v14  ;;  %v8712_v44 = vld [vmem:[#allocation4 + $0x20] sm:$0xff] }
 0xc14   : > { %8606 = vrot.lane.b32.xlu1 %v13625_v11, %s9651_s22  ;;  %v7982_v35 = vpop.permute.xlu0 %7981 }
 0xc15   : > { %8078 = vst.msk [vmem:[#allocation4 + $0x58] sm:$0xff] %vm1739_vm10, %v7982_v35  ;;  %v8714_v62 = vld [vmem:[#allocation4 + $0x30] sm:$0xff] }
 0xc16   : > { %v8205_v59 = vpop.permute.xlu1 %8204  ;;  %7999 = vrot.lane.b32.xlu0 %v13621_v25, %s9647_s28  ;;  %v8713_v16 = vld [vmem:[#allocation4 + $0x28] sm:$0xff]  ;;  %v8774_v9 = vpack.c.bf16 %v8714_v62, %v8712_v44 }
 0xc17   : > { %8296 = vst.msk [vmem:[#allocation4 + $0x48] sm:$0xff] %vm14562_vm12, %v8205_v59  ;;  %vm14576_vm12 = vmmov %vm14566_vm2 }
 0xc18   : > { %8001 = vrot.lane.b32.xlu1 %v13625_v11, %s9647_s28  ;;  %v8207_v28 = vpop.permute.xlu0 %8206  ;;  %v8715_v63 = vld [vmem:[#allocation4 + $0x38] sm:$0xff] }
 0xc19   : > { %8297 = vst.msk [vmem:[#allocation4 + $0x58] sm:$0xff] %vm14563_vm13, %v8207_v28  ;;  %v8775_v60 = vpack.c.bf16 %v8715_v63, %v8713_v16  ;;  %vm14577_vm13 = vmmov %vm14566_vm2  ;;  %v8534_v28 = vld [vmem:[#allocation3 + $0x155] sm:$0xff]  ;;  %v8535_v63 = vld [vmem:[#allocation3 + $0x15d] sm:$0xff] }
 0xc1a   : > { %v7598_v22 = vpop.permute.xlu1 %7597  ;;  %8224 = vrot.lane.b32.xlu0 %v13493_v33, %s9648_s29 }
 0xc1b   : > { %7688 = vst.msk [vmem:[#allocation4 + $0x50] sm:$0xff] %vm1351_vm7, %v7598_v22  ;;  %9404 = vmatprep.mubr.msk.bf16.mxu1 %vm14564_vm14, %v8775_v60  ;;  %vm14578_vm14 = vmmov %vm14569_vm0 }
 0xc1c   : > { %8226 = vrot.lane.b32.xlu1 %v13499_v10, %s9648_s29  ;;  %9011 = vmatmul.mubr.bf16.gmra.mrb[44].mxu1 %v8774_v9  ;;  %v8397_v25 = vpop.permute.xlu0 %8396 }
 0xc1d   : > { %8488 = vst.msk [vmem:[#allocation4 + $0x48] sm:$0xff] %vm14565_vm15, %v8397_v25  ;;  %vm14579_vm15 = vmmov %vm14568_vm1 }
 0xc1e   : > { %v8399_v11 = vpop.permute.xlu1 %8398  ;;  %7615 = vrot.lane.b32.xlu0 %v13479_v0, %s9645_s26 }
 0xc1f   : > { %8489 = vst.msk [vmem:[#allocation4 + $0x58] sm:$0xff] %vm14566_vm2, %v8399_v11  ;;  %vm14580_vm2 = vmmov %vm14569_vm0 }
 0xc20   : > { %7617 = vrot.lane.b32.xlu1 %v13484_v15, %s9645_s26  ;;  %v7788_v33 = vpop.permute.xlu0 %7787 }
 0xc21   : > { %7879 = vst.msk [vmem:[#allocation4 + $0x40] sm:$0xff] %vm14567_vm4, %v7788_v33  ;;  %vm14581_vm4 = vmmov %vm14568_vm1 }
 0xc22   : > { %8075 = vst.msk [vmem:[#allocation4 + $0x40] sm:$0xff] %vm14568_vm1, %v7980_v14  ;;  %v7790_v10 = vpop.permute.xlu1 %7789  ;;  %8416 = vrot.lane.b32.xlu0 %v8338_v7, %s9649_s30  ;;  %vm14582_vm1 = vmmov %vm14571_vm5  ;;  %v8343_v14 = vld [vmem:[#allocation3 + $0x15c] sm:$0xff] }
 0xc23   : > { %7880 = vst.msk [vmem:[#allocation4 + $0x50] sm:$0xff] %vm14569_vm0, %v7790_v10  ;;  %vm14583_vm0 = vmmov %vm14582_vm1 }
 0xc24   : > { %8077 = vst.msk [vmem:[#allocation4 + $0x50] sm:$0xff] %vm14570_vm3, %v7982_v35  ;;  %8418 = vrot.lane.b32.xlu1 %v8339_v38, %s9649_s30  ;;  %v8589_v0 = vpop.permute.xlu0 %8588  ;;  %vm14584_vm3 = vmmov %vm14573_vm8 }
 0xc25   : > { %8680 = vst.msk [vmem:[#allocation4 + $0x48] sm:$0xff] %vm14571_vm5, %v8589_v0  ;;  %vm14585_vm5 = vmmov %vm14584_vm3 }
 0xc26   : > { %v8591_v15 = vpop.permute.xlu1 %8590  ;;  %7807 = vrot.lane.b32.xlu0 %v8336_v56, %s9646_s27  ;;  %v7541_v56 = vld [vmem:[#allocation3 + $0x13b] sm:$0xff] }
 0xc27   : > { %8681 = vst.msk [vmem:[#allocation4 + $0x58] sm:$0xff] %vm14572_vm6, %v8591_v15  ;;  %vm14586_vm6 = vmmov %vm14575_vm11  ;;  %v8153_v15 = vld [vmem:[#allocation3 + $0x173] sm:$0xff] }
 0xc28   : > { %7809 = vrot.lane.b32.xlu1 %v8337_v6, %s9646_s27  ;;  %v7984_v58 = vpop.permute.xlu0 %7983  ;;  %v7542_v6 = vld [vmem:[#allocation3 + $0x143] sm:$0xff] }
 0xc29   : > { %8080 = vst.msk [vmem:[#allocation4 + $0x68] sm:$0xff] %vm1739_vm10, %v7984_v58  ;;  %v8716_v50 = vld [vmem:[#allocation4 + $0x40] sm:$0xff] }
 0xc2a   : > { %v7986_v13 = vpop.permute.xlu1 %7985  ;;  %8608 = vrot.lane.b32.xlu0 %v13629_v52, %s9651_s22 }
 0xc2b   : > { %8082 = vst.msk [vmem:[#allocation4 + $0x78] sm:$0xff] %vm1739_vm10, %v7986_v13  ;;  %v8718_v8 = vld [vmem:[#allocation4 + $0x50] sm:$0xff] }
 0xc2c   : > { %8610 = vrot.lane.b32.xlu1 %v13636_v20, %s9651_s22  ;;  %v8209_v42 = vpop.permute.xlu0 %8208  ;;  %v8717_v57 = vld [vmem:[#allocation4 + $0x48] sm:$0xff]  ;;  %v8776_v61 = vpack.c.bf16 %v8718_v8, %v8716_v50 }
 0xc2d   : > { %8298 = vst.msk [vmem:[#allocation4 + $0x68] sm:$0xff] %vm14573_vm8, %v8209_v42  ;;  %vm14587_vm8 = vmmov %vm14576_vm12  ;;  %v8344_v8 = vld [vmem:[#allocation3 + $0x16c] sm:$0xff] }
 0xc2e   : > { %v8211_v46 = vpop.permute.xlu1 %8210  ;;  %8003 = vrot.lane.b32.xlu0 %v13629_v52, %s9647_s28  ;;  %v8719_v31 = vld [vmem:[#allocation4 + $0x58] sm:$0xff] }
 0xc2f   : > { %8299 = vst.msk [vmem:[#allocation4 + $0x78] sm:$0xff] %vm14574_vm9, %v8211_v46  ;;  %v8777_v55 = vpack.c.bf16 %v8719_v31, %v8717_v57  ;;  %vm14588_vm9 = vmmov %vm14587_vm8  ;;  %v8345_v57 = vld [vmem:[#allocation3 + $0x174] sm:$0xff] }
 0xc30   : > { %8005 = vrot.lane.b32.xlu1 %v13636_v20, %s9647_s28  ;;  %v7600_v1 = vpop.permute.xlu0 %7599  ;;  %v7539_v20 = vld [vmem:[#allocation3 + $0x123] sm:$0xff] }
 0xc31   : > { %7689 = vst.msk [vmem:[#allocation4 + $0x60] sm:$0xff] %vm1351_vm7, %v7600_v1  ;;  %9405 = vmatprep.mubr.msk.bf16.mxu1 %vm14575_vm11, %v8777_v55  ;;  %vm14589_vm11 = vmmov %vm14580_vm2  ;;  %v8536_v1 = vld [vmem:[#allocation3 + $0x16d] sm:$0xff] }
 0xc32   : > { %v7602_v45 = vpop.permute.xlu1 %7601  ;;  %8228 = vrot.lane.b32.xlu0 %v13503_v39, %s9648_s29  ;;  %9019 = vmatmul.mubr.bf16.gmra.mrb[48].mxu1 %v8776_v61  ;;  %v13995_v39 = vld [vmem:[#allocation3 + $0x13c] sm:$0xff] }
 0xc33   : > { %7690 = vst.msk [vmem:[#allocation4 + $0x70] sm:$0xff] %vm1351_vm7, %v7602_v45  ;;  %v8537_v45 = vld [vmem:[#allocation3 + $0x175] sm:$0xff] }
 0xc34   : > { %8230 = vrot.lane.b32.xlu1 %v13509_v5, %s9648_s29  ;;  %v8401_v52 = vpop.permute.xlu0 %8400 }
 0xc35   : > { %8490 = vst.msk [vmem:[#allocation4 + $0x68] sm:$0xff] %vm14576_vm12, %v8401_v52  ;;  %vm14590_vm12 = vmmov %vm14581_vm4 }
 0xc36   : > { %v8403_v40 = vpop.permute.xlu1 %8402  ;;  %7619 = vrot.lane.b32.xlu0 %v7539_v20, %s9645_s26 }
 0xc37   : > { %8491 = vst.msk [vmem:[#allocation4 + $0x78] sm:$0xff] %vm14577_vm13, %v8403_v40  ;;  %vm14591_vm13 = vmmov %vm14580_vm2 }
 0xc38   : > { %7621 = vrot.lane.b32.xlu1 %v7540_v54, %s9645_s26  ;;  %v7792_v51 = vpop.permute.xlu0 %7791 }
 0xc39   : > { %7881 = vst.msk [vmem:[#allocation4 + $0x60] sm:$0xff] %vm14578_vm14, %v7792_v51  ;;  %vm14592_vm14 = vmmov %vm14581_vm4 }
 0xc3a   : > { %8079 = vst.msk [vmem:[#allocation4 + $0x60] sm:$0xff] %vm14579_vm15, %v7984_v58  ;;  %v7794_v5 = vpop.permute.xlu1 %7793  ;;  %8420 = vrot.lane.b32.xlu0 %v13995_v39, %s9649_s30  ;;  %vm14593_vm15 = vmmov %vm14583_vm0 }
 0xc3b   : > { %7882 = vst.msk [vmem:[#allocation4 + $0x70] sm:$0xff] %vm14580_vm2, %v7794_v5  ;;  %vm14594_vm2 = vmmov %vm14583_vm0 }
 0xc3c   : > { %8081 = vst.msk [vmem:[#allocation4 + $0x70] sm:$0xff] %vm14581_vm4, %v7986_v13  ;;  %8422 = vrot.lane.b32.xlu1 %v8341_v4, %s9649_s30  ;;  %v8593_v18 = vpop.permute.xlu0 %8592  ;;  %vm14595_vm4 = vmmov %vm14584_vm3 }
 0xc3d   : > { %8682 = vst.msk [vmem:[#allocation4 + $0x68] sm:$0xff] %vm14582_vm1, %v8593_v18  ;;  %vm14596_vm1 = vmmov %vm14584_vm3 }
 0xc3e   : > { %v8595_v17 = vpop.permute.xlu1 %8594  ;;  %7811 = vrot.lane.b32.xlu0 %v8338_v7, %s9646_s27 }
 0xc3f   : > { %8683 = vst.msk [vmem:[#allocation4 + $0x78] sm:$0xff] %vm14583_vm0, %v8595_v17  ;;  %vm14597_vm0 = vmmov %vm14586_vm6  ;;  %v8154_v17 = vld [vmem:[#allocation3 + $0x183] sm:$0xff] }
 0xc40   : > { %7813 = vrot.lane.b32.xlu1 %v8339_v38, %s9646_s27  ;;  %v7988_v21 = vpop.permute.xlu0 %7987  ;;  %v8152_v38 = vld [vmem:[#allocation3 + $0x16b] sm:$0xff] }
 0xc41   : > { %8084 = vst.msk [vmem:[#allocation4 + $0x88] sm:$0xff] %vm1739_vm10, %v7988_v21  ;;  %v8720_v36 = vld [vmem:[#allocation4 + $0x60] sm:$0xff] }
 0xc42   : > { %v7990_v19 = vpop.permute.xlu1 %7989  ;;  %8612 = vrot.lane.b32.xlu0 %v8532_v27, %s9651_s22 }
 0xc43   : > { %8086 = vst.msk [vmem:[#allocation4 + $0x98] sm:$0xff] %vm1739_vm10, %v7990_v19  ;;  %v8722_v37 = vld [vmem:[#allocation4 + $0x70] sm:$0xff] }
 0xc44   : > { %8614 = vrot.lane.b32.xlu1 %v8533_v2, %s9651_s22  ;;  %v8213_v26 = vpop.permute.xlu0 %8212  ;;  %v8721_v32 = vld [vmem:[#allocation4 + $0x68] sm:$0xff]  ;;  %v8778_v48 = vpack.c.bf16 %v8722_v37, %v8720_v36 }
 0xc45   : > { %8300 = vst.msk [vmem:[#allocation4 + $0x88] sm:$0xff] %vm14584_vm3, %v8213_v26  ;;  %vm14598_vm3 = vmmov %vm14587_vm8  ;;  %v8346_v37 = vld [vmem:[#allocation3 + $0x184] sm:$0xff] }
 0xc46   : > { %v8215_v30 = vpop.permute.xlu1 %8214  ;;  %8007 = vrot.lane.b32.xlu0 %v8532_v27, %s9647_s28  ;;  %v8723_v53 = vld [vmem:[#allocation4 + $0x78] sm:$0xff]  ;;  %v8155_v27 = vld [vmem:[#allocation3 + $0x18b] sm:$0xff] }
 0xc47   : > { %8301 = vst.msk [vmem:[#allocation4 + $0x98] sm:$0xff] %vm14585_vm5, %v8215_v30  ;;  %v8779_v43 = vpack.c.bf16 %v8723_v53, %v8721_v32  ;;  %vm14599_vm5 = vmmov %vm14598_vm3  ;;  %v8347_v32 = vld [vmem:[#allocation3 + $0x18c] sm:$0xff] }
 0xc48   : > { %8009 = vrot.lane.b32.xlu1 %v8533_v2, %s9647_s28  ;;  %v7604_v12 = vpop.permute.xlu0 %7603 }
 0xc49   : > { %7691 = vst.msk [vmem:[#allocation4 + $0x80] sm:$0xff] %vm1351_vm7, %v7604_v12  ;;  %9406 = vmatprep.mubr.msk.bf16.mxu1 %vm14586_vm6, %v8779_v43  ;;  %vm14600_vm6 = vmmov %vm14589_vm11  ;;  %v8538_v12 = vld [vmem:[#allocation3 + $0x185] sm:$0xff] }
 0xc4a   : > { %v7606_v24 = vpop.permute.xlu1 %7605  ;;  %8232 = vrot.lane.b32.xlu0 %v14017_v49, %s9648_s29  ;;  %9027 = vmatmul.mubr.bf16.gmra.mrb[52].mxu1 %v8778_v48 }
 0xc4b   : > { %7692 = vst.msk [vmem:[#allocation4 + $0x90] sm:$0xff] %vm1351_vm7, %v7606_v24 }
 0xc4c   : > { %8234 = vrot.lane.b32.xlu1 %v8151_v23, %s9648_s29  ;;  %v8405_v47 = vpop.permute.xlu0 %8404 }
 0xc4d   : > { %8492 = vst.msk [vmem:[#allocation4 + $0x88] sm:$0xff] %vm14587_vm8, %v8405_v47  ;;  %vm14601_vm8 = vmmov %vm14590_vm12 }
 0xc4e   : > { %v8407_v29 = vpop.permute.xlu1 %8406  ;;  %7623 = vrot.lane.b32.xlu0 %v7541_v56, %s9645_s26 }
 0xc4f   : > { %8493 = vst.msk [vmem:[#allocation4 + $0x98] sm:$0xff] %vm14588_vm9, %v8407_v29  ;;  %vm14602_vm9 = vmmov %vm14600_vm6 }
 0xc50   : > { %7625 = vrot.lane.b32.xlu1 %v7542_v6, %s9645_s26  ;;  %v7796_v41 = vpop.permute.xlu0 %7795 }
 0xc51   : > { %7883 = vst.msk [vmem:[#allocation4 + $0x80] sm:$0xff] %vm14589_vm11, %v7796_v41  ;;  %vm14603_vm11 = vmmov %vm14601_vm8 }
 0xc52   : > { %8083 = vst.msk [vmem:[#allocation4 + $0x80] sm:$0xff] %vm14590_vm12, %v7988_v21  ;;  %v7798_v3 = vpop.permute.xlu1 %7797  ;;  %8424 = vrot.lane.b32.xlu0 %v8342_v34, %s9649_s30  ;;  %vm14604_vm12 = vmmov %vm14594_vm2 }
 0xc53   : > { %7884 = vst.msk [vmem:[#allocation4 + $0x90] sm:$0xff] %vm14591_vm13, %v7798_v3  ;;  %vm14605_vm13 = vmmov %vm14594_vm2 }
 0xc54   : > { %8085 = vst.msk [vmem:[#allocation4 + $0x90] sm:$0xff] %vm14592_vm14, %v7990_v19  ;;  %8426 = vrot.lane.b32.xlu1 %v8343_v14, %s9649_s30  ;;  %v8597_v35 = vpop.permute.xlu0 %8596  ;;  %vm14606_vm14 = vmmov %vm14596_vm1 }
 0xc55   : > { %8684 = vst.msk [vmem:[#allocation4 + $0x88] sm:$0xff] %vm14593_vm15, %v8597_v35  ;;  %vm14607_vm15 = vmmov %vm14596_vm1 }
 0xc56   : > { %v8599_v59 = vpop.permute.xlu1 %8598  ;;  %7815 = vrot.lane.b32.xlu0 %v13995_v39, %s9646_s27 }
 0xc57   : > { %8685 = vst.msk [vmem:[#allocation4 + $0x98] sm:$0xff] %vm14594_vm2, %v8599_v59  ;;  %vm14608_vm2 = vmmov %vm14597_vm0  ;;  %v8157_v59 = vld [vmem:[#allocation3 + $0x1a3] sm:$0xff] }
 0xc58   : > { %7817 = vrot.lane.b32.xlu1 %v8341_v4, %s9646_s27  ;;  %v7992_v62 = vpop.permute.xlu0 %7991 }
 0xc59   : > { %8088 = vst.msk [vmem:[#allocation4 + $0xa8] sm:$0xff] %vm1739_vm10, %v7992_v62  ;;  %v8724_v33 = vld [vmem:[#allocation4 + $0x80] sm:$0xff] }
 0xc5a   : > { %v7994_v16 = vpop.permute.xlu1 %7993  ;;  %8616 = vrot.lane.b32.xlu0 %v8534_v28, %s9651_s22 }
 0xc5b   : > { %8090 = vst.msk [vmem:[#allocation4 + $0xb8] sm:$0xff] %vm1739_vm10, %v7994_v16  ;;  %v8726_v44 = vld [vmem:[#allocation4 + $0x90] sm:$0xff] }
 0xc5c   : > { %8618 = vrot.lane.b32.xlu1 %v8535_v63, %s9651_s22  ;;  %v8217_v60 = vpop.permute.xlu0 %8216  ;;  %v8725_v9 = vld [vmem:[#allocation4 + $0x88] sm:$0xff]  ;;  %v8780_v10 = vpack.c.bf16 %v8726_v44, %v8724_v33 }
 0xc5d   : > { %8302 = vst.msk [vmem:[#allocation4 + $0xa8] sm:$0xff] %vm14595_vm4, %v8217_v60  ;;  %vm14609_vm4 = vmmov %vm14598_vm3  ;;  %v8349_v44 = vld [vmem:[#allocation3 + $0x1a4] sm:$0xff] }
 0xc5e   : > { %v8219_v22 = vpop.permute.xlu1 %8218  ;;  %8011 = vrot.lane.b32.xlu0 %v8534_v28, %s9647_s28  ;;  %v8727_v25 = vld [vmem:[#allocation4 + $0x98] sm:$0xff] }
 0xc5f   : > { %8303 = vst.msk [vmem:[#allocation4 + $0xb8] sm:$0xff] %vm14596_vm1, %v8219_v22  ;;  %v8781_v11 = vpack.c.bf16 %v8727_v25, %v8725_v9  ;;  %vm14610_vm1 = vmmov %vm14598_vm3 }
 0xc60   : > { %8013 = vrot.lane.b32.xlu1 %v8535_v63, %s9647_s28  ;;  %v7608_v7 = vpop.permute.xlu0 %7607  ;;  %v8348_v63 = vld [vmem:[#allocation3 + $0x19c] sm:$0xff] }
 0xc61   : > { %7693 = vst.msk [vmem:[#allocation4 + $0xa0] sm:$0xff] %vm1351_vm7, %v7608_v7  ;;  %9407 = vmatprep.mubr.msk.bf16.mxu1 %vm14597_vm0, %v8781_v11  ;;  %vm14611_vm0 = vmmov %vm14600_vm6  ;;  %v8540_v11 = vld [vmem:[#allocation3 + $0x19d] sm:$0xff]  ;;  %v8541_v7 = vld [vmem:[#allocation3 + $0x1a5] sm:$0xff] }
 0xc62   : > { %v7610_v0 = vpop.permute.xlu1 %7609  ;;  %8236 = vrot.lane.b32.xlu0 %v8152_v38, %s9648_s29  ;;  %9035 = vmatmul.mubr.bf16.gmra.mrb[56].mxu1 %v8780_v10 }
 0xc63   : > { %7694 = vst.msk [vmem:[#allocation4 + $0xb0] sm:$0xff] %vm1351_vm7, %v7610_v0 }
 0xc64   : > { %8238 = vrot.lane.b32.xlu1 %v8153_v15, %s9648_s29  ;;  %v8409_v58 = vpop.permute.xlu0 %8408 }
 0xc65   : > { %8494 = vst.msk [vmem:[#allocation4 + $0xa8] sm:$0xff] %vm14598_vm3, %v8409_v58  ;;  %vm14612_vm3 = vmmov %vm14601_vm8 }
 0xc66   : > { %v8411_v13 = vpop.permute.xlu1 %8410  ;;  %7627 = vrot.lane.b32.xlu0 %v14017_v49, %s9645_s26  ;;  %v8539_v49 = vld [vmem:[#allocation3 + $0x18d] sm:$0xff] }
 0xc67   : > { %8495 = vst.msk [vmem:[#allocation4 + $0xb8] sm:$0xff] %vm14599_vm5, %v8411_v13  ;;  %vm14613_vm5 = vmmov %vm14611_vm0 }
 0xc68   : > { %7629 = vrot.lane.b32.xlu1 %v8151_v23, %s9645_s26  ;;  %v7800_v42 = vpop.permute.xlu0 %7799 }
 0xc69   : > { %7885 = vst.msk [vmem:[#allocation4 + $0xa0] sm:$0xff] %vm14600_vm6, %v7800_v42  ;;  %vm14614_vm6 = vmmov %vm14612_vm3 }
 0xc6a   : > { %8087 = vst.msk [vmem:[#allocation4 + $0xa0] sm:$0xff] %vm14601_vm8, %v7992_v62  ;;  %v7802_v46 = vpop.permute.xlu1 %7801  ;;  %8428 = vrot.lane.b32.xlu0 %v8344_v8, %s9649_s30  ;;  %vm14615_vm8 = vmmov %vm14604_vm12 }
 0xc6b   : > { %7886 = vst.msk [vmem:[#allocation4 + $0xb0] sm:$0xff] %vm14602_vm9, %v7802_v46  ;;  %vm14616_vm9 = vmmov %vm14615_vm8 }
 0xc6c   : > { %8089 = vst.msk [vmem:[#allocation4 + $0xb0] sm:$0xff] %vm14603_vm11, %v7994_v16  ;;  %8430 = vrot.lane.b32.xlu1 %v8345_v57, %s9649_s30  ;;  %v8601_v31 = vpop.permute.xlu0 %8600  ;;  %vm14617_vm11 = vmmov %vm14606_vm14 }
 0xc6d   : > { %8686 = vst.msk [vmem:[#allocation4 + $0xa8] sm:$0xff] %vm14604_vm12, %v8601_v31  ;;  %vm14618_vm12 = vmmov %vm14617_vm11 }
 0xc6e   : > { %v8603_v55 = vpop.permute.xlu1 %8602  ;;  %7819 = vrot.lane.b32.xlu0 %v8342_v34, %s9646_s27 }
 0xc6f   : > { %8687 = vst.msk [vmem:[#allocation4 + $0xb8] sm:$0xff] %vm14605_vm13, %v8603_v55  ;;  %vm14619_vm13 = vmmov %vm14608_vm2  ;;  %v8159_v55 = vld [vmem:[#allocation3 + $0x1bb] sm:$0xff] }
 0xc70   : > { %7821 = vrot.lane.b32.xlu1 %v8343_v14, %s9646_s27  ;;  %v7996_v50 = vpop.permute.xlu0 %7995  ;;  %v8156_v14 = vld [vmem:[#allocation3 + $0x19b] sm:$0xff] }
 0xc71   : > { %8092 = vst.msk [vmem:[#allocation4 + $0xc8] sm:$0xff] %vm1739_vm10, %v7996_v50  ;;  %v8728_v5 = vld [vmem:[#allocation4 + $0xa0] sm:$0xff] }
 0xc72   : > { %v7998_v61 = vpop.permute.xlu1 %7997  ;;  %8620 = vrot.lane.b32.xlu0 %v8536_v1, %s9651_s22 }
 0xc73   : > { %8094 = vst.msk [vmem:[#allocation4 + $0xd8] sm:$0xff] %vm1739_vm10, %v7998_v61  ;;  %v8730_v20 = vld [vmem:[#allocation4 + $0xb0] sm:$0xff] }
 0xc74   : > { %8622 = vrot.lane.b32.xlu1 %v8537_v45, %s9651_s22  ;;  %v8221_v52 = vpop.permute.xlu0 %8220  ;;  %v8729_v54 = vld [vmem:[#allocation4 + $0xa8] sm:$0xff]  ;;  %v8782_v18 = vpack.c.bf16 %v8730_v20, %v8728_v5  ;;  %v8351_v20 = vld [vmem:[#allocation3 + $0x1bc] sm:$0xff] }
 0xc75   : > { %8304 = vst.msk [vmem:[#allocation4 + $0xc8] sm:$0xff] %vm14606_vm14, %v8221_v52  ;;  %vm14620_vm14 = vmmov %vm14610_vm1 }
 0xc76   : > { %v8223_v40 = vpop.permute.xlu1 %8222  ;;  %8015 = vrot.lane.b32.xlu0 %v8536_v1, %s9647_s28  ;;  %v8731_v51 = vld [vmem:[#allocation4 + $0xb8] sm:$0xff] }
 0xc77   : > { %8305 = vst.msk [vmem:[#allocation4 + $0xd8] sm:$0xff] %vm14607_vm15, %v8223_v40  ;;  %v8783_v39 = vpack.c.bf16 %v8731_v51, %v8729_v54  ;;  %vm14621_vm15 = vmmov %vm14610_vm1 }
 0xc78   : > { %8017 = vrot.lane.b32.xlu1 %v8537_v45, %s9647_s28  ;;  %v7612_v4 = vpop.permute.xlu0 %7611  ;;  %v8350_v45 = vld [vmem:[#allocation3 + $0x1b4] sm:$0xff] }
 0xc79   : > { %7695 = vst.msk [vmem:[#allocation4 + $0xc0] sm:$0xff] %vm1351_vm7, %v7612_v4  ;;  %9408 = vmatprep.mubr.msk.bf16.mxu1 %vm14608_vm2, %v8783_v39  ;;  %vm14622_vm2 = vmmov %vm14611_vm0  ;;  %v8542_v39 = vld [vmem:[#allocation3 + $0x1b5] sm:$0xff]  ;;  %v8543_v4 = vld [vmem:[#allocation3 + $0x1bd] sm:$0xff] }
 0xc7a   : > { %v7614_v21 = vpop.permute.xlu1 %7613  ;;  %8240 = vrot.lane.b32.xlu0 %v8154_v17, %s9648_s29  ;;  %9043 = vmatmul.mubr.bf16.gmra.mrb[60].mxu1 %v8782_v18 }
 0xc7b   : > { %7696 = vst.msk [vmem:[#allocation4 + $0xd0] sm:$0xff] %vm1351_vm7, %v7614_v21 }
 0xc7c   : > { %8242 = vrot.lane.b32.xlu1 %v8155_v27, %s9648_s29  ;;  %v8413_v19 = vpop.permute.xlu0 %8412 }
 0xc7d   : > { %8496 = vst.msk [vmem:[#allocation4 + $0xc8] sm:$0xff] %vm14609_vm4, %v8413_v19  ;;  %vm14623_vm4 = vmmov %vm14612_vm3 }
 0xc7e   : > { %v8415_v2 = vpop.permute.xlu1 %8414  ;;  %7631 = vrot.lane.b32.xlu0 %v8152_v38, %s9645_s26 }
 0xc7f   : > { %8497 = vst.msk [vmem:[#allocation4 + $0xd8] sm:$0xff] %vm14610_vm1, %v8415_v2  ;;  %vm14624_vm1 = vmmov %vm14611_vm0 }
 0xc80   : > { %7633 = vrot.lane.b32.xlu1 %v8153_v15, %s9645_s26  ;;  %v7804_v26 = vpop.permute.xlu0 %7803 }
 0xc81   : > { %7887 = vst.msk [vmem:[#allocation4 + $0xc0] sm:$0xff] %vm14611_vm0, %v7804_v26  ;;  %vm14625_vm0 = vmmov %vm14612_vm3 }
 0xc82   : > { %8091 = vst.msk [vmem:[#allocation4 + $0xc0] sm:$0xff] %vm14612_vm3, %v7996_v50  ;;  %v7806_v30 = vpop.permute.xlu1 %7805  ;;  %8432 = vrot.lane.b32.xlu0 %v8346_v37, %s9649_s30  ;;  %vm14626_vm3 = vmmov %vm14615_vm8 }
 0xc83   : > { %7888 = vst.msk [vmem:[#allocation4 + $0xd0] sm:$0xff] %vm14613_vm5, %v7806_v30  ;;  %vm14627_vm5 = vmmov %vm14626_vm3 }
 0xc84   : > { %8093 = vst.msk [vmem:[#allocation4 + $0xd0] sm:$0xff] %vm14614_vm6, %v7998_v61  ;;  %8434 = vrot.lane.b32.xlu1 %v8347_v32, %s9649_s30  ;;  %v8605_v53 = vpop.permute.xlu0 %8604  ;;  %vm14628_vm6 = vmmov %vm14617_vm11 }
 0xc85   : > { %8688 = vst.msk [vmem:[#allocation4 + $0xc8] sm:$0xff] %vm14615_vm8, %v8605_v53  ;;  %vm14629_vm8 = vmmov %vm14628_vm6 }
 0xc86   : > { %v8607_v43 = vpop.permute.xlu1 %8606  ;;  %7823 = vrot.lane.b32.xlu0 %v8344_v8, %s9646_s27 }
 0xc87   : > { %8689 = vst.msk [vmem:[#allocation4 + $0xd8] sm:$0xff] %vm14616_vm9, %v8607_v43  ;;  %vm14630_vm9 = vmmov %vm14619_vm13  ;;  %v14162_v43 = vld [vmem:[#allocation3 + $0x1d3] sm:$0xff] }
 0xc88   : > { %7825 = vrot.lane.b32.xlu1 %v8345_v57, %s9646_s27  ;;  %v8000_v36 = vpop.permute.xlu0 %7999  ;;  %v8158_v57 = vld [vmem:[#allocation3 + $0x1b3] sm:$0xff] }
 0xc89   : > { %8096 = vst.msk [vmem:[#allocation4 + $0xe8] sm:$0xff] %vm1739_vm10, %v8000_v36  ;;  %v8732_v41 = vld [vmem:[#allocation4 + $0xc0] sm:$0xff] }
 0xc8a   : > { %v8002_v48 = vpop.permute.xlu1 %8001  ;;  %8624 = vrot.lane.b32.xlu0 %v8538_v12, %s9651_s22 }
 0xc8b   : > { %8098 = vst.msk [vmem:[#allocation4 + $0xf8] sm:$0xff] %vm1739_vm10, %v8002_v48  ;;  %v8734_v23 = vld [vmem:[#allocation4 + $0xd0] sm:$0xff] }
 0xc8c   : > { %8626 = vrot.lane.b32.xlu1 %v8539_v49, %s9651_s22  ;;  %v8225_v24 = vpop.permute.xlu0 %8224  ;;  %v8733_v56 = vld [vmem:[#allocation4 + $0xc8] sm:$0xff]  ;;  %v8784_v3 = vpack.c.bf16 %v8734_v23, %v8732_v41  ;;  %v14177_v23 = vld [vmem:[#allocation3 + $0x1d4] sm:$0xff] }
 0xc8d   : > { %8306 = vst.msk [vmem:[#allocation4 + $0xe8] sm:$0xff] %vm14617_vm11, %v8225_v24  ;;  %vm14631_vm11 = vmmov %vm14620_vm14 }
 0xc8e   : > { %v8227_v47 = vpop.permute.xlu1 %8226  ;;  %8019 = vrot.lane.b32.xlu0 %v8538_v12, %s9647_s28  ;;  %v8735_v29 = vld [vmem:[#allocation4 + $0xd8] sm:$0xff] }
 0xc8f   : > { %8307 = vst.msk [vmem:[#allocation4 + $0xf8] sm:$0xff] %vm14618_vm12, %v8227_v47  ;;  %v8785_v6 = vpack.c.bf16 %v8735_v29, %v8733_v56  ;;  %vm14632_vm12 = vmmov %vm14631_vm11 }
 0xc90   : > { %8021 = vrot.lane.b32.xlu1 %v8539_v49, %s9647_s28  ;;  %v7616_v34 = vpop.permute.xlu0 %7615  ;;  %v14171_v49 = vld [vmem:[#allocation3 + $0x1cc] sm:$0xff] }
 0xc91   : > { %7697 = vst.msk [vmem:[#allocation4 + $0xe0] sm:$0xff] %vm1351_vm7, %v7616_v34  ;;  %9409 = vmatprep.mubr.msk.bf16.mxu1 %vm14619_vm13, %v8785_v6  ;;  %vm14633_vm13 = vmmov %vm14624_vm1  ;;  %v8544_v6 = vld [vmem:[#allocation3 + $0x1cd] sm:$0xff]  ;;  %v8545_v34 = vld [vmem:[#allocation3 + $0x1d5] sm:$0xff] }
 0xc92   : > { %v7618_v35 = vpop.permute.xlu1 %7617  ;;  %8244 = vrot.lane.b32.xlu0 %v8156_v14, %s9648_s29  ;;  %9051 = vmatmul.mubr.bf16.gmra.mrb[64].mxu1 %v8784_v3 }
 0xc93   : > { %7698 = vst.msk [vmem:[#allocation4 + $0xf0] sm:$0xff] %vm1351_vm7, %v7618_v35 }
 0xc94   : > { %8246 = vrot.lane.b32.xlu1 %v8157_v59, %s9648_s29  ;;  %v8417_v62 = vpop.permute.xlu0 %8416 }
 0xc95   : > { %8498 = vst.msk [vmem:[#allocation4 + $0xe8] sm:$0xff] %vm14620_vm14, %v8417_v62  ;;  %vm14634_vm14 = vmmov %vm14625_vm0 }
 0xc96   : > { %v8419_v28 = vpop.permute.xlu1 %8418  ;;  %7635 = vrot.lane.b32.xlu0 %v8154_v17, %s9645_s26 }
 0xc97   : > { %8499 = vst.msk [vmem:[#allocation4 + $0xf8] sm:$0xff] %vm14621_vm15, %v8419_v28  ;;  %vm14635_vm15 = vmmov %vm14624_vm1 }
 0xc98   : > { %7637 = vrot.lane.b32.xlu1 %v8155_v27, %s9645_s26  ;;  %v7808_v16 = vpop.permute.xlu0 %7807 }
 0xc99   : > { %7889 = vst.msk [vmem:[#allocation4 + $0xe0] sm:$0xff] %vm14622_vm2, %v7808_v16  ;;  %vm14636_vm2 = vmmov %vm14625_vm0  ;;  %v8162_v16 = vld [vmem:[#allocation3 + $0x1e3] sm:$0xff] }
 0xc9a   : > { %8095 = vst.msk [vmem:[#allocation4 + $0xe0] sm:$0xff] %vm14623_vm4, %v8000_v36  ;;  %v7810_v60 = vpop.permute.xlu1 %7809  ;;  %8436 = vrot.lane.b32.xlu0 %v8348_v63, %s9649_s30  ;;  %vm14637_vm4 = vmmov %vm14626_vm3 }
 0xc9b   : > { %7890 = vst.msk [vmem:[#allocation4 + $0xf0] sm:$0xff] %vm14624_vm1, %v7810_v60  ;;  %vm14638_vm1 = vmmov %vm14626_vm3 }
 0xc9c   : > { %8097 = vst.msk [vmem:[#allocation4 + $0xf0] sm:$0xff] %vm14625_vm0, %v8002_v48  ;;  %8438 = vrot.lane.b32.xlu1 %v8349_v44, %s9649_s30  ;;  %v8609_v22 = vpop.permute.xlu0 %8608  ;;  %vm14639_vm0 = vmmov %vm14628_vm6 }
 0xc9d   : > { %8690 = vst.msk [vmem:[#allocation4 + $0xe8] sm:$0xff] %vm14626_vm3, %v8609_v22  ;;  %vm14640_vm3 = vmmov %vm14639_vm0  ;;  %v8163_v22 = vld [vmem:[#allocation3 + $0x1eb] sm:$0xff] }
 0xc9e   : > { %v8611_v9 = vpop.permute.xlu1 %8610  ;;  %7827 = vrot.lane.b32.xlu0 %v8346_v37, %s9646_s27 }
 0xc9f   : > { %8691 = vst.msk [vmem:[#allocation4 + $0xf8] sm:$0xff] %vm14627_vm5, %v8611_v9  ;;  %vm14641_vm5 = vmmov %vm14630_vm9 }
 0xca0   : > { %7829 = vrot.lane.b32.xlu1 %v8347_v32, %s9646_s27  ;;  %v8004_v25 = vpop.permute.xlu0 %8003  ;;  %v14157_v32 = vld [vmem:[#allocation3 + $0x1cb] sm:$0xff] }
 0xca1   : > { %8100 = vst.msk [vmem:[#allocation4 + $0x108] sm:$0xff] %vm1739_vm10, %v8004_v25  ;;  %v8736_v42 = vld [vmem:[#allocation4 + $0xe0] sm:$0xff] }
 0xca2   : > { %v8006_v33 = vpop.permute.xlu1 %8005  ;;  %8628 = vrot.lane.b32.xlu0 %v8540_v11, %s9651_s22 }
 0xca3   : > { %8102 = vst.msk [vmem:[#allocation4 + $0x118] sm:$0xff] %vm1739_vm10, %v8006_v33  ;;  %v8738_v38 = vld [vmem:[#allocation4 + $0xf0] sm:$0xff] }
 0xca4   : > { %8630 = vrot.lane.b32.xlu1 %v8541_v7, %s9651_s22  ;;  %v8229_v10 = vpop.permute.xlu0 %8228  ;;  %v8737_v15 = vld [vmem:[#allocation4 + $0xe8] sm:$0xff]  ;;  %v8786_v46 = vpack.c.bf16 %v8738_v38, %v8736_v42 }
 0xca5   : > { %8308 = vst.msk [vmem:[#allocation4 + $0x108] sm:$0xff] %vm14628_vm6, %v8229_v10  ;;  %vm14642_vm6 = vmmov %vm14631_vm11 }
 0xca6   : > { %v8231_v0 = vpop.permute.xlu1 %8230  ;;  %8023 = vrot.lane.b32.xlu0 %v8540_v11, %s9647_s28  ;;  %v8739_v58 = vld [vmem:[#allocation4 + $0xf8] sm:$0xff] }
 0xca7   : > { %8309 = vst.msk [vmem:[#allocation4 + $0x118] sm:$0xff] %vm14629_vm8, %v8231_v0  ;;  %v8787_v13 = vpack.c.bf16 %v8739_v58, %v8737_v15  ;;  %vm14643_vm8 = vmmov %vm14642_vm6  ;;  %v8354_v0 = vld [vmem:[#allocation3 + $0x1e4] sm:$0xff]  ;;  %v8355_v58 = vld [vmem:[#allocation3 + $0x1ec] sm:$0xff] }
 0xca8   : > { %8025 = vrot.lane.b32.xlu1 %v8541_v7, %s9647_s28  ;;  %v7620_v8 = vpop.permute.xlu0 %7619 }
 0xca9   : > { %7699 = vst.msk [vmem:[#allocation4 + $0x100] sm:$0xff] %vm1351_vm7, %v7620_v8  ;;  %9410 = vmatprep.mubr.msk.bf16.mxu1 %vm14630_vm9, %v8787_v13  ;;  %vm14644_vm9 = vmmov %vm14633_vm13 }
 0xcaa   : > { %v7622_v31 = vpop.permute.xlu1 %7621  ;;  %8248 = vrot.lane.b32.xlu0 %v8158_v57, %s9648_s29  ;;  %9059 = vmatmul.mubr.bf16.gmra.mrb[68].mxu1 %v8786_v46  ;;  %v8546_v46 = vld [vmem:[#allocation3 + $0x1e5] sm:$0xff] }
 0xcab   : > { %7700 = vst.msk [vmem:[#allocation4 + $0x110] sm:$0xff] %vm1351_vm7, %v7622_v31  ;;  %v8547_v31 = vld [vmem:[#allocation3 + $0x1ed] sm:$0xff] }
 0xcac   : > { %8250 = vrot.lane.b32.xlu1 %v8159_v55, %s9648_s29  ;;  %v8421_v50 = vpop.permute.xlu0 %8420 }
 0xcad   : > { %8500 = vst.msk [vmem:[#allocation4 + $0x108] sm:$0xff] %vm14631_vm11, %v8421_v50  ;;  %vm14645_vm11 = vmmov %vm14636_vm2 }
 0xcae   : > { %v8423_v1 = vpop.permute.xlu1 %8422  ;;  %7639 = vrot.lane.b32.xlu0 %v8156_v14, %s9645_s26 }
 0xcaf   : > { %8501 = vst.msk [vmem:[#allocation4 + $0x118] sm:$0xff] %vm14632_vm12, %v8423_v1  ;;  %vm14646_vm12 = vmmov %vm14644_vm9 }
 0xcb0   : > { %7641 = vrot.lane.b32.xlu1 %v8157_v59, %s9645_s26  ;;  %v7812_v61 = vpop.permute.xlu0 %7811 }
 0xcb1   : > { %7891 = vst.msk [vmem:[#allocation4 + $0x100] sm:$0xff] %vm14633_vm13, %v7812_v61  ;;  %vm14647_vm13 = vmmov %vm14636_vm2 }
 0xcb2   : > { %8099 = vst.msk [vmem:[#allocation4 + $0x100] sm:$0xff] %vm14634_vm14, %v8004_v25  ;;  %v7814_v52 = vpop.permute.xlu1 %7813  ;;  %8440 = vrot.lane.b32.xlu0 %v8350_v45, %s9649_s30  ;;  %vm14648_vm14 = vmmov %vm14638_vm1 }
 0xcb3   : > { %7892 = vst.msk [vmem:[#allocation4 + $0x110] sm:$0xff] %vm14635_vm15, %v7814_v52  ;;  %vm14649_vm15 = vmmov %vm14638_vm1 }
 0xcb4   : > { %8101 = vst.msk [vmem:[#allocation4 + $0x110] sm:$0xff] %vm14636_vm2, %v8006_v33  ;;  %8442 = vrot.lane.b32.xlu1 %v8351_v20, %s9649_s30  ;;  %v8613_v40 = vpop.permute.xlu0 %8612  ;;  %vm14650_vm2 = vmmov %vm14639_vm0 }
 0xcb5   : > { %8692 = vst.msk [vmem:[#allocation4 + $0x108] sm:$0xff] %vm14637_vm4, %v8613_v40  ;;  %vm14651_vm4 = vmmov %vm14639_vm0 }
 0xcb6   : > { %v8615_v54 = vpop.permute.xlu1 %8614  ;;  %7831 = vrot.lane.b32.xlu0 %v8348_v63, %s9646_s27 }
 0xcb7   : > { %8693 = vst.msk [vmem:[#allocation4 + $0x118] sm:$0xff] %vm14638_vm1, %v8615_v54  ;;  %vm14652_vm1 = vmmov %vm14641_vm5 }
 0xcb8   : > { %7833 = vrot.lane.b32.xlu1 %v8349_v44, %s9646_s27  ;;  %v8008_v51 = vpop.permute.xlu0 %8007 }
 0xcb9   : > { %8104 = vst.msk [vmem:[#allocation4 + $0x128] sm:$0xff] %vm1739_vm10, %v8008_v51  ;;  %v8740_v26 = vld [vmem:[#allocation4 + $0x100] sm:$0xff] }
 0xcba   : > { %v8010_v5 = vpop.permute.xlu1 %8009  ;;  %8632 = vrot.lane.b32.xlu0 %v8542_v39, %s9651_s22 }
 0xcbb   : > { %8106 = vst.msk [vmem:[#allocation4 + $0x138] sm:$0xff] %vm1739_vm10, %v8010_v5  ;;  %v8742_v17 = vld [vmem:[#allocation4 + $0x110] sm:$0xff] }
 0xcbc   : > { %8634 = vrot.lane.b32.xlu1 %v8543_v4, %s9651_s22  ;;  %v8233_v18 = vpop.permute.xlu0 %8232  ;;  %v8741_v27 = vld [vmem:[#allocation4 + $0x108] sm:$0xff]  ;;  %v8788_v30 = vpack.c.bf16 %v8742_v17, %v8740_v26 }
 0xcbd   : > { %8310 = vst.msk [vmem:[#allocation4 + $0x128] sm:$0xff] %vm14639_vm0, %v8233_v18  ;;  %vm14653_vm0 = vmmov %vm14642_vm6 }
 0xcbe   : > { %v8235_v21 = vpop.permute.xlu1 %8234  ;;  %8027 = vrot.lane.b32.xlu0 %v8542_v39, %s9647_s28  ;;  %v8743_v19 = vld [vmem:[#allocation4 + $0x118] sm:$0xff] }
 0xcbf   : > { %8311 = vst.msk [vmem:[#allocation4 + $0x138] sm:$0xff] %vm14640_vm3, %v8235_v21  ;;  %v8789_v2 = vpack.c.bf16 %v8743_v19, %v8741_v27  ;;  %vm14654_vm3 = vmmov %vm14653_vm0 }
 0xcc0   : > { %8029 = vrot.lane.b32.xlu1 %v8543_v4, %s9647_s28  ;;  %v7624_v37 = vpop.permute.xlu0 %7623 }
 0xcc1   : > { %7701 = vst.msk [vmem:[#allocation4 + $0x120] sm:$0xff] %vm1351_vm7, %v7624_v37  ;;  %9411 = vmatprep.mubr.msk.bf16.mxu1 %vm14641_vm5, %v8789_v2  ;;  %vm14655_vm5 = vmmov %vm14644_vm9 }
 0xcc2   : > { %v7626_v53 = vpop.permute.xlu1 %7625  ;;  %8252 = vrot.lane.b32.xlu0 %v14157_v32, %s9648_s29  ;;  %9067 = vmatmul.mubr.bf16.gmra.mrb[72].mxu1 %v8788_v30  ;;  %v14240_v30 = vld [vmem:[%s14364_s9] ss:$0 sm:$0xff] }
 0xcc3   : > { %7702 = vst.msk [vmem:[#allocation4 + $0x130] sm:$0xff] %vm1351_vm7, %v7626_v53 }
 0xcc4   : > { %8254 = vrot.lane.b32.xlu1 %v14162_v43, %s9648_s29  ;;  %v8425_v36 = vpop.permute.xlu0 %8424 }
 0xcc5   : > { %8502 = vst.msk [vmem:[#allocation4 + $0x128] sm:$0xff] %vm14642_vm6, %v8425_v36  ;;  %vm14656_vm6 = vmmov %vm14645_vm11 }
 0xcc6   : > { %v8427_v12 = vpop.permute.xlu1 %8426  ;;  %7643 = vrot.lane.b32.xlu0 %v8158_v57, %s9645_s26 }
 0xcc7   : > { %8503 = vst.msk [vmem:[#allocation4 + $0x138] sm:$0xff] %vm14643_vm8, %v8427_v12  ;;  %vm14657_vm8 = vmmov %vm14655_vm5 }
 0xcc8   : > { %7645 = vrot.lane.b32.xlu1 %v8159_v55, %s9645_s26  ;;  %v7816_v48 = vpop.permute.xlu0 %7815 }
 0xcc9   : > { %7893 = vst.msk [vmem:[#allocation4 + $0x120] sm:$0xff] %vm14644_vm9, %v7816_v48  ;;  %vm14658_vm9 = vmmov %vm14656_vm6 }
 0xcca   : > { %8103 = vst.msk [vmem:[#allocation4 + $0x120] sm:$0xff] %vm14645_vm11, %v8008_v51  ;;  %v7818_v24 = vpop.permute.xlu1 %7817  ;;  %8444 = vrot.lane.b32.xlu0 %v14171_v49, %s9649_s30  ;;  %vm14659_vm11 = vmmov %vm14648_vm14 }
 0xccb   : > { %7894 = vst.msk [vmem:[#allocation4 + $0x130] sm:$0xff] %vm14646_vm12, %v7818_v24  ;;  %vm14660_vm12 = vmmov %vm14659_vm11 }
 0xccc   : > { %8105 = vst.msk [vmem:[#allocation4 + $0x130] sm:$0xff] %vm14647_vm13, %v8010_v5  ;;  %8446 = vrot.lane.b32.xlu1 %v14177_v23, %s9649_s30  ;;  %v8617_v47 = vpop.permute.xlu0 %8616  ;;  %vm14661_vm13 = vmmov %vm14650_vm2 }
 0xccd   : > { %8694 = vst.msk [vmem:[#allocation4 + $0x128] sm:$0xff] %vm14648_vm14, %v8617_v47  ;;  %vm14662_vm14 = vmmov %vm14650_vm2 }
 0xcce   : > { %v8619_v56 = vpop.permute.xlu1 %8618  ;;  %7835 = vrot.lane.b32.xlu0 %v8350_v45, %s9646_s27 }
 0xccf   : > { %8695 = vst.msk [vmem:[#allocation4 + $0x138] sm:$0xff] %vm14649_vm15, %v8619_v56  ;;  %vm14663_vm15 = vmmov %vm14652_vm1 }
 0xcd0   : > { %7837 = vrot.lane.b32.xlu1 %v8351_v20, %s9646_s27  ;;  %v8012_v29 = vpop.permute.xlu0 %8011 }
 0xcd1   : > { %8108 = vst.msk [vmem:[#allocation4 + $0x148] sm:$0xff] %vm1739_vm10, %v8012_v29  ;;  %v8744_v63 = vld [vmem:[#allocation4 + $0x120] sm:$0xff] }
 0xcd2   : > { %v8014_v41 = vpop.permute.xlu1 %8013  ;;  %8636 = vrot.lane.b32.xlu0 %v8544_v6, %s9651_s22 }
 0xcd3   : > { %8110 = vst.msk [vmem:[#allocation4 + $0x158] sm:$0xff] %vm1739_vm10, %v8014_v41  ;;  %v8746_v14 = vld [vmem:[#allocation4 + $0x130] sm:$0xff] }
 0xcd4   : > { %8638 = vrot.lane.b32.xlu1 %v8545_v34, %s9651_s22  ;;  %v8237_v3 = vpop.permute.xlu0 %8236  ;;  %v8745_v59 = vld [vmem:[#allocation4 + $0x128] sm:$0xff]  ;;  %v8790_v44 = vpack.c.bf16 %v8746_v14, %v8744_v63 }
 0xcd5   : > { %8312 = vst.msk [vmem:[#allocation4 + $0x148] sm:$0xff] %vm14650_vm2, %v8237_v3  ;;  %vm14664_vm2 = vmmov %vm14653_vm0 }
 0xcd6   : > { %v8239_v35 = vpop.permute.xlu1 %8238  ;;  %8031 = vrot.lane.b32.xlu0 %v8544_v6, %s9647_s28  ;;  %v8747_v62 = vld [vmem:[#allocation4 + $0x138] sm:$0xff] }
 0xcd7   : > { %8313 = vst.msk [vmem:[#allocation4 + $0x158] sm:$0xff] %vm14651_vm4, %v8239_v35  ;;  %v8791_v28 = vpack.c.bf16 %v8747_v62, %v8745_v59  ;;  %vm14665_vm4 = vmmov %vm14653_vm0 }
 0xcd8   : > { %8033 = vrot.lane.b32.xlu1 %v8545_v34, %s9647_s28  ;;  %v7628_v60 = vpop.permute.xlu0 %7627  ;;  %s9423_s28 = sshll.u32 %s14718_s14, 6 }
 0xcd9   : > { %7703 = vst.msk [vmem:[#allocation4 + $0x140] sm:$0xff] %vm1351_vm7, %v7628_v60  ;;  %9412 = vmatprep.mubr.msk.bf16.mxu1 %vm14652_vm1, %v8791_v28  ;;  %vm14666_vm1 = vmmov %vm14655_vm5 }
 0xcda   : > { %v7630_v9 = vpop.permute.xlu1 %7629  ;;  %8256 = vrot.lane.b32.xlu0 %v8162_v16, %s9648_s29  ;;  %9075 = vmatmul.mubr.bf16.gmra.mrb[76].mxu1 %v8790_v44 }
 0xcdb   : > { %7704 = vst.msk [vmem:[#allocation4 + $0x150] sm:$0xff] %vm1351_vm7, %v7630_v9  ;;  %v14198_v25 = vpop.f32.mrb[40].mxu1 }
 0xcdc   : > { %8258 = vrot.lane.b32.xlu1 %v8163_v22, %s9648_s29  ;;  %v9006_v11 = vpop.f32.mrb[41].mxu1  ;;  %v8429_v33 = vpop.permute.xlu0 %8428  ;;  %v9005_v53 = vadd.f32 %v14240_v30, %v14198_v25 }
 0xcdd   : > { %8504 = vst.msk [vmem:[#allocation4 + $0x148] sm:$0xff] %vm14653_vm0, %v8429_v33  ;;  %v14202_v7 = vpop.f32.mrb[42].mxu1  ;;  %vm14667_vm0 = vmmov %vm14656_vm6 }
 0xcde   : > { %v8431_v10 = vpop.permute.xlu1 %8430  ;;  %v9009_v38 = vpop.f32.mrb[43].mxu1  ;;  %7647 = vrot.lane.b32.xlu0 %v14157_v32, %s9645_s26  ;;  %v9008_v24 = vadd.f32 %v14240_v30, %v14202_v7 }
 0xcdf   : > { %8505 = vst.msk [vmem:[#allocation4 + $0x158] sm:$0xff] %vm14654_vm3, %v8431_v10  ;;  %vm14668_vm3 = vmmov %vm14666_vm1 }
 0xce0   : > { %7649 = vrot.lane.b32.xlu1 %v14162_v43, %s9645_s26  ;;  %v7820_v15 = vpop.permute.xlu0 %7819  ;;  %v9132_v59 = vmax.f32 %v9008_v24, 0.0 }
 0xce1   : > { %7895 = vst.msk [vmem:[#allocation4 + $0x140] sm:$0xff] %vm14655_vm5, %v7820_v15  ;;  %vm14669_vm5 = vmmov %vm14667_vm0 }
 0xce2   : > { %8107 = vst.msk [vmem:[#allocation4 + $0x140] sm:$0xff] %vm14656_vm6, %v8012_v29  ;;  %v7822_v13 = vpop.permute.xlu1 %7821  ;;  %8448 = vrot.lane.b32.xlu0 %v8354_v0, %s9649_s30  ;;  %vm14670_vm6 = vmmov %vm14659_vm11 }
 0xce3   : > { %7896 = vst.msk [vmem:[#allocation4 + $0x150] sm:$0xff] %vm14657_vm8, %v7822_v13  ;;  %vm14671_vm8 = vmmov %vm14670_vm6 }
 0xce4   : > { %8109 = vst.msk [vmem:[#allocation4 + $0x150] sm:$0xff] %vm14658_vm9, %v8014_v41  ;;  %8450 = vrot.lane.b32.xlu1 %v8355_v58, %s9649_s30  ;;  %v8621_v42 = vpop.permute.xlu0 %8620  ;;  %vm14672_vm9 = vmmov %vm14661_vm13 }
 0xce5   : > { %8696 = vst.msk [vmem:[#allocation4 + $0x148] sm:$0xff] %vm14659_vm11, %v8621_v42  ;;  %vm14673_vm11 = vmmov %vm14672_vm9 }
 0xce6   : > { %v8623_v8 = vpop.permute.xlu1 %8622  ;;  %7839 = vrot.lane.b32.xlu0 %v14171_v49, %s9646_s27  ;;  %v9131_v49 = vmax.f32 %v9005_v53, 0.0 }
 0xce7   : > { %8697 = vst.msk [vmem:[#allocation4 + $0x158] sm:$0xff] %vm14660_vm12, %v8623_v8  ;;  %vm14674_vm12 = vmmov %vm14663_vm15 }
 0xce8   : > { %7841 = vrot.lane.b32.xlu1 %v14177_v23, %s9646_s27  ;;  %v8016_v57 = vpop.permute.xlu0 %8015 }
 0xce9   : > { %8112 = vst.msk [vmem:[#allocation4 + $0x168] sm:$0xff] %vm1739_vm10, %v8016_v57  ;;  %v8748_v54 = vld [vmem:[#allocation4 + $0x140] sm:$0xff] }
 0xcea   : > { %v8018_v55 = vpop.permute.xlu1 %8017  ;;  %8640 = vrot.lane.b32.xlu0 %v8546_v46, %s9651_s22 }
 0xceb   : > { %8114 = vst.msk [vmem:[#allocation4 + $0x178] sm:$0xff] %vm1739_vm10, %v8018_v55  ;;  %v8750_v1 = vld [vmem:[#allocation4 + $0x150] sm:$0xff] }
 0xcec   : > { %8642 = vrot.lane.b32.xlu1 %v8547_v31, %s9651_s22  ;;  %v8241_v50 = vpop.permute.xlu0 %8240  ;;  %v8749_v45 = vld [vmem:[#allocation4 + $0x148] sm:$0xff]  ;;  %v8792_v5 = vpack.c.bf16 %v8750_v1, %v8748_v54  ;;  %s14336_s22 = scalar_lea.vmem %s14365_s10, %s9423_s28 }
 0xced   : > { %8314 = vst.msk [vmem:[#allocation4 + $0x168] sm:$0xff] %vm14661_vm13, %v8241_v50  ;;  %vm14675_vm13 = vmmov %vm14664_vm2 }
 0xcee   : > { %v8243_v61 = vpop.permute.xlu1 %8242  ;;  %v8751_v52 = vld [vmem:[#allocation4 + $0x158] sm:$0xff] }
 0xcef   : > { %8315 = vst.msk [vmem:[#allocation4 + $0x178] sm:$0xff] %vm14662_vm14, %v8243_v61  ;;  %v9012_v20 = vpop.f32.mrb[44].mxu1  ;;  %v8793_v40 = vpack.c.bf16 %v8751_v52, %v8749_v45  ;;  %vm14676_vm14 = vmmov %vm14664_vm2 }
 0xcf0   : > { %v9014_v51 = vpop.f32.mrb[45].mxu1  ;;  %v7632_v39 = vpop.permute.xlu0 %7631  ;;  %v9013_v62 = vadd.f32 %v14240_v30, %v9012_v20 }
 0xcf1   : > { %7705 = vst.msk [vmem:[#allocation4 + $0x160] sm:$0xff] %vm1351_vm7, %v7632_v39  ;;  %v9015_v4 = vpop.f32.mrb[46].mxu1  ;;  %9413 = vmatprep.mubr.msk.bf16.mxu1 %vm14663_vm15, %v8793_v40  ;;  %vm14677_vm15 = vmmov %vm14666_vm1 }
 0xcf2   : > { %v7634_v18 = vpop.permute.xlu1 %7633  ;;  %v9017_v17 = vpop.f32.mrb[47].mxu1  ;;  %9083 = vmatmul.mubr.bf16.gmra.mrb[80].mxu1 %v8792_v5  ;;  %v9133_v63 = vmax.f32 %v9013_v62, 0.0  ;;  %v9016_v60 = vadd.f32 %v14240_v30, %v9015_v4 }
 0xcf3   : > { %7706 = vst.msk [vmem:[#allocation4 + $0x170] sm:$0xff] %vm1351_vm7, %v7634_v18 }
 0xcf4   : > { %v8433_v21 = vpop.permute.xlu0 %8432  ;;  %v9134_v9 = vmax.f32 %v9016_v60, 0.0 }
 0xcf5   : > { %8506 = vst.msk [vmem:[#allocation4 + $0x168] sm:$0xff] %vm14664_vm2, %v8433_v21  ;;  %vm14678_vm2 = vmmov %vm14667_vm0 }
 0xcf6   : > { %v8435_v27 = vpop.permute.xlu1 %8434 }
 0xcf7   : > { %8507 = vst.msk [vmem:[#allocation4 + $0x178] sm:$0xff] %vm14665_vm4, %v8435_v27  ;;  %vm14679_vm4 = vmmov %vm14666_vm1 }
 0xcf8   : > { %v7824_v19 = vpop.permute.xlu0 %7823 }
 0xcf9   : > { %7897 = vst.msk [vmem:[#allocation4 + $0x160] sm:$0xff] %vm14666_vm1, %v7824_v19  ;;  %vm14680_vm1 = vmmov %vm14667_vm0 }
 0xcfa   : > { %8111 = vst.msk [vmem:[#allocation4 + $0x160] sm:$0xff] %vm14667_vm0, %v8016_v57  ;;  %v7826_v2 = vpop.permute.xlu1 %7825  ;;  %vm14681_vm0 = vmmov %vm14670_vm6 }
 0xcfb   : > { %7898 = vst.msk [vmem:[#allocation4 + $0x170] sm:$0xff] %vm14668_vm3, %v7826_v2  ;;  %vm14682_vm3 = vmmov %vm14681_vm0 }
 0xcfc   : > { %8113 = vst.msk [vmem:[#allocation4 + $0x170] sm:$0xff] %vm14669_vm5, %v8018_v55  ;;  %v8625_v26 = vpop.permute.xlu0 %8624  ;;  %vm14683_vm5 = vmmov %vm14672_vm9 }
 0xcfd   : > { %8698 = vst.msk [vmem:[#allocation4 + $0x168] sm:$0xff] %vm14670_vm6, %v8625_v26  ;;  %vm14684_vm6 = vmmov %vm14683_vm5 }
 0xcfe   : > { %v8627_v37 = vpop.permute.xlu1 %8626 }
 0xcff   : > { %8699 = vst.msk [vmem:[#allocation4 + $0x178] sm:$0xff] %vm14671_vm8, %v8627_v37  ;;  %vm14685_vm8 = vmmov %vm14674_vm12 }
 0xd00   : > { %v8020_v32 = vpop.permute.xlu0 %8019 }
 0xd01   : > { %8116 = vst.msk [vmem:[#allocation4 + $0x188] sm:$0xff] %vm1739_vm10, %v8020_v32  ;;  %v8752_v34 = vld [vmem:[#allocation4 + $0x160] sm:$0xff] }
 0xd02   : > { %v8022_v43 = vpop.permute.xlu1 %8021 }
 0xd03   : > { %8118 = vst.msk [vmem:[#allocation4 + $0x198] sm:$0xff] %vm1739_vm10, %v8022_v43  ;;  %v8754_v48 = vld [vmem:[#allocation4 + $0x170] sm:$0xff] }
 0xd04   : > { %v8245_v36 = vpop.permute.xlu0 %8244  ;;  %v8753_v56 = vld [vmem:[#allocation4 + $0x168] sm:$0xff]  ;;  %v8794_v35 = vpack.c.bf16 %v8754_v48, %v8752_v34 }
 0xd05   : > { %8316 = vst.msk [vmem:[#allocation4 + $0x188] sm:$0xff] %vm14672_vm9, %v8245_v36  ;;  %v9020_v12 = vpop.f32.mrb[48].mxu1  ;;  %vm14686_vm9 = vmmov %vm14675_vm13 }
 0xd06   : > { %v8247_v23 = vpop.permute.xlu1 %8246  ;;  %v9022_v47 = vpop.f32.mrb[49].mxu1  ;;  %v8755_v29 = vld [vmem:[#allocation4 + $0x178] sm:$0xff]  ;;  %v9021_v25 = vadd.f32 %v14240_v30, %v9020_v12 }
 0xd07   : > { %8317 = vst.msk [vmem:[#allocation4 + $0x198] sm:$0xff] %vm14673_vm11, %v8247_v23  ;;  %v9023_v6 = vpop.f32.mrb[50].mxu1  ;;  %v8795_v41 = vpack.c.bf16 %v8755_v29, %v8753_v56  ;;  %vm14687_vm11 = vmmov %vm14686_vm9 }
 0xd08   : > { %v9025_v3 = vpop.f32.mrb[51].mxu1  ;;  %9163 = vxpose.xlu0.b32.start [1/16] (narrow) %v9131_v49, 32  ;;  %v7636_v14 = vpop.permute.xlu0 %7635  ;;  %v9135_v7 = vmax.f32 %v9021_v25, 0.0  ;;  %v9024_v10 = vadd.f32 %v14240_v30, %v9023_v6 }
 0xd09   : > { %7707 = vst.msk [vmem:[#allocation4 + $0x180] sm:$0xff] %vm1351_vm7, %v7636_v14  ;;  %9414 = vmatprep.mubr.msk.bf16.mxu1 %vm14674_vm12, %v8795_v41  ;;  %vm14688_vm12 = vmmov %vm14679_vm4 }
 0xd0a   : > { %v7638_v28 = vpop.permute.xlu1 %7637  ;;  %9091 = vmatmul.mubr.bf16.gmra.mrb[84].mxu1 %v8794_v35  ;;  %v9136_v15 = vmax.f32 %v9024_v10, 0.0 }
 0xd0b   : > { %7708 = vst.msk [vmem:[#allocation4 + $0x190] sm:$0xff] %vm1351_vm7, %v7638_v28 }
 0xd0c   : > { %9164 = vxpose.xlu0.b32.cont [2/16] (narrow) %v9132_v59, 32  ;;  %v8437_v16 = vpop.permute.xlu0 %8436 }
 0xd0d   : > { %8508 = vst.msk [vmem:[#allocation4 + $0x188] sm:$0xff] %vm14675_vm13, %v8437_v16  ;;  %vm14689_vm13 = vmmov %vm14680_vm1 }
 0xd0e   : > { %v8439_v44 = vpop.permute.xlu1 %8438 }
 0xd0f   : > { %8509 = vst.msk [vmem:[#allocation4 + $0x198] sm:$0xff] %vm14676_vm14, %v8439_v44  ;;  %vm14690_vm14 = vmmov %vm14679_vm4 }
 0xd10   : > { %9165 = vxpose.xlu0.b32.cont [3/16] (narrow) %v9133_v63, 32  ;;  %v7828_v22 = vpop.permute.xlu0 %7827 }
 0xd11   : > { %7899 = vst.msk [vmem:[#allocation4 + $0x180] sm:$0xff] %vm14677_vm15, %v7828_v22  ;;  %vm14691_vm15 = vmmov %vm14680_vm1 }
 0xd12   : > { %8115 = vst.msk [vmem:[#allocation4 + $0x180] sm:$0xff] %vm14678_vm2, %v8020_v32  ;;  %v7830_v11 = vpop.permute.xlu1 %7829  ;;  %vm14692_vm2 = vmmov %vm14681_vm0 }
 0xd13   : > { %7900 = vst.msk [vmem:[#allocation4 + $0x190] sm:$0xff] %vm14679_vm4, %v7830_v11  ;;  %vm14693_vm4 = vmmov %vm14681_vm0 }
 0xd14   : > { %8117 = vst.msk [vmem:[#allocation4 + $0x190] sm:$0xff] %vm14680_vm1, %v8022_v43  ;;  %9166 = vxpose.xlu0.b32.cont [4/16] (narrow) %v9134_v9, 32  ;;  %v8629_v33 = vpop.permute.xlu0 %8628  ;;  %vm14694_vm1 = vmmov %vm14683_vm5 }
 0xd15   : > { %8700 = vst.msk [vmem:[#allocation4 + $0x188] sm:$0xff] %vm14681_vm0, %v8629_v33  ;;  %vm14695_vm0 = vmmov %vm14694_vm1 }
 0xd16   : > { %v8631_v38 = vpop.permute.xlu1 %8630 }
 0xd17   : > { %8701 = vst.msk [vmem:[#allocation4 + $0x198] sm:$0xff] %vm14682_vm3, %v8631_v38  ;;  %vm14696_vm3 = vmmov %vm14685_vm8 }
 0xd18   : > { %9167 = vxpose.xlu0.b32.cont [5/16] (narrow) %v9135_v7, 32  ;;  %v8024_v0 = vpop.permute.xlu0 %8023 }
 0xd19   : > { %8120 = vst.msk [vmem:[#allocation4 + $0x1a8] sm:$0xff] %vm1739_vm10, %v8024_v0  ;;  %v8756_v45 = vld [vmem:[#allocation4 + $0x180] sm:$0xff] }
 0xd1a   : > { %v8026_v58 = vpop.permute.xlu1 %8025 }
 0xd1b   : > { %8122 = vst.msk [vmem:[#allocation4 + $0x1b8] sm:$0xff] %vm1739_vm10, %v8026_v58  ;;  %v8758_v8 = vld [vmem:[#allocation4 + $0x190] sm:$0xff] }
 0xd1c   : > { %9168 = vxpose.xlu0.b32.cont [6/16] (narrow) %v9136_v15, 32  ;;  %v8249_v13 = vpop.permute.xlu0 %8248  ;;  %v8757_v55 = vld [vmem:[#allocation4 + $0x188] sm:$0xff]  ;;  %v8796_v51 = vpack.c.bf16 %v8758_v8, %v8756_v45 }
 0xd1d   : > { %8318 = vst.msk [vmem:[#allocation4 + $0x1a8] sm:$0xff] %vm14683_vm5, %v8249_v13  ;;  %v9028_v42 = vpop.f32.mrb[52].mxu1  ;;  %vm14697_vm5 = vmmov %vm14686_vm9 }
 0xd1e   : > { %v9029_v46 = vadd.f32 %v14240_v30, %v9028_v42  ;;  %v8251_v57 = vpop.permute.xlu1 %8250  ;;  %v9030_v31 = vpop.f32.mrb[53].mxu1  ;;  %v8759_v50 = vld [vmem:[#allocation4 + $0x198] sm:$0xff] }
 0xd1f   : > { %8319 = vst.msk [vmem:[#allocation4 + $0x1b8] sm:$0xff] %vm14684_vm6, %v8251_v57  ;;  %v9031_v1 = vpop.f32.mrb[54].mxu1  ;;  %v8797_v61 = vpack.c.bf16 %v8759_v50, %v8757_v55  ;;  %vm14698_vm6 = vmmov %vm14697_vm5 }
 0xd20   : > { %v9137_v52 = vmax.f32 %v9029_v46, 0.0  ;;  %v9032_v20 = vadd.f32 %v14240_v30, %v9031_v1  ;;  %v9033_v40 = vpop.f32.mrb[55].mxu1  ;;  %v7640_v54 = vpop.permute.xlu0 %7639 }
 0xd21   : > { %7709 = vst.msk [vmem:[#allocation4 + $0x1a0] sm:$0xff] %vm1351_vm7, %v7640_v54  ;;  %9415 = vmatprep.mubr.msk.bf16.mxu1 %vm14685_vm8, %v8797_v61  ;;  %vm14699_vm8 = vmmov %vm14688_vm12 }
 0xd22   : > { %v7642_v39 = vpop.permute.xlu1 %7641  ;;  %9169 = vxpose.xlu0.b32.cont [7/16] (narrow) %v9137_v52, 32  ;;  %9099 = vmatmul.mubr.bf16.gmra.mrb[88].mxu1 %v8796_v51  ;;  %v9138_v5 = vmax.f32 %v9032_v20, 0.0 }
 0xd23   : > { %7710 = vst.msk [vmem:[#allocation4 + $0x1b0] sm:$0xff] %vm1351_vm7, %v7642_v39 }
 0xd24   : > { %v8441_v4 = vpop.permute.xlu0 %8440 }
 0xd25   : > { %8510 = vst.msk [vmem:[#allocation4 + $0x1a8] sm:$0xff] %vm14686_vm9, %v8441_v4  ;;  %vm14700_vm9 = vmmov %vm14689_vm13 }
 0xd26   : > { %v8443_v18 = vpop.permute.xlu1 %8442  ;;  %9170 = vxpose.xlu0.b32.cont [8/16] (narrow) %v9138_v5, 32 }
 0xd27   : > { %8511 = vst.msk [vmem:[#allocation4 + $0x1b8] sm:$0xff] %vm14687_vm11, %v8443_v18  ;;  %vm14701_vm11 = vmmov %vm14699_vm8 }
 0xd28   : > { %v7832_v17 = vpop.permute.xlu0 %7831 }
 0xd29   : > { %7901 = vst.msk [vmem:[#allocation4 + $0x1a0] sm:$0xff] %vm14688_vm12, %v7832_v17  ;;  %vm14702_vm12 = vmmov %vm14700_vm9 }
 0xd2a   : > { %8119 = vst.msk [vmem:[#allocation4 + $0x1a0] sm:$0xff] %vm14689_vm13, %v8024_v0  ;;  %v7834_v21 = vpop.permute.xlu1 %7833  ;;  %vm14703_vm13 = vmmov %vm14692_vm2 }
 0xd2b   : > { %7902 = vst.msk [vmem:[#allocation4 + $0x1b0] sm:$0xff] %vm14690_vm14, %v7834_v21  ;;  %vm14704_vm14 = vmmov %vm14692_vm2 }
 0xd2c   : > { %8121 = vst.msk [vmem:[#allocation4 + $0x1b0] sm:$0xff] %vm14691_vm15, %v8026_v58  ;;  %v8633_v27 = vpop.permute.xlu0 %8632  ;;  %vm14705_vm15 = vmmov %vm14695_vm0 }
 0xd2d   : > { %8702 = vst.msk [vmem:[#allocation4 + $0x1a8] sm:$0xff] %vm14692_vm2, %v8633_v27  ;;  %vm14706_vm2 = vmmov %vm14695_vm0 }
 0xd2e   : > { %v8635_v19 = vpop.permute.xlu1 %8634 }
 0xd2f   : > { %8703 = vst.msk [vmem:[#allocation4 + $0x1b8] sm:$0xff] %vm14693_vm4, %v8635_v19  ;;  %vm14708_vm4 = vmmov %vm14697_vm5 }
 0xd30   : > { %v8028_v2 = vpop.permute.xlu0 %8027 }
 0xd31   : > { %8124 = vst.msk [vmem:[#allocation4 + $0x1c8] sm:$0xff] %vm1739_vm10, %v8028_v2  ;;  %v8760_v47 = vld [vmem:[#allocation4 + $0x1a0] sm:$0xff] }
 0xd32   : > { %v8030_v26 = vpop.permute.xlu1 %8029 }
 0xd33   : > { %8126 = vst.msk [vmem:[#allocation4 + $0x1d8] sm:$0xff] %vm1739_vm10, %v8030_v26  ;;  %v8762_v53 = vld [vmem:[#allocation4 + $0x1b0] sm:$0xff] }
 0xd34   : > { %v8253_v37 = vpop.permute.xlu0 %8252  ;;  %v8761_v48 = vld [vmem:[#allocation4 + $0x1a8] sm:$0xff]  ;;  %v8798_v34 = vpack.c.bf16 %v8762_v53, %v8760_v47 }
 0xd35   : > { %8320 = vst.msk [vmem:[#allocation4 + $0x1c8] sm:$0xff] %vm14694_vm1, %v8253_v37  ;;  %v9036_v32 = vpop.f32.mrb[56].mxu1  ;;  %vm14709_vm1 = vmmov %vm14708_vm4 }
 0xd36   : > { %v9037_v43 = vadd.f32 %v14240_v30, %v9036_v32  ;;  %v8255_v36 = vpop.permute.xlu1 %8254  ;;  %v9038_v12 = vpop.f32.mrb[57].mxu1  ;;  %v8763_v49 = vld [vmem:[#allocation4 + $0x1b8] sm:$0xff] }
 0xd37   : > { %8321 = vst.msk [vmem:[#allocation4 + $0x1d8] sm:$0xff] %vm14695_vm0, %v8255_v36  ;;  %v9039_v24 = vpop.f32.mrb[58].mxu1  ;;  %v8799_v23 = vpack.c.bf16 %v8763_v49, %v8761_v48  ;;  %vm14710_vm0 = vmmov %vm14699_vm8 }
 0xd38   : > { %v9139_v56 = vmax.f32 %v9037_v43, 0.0  ;;  %v9040_v29 = vadd.f32 %v14240_v30, %v9039_v24  ;;  %v9041_v6 = vpop.f32.mrb[59].mxu1  ;;  %v7644_v41 = vpop.permute.xlu0 %7643 }
 0xd39   : > { %7711 = vst.msk [vmem:[#allocation4 + $0x1c0] sm:$0xff] %vm1351_vm7, %v7644_v41  ;;  %9416 = vmatprep.mubr.msk.bf16.mxu1 %vm14696_vm3, %v8799_v23 }
 0xd3a   : > { %v7646_v3 = vpop.permute.xlu1 %7645  ;;  %9171 = vxpose.xlu0.b32.cont [9/16] (narrow) %v9139_v56, 32  ;;  %9107 = vmatmul.mubr.bf16.gmra.mrb[92].mxu1 %v8798_v34  ;;  %v9140_v14 = vmax.f32 %v9040_v29, 0.0 }
 0xd3b   : > { %7712 = vst.msk [vmem:[#allocation4 + $0x1d0] sm:$0xff] %vm1351_vm7, %v7646_v3 }
 0xd3c   : > { %v8445_v35 = vpop.permute.xlu0 %8444 }
 0xd3d   : > { %8512 = vst.msk [vmem:[#allocation4 + $0x1c8] sm:$0xff] %vm14697_vm5, %v8445_v35  ;;  %vm14712_vm5 = vmmov %vm14710_vm0 }
 0xd3e   : > { %v8447_v59 = vpop.permute.xlu1 %8446  ;;  %9172 = vxpose.xlu0.b32.cont [10/16] (narrow) %v9140_v14, 32 }
 0xd3f   : > { %8513 = vst.msk [vmem:[#allocation4 + $0x1d8] sm:$0xff] %vm14698_vm6, %v8447_v59 }
 0xd40   : > { %v7836_v62 = vpop.permute.xlu0 %7835 }
 0xd41   : > { %7903 = vst.msk [vmem:[#allocation4 + $0x1c0] sm:$0xff] %vm14699_vm8, %v7836_v62 }
 0xd42   : > { %8123 = vst.msk [vmem:[#allocation4 + $0x1c0] sm:$0xff] %vm14700_vm9, %v8028_v2  ;;  %v7838_v28 = vpop.permute.xlu1 %7837 }
 0xd43   : > { %7904 = vst.msk [vmem:[#allocation4 + $0x1d0] sm:$0xff] %vm14701_vm11, %v7838_v28 }
 0xd44   : > { %8125 = vst.msk [vmem:[#allocation4 + $0x1d0] sm:$0xff] %vm14702_vm12, %v8030_v26  ;;  %v8637_v16 = vpop.permute.xlu0 %8636 }
 0xd45   : > { %8704 = vst.msk [vmem:[#allocation4 + $0x1c8] sm:$0xff] %vm14703_vm13, %v8637_v16 }
 0xd46   : > { %v8639_v63 = vpop.permute.xlu1 %8638 }
 0xd47   : > { %8705 = vst.msk [vmem:[#allocation4 + $0x1d8] sm:$0xff] %vm14704_vm14, %v8639_v63 }
 0xd48   : > { %v8032_v60 = vpop.permute.xlu0 %8031 }
 0xd49   : > { %8128 = vst.msk [vmem:[#allocation4 + $0x1e8] sm:$0xff] %vm1739_vm10, %v8032_v60  ;;  %v8764_v58 = vld [vmem:[#allocation4 + $0x1c0] sm:$0xff] }
 0xd4a   : > { %v8034_v44 = vpop.permute.xlu1 %8033 }
 0xd4b   : > { %8130 = vst.msk [vmem:[#allocation4 + $0x1f8] sm:$0xff] %vm1739_vm10, %v8034_v44  ;;  %v8766_v25 = vld [vmem:[#allocation4 + $0x1d0] sm:$0xff]  ;;  %vm14707_vm10 = vmmov %vm14696_vm3 }
 0xd4c   : > { %v8257_v22 = vpop.permute.xlu0 %8256  ;;  %v8765_v10 = vld [vmem:[#allocation4 + $0x1c8] sm:$0xff]  ;;  %v8800_v57 = vpack.c.bf16 %v8766_v25, %v8764_v58  ;;  %vm14711_vm3 = vmmov %vm14700_vm9 }
 0xd4d   : > { %8322 = vst.msk [vmem:[#allocation4 + $0x1e8] sm:$0xff] %vm14705_vm15, %v8257_v22  ;;  %v9044_v9 = vpop.f32.mrb[60].mxu1  ;;  %vm14713_vm6 = vmmov %vm14711_vm3 }
 0xd4e   : > { %v9045_v11 = vadd.f32 %v14240_v30, %v9044_v9  ;;  %v8259_v33 = vpop.permute.xlu1 %8258  ;;  %v9046_v7 = vpop.f32.mrb[61].mxu1  ;;  %v8767_v38 = vld [vmem:[#allocation4 + $0x1d8] sm:$0xff]  ;;  %vm14716_vm9 = vmmov %vm14707_vm10 }
 0xd4f   : > { %8323 = vst.msk [vmem:[#allocation4 + $0x1f8] sm:$0xff] %vm14706_vm2, %v8259_v33  ;;  %v9047_v0 = vpop.f32.mrb[62].mxu1  ;;  %v8801_v15 = vpack.c.bf16 %v8767_v38, %v8765_v10 }
 0xd50   : > { %v9141_v13 = vmax.f32 %v9045_v11, 0.0  ;;  %v9048_v42 = vadd.f32 %v14240_v30, %v9047_v0  ;;  %v9049_v8 = vpop.f32.mrb[63].mxu1  ;;  %v7648_v46 = vpop.permute.xlu0 %7647 }
 0xd51   : > { %7713 = vst.msk [vmem:[#allocation4 + $0x1e0] sm:$0xff] %vm1351_vm7, %v7648_v46  ;;  %9417 = vmatprep.mubr.msk.bf16.mxu1 %vm14707_vm10, %v8801_v15 }
 0xd52   : > { %v7650_v31 = vpop.permute.xlu1 %7649  ;;  %9173 = vxpose.xlu0.b32.cont [11/16] (narrow) %v9141_v13, 32  ;;  %9115 = vmatmul.mubr.bf16.gmra.mrb[96].mxu1 %v8800_v57  ;;  %v9142_v55 = vmax.f32 %v9048_v42, 0.0 }
 0xd53   : > { %7714 = vst.msk [vmem:[#allocation4 + $0x1f0] sm:$0xff] %vm1351_vm7, %v7650_v31  ;;  %vm14714_vm7 = vmmov %vm14703_vm13 }
 0xd54   : > { %v8449_v50 = vpop.permute.xlu0 %8448  ;;  %vm14715_vm8 = vmmov %vm14714_vm7 }
 0xd55   : > { %8514 = vst.msk [vmem:[#allocation4 + $0x1e8] sm:$0xff] %vm14708_vm4, %v8449_v50 }
 0xd56   : > { %v8451_v1 = vpop.permute.xlu1 %8450  ;;  %9174 = vxpose.xlu0.b32.cont [12/16] (narrow) %v9142_v55, 32 }
 0xd57   : > { %8515 = vst.msk [vmem:[#allocation4 + $0x1f8] sm:$0xff] %vm14709_vm1, %v8451_v1 }
 0xd58   : > { %v7840_v61 = vpop.permute.xlu0 %7839 }
 0xd59   : > { %7905 = vst.msk [vmem:[#allocation4 + $0x1e0] sm:$0xff] %vm14710_vm0, %v7840_v61 }
 0xd5a   : > { %8127 = vst.msk [vmem:[#allocation4 + $0x1e0] sm:$0xff] %vm14711_vm3, %v8032_v60  ;;  %v7842_v45 = vpop.permute.xlu1 %7841 }
 0xd5b   : > { %7906 = vst.msk [vmem:[#allocation4 + $0x1f0] sm:$0xff] %vm14712_vm5, %v7842_v45 }
 0xd5c   : > { %8129 = vst.msk [vmem:[#allocation4 + $0x1f0] sm:$0xff] %vm14713_vm6, %v8034_v44  ;;  %v8641_v52 = vpop.permute.xlu0 %8640 }
 0xd5d   : > { %8706 = vst.msk [vmem:[#allocation4 + $0x1e8] sm:$0xff] %vm14714_vm7, %v8641_v52 }
 0xd5e   : > { %v8643_v20 = vpop.permute.xlu1 %8642 }
 0xd5f   : > { %8707 = vst.msk [vmem:[#allocation4 + $0x1f8] sm:$0xff] %vm14715_vm8, %v8643_v20 }
 0xd61   : > { %v8768_v21 = vld [vmem:[#allocation4 + $0x1e0] sm:$0xff] }
 0xd63   : > { %v8770_v51 = vld [vmem:[#allocation4 + $0x1f0] sm:$0xff] }
 0xd64   : > { %v8769_v40 = vld [vmem:[#allocation4 + $0x1e8] sm:$0xff]  ;;  %v8802_v26 = vpack.c.bf16 %v8770_v51, %v8768_v21 }
 0xd65   : > { %v9052_v54 = vpop.f32.mrb[64].mxu1 }
 0xd66   : > { %v9053_v39 = vadd.f32 %v14240_v30, %v9052_v54  ;;  %v9054_v5 = vpop.f32.mrb[65].mxu1  ;;  %v8771_v4 = vld [vmem:[#allocation4 + $0x1f8] sm:$0xff] }
 0xd67   : > { %v9055_v18 = vpop.f32.mrb[66].mxu1  ;;  %v8803_v17 = vpack.c.bf16 %v8771_v4, %v8769_v40 }
 0xd68   : > { %v9143_v27 = vmax.f32 %v9053_v39, 0.0  ;;  %v9056_v19 = vadd.f32 %v14240_v30, %v9055_v18  ;;  %v9057_v2 = vpop.f32.mrb[67].mxu1 }
 0xd69   : > { %9418 = vmatprep.mubr.msk.bf16.mxu1 %vm14716_vm9, %v8803_v17 }
 0xd6a   : > { %9175 = vxpose.xlu0.b32.cont [13/16] (narrow) %v9143_v27, 32  ;;  %9123 = vmatmul.mubr.bf16.gmra.mrb[100].mxu1 %v8802_v26  ;;  %v9144_v37 = vmax.f32 %v9056_v19, 0.0 }
 0xd6e   : > { %9176 = vxpose.xlu0.b32.cont [14/16] (narrow) %v9144_v37, 32 }
 0xd7d   : > { %v9060_v32 = vpop.f32.mrb[68].mxu1 }
 0xd7e   : > { %v9061_v53 = vadd.f32 %v14240_v30, %v9060_v32  ;;  %v9062_v43 = vpop.f32.mrb[69].mxu1 }
 0xd7f   : > { %v9063_v36 = vpop.f32.mrb[70].mxu1 }
 0xd80   : > { %v9145_v12 = vmax.f32 %v9061_v53, 0.0  ;;  %v9064_v48 = vadd.f32 %v14240_v30, %v9063_v36  ;;  %v9065_v49 = vpop.f32.mrb[71].mxu1 }
 0xd82   : > { %9177 = vxpose.xlu0.b32.cont [15/16] (narrow) %v9145_v12, 32  ;;  %v9146_v24 = vmax.f32 %v9064_v48, 0.0 }
 0xd86   : > { %9178 = vxpose.xlu0.b32.end [16/16] (narrow) %v9146_v24, 32 }
 0xd95   : > { %v9068_v23 = vpop.f32.mrb[72].mxu1 }
 0xd96   : > { %v9069_v47 = vadd.f32 %v14240_v30, %v9068_v23  ;;  %v9070_v56 = vpop.f32.mrb[73].mxu1 }
 0xd97   : > { %v9071_v29 = vpop.f32.mrb[74].mxu1 }
 0xd98   : > { %v9147_v6 = vmax.f32 %v9069_v47, 0.0  ;;  %v9072_v41 = vadd.f32 %v14240_v30, %v9071_v29  ;;  %v9073_v34 = vpop.f32.mrb[75].mxu1 }
 0xd9a   : > { %9195 = vxpose.xlu1.b32.start [1/16] (narrow) %v9147_v6, 32  ;;  %v9148_v3 = vmax.f32 %v9072_v41, 0.0 }
 0xd9e   : > { %9196 = vxpose.xlu1.b32.cont [2/16] (narrow) %v9148_v3, 32 }
 0xdad   : > { %v9076_v14 = vpop.f32.mrb[76].mxu1 }
 0xdae   : > { %v9077_v35 = vadd.f32 %v14240_v30, %v9076_v14  ;;  %v9078_v59 = vpop.f32.mrb[77].mxu1 }
 0xdaf   : > { %v9079_v62 = vpop.f32.mrb[78].mxu1 }
 0xdb0   : > { %v9149_v28 = vmax.f32 %v9077_v35, 0.0  ;;  %v9080_v16 = vadd.f32 %v14240_v30, %v9079_v62  ;;  %v9081_v63 = vpop.f32.mrb[79].mxu1 }
 0xdb2   : > { %9197 = vxpose.xlu1.b32.cont [3/16] (narrow) %v9149_v28, 32  ;;  %v9150_v60 = vmax.f32 %v9080_v16, 0.0 }
 0xdb6   : > { %9198 = vxpose.xlu1.b32.cont [4/16] (narrow) %v9150_v60, 32 }
 0xdc5   : > { %v9084_v44 = vpop.f32.mrb[80].mxu1 }
 0xdc6   : > { %v9085_v22 = vadd.f32 %v14240_v30, %v9084_v44  ;;  %v9086_v9 = vpop.f32.mrb[81].mxu1 }
 0xdc7   : > { %v9087_v25 = vpop.f32.mrb[82].mxu1 }
 0xdc8   : > { %v9151_v11 = vmax.f32 %v9085_v22, 0.0  ;;  %v9088_v33 = vadd.f32 %v14240_v30, %v9087_v25  ;;  %v9089_v7 = vpop.f32.mrb[83].mxu1 }
 0xdca   : > { %9199 = vxpose.xlu1.b32.cont [5/16] (narrow) %v9151_v11, 32  ;;  %v9152_v10 = vmax.f32 %v9088_v33, 0.0  ;;  %v9179_v20 = vpop.trf.xlu0 }
 0xdcb   : > { %9227 = vst [vmem:[%s14336_s22] sm:$0xff] %v9179_v20 }
 0xdce   : > { %9200 = vxpose.xlu1.b32.cont [6/16] (narrow) %v9152_v10, 32  ;;  %v9180_v5 = vpop.trf.xlu0 }
 0xdcf   : > { %9229 = vst [vmem:[%s14336_s22 + $0x10] sm:$0xff] %v9180_v5 }
 0xdd2   : > { %v9181_v21 = vpop.trf.xlu0 }
 0xdd3   : > { %9231 = vst [vmem:[%s14336_s22 + $0x20] sm:$0xff] %v9181_v21 }
 0xdd6   : > { %v9182_v19 = vpop.trf.xlu0 }
 0xdd7   : > { %9233 = vst [vmem:[%s14336_s22 + $0x30] sm:$0xff] %v9182_v19 }
 0xddd   : > { %v9092_v38 = vpop.f32.mrb[84].mxu1 }
 0xdde   : > { %v9093_v0 = vadd.f32 %v14240_v30, %v9092_v38  ;;  %v9094_v15 = vpop.f32.mrb[85].mxu1 }
 0xddf   : > { %v9095_v58 = vpop.f32.mrb[86].mxu1 }
 0xde0   : > { %v9153_v13 = vmax.f32 %v9093_v0, 0.0  ;;  %v9096_v42 = vadd.f32 %v14240_v30, %v9095_v58  ;;  %v9097_v8 = vpop.f32.mrb[87].mxu1 }
 0xde2   : > { %9201 = vxpose.xlu1.b32.cont [7/16] (narrow) %v9153_v13, 32  ;;  %v9154_v46 = vmax.f32 %v9096_v42, 0.0 }
 0xde6   : > { %9202 = vxpose.xlu1.b32.cont [8/16] (narrow) %v9154_v46, 32 }
 0xdf5   : > { %v9100_v57 = vpop.f32.mrb[88].mxu1 }
 0xdf6   : > { %v9101_v31 = vadd.f32 %v14240_v30, %v9100_v57  ;;  %v9102_v55 = vpop.f32.mrb[89].mxu1 }
 0xdf7   : > { %v9103_v50 = vpop.f32.mrb[90].mxu1 }
 0xdf8   : > { %v9155_v1 = vmax.f32 %v9101_v31, 0.0  ;;  %v9104_v61 = vadd.f32 %v14240_v30, %v9103_v50  ;;  %v9105_v45 = vpop.f32.mrb[91].mxu1 }
 0xdfa   : > { %9203 = vxpose.xlu1.b32.cont [9/16] (narrow) %v9155_v1, 32  ;;  %v9156_v52 = vmax.f32 %v9104_v61, 0.0 }
 0xdfe   : > { %9204 = vxpose.xlu1.b32.cont [10/16] (narrow) %v9156_v52, 32 }
 0xe0d   : > { %v9108_v40 = vpop.f32.mrb[92].mxu1 }
 0xe0e   : > { %v9109_v54 = vadd.f32 %v14240_v30, %v9108_v40  ;;  %v9110_v51 = vpop.f32.mrb[93].mxu1 }
 0xe0f   : > { %v9111_v39 = vpop.f32.mrb[94].mxu1 }
 0xe10   : > { %v9157_v4 = vmax.f32 %v9109_v54, 0.0  ;;  %v9112_v18 = vadd.f32 %v14240_v30, %v9111_v39  ;;  %v9113_v17 = vpop.f32.mrb[95].mxu1 }
 0xe12   : > { %9205 = vxpose.xlu1.b32.cont [11/16] (narrow) %v9157_v4, 32  ;;  %v9158_v27 = vmax.f32 %v9112_v18, 0.0 }
 0xe16   : > { %9206 = vxpose.xlu1.b32.cont [12/16] (narrow) %v9158_v27, 32 }
 0xe25   : > { %v9116_v2 = vpop.f32.mrb[96].mxu1 }
 0xe26   : > { %v9117_v26 = vadd.f32 %v14240_v30, %v9116_v2  ;;  %v9118_v37 = vpop.f32.mrb[97].mxu1 }
 0xe27   : > { %v9119_v32 = vpop.f32.mrb[98].mxu1 }
 0xe28   : > { %v9159_v53 = vmax.f32 %v9117_v26, 0.0  ;;  %v9120_v43 = vadd.f32 %v14240_v30, %v9119_v32  ;;  %v9121_v36 = vpop.f32.mrb[99].mxu1 }
 0xe2a   : > { %9207 = vxpose.xlu1.b32.cont [13/16] (narrow) %v9159_v53, 32  ;;  %v9160_v12 = vmax.f32 %v9120_v43, 0.0 }
 0xe2e   : > { %9208 = vxpose.xlu1.b32.cont [14/16] (narrow) %v9160_v12, 32 }
 0xe3d   : > { %v9124_v48 = vpop.f32.mrb[100].mxu1 }
 0xe3e   : > { %v9125_v49 = vadd.f32 %v14240_v30, %v9124_v48  ;;  %v9126_v24 = vpop.f32.mrb[101].mxu1 }
 0xe3f   : > { %v9127_v23 = vpop.f32.mrb[102].mxu1 }
 0xe40   : > { %v9161_v47 = vmax.f32 %v9125_v49, 0.0  ;;  %v9128_v56 = vadd.f32 %v14240_v30, %v9127_v23  ;;  %v9129_v29 = vpop.f32.mrb[103].mxu1 }
 0xe42   : > { %9209 = vxpose.xlu1.b32.cont [15/16] (narrow) %v9161_v47, 32  ;;  %v9162_v6 = vmax.f32 %v9128_v56, 0.0 }
 0xe46   : > { %9210 = vxpose.xlu1.b32.end [16/16] (narrow) %v9162_v6, 32 }
 0xe8a   : > { %v9211_v41 = vpop.trf.xlu1 }
 0xe8b   : > { %9228 = vst [vmem:[%s14336_s22 + $0x8] sm:$0xff] %v9211_v41 }
 0xe8e   : > { %v9212_v34 = vpop.trf.xlu1 }
 0xe8f   : > { %9230 = vst [vmem:[%s14336_s22 + $0x18] sm:$0xff] %v9212_v34 }
 0xe92   : > { %v9213_v3 = vpop.trf.xlu1 }
 0xe93   : > { %9232 = vst [vmem:[%s14336_s22 + $0x28] sm:$0xff] %v9213_v3 }
 0xe96   : > { %v9214_v14 = vpop.trf.xlu1 }
 0xe97   : > { %9234 = vst [vmem:[%s14336_s22 + $0x38] sm:$0xff] %v9214_v14 }
 0xe98 PF: > { %s20_s13 = sadd.s32 1, %s9639_s13  }
 0xe99   : > { %p17_p4 = scmp.ge.s32.totalorder %s20_s13, 4  }
 0xe9b   :  { %19 = sbr.rel (!%p17_p4) target bundleno = 1 (0x1), region = 103 }

</bundles_post_ra>
